<compile_context>
chip_gen: v6e
topology: v6e:2x2x1
jax: 0.10.0
libtpu: 0.0.40
codegen_flags: <defaults>
</compile_context>

<pallas_src>
import functools

import jax
import jax.numpy as jnp
from jax.experimental import pallas as pl
from jax.experimental.pallas import tpu as pltpu


def _round_up(x, m):
    return ((x + m - 1) // m) * m


# ----------------------------------------------------------------------------
# Tiling plan: per-generation VMEM-aware point-tile size + v7x chunk split.
# ----------------------------------------------------------------------------
def plan_lidar_tiling(batch, n_points):
    b_pad = _round_up(max(batch, 1), 8)
    try:
        vmem_cap = int(pltpu.get_tpu_info().vmem_capacity_bytes)
    except Exception:
        vmem_cap = 64 * 1024 * 1024      # conservative (v7x per-core VMEM)

    # Dominant per-row live f32 bytes inside one point tile:
    #   layer-3 act (+ reshape/max temp) ~2*4KB, layer-2 act (+bf16 copy), layer-1, pts.
    bytes_per_row = (1024 * 2 + 128 * 2 + 64 * 2 + 3) * 4
    rows_budget = int(vmem_cap * 0.4) // bytes_per_row
    rows_budget = max(1024, min(rows_budget, 4096))   # >=1024 rows keeps the MXU fed

    tile_n = max(8, ((rows_budget // b_pad) // 8) * 8)
    tile_n = min(tile_n, _round_up(n_points, 8))      # never tile wider than the cloud
    n_tiles = -(-n_points // tile_n)
    n_chunks = 2 if n_tiles >= 2 else 1               # split point loop across v7x's 2 TCs
    np_pad = _round_up(n_points, tile_n * n_chunks)
    vmem_limit = min(int(vmem_cap * 0.85), 110 * 1024 * 1024)
    return b_pad, tile_n, n_chunks, np_pad, vmem_limit


# ----------------------------------------------------------------------------
# Kernel 1: PointNet shared MLP + per-chunk running max over point tiles.
# Grid = (n_chunks [parallel], tiles_per_chunk [arbitrary]); each chunk owns one
# (1, B, 1024) output block used directly as the running-max accumulator.
# Matmul operands are bf16 (f32 accumulation); bias/ReLU/max stay f32.
# ----------------------------------------------------------------------------
def pointnet_max_kernel(pts_ref, w1_ref, b1_ref, w2_ref, b2_ref, w3_ref, b3_ref,
                        pmax_ref):
    t = pl.program_id(1)
    B, TN, _ = pts_ref.shape
    M = B * TN

    pts = pts_ref[...].reshape(M, 3)                       # flatten batch x points
    w1 = w1_ref[...]                                       # (3, 64) f32
    # Layer 1 (K=3): VPU broadcast FMAs instead of a padded-K MXU matmul.
    h = (pts[:, 0:1] * w1[0:1, :]
         + pts[:, 1:2] * w1[1:2, :]
         + pts[:, 2:3] * w1[2:3, :]
         + b1_ref[...])
    h = jnp.maximum(h, 0.0)
    # Layers 2/3: single large-M MXU matmuls, bf16 in / f32 accumulate.
    h = jnp.dot(h.astype(jnp.bfloat16), w2_ref[...],
                preferred_element_type=jnp.float32) + b2_ref[...]
    h = jnp.maximum(h, 0.0)
    h = jnp.dot(h.astype(jnp.bfloat16), w3_ref[...],
                preferred_element_type=jnp.float32) + b3_ref[...]
    h = jnp.maximum(h, 0.0)
    tile_max = jnp.max(h.reshape(B, TN, h.shape[-1]), axis=1)   # (B, 1024) f32

    @pl.when(t == 0)
    def _():
        pmax_ref[0] = tile_max

    @pl.when(t > 0)
    def _():
        pmax_ref[0] = jnp.maximum(pmax_ref[0], tile_max)


def pointnet_partial_max(pts, w1, b1, w2, b2, w3, b3, *, tile_n, n_chunks, vmem_limit):
    B, Np, C = pts.shape
    tiles_per_chunk = Np // (tile_n * n_chunks)
    total_tiles = n_chunks * tiles_per_chunk
    m_rows = B * tile_n
    mlp_flops_per_row = 2 * (3 * 64 + 64 * 128 + 128 * 1024)
    cost = pl.CostEstimate(
        flops=mlp_flops_per_row * m_rows * total_tiles,
        transcendentals=0,
        bytes_accessed=(B * Np * C * 4                       # point cloud
                        + (3 * 64 * 4 + (64 * 128 + 128 * 1024) * 2)  # weights
                        + n_chunks * B * 1024 * 4),          # partial maxes
    )
    const = lambda c, t: (0, 0)
    return pl.pallas_call(
        pointnet_max_kernel,
        out_shape=jax.ShapeDtypeStruct((n_chunks, B, 1024), jnp.float32),
        grid=(n_chunks, tiles_per_chunk),
        in_specs=[
            pl.BlockSpec((B, tile_n, C),
                         lambda c, t: (0, c * tiles_per_chunk + t, 0)),  # point tile
            pl.BlockSpec((C, 64), const),        # f32 layer-1 weight (VPU path)
            pl.BlockSpec((1, 64), const),
            pl.BlockSpec((64, 128), const),      # bf16
            pl.BlockSpec((1, 128), const),
            pl.BlockSpec((128, 1024), const),    # bf16
            pl.BlockSpec((1, 1024), const),
        ],
        out_specs=pl.BlockSpec((1, B, 1024), lambda c, t: (c, 0, 0)),
        compiler_params=pltpu.CompilerParams(
            dimension_semantics=("parallel", "arbitrary"),
            vmem_limit_bytes=vmem_limit),
        cost_estimate=cost,
    )(pts, w1, b1, w2, b2, w3, b3)


# ----------------------------------------------------------------------------
# Kernel 2: fused LSTM recurrence + final max over chunks + concat classifier.
# Single invocation (no grid). The input projection (emb @ Wih + b) is hoisted
# into XLA and arrives with each gate padded to Hp=128 lanes (lane-aligned slices).
# The concat is replaced by split-weight matmuls; BN(eval) is folded into Linear1.
# ----------------------------------------------------------------------------
def lstm_concat_classifier_kernel(xlen_ref, xg_ref, whh_ref, pmax_ref,
                                  cw1l_ref, cw1q_ref, cb1_ref, cw2_ref, cb2_ref,
                                  out_ref):
    T = xg_ref.shape[0]
    B = xg_ref.shape[1]
    Hp = whh_ref.shape[0]
    whh = whh_ref[...]                       # (Hp, 4*Hp) f32, zero-padded
    xlen = xlen_ref[...]                     # (B, 1) int32

    def step(t, carry):
        h, c, ques = carry
        gates = xg_ref[t] + jnp.dot(h, whh, preferred_element_type=jnp.float32)
        i = jax.nn.sigmoid(gates[:, 0 * Hp:1 * Hp])
        f = jax.nn.sigmoid(gates[:, 1 * Hp:2 * Hp])
        g = jnp.tanh(gates[:, 2 * Hp:3 * Hp])
        o = jax.nn.sigmoid(gates[:, 3 * Hp:4 * Hp])
        c = f * c + i * g
        h = o * jnp.tanh(c)
        # pick hidden state at t == xlen - 1 (pack_padded_sequence semantics)
        ques = jnp.where(xlen == (t + 1), h, ques)
        return h, c, ques

    zeros = jnp.zeros((B, Hp), jnp.float32)
    _, _, ques = jax.lax.fori_loop(0, T, step, (zeros, zeros, zeros), unroll=True)

    # Global max pool over the per-chunk partial maxes.
    feat = jnp.max(pmax_ref[...], axis=0)                    # (B, 1024) f32

    # Fused concat + Linear(+folded BN) + ReLU + Linear (bf16 MXU, f32 accumulate).
    h1 = (jnp.dot(feat.astype(jnp.bfloat16), cw1l_ref[...],
                  preferred_element_type=jnp.float32)
          + jnp.dot(ques.astype(jnp.bfloat16), cw1q_ref[...],
                    preferred_element_type=jnp.float32)
          + cb1_ref[...])
    h1 = jnp.maximum(h1, 0.0)                                # Dropout(0.5) = identity (eval)
    out_ref[...] = (jnp.dot(h1.astype(jnp.bfloat16), cw2_ref[...],
                            preferred_element_type=jnp.float32)
                    + cb2_ref[...])


# ----------------------------------------------------------------------------
# Full forward (glue in plain JAX: batch/gate/lane padding, embedding gather,
# hoisted LSTM input projection, BN folding, bf16 weight prep, point padding).
# ----------------------------------------------------------------------------
@functools.partial(jax.jit, static_argnames=("hidden", "num_classes", "b_pad",
                                             "tile_n", "n_chunks", "np_pad",
                                             "vmem_limit"))
def _forward_impl(tokens, xlen, point_set, params, *, hidden, num_classes,
                  b_pad, tile_n, n_chunks, np_pad, vmem_limit):
    B, T = tokens.shape
    Hp = _round_up(hidden, 128)
    Cp = _round_up(num_classes, 128)

    # --- pad batch to a multiple of 8 sublanes (no masked partial stores) ---
    tokens_p = jnp.pad(tokens, ((0, b_pad - B), (0, 0)))
    xlen_p = jnp.pad(xlen.astype(jnp.int32), (0, b_pad - B), constant_values=1)

    # --- Question path glue: embedding gather + hoisted input projection ---
    emb = jnp.take(params["emb"], tokens_p, axis=0)                 # (Bp, T, D)
    emb_tbd = jnp.transpose(emb, (1, 0, 2))                         # (T, Bp, D)
    xg = jnp.einsum("tbd,dg->tbg", emb_tbd, params["wih"]) + params["b_lstm"]
    # pad each gate from H to Hp lanes so in-kernel gate slices are 128-aligned
    xg = xg.reshape(T, b_pad, 4, hidden)
    xg = jnp.pad(xg, ((0, 0), (0, 0), (0, 0), (0, Hp - hidden))).reshape(T, b_pad, 4 * Hp)
    whh = params["whh"].reshape(hidden, 4, hidden)
    whh = jnp.pad(whh, ((0, Hp - hidden), (0, 0), (0, Hp - hidden))).reshape(Hp, 4 * Hp)

    # --- Lidar path: channels-last, pad points (edge = duplicate, max-safe), pad batch ---
    pts = jnp.transpose(point_set.astype(jnp.float32), (0, 2, 1))   # (B, Np, 3)
    Np = pts.shape[1]
    if np_pad != Np:
        pts = jnp.pad(pts, ((0, 0), (0, np_pad - Np), (0, 0)), mode="edge")
    pts = jnp.pad(pts, ((0, b_pad - B), (0, 0), (0, 0)))

    # --- bf16 MXU operands (f32 accumulation kept in the kernels) ---
    pw2 = params["pw2"].astype(jnp.bfloat16)
    pw3 = params["pw3"].astype(jnp.bfloat16)

    # --- Classifier weights: fold BN(eval) into Linear1, split concat, pad lanes ---
    # NOTE: params['gamma'] / params['beta'] are assumed pre-folded:
    #   gamma = bn_gamma / sqrt(running_var + eps), beta = bn_beta - running_mean * gamma.
    scale = params["gamma"]
    cw1 = params["cw1"] * scale
    cb1 = params["cb1"] * scale + params["beta"]
    cw1l = cw1[:1024].astype(jnp.bfloat16)                           # lidar slab
    cw1q = jnp.pad(cw1[1024:], ((0, Hp - hidden), (0, 0))).astype(jnp.bfloat16)
    cw2 = jnp.pad(params["cw2"], ((0, 0), (0, Cp - num_classes))).astype(jnp.bfloat16)
    cb2 = jnp.pad(params["cb2"], ((0, 0), (0, Cp - num_classes)))

    # Kernel 1: per-chunk PointNet partial maxes (parallel chunks -> both v7x TCs).
    pmax = pointnet_partial_max(pts, params["pw1"], params["pb1"], pw2,
                                params["pb2"], pw3, params["pb3"],
                                tile_n=tile_n, n_chunks=n_chunks,
                                vmem_limit=vmem_limit)

    # Kernel 2: fused LSTM + final max + concat classifier (single invocation).
    logits_p = pl.pallas_call(
        lstm_concat_classifier_kernel,
        out_shape=jax.ShapeDtypeStruct((b_pad, Cp), jnp.float32),
    )(xlen_p[:, None], xg, whh, pmax, cw1l, cw1q, cb1, cw2, cb2)

    return logits_p[:B, :num_classes]


def lidar_model_forward(tokens, xlen, point_set, params, *, hidden, num_classes):
    b_pad, tile_n, n_chunks, np_pad, vmem_limit = plan_lidar_tiling(
        tokens.shape[0], point_set.shape[2])
    return _forward_impl(tokens, xlen, point_set, params,
                         hidden=hidden, num_classes=num_classes,
                         b_pad=b_pad, tile_n=tile_n, n_chunks=n_chunks,
                         np_pad=np_pad, vmem_limit=vmem_limit)


def init_params(key, *, vocab_n, emb_d, hidden, num_classes):
    ks = jax.random.split(key, 12)
    s = 0.05
    emb = s * jax.random.normal(ks[0], (vocab_n, emb_d), jnp.float32)
    emb = emb.at[0].set(0.0)                             # padding_idx ('<NULL>') row
    params = dict(
        emb=emb,
        wih=s * jax.random.normal(ks[1], (emb_d, 4 * hidden), jnp.float32),
        whh=s * jax.random.normal(ks[2], (hidden, 4 * hidden), jnp.float32),
        b_lstm=s * jax.random.normal(ks[3], (1, 4 * hidden), jnp.float32),  # b_ih + b_hh
        pw1=s * jax.random.normal(ks[4], (3, 64), jnp.float32),
        pb1=jnp.zeros((1, 64), jnp.float32),
        pw2=s * jax.random.normal(ks[5], (64, 128), jnp.float32),
        pb2=jnp.zeros((1, 128), jnp.float32),
        pw3=s * jax.random.normal(ks[6], (128, 1024), jnp.float32),
        pb3=jnp.zeros((1, 1024), jnp.float32),
        cw1=s * jax.random.normal(ks[7], (1024 + hidden, 128), jnp.float32),
        cb1=jnp.zeros((1, 128), jnp.float32),
        gamma=jnp.ones((1, 128), jnp.float32),   # BN eval: gamma/sqrt(var+eps), pre-folded
        beta=jnp.zeros((1, 128), jnp.float32),   # BN eval: beta - mean*scale, pre-folded
        cw2=s * jax.random.normal(ks[8], (128, num_classes), jnp.float32),
        cb2=jnp.zeros((1, num_classes), jnp.float32),
    )
    return params


if __name__ == "__main__":
    B, T, VOCAB_N, EMB_D = 2, 8, 50, 200
    HIDDEN = 32            # ques_feat_size
    NUM_CLASSES = 10
    NPTS = 64

    key = jax.random.PRNGKey(0)
    k_tok, k_len, k_pts, k_par = jax.random.split(key, 4)

    tokens = jax.random.randint(k_tok, (B, T), 0, VOCAB_N, dtype=jnp.int32)
    xlen = jax.random.randint(k_len, (B,), 1, T + 1, dtype=jnp.int32)
    point_set = jax.random.normal(k_pts, (B, 3, NPTS), jnp.float32)   # PyTorch layout

    params = init_params(k_par, vocab_n=VOCAB_N, emb_d=EMB_D,
                         hidden=HIDDEN, num_classes=NUM_CLASSES)

    logits = lidar_model_forward(tokens, xlen, point_set, params,
                                 hidden=HIDDEN, num_classes=NUM_CLASSES)
    logits = jax.block_until_ready(logits)
    assert logits.shape == (B, NUM_CLASSES) and logits.dtype == jnp.float32
    print("KERNEL_OK")
</pallas_src>

<mosaic_0001>
module attributes {stable_mosaic.version = 11 : i64} {
  func.func @pointnet_max_kernel(%arg0: i32, %arg1: i32, %arg2: memref<8x64x3xf32, #tpu.memory_space<vmem>>, %arg3: memref<3x64xf32, #tpu.memory_space<vmem>>, %arg4: memref<1x64xf32, #tpu.memory_space<vmem>>, %arg5: memref<64x128xbf16, #tpu.memory_space<vmem>>, %arg6: memref<1x128xf32, #tpu.memory_space<vmem>>, %arg7: memref<128x1024xbf16, #tpu.memory_space<vmem>>, %arg8: memref<1x1024xf32, #tpu.memory_space<vmem>>, %arg9: memref<1x8x1024xf32, #tpu.memory_space<vmem>>) attributes {dimension_semantics = [#tpu.dimension_semantics<parallel>, #tpu.dimension_semantics<arbitrary>], iteration_bounds = array<i64: 1, 1>, scalar_prefetch = 0 : i64, scratch_operands = 0 : i64, tpu.core_type = #tpu.core_type<tc>, window_params = [{transform_indices = @transform_0, window_bounds = array<i64: 8, 64, 3>}, {pipeline_mode = #tpu.pipeline_mode<synchronous>, transform_indices = @transform_1, window_bounds = array<i64: 3, 64>}, {pipeline_mode = #tpu.pipeline_mode<synchronous>, transform_indices = @transform_2, window_bounds = array<i64: 1, 64>}, {pipeline_mode = #tpu.pipeline_mode<synchronous>, transform_indices = @transform_3, window_bounds = array<i64: 64, 128>}, {pipeline_mode = #tpu.pipeline_mode<synchronous>, transform_indices = @transform_4, window_bounds = array<i64: 1, 128>}, {pipeline_mode = #tpu.pipeline_mode<synchronous>, transform_indices = @transform_5, window_bounds = array<i64: 128, 1024>}, {pipeline_mode = #tpu.pipeline_mode<synchronous>, transform_indices = @transform_6, window_bounds = array<i64: 1, 1024>}, {transform_indices = @transform_7, window_bounds = array<i64: 1, 8, 1024>}]} {
    %c0 = arith.constant 0 : index
    %c0_0 = arith.constant 0 : index
    %c0_1 = arith.constant 0 : index
    %0 = vector.load %arg2[%c0, %c0_0, %c0_1] : memref<8x64x3xf32, #tpu.memory_space<vmem>>, vector<8x64x3xf32>
    %1 = vector.shape_cast %0 : vector<8x64x3xf32> to vector<512x3xf32>
    %c0_2 = arith.constant 0 : index
    %c0_3 = arith.constant 0 : index
    %2 = vector.load %arg3[%c0_2, %c0_3] : memref<3x64xf32, #tpu.memory_space<vmem>>, vector<3x64xf32>
    %3 = vector.extract_strided_slice %1 {offsets = [0, 0], sizes = [512, 1], strides = [1, 1]} : vector<512x3xf32> to vector<512x1xf32>
    %4 = vector.extract_strided_slice %2 {offsets = [0, 0], sizes = [1, 64], strides = [1, 1]} : vector<3x64xf32> to vector<1x64xf32>
    %5 = vector.broadcast %3 : vector<512x1xf32> to vector<512x64xf32>
    %6 = vector.broadcast %4 : vector<1x64xf32> to vector<512x64xf32>
    %7 = arith.mulf %5, %6 : vector<512x64xf32>
    %8 = vector.extract_strided_slice %1 {offsets = [0, 1], sizes = [512, 1], strides = [1, 1]} : vector<512x3xf32> to vector<512x1xf32>
    %9 = vector.extract_strided_slice %2 {offsets = [1, 0], sizes = [1, 64], strides = [1, 1]} : vector<3x64xf32> to vector<1x64xf32>
    %10 = vector.broadcast %8 : vector<512x1xf32> to vector<512x64xf32>
    %11 = vector.broadcast %9 : vector<1x64xf32> to vector<512x64xf32>
    %12 = arith.mulf %10, %11 : vector<512x64xf32>
    %13 = arith.addf %7, %12 : vector<512x64xf32>
    %14 = vector.extract_strided_slice %1 {offsets = [0, 2], sizes = [512, 1], strides = [1, 1]} : vector<512x3xf32> to vector<512x1xf32>
    %15 = vector.extract_strided_slice %2 {offsets = [2, 0], sizes = [1, 64], strides = [1, 1]} : vector<3x64xf32> to vector<1x64xf32>
    %16 = vector.broadcast %14 : vector<512x1xf32> to vector<512x64xf32>
    %17 = vector.broadcast %15 : vector<1x64xf32> to vector<512x64xf32>
    %18 = arith.mulf %16, %17 : vector<512x64xf32>
    %19 = arith.addf %13, %18 : vector<512x64xf32>
    %c0_4 = arith.constant 0 : index
    %c0_5 = arith.constant 0 : index
    %20 = vector.load %arg4[%c0_4, %c0_5] : memref<1x64xf32, #tpu.memory_space<vmem>>, vector<1x64xf32>
    %21 = vector.broadcast %20 : vector<1x64xf32> to vector<512x64xf32>
    %22 = arith.addf %19, %21 : vector<512x64xf32>
    %cst = arith.constant 0.000000e+00 : f32
    %23 = vector.broadcast %cst : f32 to vector<512x64xf32>
    %24 = arith.maximumf %22, %23 : vector<512x64xf32>
    %25 = arith.truncf %24 : vector<512x64xf32> to vector<512x64xbf16>
    %c0_6 = arith.constant 0 : index
    %c0_7 = arith.constant 0 : index
    %26 = vector.load %arg5[%c0_6, %c0_7] : memref<64x128xbf16, #tpu.memory_space<vmem>>, vector<64x128xbf16>
    %cst_8 = arith.constant dense<0.000000e+00> : vector<512x128xf32>
    %27 = tpu.matmul %25, %26, %cst_8 {dimension_numbers = #tpu.dot_dimension_numbers<[1], [0], [0], [1], [0, 0, 1, 1], [], []>} : vector<512x64xbf16>, vector<64x128xbf16>, vector<512x128xf32> -> vector<512x128xf32>
    %c0_9 = arith.constant 0 : index
    %c0_10 = arith.constant 0 : index
    %28 = vector.load %arg6[%c0_9, %c0_10] : memref<1x128xf32, #tpu.memory_space<vmem>>, vector<1x128xf32>
    %29 = vector.broadcast %28 : vector<1x128xf32> to vector<512x128xf32>
    %30 = arith.addf %27, %29 : vector<512x128xf32>
    %cst_11 = arith.constant 0.000000e+00 : f32
    %31 = vector.broadcast %cst_11 : f32 to vector<512x128xf32>
    %32 = arith.maximumf %30, %31 : vector<512x128xf32>
    %33 = arith.truncf %32 : vector<512x128xf32> to vector<512x128xbf16>
    %c0_12 = arith.constant 0 : index
    %c0_13 = arith.constant 0 : index
    %34 = vector.load %arg7[%c0_12, %c0_13] : memref<128x1024xbf16, #tpu.memory_space<vmem>>, vector<128x1024xbf16>
    %cst_14 = arith.constant dense<0.000000e+00> : vector<512x1024xf32>
    %35 = tpu.matmul %33, %34, %cst_14 {dimension_numbers = #tpu.dot_dimension_numbers<[1], [0], [0], [1], [0, 0, 1, 1], [], []>} : vector<512x128xbf16>, vector<128x1024xbf16>, vector<512x1024xf32> -> vector<512x1024xf32>
    %c0_15 = arith.constant 0 : index
    %c0_16 = arith.constant 0 : index
    %36 = vector.load %arg8[%c0_15, %c0_16] : memref<1x1024xf32, #tpu.memory_space<vmem>>, vector<1x1024xf32>
    %37 = vector.broadcast %36 : vector<1x1024xf32> to vector<512x1024xf32>
    %38 = arith.addf %35, %37 : vector<512x1024xf32>
    %cst_17 = arith.constant 0.000000e+00 : f32
    %39 = vector.broadcast %cst_17 : f32 to vector<512x1024xf32>
    %40 = arith.maximumf %38, %39 : vector<512x1024xf32>
    %41 = vector.shape_cast %40 : vector<512x1024xf32> to vector<8x64x1024xf32>
    %cst_18 = arith.constant dense<0xFF800000> : vector<8x1024xf32>
    %42 = vector.multi_reduction <maximumf>, %41, %cst_18 [1] : vector<8x64x1024xf32> to vector<8x1024xf32>
    %c0_i32 = arith.constant 0 : i32
    %43 = arith.cmpi eq, %arg1, %c0_i32 : i32
    %44 = arith.extui %43 : i1 to i32
    %c0_i32_19 = arith.constant 0 : i32
    %45 = arith.cmpi ne, %44, %c0_i32_19 : i32
    scf.if %45 {
      %c0_22 = arith.constant 0 : index
      %c0_23 = arith.constant 0 : index
      %c0_24 = arith.constant 0 : index
      %49 = vector.load %arg9[%c0_22, %c0_23, %c0_24] : memref<1x8x1024xf32, #tpu.memory_space<vmem>>, vector<1x8x1024xf32>
      %50 = vector.shape_cast %49 : vector<1x8x1024xf32> to vector<8x1024xf32>
      %51 = vector.shape_cast %42 : vector<8x1024xf32> to vector<1x8x1024xf32>
      tpu.vector_store %arg9[%c0_22, %c0_23, %c0_24], %51 {strides = array<i32>} : memref<1x8x1024xf32, #tpu.memory_space<vmem>>, vector<1x8x1024xf32>,
    } else {
    }
    %c0_i32_20 = arith.constant 0 : i32
    %46 = arith.cmpi sgt, %arg1, %c0_i32_20 : i32
    %47 = arith.extui %46 : i1 to i32
    %c0_i32_21 = arith.constant 0 : i32
    %48 = arith.cmpi ne, %47, %c0_i32_21 : i32
    scf.if %48 {
      %c0_22 = arith.constant 0 : index
      %c0_23 = arith.constant 0 : index
      %c0_24 = arith.constant 0 : index
      %49 = vector.load %arg9[%c0_22, %c0_23, %c0_24] : memref<1x8x1024xf32, #tpu.memory_space<vmem>>, vector<1x8x1024xf32>
      %50 = vector.shape_cast %49 : vector<1x8x1024xf32> to vector<8x1024xf32>
      %51 = arith.maximumf %50, %42 : vector<8x1024xf32>
      %c0_25 = arith.constant 0 : index
      %c0_26 = arith.constant 0 : index
      %c0_27 = arith.constant 0 : index
      %52 = vector.load %arg9[%c0_25, %c0_26, %c0_27] : memref<1x8x1024xf32, #tpu.memory_space<vmem>>, vector<1x8x1024xf32>
      %53 = vector.shape_cast %52 : vector<1x8x1024xf32> to vector<8x1024xf32>
      %54 = vector.shape_cast %51 : vector<8x1024xf32> to vector<1x8x1024xf32>
      tpu.vector_store %arg9[%c0_25, %c0_26, %c0_27], %54 {strides = array<i32>} : memref<1x8x1024xf32, #tpu.memory_space<vmem>>, vector<1x8x1024xf32>,
    } else {
    }
    return
  }
  func.func @transform_0(%arg0: i32, %arg1: i32) -> (i32, i32, i32) {
    %c1_i32 = arith.constant 1 : i32
    %0 = arith.muli %arg0, %c1_i32 : i32
    %1 = arith.addi %0, %arg1 : i32
    %c0_i32 = arith.constant 0 : i32
    %c0_i32_0 = arith.constant 0 : i32
    %c0_i32_1 = arith.constant 0 : i32
    return %c0_i32, %1, %c0_i32_0 : i32, i32, i32
  }
  func.func @transform_1(%arg0: i32, %arg1: i32) -> (i32, i32) {
    %c0_i32 = arith.constant 0 : i32
    %c0_i32_0 = arith.constant 0 : i32
    %c0_i32_1 = arith.constant 0 : i32
    return %c0_i32, %c0_i32_0 : i32, i32
  }
  func.func @transform_2(%arg0: i32, %arg1: i32) -> (i32, i32) {
    %c0_i32 = arith.constant 0 : i32
    %c0_i32_0 = arith.constant 0 : i32
    %c0_i32_1 = arith.constant 0 : i32
    return %c0_i32, %c0_i32_0 : i32, i32
  }
  func.func @transform_3(%arg0: i32, %arg1: i32) -> (i32, i32) {
    %c0_i32 = arith.constant 0 : i32
    %c0_i32_0 = arith.constant 0 : i32
    %c0_i32_1 = arith.constant 0 : i32
    return %c0_i32, %c0_i32_0 : i32, i32
  }
  func.func @transform_4(%arg0: i32, %arg1: i32) -> (i32, i32) {
    %c0_i32 = arith.constant 0 : i32
    %c0_i32_0 = arith.constant 0 : i32
    %c0_i32_1 = arith.constant 0 : i32
    return %c0_i32, %c0_i32_0 : i32, i32
  }
  func.func @transform_5(%arg0: i32, %arg1: i32) -> (i32, i32) {
    %c0_i32 = arith.constant 0 : i32
    %c0_i32_0 = arith.constant 0 : i32
    %c0_i32_1 = arith.constant 0 : i32
    return %c0_i32, %c0_i32_0 : i32, i32
  }
  func.func @transform_6(%arg0: i32, %arg1: i32) -> (i32, i32) {
    %c0_i32 = arith.constant 0 : i32
    %c0_i32_0 = arith.constant 0 : i32
    %c0_i32_1 = arith.constant 0 : i32
    return %c0_i32, %c0_i32_0 : i32, i32
  }
  func.func @transform_7(%arg0: i32, %arg1: i32) -> (i32, i32, i32) {
    %c0_i32 = arith.constant 0 : i32
    %c0_i32_0 = arith.constant 0 : i32
    %c0_i32_1 = arith.constant 0 : i32
    return %arg0, %c0_i32, %c0_i32_0 : i32, i32, i32
  }
}

module attributes {stable_mosaic.version = 11 : i64} {
  func.func @lstm_concat_classifier_kernel(%arg0: memref<8x1xi32, #tpu.memory_space<vmem>>, %arg1: memref<8x8x512xf32, #tpu.memory_space<vmem>>, %arg2: memref<128x512xf32, #tpu.memory_space<vmem>>, %arg3: memref<1x8x1024xf32, #tpu.memory_space<vmem>>, %arg4: memref<1024x128xbf16, #tpu.memory_space<vmem>>, %arg5: memref<128x128xbf16, #tpu.memory_space<vmem>>, %arg6: memref<1x128xf32, #tpu.memory_space<vmem>>, %arg7: memref<128x128xbf16, #tpu.memory_space<vmem>>, %arg8: memref<1x128xf32, #tpu.memory_space<vmem>>, %arg9: memref<8x128xf32, #tpu.memory_space<vmem>>) attributes {dimension_semantics = [], scalar_prefetch = 0 : i64, scratch_operands = 0 : i64, tpu.core_type = #tpu.core_type<tc>} {
    %c0 = arith.constant 0 : index
    %c0_0 = arith.constant 0 : index
    %0 = vector.load %arg2[%c0, %c0_0] : memref<128x512xf32, #tpu.memory_space<vmem>>, vector<128x512xf32>
    %c0_1 = arith.constant 0 : index
    %c0_2 = arith.constant 0 : index
    %1 = vector.load %arg0[%c0_1, %c0_2] : memref<8x1xi32, #tpu.memory_space<vmem>>, vector<8x1xi32>
    %cst = arith.constant 0.000000e+00 : f32
    %2 = vector.broadcast %cst : f32 to vector<8x128xf32>
    %c0_i32 = arith.constant 0 : i32
    %3 = arith.index_cast %c0_i32 : i32 to index
    %c0_3 = arith.constant 0 : index
    %c0_4 = arith.constant 0 : index
    %4 = vector.load %arg1[%3, %c0_3, %c0_4] : memref<8x8x512xf32, #tpu.memory_space<vmem>>, vector<1x8x512xf32>
    %5 = vector.shape_cast %4 : vector<1x8x512xf32> to vector<8x512xf32>
    %cst_5 = arith.constant dense<0.000000e+00> : vector<8x512xf32>
    %6 = tpu.matmul %2, %0, %cst_5 {dimension_numbers = #tpu.dot_dimension_numbers<[1], [0], [0], [1], [0, 0, 1, 1], [], []>} : vector<8x128xf32>, vector<128x512xf32>, vector<8x512xf32> -> vector<8x512xf32>
    %7 = arith.addf %5, %6 : vector<8x512xf32>
    %8 = vector.extract_strided_slice %7 {offsets = [0, 0], sizes = [8, 128], strides = [1, 1]} : vector<8x512xf32> to vector<8x128xf32>
    %9 = arith.negf %8 : vector<8x128xf32>
    %10 = math.exp %9 : vector<8x128xf32>
    %cst_6 = arith.constant 1.000000e+00 : f32
    %11 = vector.broadcast %cst_6 : f32 to vector<8x128xf32>
    %12 = arith.addf %11, %10 : vector<8x128xf32>
    %13 = arith.divf %11, %12 : vector<8x128xf32>
    %14 = vector.extract_strided_slice %7 {offsets = [0, 128], sizes = [8, 128], strides = [1, 1]} : vector<8x512xf32> to vector<8x128xf32>
    %15 = arith.negf %14 : vector<8x128xf32>
    %16 = math.exp %15 : vector<8x128xf32>
    %cst_7 = arith.constant 1.000000e+00 : f32
    %17 = vector.broadcast %cst_7 : f32 to vector<8x128xf32>
    %18 = arith.addf %17, %16 : vector<8x128xf32>
    %19 = arith.divf %17, %18 : vector<8x128xf32>
    %20 = vector.extract_strided_slice %7 {offsets = [0, 256], sizes = [8, 128], strides = [1, 1]} : vector<8x512xf32> to vector<8x128xf32>
    %21 = math.tanh %20 : vector<8x128xf32>
    %22 = vector.extract_strided_slice %7 {offsets = [0, 384], sizes = [8, 128], strides = [1, 1]} : vector<8x512xf32> to vector<8x128xf32>
    %23 = arith.negf %22 : vector<8x128xf32>
    %24 = math.exp %23 : vector<8x128xf32>
    %cst_8 = arith.constant 1.000000e+00 : f32
    %25 = vector.broadcast %cst_8 : f32 to vector<8x128xf32>
    %26 = arith.addf %25, %24 : vector<8x128xf32>
    %27 = arith.divf %25, %26 : vector<8x128xf32>
    %28 = arith.mulf %19, %2 : vector<8x128xf32>
    %29 = arith.mulf %13, %21 : vector<8x128xf32>
    %30 = arith.addf %28, %29 : vector<8x128xf32>
    %31 = math.tanh %30 : vector<8x128xf32>
    %32 = arith.mulf %27, %31 : vector<8x128xf32>
    %c1_i32 = arith.constant 1 : i32
    %33 = arith.addi %c0_i32, %c1_i32 : i32
    %34 = vector.broadcast %33 : i32 to vector<8x1xi32>
    %35 = arith.cmpi eq, %1, %34 : vector<8x1xi32>
    %36 = vector.shape_cast %35 : vector<8x1xi1> to vector<8x1xi1>
    %37 = vector.broadcast %36 : vector<8x1xi1> to vector<8x128xi1>
    %38 = arith.select %37, %32, %2 : vector<8x128xi1>, vector<8x128xf32>
    %c1_i32_9 = arith.constant 1 : i32
    %39 = arith.index_cast %c1_i32_9 : i32 to index
    %c0_10 = arith.constant 0 : index
    %c0_11 = arith.constant 0 : index
    %40 = vector.load %arg1[%39, %c0_10, %c0_11] : memref<8x8x512xf32, #tpu.memory_space<vmem>>, vector<1x8x512xf32>
    %41 = vector.shape_cast %40 : vector<1x8x512xf32> to vector<8x512xf32>
    %cst_12 = arith.constant dense<0.000000e+00> : vector<8x512xf32>
    %42 = tpu.matmul %32, %0, %cst_12 {dimension_numbers = #tpu.dot_dimension_numbers<[1], [0], [0], [1], [0, 0, 1, 1], [], []>} : vector<8x128xf32>, vector<128x512xf32>, vector<8x512xf32> -> vector<8x512xf32>
    %43 = arith.addf %41, %42 : vector<8x512xf32>
    %44 = vector.extract_strided_slice %43 {offsets = [0, 0], sizes = [8, 128], strides = [1, 1]} : vector<8x512xf32> to vector<8x128xf32>
    %45 = arith.negf %44 : vector<8x128xf32>
    %46 = math.exp %45 : vector<8x128xf32>
    %cst_13 = arith.constant 1.000000e+00 : f32
    %47 = vector.broadcast %cst_13 : f32 to vector<8x128xf32>
    %48 = arith.addf %47, %46 : vector<8x128xf32>
    %49 = arith.divf %47, %48 : vector<8x128xf32>
    %50 = vector.extract_strided_slice %43 {offsets = [0, 128], sizes = [8, 128], strides = [1, 1]} : vector<8x512xf32> to vector<8x128xf32>
    %51 = arith.negf %50 : vector<8x128xf32>
    %52 = math.exp %51 : vector<8x128xf32>
    %cst_14 = arith.constant 1.000000e+00 : f32
    %53 = vector.broadcast %cst_14 : f32 to vector<8x128xf32>
    %54 = arith.addf %53, %52 : vector<8x128xf32>
    %55 = arith.divf %53, %54 : vector<8x128xf32>
    %56 = vector.extract_strided_slice %43 {offsets = [0, 256], sizes = [8, 128], strides = [1, 1]} : vector<8x512xf32> to vector<8x128xf32>
    %57 = math.tanh %56 : vector<8x128xf32>
    %58 = vector.extract_strided_slice %43 {offsets = [0, 384], sizes = [8, 128], strides = [1, 1]} : vector<8x512xf32> to vector<8x128xf32>
    %59 = arith.negf %58 : vector<8x128xf32>
    %60 = math.exp %59 : vector<8x128xf32>
    %cst_15 = arith.constant 1.000000e+00 : f32
    %61 = vector.broadcast %cst_15 : f32 to vector<8x128xf32>
    %62 = arith.addf %61, %60 : vector<8x128xf32>
    %63 = arith.divf %61, %62 : vector<8x128xf32>
    %64 = arith.mulf %55, %30 : vector<8x128xf32>
    %65 = arith.mulf %49, %57 : vector<8x128xf32>
    %66 = arith.addf %64, %65 : vector<8x128xf32>
    %67 = math.tanh %66 : vector<8x128xf32>
    %68 = arith.mulf %63, %67 : vector<8x128xf32>
    %c1_i32_16 = arith.constant 1 : i32
    %69 = arith.addi %c1_i32_9, %c1_i32_16 : i32
    %70 = vector.broadcast %69 : i32 to vector<8x1xi32>
    %71 = arith.cmpi eq, %1, %70 : vector<8x1xi32>
    %72 = vector.shape_cast %71 : vector<8x1xi1> to vector<8x1xi1>
    %73 = vector.broadcast %72 : vector<8x1xi1> to vector<8x128xi1>
    %74 = arith.select %73, %68, %38 : vector<8x128xi1>, vector<8x128xf32>
    %c2_i32 = arith.constant 2 : i32
    %75 = arith.index_cast %c2_i32 : i32 to index
    %c0_17 = arith.constant 0 : index
    %c0_18 = arith.constant 0 : index
    %76 = vector.load %arg1[%75, %c0_17, %c0_18] : memref<8x8x512xf32, #tpu.memory_space<vmem>>, vector<1x8x512xf32>
    %77 = vector.shape_cast %76 : vector<1x8x512xf32> to vector<8x512xf32>
    %cst_19 = arith.constant dense<0.000000e+00> : vector<8x512xf32>
    %78 = tpu.matmul %68, %0, %cst_19 {dimension_numbers = #tpu.dot_dimension_numbers<[1], [0], [0], [1], [0, 0, 1, 1], [], []>} : vector<8x128xf32>, vector<128x512xf32>, vector<8x512xf32> -> vector<8x512xf32>
    %79 = arith.addf %77, %78 : vector<8x512xf32>
    %80 = vector.extract_strided_slice %79 {offsets = [0, 0], sizes = [8, 128], strides = [1, 1]} : vector<8x512xf32> to vector<8x128xf32>
    %81 = arith.negf %80 : vector<8x128xf32>
    %82 = math.exp %81 : vector<8x128xf32>
    %cst_20 = arith.constant 1.000000e+00 : f32
    %83 = vector.broadcast %cst_20 : f32 to vector<8x128xf32>
    %84 = arith.addf %83, %82 : vector<8x128xf32>
    %85 = arith.divf %83, %84 : vector<8x128xf32>
    %86 = vector.extract_strided_slice %79 {offsets = [0, 128], sizes = [8, 128], strides = [1, 1]} : vector<8x512xf32> to vector<8x128xf32>
    %87 = arith.negf %86 : vector<8x128xf32>
    %88 = math.exp %87 : vector<8x128xf32>
    %cst_21 = arith.constant 1.000000e+00 : f32
    %89 = vector.broadcast %cst_21 : f32 to vector<8x128xf32>
    %90 = arith.addf %89, %88 : vector<8x128xf32>
    %91 = arith.divf %89, %90 : vector<8x128xf32>
    %92 = vector.extract_strided_slice %79 {offsets = [0, 256], sizes = [8, 128], strides = [1, 1]} : vector<8x512xf32> to vector<8x128xf32>
    %93 = math.tanh %92 : vector<8x128xf32>
    %94 = vector.extract_strided_slice %79 {offsets = [0, 384], sizes = [8, 128], strides = [1, 1]} : vector<8x512xf32> to vector<8x128xf32>
    %95 = arith.negf %94 : vector<8x128xf32>
    %96 = math.exp %95 : vector<8x128xf32>
    %cst_22 = arith.constant 1.000000e+00 : f32
    %97 = vector.broadcast %cst_22 : f32 to vector<8x128xf32>
    %98 = arith.addf %97, %96 : vector<8x128xf32>
    %99 = arith.divf %97, %98 : vector<8x128xf32>
    %100 = arith.mulf %91, %66 : vector<8x128xf32>
    %101 = arith.mulf %85, %93 : vector<8x128xf32>
    %102 = arith.addf %100, %101 : vector<8x128xf32>
    %103 = math.tanh %102 : vector<8x128xf32>
    %104 = arith.mulf %99, %103 : vector<8x128xf32>
    %c1_i32_23 = arith.constant 1 : i32
    %105 = arith.addi %c2_i32, %c1_i32_23 : i32
    %106 = vector.broadcast %105 : i32 to vector<8x1xi32>
    %107 = arith.cmpi eq, %1, %106 : vector<8x1xi32>
    %108 = vector.shape_cast %107 : vector<8x1xi1> to vector<8x1xi1>
    %109 = vector.broadcast %108 : vector<8x1xi1> to vector<8x128xi1>
    %110 = arith.select %109, %104, %74 : vector<8x128xi1>, vector<8x128xf32>
    %c3_i32 = arith.constant 3 : i32
    %111 = arith.index_cast %c3_i32 : i32 to index
    %c0_24 = arith.constant 0 : index
    %c0_25 = arith.constant 0 : index
    %112 = vector.load %arg1[%111, %c0_24, %c0_25] : memref<8x8x512xf32, #tpu.memory_space<vmem>>, vector<1x8x512xf32>
    %113 = vector.shape_cast %112 : vector<1x8x512xf32> to vector<8x512xf32>
    %cst_26 = arith.constant dense<0.000000e+00> : vector<8x512xf32>
    %114 = tpu.matmul %104, %0, %cst_26 {dimension_numbers = #tpu.dot_dimension_numbers<[1], [0], [0], [1], [0, 0, 1, 1], [], []>} : vector<8x128xf32>, vector<128x512xf32>, vector<8x512xf32> -> vector<8x512xf32>
    %115 = arith.addf %113, %114 : vector<8x512xf32>
    %116 = vector.extract_strided_slice %115 {offsets = [0, 0], sizes = [8, 128], strides = [1, 1]} : vector<8x512xf32> to vector<8x128xf32>
    %117 = arith.negf %116 : vector<8x128xf32>
    %118 = math.exp %117 : vector<8x128xf32>
    %cst_27 = arith.constant 1.000000e+00 : f32
    %119 = vector.broadcast %cst_27 : f32 to vector<8x128xf32>
    %120 = arith.addf %119, %118 : vector<8x128xf32>
    %121 = arith.divf %119, %120 : vector<8x128xf32>
    %122 = vector.extract_strided_slice %115 {offsets = [0, 128], sizes = [8, 128], strides = [1, 1]} : vector<8x512xf32> to vector<8x128xf32>
    %123 = arith.negf %122 : vector<8x128xf32>
    %124 = math.exp %123 : vector<8x128xf32>
    %cst_28 = arith.constant 1.000000e+00 : f32
    %125 = vector.broadcast %cst_28 : f32 to vector<8x128xf32>
    %126 = arith.addf %125, %124 : vector<8x128xf32>
    %127 = arith.divf %125, %126 : vector<8x128xf32>
    %128 = vector.extract_strided_slice %115 {offsets = [0, 256], sizes = [8, 128], strides = [1, 1]} : vector<8x512xf32> to vector<8x128xf32>
    %129 = math.tanh %128 : vector<8x128xf32>
    %130 = vector.extract_strided_slice %115 {offsets = [0, 384], sizes = [8, 128], strides = [1, 1]} : vector<8x512xf32> to vector<8x128xf32>
    %131 = arith.negf %130 : vector<8x128xf32>
    %132 = math.exp %131 : vector<8x128xf32>
    %cst_29 = arith.constant 1.000000e+00 : f32
    %133 = vector.broadcast %cst_29 : f32 to vector<8x128xf32>
    %134 = arith.addf %133, %132 : vector<8x128xf32>
    %135 = arith.divf %133, %134 : vector<8x128xf32>
    %136 = arith.mulf %127, %102 : vector<8x128xf32>
    %137 = arith.mulf %121, %129 : vector<8x128xf32>
    %138 = arith.addf %136, %137 : vector<8x128xf32>
    %139 = math.tanh %138 : vector<8x128xf32>
    %140 = arith.mulf %135, %139 : vector<8x128xf32>
    %c1_i32_30 = arith.constant 1 : i32
    %141 = arith.addi %c3_i32, %c1_i32_30 : i32
    %142 = vector.broadcast %141 : i32 to vector<8x1xi32>
    %143 = arith.cmpi eq, %1, %142 : vector<8x1xi32>
    %144 = vector.shape_cast %143 : vector<8x1xi1> to vector<8x1xi1>
    %145 = vector.broadcast %144 : vector<8x1xi1> to vector<8x128xi1>
    %146 = arith.select %145, %140, %110 : vector<8x128xi1>, vector<8x128xf32>
    %c4_i32 = arith.constant 4 : i32
    %147 = arith.index_cast %c4_i32 : i32 to index
    %c0_31 = arith.constant 0 : index
    %c0_32 = arith.constant 0 : index
    %148 = vector.load %arg1[%147, %c0_31, %c0_32] : memref<8x8x512xf32, #tpu.memory_space<vmem>>, vector<1x8x512xf32>
    %149 = vector.shape_cast %148 : vector<1x8x512xf32> to vector<8x512xf32>
    %cst_33 = arith.constant dense<0.000000e+00> : vector<8x512xf32>
    %150 = tpu.matmul %140, %0, %cst_33 {dimension_numbers = #tpu.dot_dimension_numbers<[1], [0], [0], [1], [0, 0, 1, 1], [], []>} : vector<8x128xf32>, vector<128x512xf32>, vector<8x512xf32> -> vector<8x512xf32>
    %151 = arith.addf %149, %150 : vector<8x512xf32>
    %152 = vector.extract_strided_slice %151 {offsets = [0, 0], sizes = [8, 128], strides = [1, 1]} : vector<8x512xf32> to vector<8x128xf32>
    %153 = arith.negf %152 : vector<8x128xf32>
    %154 = math.exp %153 : vector<8x128xf32>
    %cst_34 = arith.constant 1.000000e+00 : f32
    %155 = vector.broadcast %cst_34 : f32 to vector<8x128xf32>
    %156 = arith.addf %155, %154 : vector<8x128xf32>
    %157 = arith.divf %155, %156 : vector<8x128xf32>
    %158 = vector.extract_strided_slice %151 {offsets = [0, 128], sizes = [8, 128], strides = [1, 1]} : vector<8x512xf32> to vector<8x128xf32>
    %159 = arith.negf %158 : vector<8x128xf32>
    %160 = math.exp %159 : vector<8x128xf32>
    %cst_35 = arith.constant 1.000000e+00 : f32
    %161 = vector.broadcast %cst_35 : f32 to vector<8x128xf32>
    %162 = arith.addf %161, %160 : vector<8x128xf32>
    %163 = arith.divf %161, %162 : vector<8x128xf32>
    %164 = vector.extract_strided_slice %151 {offsets = [0, 256], sizes = [8, 128], strides = [1, 1]} : vector<8x512xf32> to vector<8x128xf32>
    %165 = math.tanh %164 : vector<8x128xf32>
    %166 = vector.extract_strided_slice %151 {offsets = [0, 384], sizes = [8, 128], strides = [1, 1]} : vector<8x512xf32> to vector<8x128xf32>
    %167 = arith.negf %166 : vector<8x128xf32>
    %168 = math.exp %167 : vector<8x128xf32>
    %cst_36 = arith.constant 1.000000e+00 : f32
    %169 = vector.broadcast %cst_36 : f32 to vector<8x128xf32>
    %170 = arith.addf %169, %168 : vector<8x128xf32>
    %171 = arith.divf %169, %170 : vector<8x128xf32>
    %172 = arith.mulf %163, %138 : vector<8x128xf32>
    %173 = arith.mulf %157, %165 : vector<8x128xf32>
    %174 = arith.addf %172, %173 : vector<8x128xf32>
    %175 = math.tanh %174 : vector<8x128xf32>
    %176 = arith.mulf %171, %175 : vector<8x128xf32>
    %c1_i32_37 = arith.constant 1 : i32
    %177 = arith.addi %c4_i32, %c1_i32_37 : i32
    %178 = vector.broadcast %177 : i32 to vector<8x1xi32>
    %179 = arith.cmpi eq, %1, %178 : vector<8x1xi32>
    %180 = vector.shape_cast %179 : vector<8x1xi1> to vector<8x1xi1>
    %181 = vector.broadcast %180 : vector<8x1xi1> to vector<8x128xi1>
    %182 = arith.select %181, %176, %146 : vector<8x128xi1>, vector<8x128xf32>
    %c5_i32 = arith.constant 5 : i32
    %183 = arith.index_cast %c5_i32 : i32 to index
    %c0_38 = arith.constant 0 : index
    %c0_39 = arith.constant 0 : index
    %184 = vector.load %arg1[%183, %c0_38, %c0_39] : memref<8x8x512xf32, #tpu.memory_space<vmem>>, vector<1x8x512xf32>
    %185 = vector.shape_cast %184 : vector<1x8x512xf32> to vector<8x512xf32>
    %cst_40 = arith.constant dense<0.000000e+00> : vector<8x512xf32>
    %186 = tpu.matmul %176, %0, %cst_40 {dimension_numbers = #tpu.dot_dimension_numbers<[1], [0], [0], [1], [0, 0, 1, 1], [], []>} : vector<8x128xf32>, vector<128x512xf32>, vector<8x512xf32> -> vector<8x512xf32>
    %187 = arith.addf %185, %186 : vector<8x512xf32>
    %188 = vector.extract_strided_slice %187 {offsets = [0, 0], sizes = [8, 128], strides = [1, 1]} : vector<8x512xf32> to vector<8x128xf32>
    %189 = arith.negf %188 : vector<8x128xf32>
    %190 = math.exp %189 : vector<8x128xf32>
    %cst_41 = arith.constant 1.000000e+00 : f32
    %191 = vector.broadcast %cst_41 : f32 to vector<8x128xf32>
    %192 = arith.addf %191, %190 : vector<8x128xf32>
    %193 = arith.divf %191, %192 : vector<8x128xf32>
    %194 = vector.extract_strided_slice %187 {offsets = [0, 128], sizes = [8, 128], strides = [1, 1]} : vector<8x512xf32> to vector<8x128xf32>
    %195 = arith.negf %194 : vector<8x128xf32>
    %196 = math.exp %195 : vector<8x128xf32>
    %cst_42 = arith.constant 1.000000e+00 : f32
    %197 = vector.broadcast %cst_42 : f32 to vector<8x128xf32>
    %198 = arith.addf %197, %196 : vector<8x128xf32>
    %199 = arith.divf %197, %198 : vector<8x128xf32>
    %200 = vector.extract_strided_slice %187 {offsets = [0, 256], sizes = [8, 128], strides = [1, 1]} : vector<8x512xf32> to vector<8x128xf32>
    %201 = math.tanh %200 : vector<8x128xf32>
    %202 = vector.extract_strided_slice %187 {offsets = [0, 384], sizes = [8, 128], strides = [1, 1]} : vector<8x512xf32> to vector<8x128xf32>
    %203 = arith.negf %202 : vector<8x128xf32>
    %204 = math.exp %203 : vector<8x128xf32>
    %cst_43 = arith.constant 1.000000e+00 : f32
    %205 = vector.broadcast %cst_43 : f32 to vector<8x128xf32>
    %206 = arith.addf %205, %204 : vector<8x128xf32>
    %207 = arith.divf %205, %206 : vector<8x128xf32>
    %208 = arith.mulf %199, %174 : vector<8x128xf32>
    %209 = arith.mulf %193, %201 : vector<8x128xf32>
    %210 = arith.addf %208, %209 : vector<8x128xf32>
    %211 = math.tanh %210 : vector<8x128xf32>
    %212 = arith.mulf %207, %211 : vector<8x128xf32>
    %c1_i32_44 = arith.constant 1 : i32
    %213 = arith.addi %c5_i32, %c1_i32_44 : i32
    %214 = vector.broadcast %213 : i32 to vector<8x1xi32>
    %215 = arith.cmpi eq, %1, %214 : vector<8x1xi32>
    %216 = vector.shape_cast %215 : vector<8x1xi1> to vector<8x1xi1>
    %217 = vector.broadcast %216 : vector<8x1xi1> to vector<8x128xi1>
    %218 = arith.select %217, %212, %182 : vector<8x128xi1>, vector<8x128xf32>
    %c6_i32 = arith.constant 6 : i32
    %219 = arith.index_cast %c6_i32 : i32 to index
    %c0_45 = arith.constant 0 : index
    %c0_46 = arith.constant 0 : index
    %220 = vector.load %arg1[%219, %c0_45, %c0_46] : memref<8x8x512xf32, #tpu.memory_space<vmem>>, vector<1x8x512xf32>
    %221 = vector.shape_cast %220 : vector<1x8x512xf32> to vector<8x512xf32>
    %cst_47 = arith.constant dense<0.000000e+00> : vector<8x512xf32>
    %222 = tpu.matmul %212, %0, %cst_47 {dimension_numbers = #tpu.dot_dimension_numbers<[1], [0], [0], [1], [0, 0, 1, 1], [], []>} : vector<8x128xf32>, vector<128x512xf32>, vector<8x512xf32> -> vector<8x512xf32>
    %223 = arith.addf %221, %222 : vector<8x512xf32>
    %224 = vector.extract_strided_slice %223 {offsets = [0, 0], sizes = [8, 128], strides = [1, 1]} : vector<8x512xf32> to vector<8x128xf32>
    %225 = arith.negf %224 : vector<8x128xf32>
    %226 = math.exp %225 : vector<8x128xf32>
    %cst_48 = arith.constant 1.000000e+00 : f32
    %227 = vector.broadcast %cst_48 : f32 to vector<8x128xf32>
    %228 = arith.addf %227, %226 : vector<8x128xf32>
    %229 = arith.divf %227, %228 : vector<8x128xf32>
    %230 = vector.extract_strided_slice %223 {offsets = [0, 128], sizes = [8, 128], strides = [1, 1]} : vector<8x512xf32> to vector<8x128xf32>
    %231 = arith.negf %230 : vector<8x128xf32>
    %232 = math.exp %231 : vector<8x128xf32>
    %cst_49 = arith.constant 1.000000e+00 : f32
    %233 = vector.broadcast %cst_49 : f32 to vector<8x128xf32>
    %234 = arith.addf %233, %232 : vector<8x128xf32>
    %235 = arith.divf %233, %234 : vector<8x128xf32>
    %236 = vector.extract_strided_slice %223 {offsets = [0, 256], sizes = [8, 128], strides = [1, 1]} : vector<8x512xf32> to vector<8x128xf32>
    %237 = math.tanh %236 : vector<8x128xf32>
    %238 = vector.extract_strided_slice %223 {offsets = [0, 384], sizes = [8, 128], strides = [1, 1]} : vector<8x512xf32> to vector<8x128xf32>
    %239 = arith.negf %238 : vector<8x128xf32>
    %240 = math.exp %239 : vector<8x128xf32>
    %cst_50 = arith.constant 1.000000e+00 : f32
    %241 = vector.broadcast %cst_50 : f32 to vector<8x128xf32>
    %242 = arith.addf %241, %240 : vector<8x128xf32>
    %243 = arith.divf %241, %242 : vector<8x128xf32>
    %244 = arith.mulf %235, %210 : vector<8x128xf32>
    %245 = arith.mulf %229, %237 : vector<8x128xf32>
    %246 = arith.addf %244, %245 : vector<8x128xf32>
    %247 = math.tanh %246 : vector<8x128xf32>
    %248 = arith.mulf %243, %247 : vector<8x128xf32>
    %c1_i32_51 = arith.constant 1 : i32
    %249 = arith.addi %c6_i32, %c1_i32_51 : i32
    %250 = vector.broadcast %249 : i32 to vector<8x1xi32>
    %251 = arith.cmpi eq, %1, %250 : vector<8x1xi32>
    %252 = vector.shape_cast %251 : vector<8x1xi1> to vector<8x1xi1>
    %253 = vector.broadcast %252 : vector<8x1xi1> to vector<8x128xi1>
    %254 = arith.select %253, %248, %218 : vector<8x128xi1>, vector<8x128xf32>
    %c7_i32 = arith.constant 7 : i32
    %255 = arith.index_cast %c7_i32 : i32 to index
    %c0_52 = arith.constant 0 : index
    %c0_53 = arith.constant 0 : index
    %256 = vector.load %arg1[%255, %c0_52, %c0_53] : memref<8x8x512xf32, #tpu.memory_space<vmem>>, vector<1x8x512xf32>
    %257 = vector.shape_cast %256 : vector<1x8x512xf32> to vector<8x512xf32>
    %cst_54 = arith.constant dense<0.000000e+00> : vector<8x512xf32>
    %258 = tpu.matmul %248, %0, %cst_54 {dimension_numbers = #tpu.dot_dimension_numbers<[1], [0], [0], [1], [0, 0, 1, 1], [], []>} : vector<8x128xf32>, vector<128x512xf32>, vector<8x512xf32> -> vector<8x512xf32>
    %259 = arith.addf %257, %258 : vector<8x512xf32>
    %260 = vector.extract_strided_slice %259 {offsets = [0, 0], sizes = [8, 128], strides = [1, 1]} : vector<8x512xf32> to vector<8x128xf32>
    %261 = arith.negf %260 : vector<8x128xf32>
    %262 = math.exp %261 : vector<8x128xf32>
    %cst_55 = arith.constant 1.000000e+00 : f32
    %263 = vector.broadcast %cst_55 : f32 to vector<8x128xf32>
    %264 = arith.addf %263, %262 : vector<8x128xf32>
    %265 = arith.divf %263, %264 : vector<8x128xf32>
    %266 = vector.extract_strided_slice %259 {offsets = [0, 128], sizes = [8, 128], strides = [1, 1]} : vector<8x512xf32> to vector<8x128xf32>
    %267 = arith.negf %266 : vector<8x128xf32>
    %268 = math.exp %267 : vector<8x128xf32>
    %cst_56 = arith.constant 1.000000e+00 : f32
    %269 = vector.broadcast %cst_56 : f32 to vector<8x128xf32>
    %270 = arith.addf %269, %268 : vector<8x128xf32>
    %271 = arith.divf %269, %270 : vector<8x128xf32>
    %272 = vector.extract_strided_slice %259 {offsets = [0, 256], sizes = [8, 128], strides = [1, 1]} : vector<8x512xf32> to vector<8x128xf32>
    %273 = math.tanh %272 : vector<8x128xf32>
    %274 = vector.extract_strided_slice %259 {offsets = [0, 384], sizes = [8, 128], strides = [1, 1]} : vector<8x512xf32> to vector<8x128xf32>
    %275 = arith.negf %274 : vector<8x128xf32>
    %276 = math.exp %275 : vector<8x128xf32>
    %cst_57 = arith.constant 1.000000e+00 : f32
    %277 = vector.broadcast %cst_57 : f32 to vector<8x128xf32>
    %278 = arith.addf %277, %276 : vector<8x128xf32>
    %279 = arith.divf %277, %278 : vector<8x128xf32>
    %280 = arith.mulf %271, %246 : vector<8x128xf32>
    %281 = arith.mulf %265, %273 : vector<8x128xf32>
    %282 = arith.addf %280, %281 : vector<8x128xf32>
    %283 = math.tanh %282 : vector<8x128xf32>
    %284 = arith.mulf %279, %283 : vector<8x128xf32>
    %c1_i32_58 = arith.constant 1 : i32
    %285 = arith.addi %c7_i32, %c1_i32_58 : i32
    %286 = vector.broadcast %285 : i32 to vector<8x1xi32>
    %287 = arith.cmpi eq, %1, %286 : vector<8x1xi32>
    %288 = vector.shape_cast %287 : vector<8x1xi1> to vector<8x1xi1>
    %289 = vector.broadcast %288 : vector<8x1xi1> to vector<8x128xi1>
    %290 = arith.select %289, %284, %254 : vector<8x128xi1>, vector<8x128xf32>
    %c8_i32 = arith.constant 8 : i32
    %c0_59 = arith.constant 0 : index
    %c0_60 = arith.constant 0 : index
    %c0_61 = arith.constant 0 : index
    %291 = vector.load %arg3[%c0_59, %c0_60, %c0_61] : memref<1x8x1024xf32, #tpu.memory_space<vmem>>, vector<1x8x1024xf32>
    %cst_62 = arith.constant dense<0xFF800000> : vector<8x1024xf32>
    %292 = vector.multi_reduction <maximumf>, %291, %cst_62 [0] : vector<1x8x1024xf32> to vector<8x1024xf32>
    %293 = arith.truncf %292 : vector<8x1024xf32> to vector<8x1024xbf16>
    %c0_63 = arith.constant 0 : index
    %c0_64 = arith.constant 0 : index
    %294 = vector.load %arg4[%c0_63, %c0_64] : memref<1024x128xbf16, #tpu.memory_space<vmem>>, vector<1024x128xbf16>
    %cst_65 = arith.constant dense<0.000000e+00> : vector<8x128xf32>
    %295 = tpu.matmul %293, %294, %cst_65 {dimension_numbers = #tpu.dot_dimension_numbers<[1], [0], [0], [1], [0, 0, 1, 1], [], []>} : vector<8x1024xbf16>, vector<1024x128xbf16>, vector<8x128xf32> -> vector<8x128xf32>
    %296 = arith.truncf %290 : vector<8x128xf32> to vector<8x128xbf16>
    %c0_66 = arith.constant 0 : index
    %c0_67 = arith.constant 0 : index
    %297 = vector.load %arg5[%c0_66, %c0_67] : memref<128x128xbf16, #tpu.memory_space<vmem>>, vector<128x128xbf16>
    %cst_68 = arith.constant dense<0.000000e+00> : vector<8x128xf32>
    %298 = tpu.matmul %296, %297, %cst_68 {dimension_numbers = #tpu.dot_dimension_numbers<[1], [0], [0], [1], [0, 0, 1, 1], [], []>} : vector<8x128xbf16>, vector<128x128xbf16>, vector<8x128xf32> -> vector<8x128xf32>
    %299 = arith.addf %295, %298 : vector<8x128xf32>
    %c0_69 = arith.constant 0 : index
    %c0_70 = arith.constant 0 : index
    %300 = vector.load %arg6[%c0_69, %c0_70] : memref<1x128xf32, #tpu.memory_space<vmem>>, vector<1x128xf32>
    %301 = vector.broadcast %300 : vector<1x128xf32> to vector<8x128xf32>
    %302 = arith.addf %299, %301 : vector<8x128xf32>
    %cst_71 = arith.constant 0.000000e+00 : f32
    %303 = vector.broadcast %cst_71 : f32 to vector<8x128xf32>
    %304 = arith.maximumf %302, %303 : vector<8x128xf32>
    %305 = arith.truncf %304 : vector<8x128xf32> to vector<8x128xbf16>
    %c0_72 = arith.constant 0 : index
    %c0_73 = arith.constant 0 : index
    %306 = vector.load %arg7[%c0_72, %c0_73] : memref<128x128xbf16, #tpu.memory_space<vmem>>, vector<128x128xbf16>
    %cst_74 = arith.constant dense<0.000000e+00> : vector<8x128xf32>
    %307 = tpu.matmul %305, %306, %cst_74 {dimension_numbers = #tpu.dot_dimension_numbers<[1], [0], [0], [1], [0, 0, 1, 1], [], []>} : vector<8x128xbf16>, vector<128x128xbf16>, vector<8x128xf32> -> vector<8x128xf32>
    %c0_75 = arith.constant 0 : index
    %c0_76 = arith.constant 0 : index
    %308 = vector.load %arg8[%c0_75, %c0_76] : memref<1x128xf32, #tpu.memory_space<vmem>>, vector<1x128xf32>
    %309 = vector.broadcast %308 : vector<1x128xf32> to vector<8x128xf32>
    %310 = arith.addf %307, %309 : vector<8x128xf32>
    %c0_77 = arith.constant 0 : index
    %c0_78 = arith.constant 0 : index
    %311 = vector.load %arg9[%c0_77, %c0_78] : memref<8x128xf32, #tpu.memory_space<vmem>>, vector<8x128xf32>
    tpu.vector_store %arg9[%c0_77, %c0_78], %310 {strides = array<i32>} : memref<8x128xf32, #tpu.memory_space<vmem>>, vector<8x128xf32>,
    return
  }
}

</mosaic_0001>

<bundles_post_ra>
// kernel: _forward_impl.3
= control target key start
LH: loop header
LB: loop body
LE: loop exit
PB: predicated region body
PF: predicated region fallthrough
CT: control target
= control target key end

     0   :  { %v4731_v3 = vmov 0.0   ;;  %v4739_v5 = vmov 0   ;;  %vm3032_vm15 = vmmov 0   ;;  %s4721_s2 = inlined_call_operand.vmem [shape: f32[128,512], index: 2, kind: input, shape index: {}]   ;;  %s4722_s0 = inlined_call_operand.vmem [shape: s32[8,1], index: 0, kind: input, shape index: {}]   ;;  %s4723_s1 = inlined_call_operand.vmem [shape: f32[8,8,512], index: 1, kind: input, shape index: {}]   ;;  %s4724_s4 = inlined_call_operand.vmem [shape: bf16[1024,128], index: 4, kind: input, shape index: {}]   ;;  %s4725_s5 = inlined_call_operand.vmem [shape: bf16[128,128], index: 5, kind: input, shape index: {}]   ;;  %s4726_s3 = inlined_call_operand.vmem [shape: f32[1,8,1024], index: 3, kind: input, shape index: {}]   ;;  %s4727_s7 = inlined_call_operand.vmem [shape: bf16[128,128], index: 7, kind: input, shape index: {}]   ;;  %s4728_s6 = inlined_call_operand.vmem [shape: f32[1,128], index: 6, kind: input, shape index: {}]   ;;  %s4729_s8 = inlined_call_operand.vmem [shape: f32[1,128], index: 8, kind: input, shape index: {}]   ;;  %s4730_s9 = inlined_call_operand.vmem [shape: f32[8,128], index: 9, kind: output, shape index: {}]  }
   0x1   :  { %v3086_v0 = vld [vmem:[%s4721_s2 + $0x1e8] sm:$0xff]  ;;  %v3091_v1 = vld [vmem:[%s4721_s2 + $0x1e0] sm:$0xff]  ;;  %166 = vmatprep.mubr.f32.mxu0 %v4731_v3  ;;  %237 = vmatprep.mubr.f32.mxu1 %v4731_v3  ;;  %v3135_v10 = vld [vmem:[%s4721_s2 + $0x1f8] sm:$0xff] }
   0x2   :  { %4819 = vst [vmem:[#allocation2_spill] sm:$0xff] %v3086_v0  ;;  %v3096_v2 = vld [vmem:[%s4721_s2 + $0x1c8] sm:$0xff]  ;;  %102 = vmatprep.subr.mxu0 %v3086_v0  ;;  %v3104_v4 = vld [vmem:[%s4721_s2 + $0x1c0] sm:$0xff]  ;;  %2755 = vset.pattern.permute.xlu0 %v4739_v5  ;;  %4820 = vst [vmem:[#allocation3_spill] sm:$0xff] %v3135_v10 }
   0x3   :  { %103 = vmatpush1.msra.mxu0 %v3091_v1  ;;  %v3111_v6 = vld [vmem:[%s4721_s2 + $0x1a8] sm:$0xff]  ;;  %2756 = vset.pattern.permute.xlu1 %v4739_v5  ;;  %v3118_v7 = vld [vmem:[%s4721_s2 + $0x1a0] sm:$0xff]  ;;  %v3147_v12 = vld [vmem:[%s4721_s2 + $0x1f0] sm:$0xff] }
   0x4   :  { %104 = vmatprep.subr.mxu0 %v3096_v2  ;;  %v3124_v8 = vld [vmem:[%s4721_s2 + $0x188] sm:$0xff]  ;;  %v3130_v9 = vld [vmem:[%s4721_s2 + $0x180] sm:$0xff]  ;;  %173 = vmatprep.subr.mxu1 %v3135_v10  ;;  %v3159_v14 = vld [vmem:[%s4721_s2 + $0x1d8] sm:$0xff] }
   0x5   :  { %105 = vmatpush1.msra.mxu0 %v3104_v4  ;;  %v3141_v11 = vld [vmem:[%s4721_s2 + $0x168] sm:$0xff]  ;;  %v3153_v13 = vld [vmem:[%s4721_s2 + $0x160] sm:$0xff]  ;;  %174 = vmatpush1.msra.mxu1 %v3147_v12  ;;  %v3164_v15 = vld [vmem:[%s4721_s2 + $0x1d0] sm:$0xff] }
   0x6   :  { %106 = vmatprep.subr.mxu0 %v3111_v6  ;;  %v3170_v16 = vld [vmem:[%s4721_s2 + $0x148] sm:$0xff]  ;;  %175 = vmatprep.subr.mxu1 %v3159_v14  ;;  %v3176_v17 = vld [vmem:[%s4721_s2 + $0x1b8] sm:$0xff]  ;;  %v3182_v18 = vld [vmem:[%s4721_s2 + $0x140] sm:$0xff] }
   0x7   :  { %107 = vmatpush1.msra.mxu0 %v3118_v7  ;;  %176 = vmatpush1.msra.mxu1 %v3164_v15  ;;  %v3188_v19 = vld [vmem:[%s4721_s2 + $0x1b0] sm:$0xff]  ;;  %v3193_v20 = vld [vmem:[%s4721_s2 + $0x198] sm:$0xff]  ;;  %v3199_v21 = vld [vmem:[%s4721_s2 + $0x128] sm:$0xff] }
   0x8   :  { %108 = vmatprep.subr.mxu0 %v3124_v8  ;;  %177 = vmatprep.subr.mxu1 %v3176_v17  ;;  %v3205_v22 = vld [vmem:[%s4721_s2 + $0x190] sm:$0xff]  ;;  %v3211_v23 = vld [vmem:[%s4721_s2 + $0x120] sm:$0xff]  ;;  %v3217_v24 = vld [vmem:[%s4721_s2 + $0x178] sm:$0xff] }
   0x9   :  { %109 = vmatpush1.msra.mxu0 %v3130_v9  ;;  %178 = vmatpush1.msra.mxu1 %v3188_v19  ;;  %v3223_v25 = vld [vmem:[%s4721_s2 + $0x108] sm:$0xff]  ;;  %v3229_v26 = vld [vmem:[%s4721_s2 + $0x170] sm:$0xff]  ;;  %v3235_v27 = vld [vmem:[%s4721_s2 + $0x100] sm:$0xff] }
   0xa   :  { %110 = vmatprep.subr.mxu0 %v3141_v11  ;;  %179 = vmatprep.subr.mxu1 %v3193_v20  ;;  %v3241_v28 = vld [vmem:[%s4721_s2 + $0x158] sm:$0xff]  ;;  %v3247_v29 = vld [vmem:[%s4721_s2 + $0xe8] sm:$0xff]  ;;  %v3253_v30 = vld [vmem:[%s4721_s2 + $0x150] sm:$0xff] }
   0xb   :  { %111 = vmatpush1.msra.mxu0 %v3153_v13  ;;  %180 = vmatpush1.msra.mxu1 %v3205_v22  ;;  %v3259_v31 = vld [vmem:[%s4721_s2 + $0xe0] sm:$0xff]  ;;  %v3265_v32 = vld [vmem:[%s4721_s2 + $0x138] sm:$0xff]  ;;  %v3271_v33 = vld [vmem:[%s4721_s2 + $0xc8] sm:$0xff] }
   0xc   :  { %112 = vmatprep.subr.mxu0 %v3170_v16  ;;  %181 = vmatprep.subr.mxu1 %v3217_v24  ;;  %v3277_v34 = vld [vmem:[%s4721_s2 + $0x130] sm:$0xff]  ;;  %v3283_v35 = vld [vmem:[%s4721_s2 + $0xc0] sm:$0xff]  ;;  %v3289_v36 = vld [vmem:[%s4721_s2 + $0x118] sm:$0xff] }
   0xd   :  { %113 = vmatpush1.msra.mxu0 %v3182_v18  ;;  %182 = vmatpush1.msra.mxu1 %v3229_v26  ;;  %v3295_v37 = vld [vmem:[%s4721_s2 + $0xa8] sm:$0xff]  ;;  %v3301_v38 = vld [vmem:[%s4721_s2 + $0x110] sm:$0xff]  ;;  %v3307_v39 = vld [vmem:[%s4721_s2 + $0xa0] sm:$0xff] }
   0xe   :  { %114 = vmatprep.subr.mxu0 %v3199_v21  ;;  %183 = vmatprep.subr.mxu1 %v3241_v28  ;;  %v3313_v40 = vld [vmem:[%s4721_s2 + $0xf8] sm:$0xff]  ;;  %v3319_v41 = vld [vmem:[%s4721_s2 + $0x88] sm:$0xff]  ;;  %v3325_v42 = vld [vmem:[%s4721_s2 + $0xf0] sm:$0xff] }
   0xf   :  { %115 = vmatpush1.msra.mxu0 %v3211_v23  ;;  %184 = vmatpush1.msra.mxu1 %v3253_v30  ;;  %v3331_v43 = vld [vmem:[%s4721_s2 + $0x80] sm:$0xff]  ;;  %v3337_v44 = vld [vmem:[%s4721_s2 + $0xd8] sm:$0xff]  ;;  %v3343_v45 = vld [vmem:[%s4721_s2 + $0x68] sm:$0xff] }
  0x10   :  { %116 = vmatprep.subr.mxu0 %v3223_v25  ;;  %185 = vmatprep.subr.mxu1 %v3265_v32  ;;  %4821 = vst [vmem:[#allocation4_spill] sm:$0xff] %v3343_v45  ;;  %v3349_v46 = vld [vmem:[%s4721_s2 + $0xd0] sm:$0xff]  ;;  %v3355_v47 = vld [vmem:[%s4721_s2 + $0x60] sm:$0xff]  ;;  %v3361_v48 = vld [vmem:[%s4721_s2 + $0xb8] sm:$0xff] }
  0x11   :  { %117 = vmatpush1.msra.mxu0 %v3235_v27  ;;  %186 = vmatpush1.msra.mxu1 %v3277_v34  ;;  %4822 = vst [vmem:[#allocation5_spill] sm:$0xff] %v3355_v47  ;;  %v3367_v49 = vld [vmem:[%s4721_s2 + $0x48] sm:$0xff]  ;;  %v3373_v50 = vld [vmem:[%s4721_s2 + $0xb0] sm:$0xff]  ;;  %v3379_v51 = vld [vmem:[%s4721_s2 + $0x40] sm:$0xff] }
  0x12   :  { %118 = vmatprep.subr.mxu0 %v3247_v29  ;;  %187 = vmatprep.subr.mxu1 %v3289_v36  ;;  %4823 = vst [vmem:[#allocation6_spill] sm:$0xff] %v3367_v49  ;;  %4824 = vst [vmem:[#allocation7_spill] sm:$0xff] %v3379_v51  ;;  %v3385_v52 = vld [vmem:[%s4721_s2 + $0x98] sm:$0xff]  ;;  %v3390_v53 = vld [vmem:[%s4722_s0] sm:$0xff] }
  0x13   :  { %119 = vmatpush1.msra.mxu0 %v3259_v31  ;;  %188 = vmatpush1.msra.mxu1 %v3301_v38  ;;  %4825 = vst [vmem:[#allocation8_spill] sm:$0xff] %v3390_v53  ;;  %v3396_v54 = vld [vmem:[%s4721_s2 + $0x28] sm:$0xff]  ;;  %v3402_v55 = vld [vmem:[%s4721_s2 + $0x90] sm:$0xff]  ;;  %v3408_v56 = vld [vmem:[%s4721_s2 + $0x20] sm:$0xff]  ;;  %vm272_vm0 = vcmp.eq.s32.totalorder %v3390_v53, 1 }
  0x14   :  { %120 = vmatprep.subr.mxu0 %v3271_v33  ;;  %189 = vmatprep.subr.mxu1 %v3313_v40  ;;  %4826 = vst [vmem:[#allocation9_spill] sm:$0xff] %v3396_v54  ;;  %4827 = vst [vmem:[#allocation10_spill] sm:$0xff] %v3402_v55  ;;  %v3414_v57 = vld [vmem:[%s4721_s2 + $0x78] sm:$0xff]  ;;  %v3420_v58 = vld [vmem:[%s4721_s2 + $0x8] sm:$0xff]  ;;  %v273_v3 = vsel %vm272_vm0, 1, %v4739_v5 }
  0x15   :  { %121 = vmatpush1.msra.mxu0 %v3283_v35  ;;  %190 = vmatpush1.msra.mxu1 %v3325_v42  ;;  %4828 = vst [vmem:[#allocation11_spill] sm:$0xff] %v3408_v56  ;;  %4829 = vst [vmem:[#allocation12_spill] sm:$0xff] %v3414_v57  ;;  %v3426_v59 = vld [vmem:[%s4721_s2 + $0x70] sm:$0xff]  ;;  %v3433_v60 = vld [vmem:[%s4721_s2] sm:$0xff] }
  0x16   :  { %122 = vmatprep.subr.mxu0 %v3295_v37  ;;  %191 = vmatprep.subr.mxu1 %v3337_v44  ;;  %4830 = vst [vmem:[#allocation13_spill] sm:$0xff] %v3420_v58  ;;  %4831 = vst [vmem:[#allocation14_spill] sm:$0xff] %v3426_v59  ;;  %v3439_v61 = vld [vmem:[%s4721_s2 + $0x58] sm:$0xff]  ;;  %v3446_v62 = vld [vmem:[%s4721_s2 + $0x50] sm:$0xff] }
  0x17   :  { %123 = vmatpush1.msra.mxu0 %v3307_v39  ;;  %192 = vmatpush1.msra.mxu1 %v3349_v46  ;;  %4832 = vst [vmem:[#allocation15_spill] sm:$0xff] %v3433_v60  ;;  %4833 = vst [vmem:[#allocation16_spill] sm:$0xff] %v3439_v61  ;;  %v3453_v63 = vld [vmem:[%s4721_s2 + $0x38] sm:$0xff]  ;;  %v3461_v53 = vld [vmem:[%s4721_s2 + $0x30] sm:$0xff] }
  0x18   :  { %124 = vmatprep.subr.mxu0 %v3319_v41  ;;  %193 = vmatprep.subr.mxu1 %v3361_v48  ;;  %4834 = vst [vmem:[#allocation17_spill] sm:$0xff] %v3446_v62  ;;  %4835 = vst [vmem:[#allocation18_spill] sm:$0xff] %v3453_v63  ;;  %v3474_v5 = vld [vmem:[%s4721_s2 + $0x10] sm:$0xff] }
  0x19   :  { %125 = vmatpush1.msra.mxu0 %v3331_v43  ;;  %194 = vmatpush1.msra.mxu1 %v3373_v50  ;;  %4836 = vst [vmem:[#allocation19_spill] sm:$0xff] %v3461_v53  ;;  %4839 = vst [vmem:[#allocation21_spill] sm:$0xff] %v3474_v5 }
  0x1a   :  { %126 = vmatprep.subr.mxu0 %v3343_v45  ;;  %195 = vmatprep.subr.mxu1 %v3385_v52 }
  0x1b   :  { %127 = vmatpush1.msra.mxu0 %v3355_v47  ;;  %196 = vmatpush1.msra.mxu1 %v3402_v55 }
  0x1c   :  { %128 = vmatprep.subr.mxu0 %v3367_v49  ;;  %197 = vmatprep.subr.mxu1 %v3414_v57 }
  0x1d   :  { %129 = vmatpush1.msra.mxu0 %v3379_v51  ;;  %198 = vmatpush1.msra.mxu1 %v3426_v59 }
  0x1e   :  { %130 = vmatprep.subr.mxu0 %v3396_v54  ;;  %199 = vmatprep.subr.mxu1 %v3439_v61 }
  0x1f   :  { %131 = vmatpush1.msra.mxu0 %v3408_v56  ;;  %v4837_v56 = vmov 0.0   ;;  %200 = vmatpush1.msra.mxu1 %v3446_v62 }
  0x20   :  { %132 = vmatprep.subr.mxu0 %v3420_v58  ;;  %v3468_v58 = vld [vmem:[%s4721_s2 + $0x18] sm:$0xff]  ;;  %201 = vmatprep.subr.mxu1 %v3453_v63 }
  0x21   :  { %133 = vmatpush1.msra.mxu0 %v3433_v60  ;;  %4838 = vst [vmem:[#allocation20_spill] sm:$0xff] %v3468_v58  ;;  %275 = vperm.xlu0 %2755, %v273_v3   ;;  %v4840_v3 = vld [vmem:[#allocation11_spill] sm:$0xff] }
  0x22   :  { %167 = vmatmul.mubr.f32.vlgmr.msra.gmra.mxu0 %v4837_v56  ;;  %202 = vmatpush1.msra.mxu1 %v3461_v53 }
  0x23   :  { %284 = vmatprep.subr.mxu0 %v3086_v0  ;;  %203 = vmatprep.subr.mxu1 %v3468_v58 }
  0x24   :  { %285 = vmatpush1.msra.mxu0 %v3091_v1  ;;  %204 = vmatpush1.msra.mxu1 %v3474_v5 }
  0x25   :  { %286 = vmatprep.subr.mxu0 %v3096_v2  ;;  %238 = vmatmul.mubr.f32.vlgmr.msra.gmra.mxu1 %v4837_v56 }
  0x26   :  { %355 = vmatprep.subr.mxu1 %v3135_v10  ;;  %287 = vmatpush1.msra.mxu0 %v3104_v4 }
  0x27   :  { %356 = vmatpush1.msra.mxu1 %v3147_v12  ;;  %288 = vmatprep.subr.mxu0 %v3111_v6 }
  0x28   :  { %357 = vmatprep.subr.mxu1 %v3159_v14  ;;  %289 = vmatpush1.msra.mxu0 %v3118_v7 }
  0x29   :  { %358 = vmatpush1.msra.mxu1 %v3164_v15  ;;  %290 = vmatprep.subr.mxu0 %v3124_v8 }
  0x2a   :  { %359 = vmatprep.subr.mxu1 %v3176_v17  ;;  %291 = vmatpush1.msra.mxu0 %v3130_v9 }
  0x2b   :  { %360 = vmatpush1.msra.mxu1 %v3188_v19  ;;  %292 = vmatprep.subr.mxu0 %v3141_v11 }
  0x2c   :  { %361 = vmatprep.subr.mxu1 %v3193_v20  ;;  %293 = vmatpush1.msra.mxu0 %v3153_v13 }
  0x2d   :  { %362 = vmatpush1.msra.mxu1 %v3205_v22  ;;  %294 = vmatprep.subr.mxu0 %v3170_v16 }
  0x2e   :  { %363 = vmatprep.subr.mxu1 %v3217_v24  ;;  %295 = vmatpush1.msra.mxu0 %v3182_v18 }
  0x2f   :  { %364 = vmatpush1.msra.mxu1 %v3229_v26  ;;  %296 = vmatprep.subr.mxu0 %v3199_v21 }
  0x30   :  { %365 = vmatprep.subr.mxu1 %v3241_v28  ;;  %297 = vmatpush1.msra.mxu0 %v3211_v23 }
  0x31   :  { %366 = vmatpush1.msra.mxu1 %v3253_v30  ;;  %298 = vmatprep.subr.mxu0 %v3223_v25 }
  0x32   :  { %367 = vmatprep.subr.mxu1 %v3265_v32  ;;  %299 = vmatpush1.msra.mxu0 %v3235_v27 }
  0x33   :  { %368 = vmatpush1.msra.mxu1 %v3277_v34  ;;  %300 = vmatprep.subr.mxu0 %v3247_v29 }
  0x34   :  { %369 = vmatprep.subr.mxu1 %v3289_v36  ;;  %301 = vmatpush1.msra.mxu0 %v3259_v31 }
  0x35   :  { %370 = vmatpush1.msra.mxu1 %v3301_v38  ;;  %302 = vmatprep.subr.mxu0 %v3271_v33 }
  0x36   :  { %371 = vmatprep.subr.mxu1 %v3313_v40  ;;  %303 = vmatpush1.msra.mxu0 %v3283_v35 }
  0x37   :  { %372 = vmatpush1.msra.mxu1 %v3325_v42  ;;  %304 = vmatprep.subr.mxu0 %v3295_v37 }
  0x38   :  { %373 = vmatprep.subr.mxu1 %v3337_v44  ;;  %305 = vmatpush1.msra.mxu0 %v3307_v39 }
  0x39   :  { %374 = vmatpush1.msra.mxu1 %v3349_v46  ;;  %306 = vmatprep.subr.mxu0 %v3319_v41 }
  0x3a   :  { %375 = vmatprep.subr.mxu1 %v3361_v48  ;;  %307 = vmatpush1.msra.mxu0 %v3331_v43 }
  0x3b   :  { %376 = vmatpush1.msra.mxu1 %v3373_v50  ;;  %308 = vmatprep.subr.mxu0 %v3343_v45  ;;  %v4841_v45 = vld [vmem:[#allocation13_spill] sm:$0xff] }
  0x3c   :  { %377 = vmatprep.subr.mxu1 %v3385_v52  ;;  %309 = vmatpush1.msra.mxu0 %v3355_v47 }
  0x3d   :  { %378 = vmatpush1.msra.mxu1 %v3402_v55  ;;  %310 = vmatprep.subr.mxu0 %v3367_v49 }
  0x3e   :  { %379 = vmatprep.subr.mxu1 %v3414_v57  ;;  %311 = vmatpush1.msra.mxu0 %v3379_v51 }
  0x3f   :  { %380 = vmatpush1.msra.mxu1 %v3426_v59  ;;  %312 = vmatprep.subr.mxu0 %v3396_v54 }
  0x40   :  { %381 = vmatprep.subr.mxu1 %v3439_v61  ;;  %313 = vmatpush1.msra.mxu0 %v4840_v3  ;;  %v4842_v3 = vld [vmem:[#allocation8_spill] sm:$0xff] }
  0x41   :  { %382 = vmatpush1.msra.mxu1 %v3446_v62  ;;  %314 = vmatprep.subr.mxu0 %v4841_v45  ;;  %vm454_vm1 = vcmp.eq.s32.totalorder %v4842_v3, 2  ;;  %v100_v3 = vld [vmem:[%s4723_s1 + $0x10] sm:$0xff] }
  0x42   :  { %383 = vmatprep.subr.mxu1 %v3453_v63  ;;  %315 = vmatpush1.msra.mxu0 %v3433_v60  ;;  %v4843_v63 = vmov 0   ;;  %v98_v60 = vld [vmem:[%s4723_s1] sm:$0xff] }
  0x43   :  { %384 = vmatpush1.msra.mxu1 %v3461_v53  ;;  %348 = vmatprep.mubr.f32.mxu0 %v4837_v56  ;;  %v455_v45 = vsel %vm454_vm1, 1, %v4843_v63 }
  0x44   :  { %385 = vmatprep.subr.mxu1 %v3468_v58  ;;  %419 = vmatprep.mubr.f32.mxu1 %v4837_v56 }
  0x45   :  { %386 = vmatpush1.msra.mxu1 %v3474_v5  ;;  %466 = vmatprep.subr.mxu0 %v3086_v0  ;;  %v99_v5 = vld [vmem:[%s4723_s1 + $0x8] sm:$0xff] }
  0x46   :  { %537 = vmatprep.subr.mxu1 %v3135_v10  ;;  %457 = vperm.xlu0 %2755, %v455_v45   ;;  %v101_v45 = vld [vmem:[%s4723_s1 + $0x18] sm:$0xff] }
  0xe2   :  { %v168_v58 = vpop.f32.mrf.mxu0 }
  0xe3   :  { %v244_v53 = vadd.f32 %v168_v58, %v98_v60 }
  0xe4   :  { %v170_v56 = vpop.f32.mrf.mxu0 }
  0xe5   :  { %v2472_v54 = vmul.f32 -1.442695, %v244_v53  ;;  %v245_v0 = vadd.f32 %v170_v56, %v99_v5  ;;  %v239_v62 = vpop.f32.mrf.mxu1 }
  0xe6   :  { %v246_v61 = vadd.f32 %v239_v62, %v100_v3  ;;  %v4849_v3 = vld [vmem:[#allocation6_spill] sm:$0xff] }
  0xe7   :  { %2837 = vpow2.f32 %v2472_v54  ;;  %v2473_v10 = vmul.f32 -1.442695, %v245_v0  ;;  %v241_v63 = vpop.f32.mrf.mxu1 }
  0xe8   :  { %v247_v51 = vadd.f32 %v241_v63, %v101_v45  ;;  %v4848_v63 = vld [vmem:[#allocation14_spill] sm:$0xff]  ;;  %v4850_v45 = vld [vmem:[#allocation16_spill] sm:$0xff] }
  0xe9   :  { %2839 = vpow2.f32 %v2473_v10 }
  0xea   :  { %v2474_v49 = vmul.f32 -1.442695, %v247_v51  ;;  %2841 = vtanh.f32 %v246_v61 }
  0xec   :  { %2843 = vpow2.f32 %v2474_v49  ;;  %v4845_v49 = vld [vmem:[#allocation4_spill] sm:$0xff] }
  0xf4   :  { %v2838_v58 = vpop.eup %2837 }
  0xf5   :  { %v251_v60 = vadd.f32 1.0, %v2838_v58  ;;  %v4851_v58 = vld [vmem:[#allocation7_spill] sm:$0xff] }
  0xf6   :  { %v2840_v5 = vpop.eup %2839 }
  0xf7   :  { %2845 = vrcp.f32 %v251_v60  ;;  %v257_v0 = vadd.f32 1.0, %v2840_v5  ;;  %v2842_v10 = vpop.eup %2841  ;;  %v4852_v60 = vld [vmem:[#allocation17_spill] sm:$0xff] }
  0xf8   :  { %v4853_v5 = vld [vmem:[#allocation9_spill] sm:$0xff] }
  0xf9   :  { %2847 = vrcp.f32 %v257_v0  ;;  %v2844_v53 = vpop.eup %2843  ;;  %v4854_v0 = vld [vmem:[#allocation18_spill] sm:$0xff] }
  0xfa   :  { %v264_v59 = vadd.f32 1.0, %v2844_v53  ;;  %v4856_v53 = vld [vmem:[#allocation19_spill] sm:$0xff] }
  0xfc   :  { %2849 = vrcp.f32 %v264_v59  ;;  %v4847_v59 = vld [vmem:[#allocation5_spill] sm:$0xff] }
 0x104   :  { %v2846_v54 = vpop.eup %2845 }
 0x105   :  { %v268_v57 = vmul.f32 %v2846_v54, %v2842_v10  ;;  %v4855_v10 = vld [vmem:[#allocation11_spill] sm:$0xff]  ;;  %v4857_v54 = vld [vmem:[#allocation13_spill] sm:$0xff] }
 0x106   :  { %v2848_v56 = vpop.eup %2847 }
 0x107   :  { %v267_v47 = vmul.f32 0.0, %v2848_v56  ;;  %v4858_v56 = vld [vmem:[#allocation20_spill] sm:$0xff] }
 0x109   :  { %v3562_v55 = vadd.f32 %v268_v57, %v267_v47  ;;  %v2850_v51 = vpop.eup %2849  ;;  %v4844_v47 = vld [vmem:[#allocation10_spill] sm:$0xff]  ;;  %v4846_v57 = vld [vmem:[#allocation12_spill] sm:$0xff] }
 0x10b   :  { %2851 = vtanh.f32 %v3562_v55 }
 0x118   :  { %v2852_v62 = vpop.eup %2851 }
 0x119   :  { %v3565_v61 = vmul.f32 %v2852_v62, %v2850_v51  ;;  %v4859_v51 = vld [vmem:[#allocation15_spill] sm:$0xff]  ;;  %v4860_v62 = vmov 0.0  }
 0x11b   :  { %349 = vmatmul.mubr.f32.vlgmr.msra.gmra.mxu0 %v3565_v61  ;;  %420 = vmatmul.mubr.f32.vlgmr.msra.gmra.mxu1 %v3565_v61 }
 0x11c   :  { %467 = vmatpush1.msra.mxu0 %v3091_v1  ;;  %538 = vmatpush1.msra.mxu1 %v3147_v12 }
 0x11d   :  { %468 = vmatprep.subr.mxu0 %v3096_v2  ;;  %539 = vmatprep.subr.mxu1 %v3159_v14 }
 0x11e   :  { %469 = vmatpush1.msra.mxu0 %v3104_v4  ;;  %540 = vmatpush1.msra.mxu1 %v3164_v15 }
 0x11f   :  { %470 = vmatprep.subr.mxu0 %v3111_v6  ;;  %541 = vmatprep.subr.mxu1 %v3176_v17 }
 0x120   :  { %471 = vmatpush1.msra.mxu0 %v3118_v7  ;;  %542 = vmatpush1.msra.mxu1 %v3188_v19 }
 0x121   :  { %472 = vmatprep.subr.mxu0 %v3124_v8  ;;  %543 = vmatprep.subr.mxu1 %v3193_v20 }
 0x122   :  { %473 = vmatpush1.msra.mxu0 %v3130_v9  ;;  %544 = vmatpush1.msra.mxu1 %v3205_v22 }
 0x123   :  { %474 = vmatprep.subr.mxu0 %v3141_v11  ;;  %545 = vmatprep.subr.mxu1 %v3217_v24 }
 0x124   :  { %475 = vmatpush1.msra.mxu0 %v3153_v13  ;;  %546 = vmatpush1.msra.mxu1 %v3229_v26 }
 0x125   :  { %476 = vmatprep.subr.mxu0 %v3170_v16  ;;  %547 = vmatprep.subr.mxu1 %v3241_v28 }
 0x126   :  { %477 = vmatpush1.msra.mxu0 %v3182_v18  ;;  %548 = vmatpush1.msra.mxu1 %v3253_v30 }
 0x127   :  { %478 = vmatprep.subr.mxu0 %v3199_v21  ;;  %549 = vmatprep.subr.mxu1 %v3265_v32 }
 0x128   :  { %479 = vmatpush1.msra.mxu0 %v3211_v23  ;;  %550 = vmatpush1.msra.mxu1 %v3277_v34 }
 0x129   :  { %480 = vmatprep.subr.mxu0 %v3223_v25  ;;  %551 = vmatprep.subr.mxu1 %v3289_v36 }
 0x12a   :  { %481 = vmatpush1.msra.mxu0 %v3235_v27  ;;  %552 = vmatpush1.msra.mxu1 %v3301_v38 }
 0x12b   :  { %482 = vmatprep.subr.mxu0 %v3247_v29  ;;  %553 = vmatprep.subr.mxu1 %v3313_v40 }
 0x12c   :  { %483 = vmatpush1.msra.mxu0 %v3259_v31  ;;  %554 = vmatpush1.msra.mxu1 %v3325_v42 }
 0x12d   :  { %484 = vmatprep.subr.mxu0 %v3271_v33  ;;  %555 = vmatprep.subr.mxu1 %v3337_v44 }
 0x12e   :  { %485 = vmatpush1.msra.mxu0 %v3283_v35  ;;  %556 = vmatpush1.msra.mxu1 %v3349_v46 }
 0x12f   :  { %486 = vmatprep.subr.mxu0 %v3295_v37  ;;  %557 = vmatprep.subr.mxu1 %v3361_v48 }
 0x130   :  { %487 = vmatpush1.msra.mxu0 %v3307_v39  ;;  %558 = vmatpush1.msra.mxu1 %v3373_v50 }
 0x131   :  { %488 = vmatprep.subr.mxu0 %v3319_v41  ;;  %559 = vmatprep.subr.mxu1 %v3385_v52 }
 0x132   :  { %489 = vmatpush1.msra.mxu0 %v3331_v43  ;;  %560 = vmatpush1.msra.mxu1 %v4844_v47 }
 0x133   :  { %490 = vmatprep.subr.mxu0 %v4845_v49  ;;  %561 = vmatprep.subr.mxu1 %v4846_v57 }
 0x134   :  { %491 = vmatpush1.msra.mxu0 %v4847_v59  ;;  %562 = vmatpush1.msra.mxu1 %v4848_v63  ;;  %v2477_v63 = vld [vmem:[%s4723_s1 + $0x30] sm:$0xff] }
 0x135   :  { %492 = vmatprep.subr.mxu0 %v4849_v3  ;;  %563 = vmatprep.subr.mxu1 %v4850_v45  ;;  %v4861_v45 = vld [vmem:[#allocation21_spill] sm:$0xff] }
 0x136   :  { %493 = vmatpush1.msra.mxu0 %v4851_v58  ;;  %564 = vmatpush1.msra.mxu1 %v4852_v60  ;;  %v4862_v60 = vld [vmem:[#allocation2_spill] sm:$0xff] }
 0x137   :  { %494 = vmatprep.subr.mxu0 %v4853_v5  ;;  %565 = vmatprep.subr.mxu1 %v4854_v0  ;;  %v4863_v5 = vld [vmem:[#allocation3_spill] sm:$0xff]  ;;  %v4864_v0 = vld [vmem:[#allocation8_spill] sm:$0xff] }
 0x138   :  { %495 = vmatpush1.msra.mxu0 %v4855_v10  ;;  %566 = vmatpush1.msra.mxu1 %v4856_v53  ;;  %vm636_vm2 = vcmp.eq.s32.totalorder %v4864_v0, 3  ;;  %v4865_v10 = vmov 0  }
 0x139   :  { %496 = vmatprep.subr.mxu0 %v4857_v54  ;;  %567 = vmatprep.subr.mxu1 %v4858_v56  ;;  %v637_v53 = vsel %vm636_vm2, 1, %v4865_v10  ;;  %v2475_v56 = vld [vmem:[%s4723_s1 + $0x20] sm:$0xff] }
 0x13a   :  { %497 = vmatpush1.msra.mxu0 %v4859_v51  ;;  %530 = vmatprep.mubr.f32.mxu0 %v4860_v62 }
 0x13b   :  { %568 = vmatpush1.msra.mxu1 %v4861_v45  ;;  %601 = vmatprep.mubr.f32.mxu1 %v4860_v62  ;;  %v2476_v45 = vld [vmem:[%s4723_s1 + $0x28] sm:$0xff] }
 0x13c   :  { %648 = vmatprep.subr.mxu0 %v4862_v60  ;;  %719 = vmatprep.subr.mxu1 %v4863_v5 }
 0x13d   :  { %639 = vperm.xlu1 %2756, %v637_v53   ;;  %v2478_v53 = vld [vmem:[%s4723_s1 + $0x38] sm:$0xff] }
 0x1db   :  { %v350_v51 = vpop.f32.mrf.mxu0  ;;  %v421_v5 = vpop.f32.mrf.mxu1 }
 0x1dc   :  { %v426_v54 = vadd.f32 %v2475_v56, %v350_v51  ;;  %v428_v56 = vadd.f32 %v2477_v63, %v421_v5 }
 0x1dd   :  { %v352_v62 = vpop.f32.mrf.mxu0  ;;  %v423_v10 = vpop.f32.mrf.mxu1 }
 0x1de   :  { %v2479_v58 = vmul.f32 -1.442695, %v426_v54  ;;  %v427_v60 = vadd.f32 %v2476_v45, %v352_v62  ;;  %v429_v0 = vadd.f32 %v2478_v53, %v423_v10 }
 0x1e0   :  { %2853 = vpow2.f32 %v2479_v58  ;;  %v2480_v3 = vmul.f32 -1.442695, %v427_v60  ;;  %v2481_v59 = vmul.f32 -1.442695, %v429_v0 }
 0x1e2   :  { %2855 = vpow2.f32 %v2480_v3 }
 0x1e3   :  { %2857 = vpow2.f32 %v2481_v59 }
 0x1ed   :  { %v2854_v57 = vpop.eup %2853 }
 0x1ee   :  { %v433_v51 = vadd.f32 1.0, %v2854_v57  ;;  %v276_v57 = vpop.permute.xlu0 %275 }
 0x1ef   :  { %v2856_v54 = vpop.eup %2855  ;;  %vm277_vm3 = vcmp.eq.s32.totalorder %v276_v57, 1  ;;  %v4877_v57 = vld [vmem:[#allocation11_spill] sm:$0xff] }
 0x1f0   :  { %2859 = vrcp.f32 %v433_v51  ;;  %v439_v45 = vadd.f32 1.0, %v2856_v54  ;;  %v2858_v3 = vpop.eup %2857  ;;  %v4869_v54 = vld [vmem:[#allocation5_spill] sm:$0xff] }
 0x1f1   :  { %2861 = vtanh.f32 %v428_v56  ;;  %v446_v49 = vadd.f32 1.0, %v2858_v3  ;;  %v278_v56 = vsel %vm277_vm3, %v3565_v61, 0.0  ;;  %v4867_v61 = vld [vmem:[#allocation4_spill] sm:$0xff]  ;;  %v4871_v3 = vld [vmem:[#allocation6_spill] sm:$0xff] }
 0x1f2   :  { %2863 = vrcp.f32 %v439_v45  ;;  %v458_v63 = vpop.permute.xlu0 %457  ;;  %v4870_v45 = vld [vmem:[#allocation14_spill] sm:$0xff] }
 0x1f3   :  { %2865 = vrcp.f32 %v446_v49  ;;  %vm459_vm4 = vcmp.eq.s32.totalorder %v458_v63, 1  ;;  %v4868_v49 = vld [vmem:[#allocation12_spill] sm:$0xff]  ;;  %v4878_v63 = vld [vmem:[#allocation19_spill] sm:$0xff] }
 0x1fd   :  { %v2860_v58 = vpop.eup %2859 }
 0x1fe   :  { %v2862_v60 = vpop.eup %2861 }
 0x1ff   :  { %v2864_v62 = vpop.eup %2863  ;;  %v450_v10 = vmul.f32 %v2862_v60, %v2860_v58  ;;  %v4872_v58 = vld [vmem:[#allocation16_spill] sm:$0xff]  ;;  %v4873_v60 = vld [vmem:[#allocation7_spill] sm:$0xff] }
 0x200   :  { %v449_v53 = vmul.f32 %v2864_v62, %v3562_v55  ;;  %v2866_v59 = vpop.eup %2865  ;;  %v4866_v55 = vld [vmem:[#allocation10_spill] sm:$0xff]  ;;  %v4874_v62 = vld [vmem:[#allocation17_spill] sm:$0xff] }
 0x202   :  { %v3650_v47 = vadd.f32 %v450_v10, %v449_v53  ;;  %v4875_v10 = vld [vmem:[#allocation9_spill] sm:$0xff]  ;;  %v4876_v53 = vld [vmem:[#allocation18_spill] sm:$0xff] }
 0x204   :  { %2867 = vtanh.f32 %v3650_v47 }
 0x211   :  { %v2868_v5 = vpop.eup %2867 }
 0x212   :  { %v453_v0 = vmul.f32 %v2868_v5, %v2866_v59  ;;  %v4879_v59 = vld [vmem:[#allocation13_spill] sm:$0xff]  ;;  %v4880_v5 = vld [vmem:[#allocation20_spill] sm:$0xff] }
 0x214   :  { %v3654_v51 = vsel %vm459_vm4, %v453_v0, %v278_v56  ;;  %531 = vmatmul.mubr.f32.vlgmr.msra.gmra.mxu0 %v453_v0  ;;  %602 = vmatmul.mubr.f32.vlgmr.msra.gmra.mxu1 %v453_v0  ;;  %v4881_v0 = vld [vmem:[#allocation15_spill] sm:$0xff]  ;;  %v4882_v56 = vmov 0.0  }
 0x215   :  { %649 = vmatpush1.msra.mxu0 %v3091_v1  ;;  %720 = vmatpush1.msra.mxu1 %v3147_v12 }
 0x216   :  { %650 = vmatprep.subr.mxu0 %v3096_v2  ;;  %721 = vmatprep.subr.mxu1 %v3159_v14 }
 0x217   :  { %651 = vmatpush1.msra.mxu0 %v3104_v4  ;;  %722 = vmatpush1.msra.mxu1 %v3164_v15 }
 0x218   :  { %652 = vmatprep.subr.mxu0 %v3111_v6  ;;  %723 = vmatprep.subr.mxu1 %v3176_v17 }
 0x219   :  { %653 = vmatpush1.msra.mxu0 %v3118_v7  ;;  %724 = vmatpush1.msra.mxu1 %v3188_v19 }
 0x21a   :  { %654 = vmatprep.subr.mxu0 %v3124_v8  ;;  %725 = vmatprep.subr.mxu1 %v3193_v20 }
 0x21b   :  { %655 = vmatpush1.msra.mxu0 %v3130_v9  ;;  %726 = vmatpush1.msra.mxu1 %v3205_v22 }
 0x21c   :  { %656 = vmatprep.subr.mxu0 %v3141_v11  ;;  %727 = vmatprep.subr.mxu1 %v3217_v24 }
 0x21d   :  { %657 = vmatpush1.msra.mxu0 %v3153_v13  ;;  %728 = vmatpush1.msra.mxu1 %v3229_v26 }
 0x21e   :  { %658 = vmatprep.subr.mxu0 %v3170_v16  ;;  %729 = vmatprep.subr.mxu1 %v3241_v28 }
 0x21f   :  { %659 = vmatpush1.msra.mxu0 %v3182_v18  ;;  %730 = vmatpush1.msra.mxu1 %v3253_v30 }
 0x220   :  { %660 = vmatprep.subr.mxu0 %v3199_v21  ;;  %731 = vmatprep.subr.mxu1 %v3265_v32 }
 0x221   :  { %661 = vmatpush1.msra.mxu0 %v3211_v23  ;;  %732 = vmatpush1.msra.mxu1 %v3277_v34 }
 0x222   :  { %662 = vmatprep.subr.mxu0 %v3223_v25  ;;  %733 = vmatprep.subr.mxu1 %v3289_v36 }
 0x223   :  { %663 = vmatpush1.msra.mxu0 %v3235_v27  ;;  %734 = vmatpush1.msra.mxu1 %v3301_v38 }
 0x224   :  { %664 = vmatprep.subr.mxu0 %v3247_v29  ;;  %735 = vmatprep.subr.mxu1 %v3313_v40 }
 0x225   :  { %665 = vmatpush1.msra.mxu0 %v3259_v31  ;;  %736 = vmatpush1.msra.mxu1 %v3325_v42 }
 0x226   :  { %666 = vmatprep.subr.mxu0 %v3271_v33  ;;  %737 = vmatprep.subr.mxu1 %v3337_v44 }
 0x227   :  { %667 = vmatpush1.msra.mxu0 %v3283_v35  ;;  %738 = vmatpush1.msra.mxu1 %v3349_v46 }
 0x228   :  { %668 = vmatprep.subr.mxu0 %v3295_v37  ;;  %739 = vmatprep.subr.mxu1 %v3361_v48 }
 0x229   :  { %669 = vmatpush1.msra.mxu0 %v3307_v39  ;;  %740 = vmatpush1.msra.mxu1 %v3373_v50 }
 0x22a   :  { %670 = vmatprep.subr.mxu0 %v3319_v41  ;;  %741 = vmatprep.subr.mxu1 %v3385_v52 }
 0x22b   :  { %671 = vmatpush1.msra.mxu0 %v3331_v43  ;;  %742 = vmatpush1.msra.mxu1 %v4866_v55 }
 0x22c   :  { %672 = vmatprep.subr.mxu0 %v4867_v61  ;;  %743 = vmatprep.subr.mxu1 %v4868_v49 }
 0x22d   :  { %673 = vmatpush1.msra.mxu0 %v4869_v54  ;;  %744 = vmatpush1.msra.mxu1 %v4870_v45  ;;  %v2484_v45 = vld [vmem:[%s4723_s1 + $0x50] sm:$0xff] }
 0x22e   :  { %674 = vmatprep.subr.mxu0 %v4871_v3  ;;  %745 = vmatprep.subr.mxu1 %v4872_v58  ;;  %v4883_v58 = vld [vmem:[#allocation21_spill] sm:$0xff] }
 0x22f   :  { %675 = vmatpush1.msra.mxu0 %v4873_v60  ;;  %746 = vmatpush1.msra.mxu1 %v4874_v62  ;;  %v4884_v62 = vld [vmem:[#allocation2_spill] sm:$0xff] }
 0x230   :  { %676 = vmatprep.subr.mxu0 %v4875_v10  ;;  %747 = vmatprep.subr.mxu1 %v4876_v53  ;;  %v4885_v10 = vld [vmem:[#allocation3_spill] sm:$0xff]  ;;  %v4886_v53 = vld [vmem:[#allocation8_spill] sm:$0xff] }
 0x231   :  { %677 = vmatpush1.msra.mxu0 %v4877_v57  ;;  %748 = vmatpush1.msra.mxu1 %v4878_v63  ;;  %vm818_vm5 = vcmp.eq.s32.totalorder %v4886_v53, 4  ;;  %v4887_v57 = vmov 0  }
 0x232   :  { %678 = vmatprep.subr.mxu0 %v4879_v59  ;;  %749 = vmatprep.subr.mxu1 %v4880_v5  ;;  %v819_v63 = vsel %vm818_vm5, 1, %v4887_v57  ;;  %v2482_v5 = vld [vmem:[%s4723_s1 + $0x40] sm:$0xff] }
 0x233   :  { %679 = vmatpush1.msra.mxu0 %v4881_v0  ;;  %712 = vmatprep.mubr.f32.mxu0 %v4882_v56 }
 0x234   :  { %750 = vmatpush1.msra.mxu1 %v4883_v58  ;;  %783 = vmatprep.mubr.f32.mxu1 %v4882_v56  ;;  %v2483_v58 = vld [vmem:[%s4723_s1 + $0x48] sm:$0xff] }
 0x235   :  { %830 = vmatprep.subr.mxu0 %v4884_v62  ;;  %901 = vmatprep.subr.mxu1 %v4885_v10 }
 0x236   :  { %821 = vperm.xlu1 %2756, %v819_v63   ;;  %v2485_v63 = vld [vmem:[%s4723_s1 + $0x58] sm:$0xff] }
 0x2d4   :  { %v532_v0 = vpop.f32.mrf.mxu0  ;;  %v603_v10 = vpop.f32.mrf.mxu1 }
 0x2d5   :  { %v608_v59 = vadd.f32 %v2482_v5, %v532_v0  ;;  %v610_v5 = vadd.f32 %v2484_v45, %v603_v10 }
 0x2d6   :  { %v534_v56 = vpop.f32.mrf.mxu0  ;;  %v605_v57 = vpop.f32.mrf.mxu1 }
 0x2d7   :  { %v2486_v60 = vmul.f32 -1.442695, %v608_v59  ;;  %v609_v62 = vadd.f32 %v2483_v58, %v534_v56  ;;  %v611_v53 = vadd.f32 %v2485_v63, %v605_v57 }
 0x2d9   :  { %2869 = vpow2.f32 %v2486_v60  ;;  %v2487_v3 = vmul.f32 -1.442695, %v609_v62  ;;  %v2488_v54 = vmul.f32 -1.442695, %v611_v53 }
 0x2db   :  { %2871 = vpow2.f32 %v2487_v3 }
 0x2dc   :  { %2873 = vpow2.f32 %v2488_v54 }
 0x2e6   :  { %v2870_v49 = vpop.eup %2869 }
 0x2e7   :  { %v615_v0 = vadd.f32 1.0, %v2870_v49  ;;  %v640_v49 = vpop.permute.xlu1 %639 }
 0x2e8   :  { %v2872_v59 = vpop.eup %2871  ;;  %vm641_vm6 = vcmp.eq.s32.totalorder %v640_v49, 1  ;;  %v3867_v49 = vld [vmem:[%s4721_s2 + $0x1c0] sm:$0xff] }
 0x2e9   :  { %2875 = vrcp.f32 %v615_v0  ;;  %v621_v58 = vadd.f32 1.0, %v2872_v59  ;;  %v2874_v3 = vpop.eup %2873 }
 0x2ea   :  { %2877 = vtanh.f32 %v610_v5  ;;  %v628_v61 = vadd.f32 1.0, %v2874_v3 }
 0x2eb   :  { %2879 = vrcp.f32 %v621_v58  ;;  %v822_v59 = vpop.permute.xlu1 %821 }
 0x2ec   :  { %2881 = vrcp.f32 %v628_v61  ;;  %vm823_vm8 = vcmp.eq.s32.totalorder %v822_v59, 1  ;;  %v4167_v59 = vld [vmem:[%s4721_s2 + $0x28] sm:$0xff] }
 0x2f6   :  { %v2876_v60 = vpop.eup %2875 }
 0x2f7   :  { %v2878_v56 = vpop.eup %2877 }
 0x2f8   :  { %v2880_v62 = vpop.eup %2879  ;;  %v632_v57 = vmul.f32 %v2878_v56, %v2876_v60 }
 0x2f9   :  { %v631_v63 = vmul.f32 %v2880_v62, %v3650_v47  ;;  %v2882_v45 = vpop.eup %2881  ;;  %v3843_v62 = vld [vmem:[%s4721_s2 + $0x1e0] sm:$0xff] }
 0x2fb   :  { %v3737_v55 = vadd.f32 %v632_v57, %v631_v63  ;;  %v3855_v57 = vld [vmem:[%s4721_s2 + $0x1c8] sm:$0xff]  ;;  %v3861_v63 = vld [vmem:[%s4721_s2 + $0x1d8] sm:$0xff] }
 0x2fd   :  { %2883 = vtanh.f32 %v3737_v55 }
 0x30a   :  { %v2884_v54 = vpop.eup %2883 }
 0x30b   :  { %v635_v53 = vmul.f32 %v2884_v54, %v2882_v45  ;;  %v3873_v45 = vld [vmem:[%s4721_s2 + $0x1d0] sm:$0xff]  ;;  %v3879_v54 = vld [vmem:[%s4721_s2 + $0x1a8] sm:$0xff] }
 0x30d   :  { %v3741_v10 = vsel %vm641_vm6, %v635_v53, %v3654_v51  ;;  %713 = vmatmul.mubr.f32.vlgmr.msra.gmra.mxu0 %v635_v53  ;;  %784 = vmatmul.mubr.f32.vlgmr.msra.gmra.mxu1 %v635_v53  ;;  %v3885_v53 = vld [vmem:[%s4721_s2 + $0x1b8] sm:$0xff] }
 0x30e   :  { %831 = vmatpush1.msra.mxu0 %v3091_v1  ;;  %902 = vmatpush1.msra.mxu1 %v3147_v12  ;;  %v4888_v1 = vld [vmem:[#allocation10_spill] sm:$0xff]  ;;  %v4896_v12 = vld [vmem:[#allocation17_spill] sm:$0xff] }
 0x30f   :  { %832 = vmatprep.subr.mxu0 %v3096_v2  ;;  %903 = vmatprep.subr.mxu1 %v3159_v14  ;;  %v4889_v2 = vld [vmem:[#allocation4_spill] sm:$0xff]  ;;  %v4898_v14 = vld [vmem:[#allocation18_spill] sm:$0xff] }
 0x310   :  { %833 = vmatpush1.msra.mxu0 %v3104_v4  ;;  %904 = vmatpush1.msra.mxu1 %v3164_v15  ;;  %v4890_v4 = vld [vmem:[#allocation12_spill] sm:$0xff]  ;;  %v4899_v15 = vld [vmem:[#allocation11_spill] sm:$0xff] }
 0x311   :  { %834 = vmatprep.subr.mxu0 %v3111_v6  ;;  %905 = vmatprep.subr.mxu1 %v3176_v17  ;;  %v4891_v6 = vld [vmem:[#allocation5_spill] sm:$0xff] }
 0x312   :  { %835 = vmatpush1.msra.mxu0 %v3118_v7  ;;  %906 = vmatpush1.msra.mxu1 %v3188_v19  ;;  %v4892_v7 = vld [vmem:[#allocation14_spill] sm:$0xff]  ;;  %v4901_v17 = vld [vmem:[#allocation13_spill] sm:$0xff]  ;;  %v4903_v19 = vld [vmem:[#allocation15_spill] sm:$0xff] }
 0x313   :  { %836 = vmatprep.subr.mxu0 %v3124_v8  ;;  %907 = vmatprep.subr.mxu1 %v3193_v20  ;;  %v4893_v8 = vld [vmem:[#allocation6_spill] sm:$0xff]  ;;  %v4904_v20 = vmov 0.0  }
 0x314   :  { %837 = vmatpush1.msra.mxu0 %v3130_v9  ;;  %908 = vmatpush1.msra.mxu1 %v3205_v22  ;;  %v4894_v9 = vld [vmem:[#allocation16_spill] sm:$0xff]  ;;  %v3810_v22 = vld [vmem:[%s4721_s2 + $0x1e8] sm:$0xff] }
 0x315   :  { %838 = vmatprep.subr.mxu0 %v3141_v11  ;;  %909 = vmatprep.subr.mxu1 %v3217_v24  ;;  %v4895_v11 = vld [vmem:[#allocation7_spill] sm:$0xff]  ;;  %4906 = vst [vmem:[#allocation2_spill] sm:$0xff] %v3810_v22  ;;  %v4908_v24 = vld [vmem:[#allocation8_spill] sm:$0xff] }
 0x316   :  { %839 = vmatpush1.msra.mxu0 %v3153_v13  ;;  %910 = vmatpush1.msra.mxu1 %v3229_v26  ;;  %v4897_v13 = vld [vmem:[#allocation9_spill] sm:$0xff]  ;;  %vm1000_vm7 = vcmp.eq.s32.totalorder %v4908_v24, 5  ;;  %v3999_v24 = vld [vmem:[%s4721_s2 + $0x108] sm:$0xff] }
 0x317   :  { %840 = vmatprep.subr.mxu0 %v3170_v16  ;;  %911 = vmatprep.subr.mxu1 %v3241_v28  ;;  %v4900_v16 = vld [vmem:[#allocation19_spill] sm:$0xff]  ;;  %4919 = vst [vmem:[#allocation9_spill] sm:$0xff] %v4167_v59 }
 0x318   :  { %841 = vmatpush1.msra.mxu0 %v3182_v18  ;;  %912 = vmatpush1.msra.mxu1 %v3253_v30  ;;  %v4902_v18 = vld [vmem:[#allocation20_spill] sm:$0xff] }
 0x319   :  { %842 = vmatprep.subr.mxu0 %v3199_v21  ;;  %913 = vmatprep.subr.mxu1 %v3265_v32  ;;  %v4905_v21 = vld [vmem:[#allocation21_spill] sm:$0xff] }
 0x31a   :  { %843 = vmatpush1.msra.mxu0 %v3211_v23  ;;  %914 = vmatpush1.msra.mxu1 %v3277_v34  ;;  %v3816_v23 = vld [vmem:[%s4721_s2 + $0x1f8] sm:$0xff] }
 0x31b   :  { %844 = vmatprep.subr.mxu0 %v3223_v25  ;;  %915 = vmatprep.subr.mxu1 %v3289_v36  ;;  %4907 = vst [vmem:[#allocation3_spill] sm:$0xff] %v3816_v23  ;;  %v4909_v25 = vmov 0   ;;  %v2492_v36 = vld [vmem:[%s4723_s1 + $0x78] sm:$0xff] }
 0x31c   :  { %845 = vmatpush1.msra.mxu0 %v3235_v27  ;;  %916 = vmatpush1.msra.mxu1 %v3301_v38  ;;  %v1001_v26 = vsel %vm1000_vm7, 1, %v4909_v25  ;;  %v2489_v27 = vld [vmem:[%s4723_s1 + $0x60] sm:$0xff] }
 0x31d   :  { %846 = vmatprep.subr.mxu0 %v3247_v29  ;;  %917 = vmatprep.subr.mxu1 %v3313_v40  ;;  %v2490_v29 = vld [vmem:[%s4723_s1 + $0x68] sm:$0xff] }
 0x31e   :  { %847 = vmatpush1.msra.mxu0 %v3259_v31  ;;  %918 = vmatpush1.msra.mxu1 %v3325_v42 }
 0x31f   :  { %848 = vmatprep.subr.mxu0 %v3271_v33  ;;  %919 = vmatprep.subr.mxu1 %v3337_v44 }
 0x320   :  { %849 = vmatpush1.msra.mxu0 %v3283_v35  ;;  %920 = vmatpush1.msra.mxu1 %v3349_v46 }
 0x321   :  { %850 = vmatprep.subr.mxu0 %v3295_v37  ;;  %921 = vmatprep.subr.mxu1 %v3361_v48 }
 0x322   :  { %851 = vmatpush1.msra.mxu0 %v3307_v39  ;;  %922 = vmatpush1.msra.mxu1 %v3373_v50  ;;  %v2491_v39 = vld [vmem:[%s4723_s1 + $0x70] sm:$0xff] }
 0x323   :  { %852 = vmatprep.subr.mxu0 %v3319_v41  ;;  %923 = vmatprep.subr.mxu1 %v3385_v52 }
 0x324   :  { %853 = vmatpush1.msra.mxu0 %v3331_v43  ;;  %924 = vmatpush1.msra.mxu1 %v4888_v1  ;;  %v3897_v1 = vld [vmem:[%s4721_s2 + $0x1b0] sm:$0xff] }
 0x325   :  { %854 = vmatprep.subr.mxu0 %v4889_v2  ;;  %925 = vmatprep.subr.mxu1 %v4890_v4  ;;  %v3903_v2 = vld [vmem:[%s4721_s2 + $0x188] sm:$0xff]  ;;  %v3909_v4 = vld [vmem:[%s4721_s2 + $0x198] sm:$0xff] }
 0x326   :  { %855 = vmatpush1.msra.mxu0 %v4891_v6  ;;  %926 = vmatpush1.msra.mxu1 %v4892_v7  ;;  %v3915_v6 = vld [vmem:[%s4721_s2 + $0x180] sm:$0xff]  ;;  %v3921_v7 = vld [vmem:[%s4721_s2 + $0x190] sm:$0xff] }
 0x327   :  { %856 = vmatprep.subr.mxu0 %v4893_v8  ;;  %927 = vmatprep.subr.mxu1 %v4894_v9  ;;  %v3927_v8 = vld [vmem:[%s4721_s2 + $0x168] sm:$0xff]  ;;  %v3933_v9 = vld [vmem:[%s4721_s2 + $0x178] sm:$0xff] }
 0x328   :  { %857 = vmatpush1.msra.mxu0 %v4895_v11  ;;  %928 = vmatpush1.msra.mxu1 %v4896_v12  ;;  %v3939_v11 = vld [vmem:[%s4721_s2 + $0x160] sm:$0xff]  ;;  %v3945_v12 = vld [vmem:[%s4721_s2 + $0x170] sm:$0xff] }
 0x329   :  { %858 = vmatprep.subr.mxu0 %v4897_v13  ;;  %929 = vmatprep.subr.mxu1 %v4898_v14  ;;  %v3951_v13 = vld [vmem:[%s4721_s2 + $0x148] sm:$0xff]  ;;  %v3957_v14 = vld [vmem:[%s4721_s2 + $0x158] sm:$0xff] }
 0x32a   :  { %859 = vmatpush1.msra.mxu0 %v4899_v15  ;;  %930 = vmatpush1.msra.mxu1 %v4900_v16  ;;  %v3963_v15 = vld [vmem:[%s4721_s2 + $0x140] sm:$0xff]  ;;  %v3969_v16 = vld [vmem:[%s4721_s2 + $0x150] sm:$0xff] }
 0x32b   :  { %860 = vmatprep.subr.mxu0 %v4901_v17  ;;  %931 = vmatprep.subr.mxu1 %v4902_v18  ;;  %v3975_v17 = vld [vmem:[%s4721_s2 + $0x128] sm:$0xff]  ;;  %v3981_v18 = vld [vmem:[%s4721_s2 + $0x138] sm:$0xff] }
 0x32c   :  { %861 = vmatpush1.msra.mxu0 %v4903_v19  ;;  %894 = vmatprep.mubr.f32.mxu0 %v4904_v20  ;;  %v3987_v19 = vld [vmem:[%s4721_s2 + $0x120] sm:$0xff] }
 0x32d   :  { %932 = vmatpush1.msra.mxu1 %v4905_v21  ;;  %965 = vmatprep.mubr.f32.mxu1 %v4904_v20  ;;  %v3993_v21 = vld [vmem:[%s4721_s2 + $0x130] sm:$0xff] }
 0x32e   :  { %1012 = vmatprep.subr.mxu0 %v3810_v22  ;;  %1083 = vmatprep.subr.mxu1 %v3816_v23 }
 0x32f   :  { %1003 = vperm.xlu0 %2755, %v1001_v26   ;;  %v4005_v26 = vld [vmem:[%s4721_s2 + $0x118] sm:$0xff] }
 0x3cd   :  { %v714_v28 = vpop.f32.mrf.mxu0  ;;  %v785_v34 = vpop.f32.mrf.mxu1 }
 0x3ce   :  { %v790_v30 = vadd.f32 %v2489_v27, %v714_v28  ;;  %v792_v42 = vadd.f32 %v2491_v39, %v785_v34  ;;  %v4011_v27 = vld [vmem:[%s4721_s2 + $0x100] sm:$0xff]  ;;  %v4017_v28 = vld [vmem:[%s4721_s2 + $0x110] sm:$0xff]  ;;  %v4053_v34 = vld [vmem:[%s4721_s2 + $0xd8] sm:$0xff] }
 0x3cf   :  { %v716_v31 = vpop.f32.mrf.mxu0  ;;  %v787_v37 = vpop.f32.mrf.mxu1  ;;  %v4083_v39 = vld [vmem:[%s4721_s2 + $0xa0] sm:$0xff] }
 0x3d0   :  { %v2493_v32 = vmul.f32 -1.442695, %v790_v30  ;;  %v791_v33 = vadd.f32 %v2490_v29, %v716_v31  ;;  %v793_v38 = vadd.f32 %v2492_v36, %v787_v37  ;;  %v4023_v29 = vld [vmem:[%s4721_s2 + $0xe8] sm:$0xff]  ;;  %v4029_v30 = vld [vmem:[%s4721_s2 + $0xf8] sm:$0xff]  ;;  %v4035_v31 = vld [vmem:[%s4721_s2 + $0xe0] sm:$0xff] }
 0x3d1   :  { %v4065_v36 = vld [vmem:[%s4721_s2 + $0xd0] sm:$0xff]  ;;  %v4071_v37 = vld [vmem:[%s4721_s2 + $0xa8] sm:$0xff] }
 0x3d2   :  { %2885 = vpow2.f32 %v2493_v32  ;;  %v2494_v35 = vmul.f32 -1.442695, %v791_v33  ;;  %v2495_v40 = vmul.f32 -1.442695, %v793_v38  ;;  %v4041_v32 = vld [vmem:[%s4721_s2 + $0xf0] sm:$0xff]  ;;  %v4047_v33 = vld [vmem:[%s4721_s2 + $0xc8] sm:$0xff] }
 0x3d3   :  { %v4077_v38 = vld [vmem:[%s4721_s2 + $0xb8] sm:$0xff] }
 0x3d4   :  { %2887 = vpow2.f32 %v2494_v35  ;;  %v4059_v35 = vld [vmem:[%s4721_s2 + $0xc0] sm:$0xff] }
 0x3d5   :  { %2889 = vpow2.f32 %v2495_v40  ;;  %v4089_v40 = vld [vmem:[%s4721_s2 + $0xb0] sm:$0xff] }
 0x3df   :  { %v2886_v41 = vpop.eup %2885 }
 0x3e0   :  { %v797_v43 = vadd.f32 1.0, %v2886_v41  ;;  %v4095_v41 = vld [vmem:[%s4721_s2 + $0x88] sm:$0xff] }
 0x3e1   :  { %v2888_v44 = vpop.eup %2887 }
 0x3e2   :  { %2891 = vrcp.f32 %v797_v43  ;;  %v803_v46 = vadd.f32 1.0, %v2888_v44  ;;  %v2890_v48 = vpop.eup %2889  ;;  %v4107_v43 = vld [vmem:[%s4721_s2 + $0x80] sm:$0xff]  ;;  %v4113_v44 = vld [vmem:[%s4721_s2 + $0x90] sm:$0xff] }
 0x3e3   :  { %2893 = vtanh.f32 %v792_v42  ;;  %v810_v51 = vadd.f32 1.0, %v2890_v48  ;;  %v4101_v42 = vld [vmem:[%s4721_s2 + $0x98] sm:$0xff]  ;;  %4910 = vst [vmem:[#allocation10_spill] sm:$0xff] %v4113_v44 }
 0x3e4   :  { %2895 = vrcp.f32 %v803_v46  ;;  %v4119_v46 = vld [vmem:[%s4721_s2 + $0x68] sm:$0xff]  ;;  %v4125_v48 = vld [vmem:[%s4721_s2 + $0x78] sm:$0xff] }
 0x3e5   :  { %2897 = vrcp.f32 %v810_v51  ;;  %4911 = vst [vmem:[#allocation4_spill] sm:$0xff] %v4119_v46  ;;  %4912 = vst [vmem:[#allocation12_spill] sm:$0xff] %v4125_v48  ;;  %v4149_v51 = vld [vmem:[%s4721_s2 + $0x58] sm:$0xff] }
 0x3e6   :  { %4916 = vst [vmem:[#allocation16_spill] sm:$0xff] %v4149_v51 }
 0x3ef   :  { %v2892_v50 = vpop.eup %2891 }
 0x3f0   :  { %v2894_v52 = vpop.eup %2893 }
 0x3f1   :  { %v2896_v47 = vpop.eup %2895  ;;  %v814_v61 = vmul.f32 %v2894_v52, %v2892_v50  ;;  %v4131_v50 = vld [vmem:[%s4721_s2 + $0x60] sm:$0xff]  ;;  %v4137_v52 = vld [vmem:[%s4721_s2 + $0x70] sm:$0xff] }
 0x3f2   :  { %v813_v5 = vmul.f32 %v2896_v47, %v3737_v55  ;;  %v2898_v58 = vpop.eup %2897  ;;  %v3849_v55 = vld [vmem:[%s4721_s2 + $0x1f0] sm:$0xff]  ;;  %4913 = vst [vmem:[#allocation5_spill] sm:$0xff] %v4131_v50  ;;  %4914 = vst [vmem:[#allocation14_spill] sm:$0xff] %v4137_v52  ;;  %v4143_v47 = vld [vmem:[%s4721_s2 + $0x48] sm:$0xff] }
 0x3f3   :  { %4915 = vst [vmem:[#allocation6_spill] sm:$0xff] %v4143_v47 }
 0x3f4   :  { %v3834_v0 = vadd.f32 %v814_v61, %v813_v5  ;;  %v4155_v61 = vld [vmem:[%s4721_s2 + $0x40] sm:$0xff]  ;;  %v4161_v5 = vld [vmem:[%s4721_s2 + $0x50] sm:$0xff] }
 0x3f5   :  { %4917 = vst [vmem:[#allocation7_spill] sm:$0xff] %v4155_v61  ;;  %4918 = vst [vmem:[#allocation17_spill] sm:$0xff] %v4161_v5 }
 0x3f6   :  { %2899 = vtanh.f32 %v3834_v0 }
 0x403   :  { %v2900_v3 = vpop.eup %2899 }
 0x404   :  { %v817_v60 = vmul.f32 %v2900_v3, %v2898_v58  ;;  %v4173_v58 = vld [vmem:[%s4721_s2 + $0x38] sm:$0xff]  ;;  %v4179_v3 = vld [vmem:[%s4721_s2 + $0x20] sm:$0xff] }
 0x405   :  { %4920 = vst [vmem:[#allocation18_spill] sm:$0xff] %v4173_v58  ;;  %4921 = vst [vmem:[#allocation11_spill] sm:$0xff] %v4179_v3 }
 0x406   :  { %v3838_v56 = vsel %vm823_vm8, %v817_v60, %v3741_v10  ;;  %895 = vmatmul.mubr.f32.vlgmr.msra.gmra.mxu0 %v817_v60  ;;  %966 = vmatmul.mubr.f32.vlgmr.msra.gmra.mxu1 %v817_v60  ;;  %v3891_v10 = vld [vmem:[%s4721_s2 + $0x1a0] sm:$0xff]  ;;  %v4185_v60 = vld [vmem:[%s4721_s2 + $0x30] sm:$0xff] }
 0x407   :  { %1013 = vmatpush1.msra.mxu0 %v3843_v62  ;;  %1084 = vmatpush1.msra.mxu1 %v3849_v55  ;;  %4922 = vst [vmem:[#allocation19_spill] sm:$0xff] %v4185_v60 }
 0x408   :  { %1014 = vmatprep.subr.mxu0 %v3855_v57  ;;  %1085 = vmatprep.subr.mxu1 %v3861_v63 }
 0x409   :  { %1015 = vmatpush1.msra.mxu0 %v3867_v49  ;;  %1086 = vmatpush1.msra.mxu1 %v3873_v45 }
 0x40a   :  { %1016 = vmatprep.subr.mxu0 %v3879_v54  ;;  %1087 = vmatprep.subr.mxu1 %v3885_v53 }
 0x40b   :  { %1017 = vmatpush1.msra.mxu0 %v3891_v10  ;;  %1088 = vmatpush1.msra.mxu1 %v3897_v1 }
 0x40c   :  { %1018 = vmatprep.subr.mxu0 %v3903_v2  ;;  %1089 = vmatprep.subr.mxu1 %v3909_v4 }
 0x40d   :  { %1019 = vmatpush1.msra.mxu0 %v3915_v6  ;;  %1090 = vmatpush1.msra.mxu1 %v3921_v7 }
 0x40e   :  { %1020 = vmatprep.subr.mxu0 %v3927_v8  ;;  %1091 = vmatprep.subr.mxu1 %v3933_v9 }
 0x40f   :  { %1021 = vmatpush1.msra.mxu0 %v3939_v11  ;;  %1092 = vmatpush1.msra.mxu1 %v3945_v12 }
 0x410   :  { %1022 = vmatprep.subr.mxu0 %v3951_v13  ;;  %1093 = vmatprep.subr.mxu1 %v3957_v14 }
 0x411   :  { %1023 = vmatpush1.msra.mxu0 %v3963_v15  ;;  %1094 = vmatpush1.msra.mxu1 %v3969_v16 }
 0x412   :  { %1024 = vmatprep.subr.mxu0 %v3975_v17  ;;  %1095 = vmatprep.subr.mxu1 %v3981_v18 }
 0x413   :  { %1025 = vmatpush1.msra.mxu0 %v3987_v19  ;;  %1096 = vmatpush1.msra.mxu1 %v3993_v21 }
 0x414   :  { %1026 = vmatprep.subr.mxu0 %v3999_v24  ;;  %1097 = vmatprep.subr.mxu1 %v4005_v26 }
 0x415   :  { %1027 = vmatpush1.msra.mxu0 %v4011_v27  ;;  %1098 = vmatpush1.msra.mxu1 %v4017_v28 }
 0x416   :  { %1028 = vmatprep.subr.mxu0 %v4023_v29  ;;  %1099 = vmatprep.subr.mxu1 %v4029_v30 }
 0x417   :  { %1029 = vmatpush1.msra.mxu0 %v4035_v31  ;;  %1100 = vmatpush1.msra.mxu1 %v4041_v32 }
 0x418   :  { %1030 = vmatprep.subr.mxu0 %v4047_v33  ;;  %1101 = vmatprep.subr.mxu1 %v4053_v34 }
 0x419   :  { %1031 = vmatpush1.msra.mxu0 %v4059_v35  ;;  %1102 = vmatpush1.msra.mxu1 %v4065_v36 }
 0x41a   :  { %1032 = vmatprep.subr.mxu0 %v4071_v37  ;;  %1103 = vmatprep.subr.mxu1 %v4077_v38 }
 0x41b   :  { %1033 = vmatpush1.msra.mxu0 %v4083_v39  ;;  %1104 = vmatpush1.msra.mxu1 %v4089_v40 }
 0x41c   :  { %1034 = vmatprep.subr.mxu0 %v4095_v41  ;;  %1105 = vmatprep.subr.mxu1 %v4101_v42 }
 0x41d   :  { %1035 = vmatpush1.msra.mxu0 %v4107_v43  ;;  %1106 = vmatpush1.msra.mxu1 %v4113_v44 }
 0x41e   :  { %1036 = vmatprep.subr.mxu0 %v4119_v46  ;;  %1107 = vmatprep.subr.mxu1 %v4125_v48 }
 0x41f   :  { %1037 = vmatpush1.msra.mxu0 %v4131_v50  ;;  %1108 = vmatpush1.msra.mxu1 %v4137_v52  ;;  %v2498_v52 = vld [vmem:[%s4723_s1 + $0x90] sm:$0xff] }
 0x420   :  { %1038 = vmatprep.subr.mxu0 %v4143_v47  ;;  %1109 = vmatprep.subr.mxu1 %v4149_v51 }
 0x421   :  { %1039 = vmatpush1.msra.mxu0 %v4155_v61  ;;  %1110 = vmatpush1.msra.mxu1 %v4161_v5 }
 0x422   :  { %1040 = vmatprep.subr.mxu0 %v4167_v59  ;;  %1111 = vmatprep.subr.mxu1 %v4173_v58  ;;  %v4191_v59 = vld [vmem:[%s4721_s2 + $0x8] sm:$0xff]  ;;  %v4197_v58 = vld [vmem:[%s4721_s2 + $0x18] sm:$0xff] }
 0x423   :  { %1041 = vmatpush1.msra.mxu0 %v4179_v3  ;;  %1112 = vmatpush1.msra.mxu1 %v4185_v60  ;;  %4923 = vst [vmem:[#allocation13_spill] sm:$0xff] %v4191_v59  ;;  %4924 = vst [vmem:[#allocation20_spill] sm:$0xff] %v4197_v58  ;;  %v4203_v3 = vld [vmem:[%s4721_s2] sm:$0xff] }
 0x424   :  { %1042 = vmatprep.subr.mxu0 %v4191_v59  ;;  %1113 = vmatprep.subr.mxu1 %v4197_v58  ;;  %4925 = vst [vmem:[#allocation15_spill] sm:$0xff] %v4203_v3  ;;  %v4210_v59 = vld [vmem:[%s4721_s2 + $0x10] sm:$0xff]  ;;  %v4219_v58 = vld [vmem:[%s4722_s0] sm:$0xff] }
 0x425   :  { %1043 = vmatpush1.msra.mxu0 %v4203_v3  ;;  %1076 = vmatprep.mubr.f32.mxu0 %v4904_v20  ;;  %4926 = vst [vmem:[#allocation21_spill] sm:$0xff] %v4210_v59  ;;  %4927 = vst [vmem:[#allocation8_spill] sm:$0xff] %v4219_v58  ;;  %vm1182_vm9 = vcmp.eq.s32.totalorder %v4219_v58, 6 }
 0x426   :  { %1114 = vmatpush1.msra.mxu1 %v4210_v59  ;;  %1147 = vmatprep.mubr.f32.mxu1 %v4904_v20  ;;  %v1183_v3 = vsel %vm1182_vm9, 1, %v4909_v25  ;;  %v2496_v59 = vld [vmem:[%s4723_s1 + $0x80] sm:$0xff] }
 0x427   :  { %1194 = vmatprep.subr.mxu0 %v3810_v22  ;;  %1265 = vmatprep.subr.mxu1 %v3816_v23  ;;  %v2497_v22 = vld [vmem:[%s4723_s1 + $0x88] sm:$0xff] }
 0x428   :  { %1185 = vperm.xlu1 %2756, %v1183_v3   ;;  %v2499_v3 = vld [vmem:[%s4723_s1 + $0x98] sm:$0xff] }
 0x4c6   :  { %v896_v60 = vpop.f32.mrf.mxu0  ;;  %v967_v51 = vpop.f32.mrf.mxu1 }
 0x4c7   :  { %v972_v23 = vadd.f32 %v2496_v59, %v896_v60  ;;  %v974_v59 = vadd.f32 %v2498_v52, %v967_v51 }
 0x4c8   :  { %v898_v20 = vpop.f32.mrf.mxu0  ;;  %v969_v25 = vpop.f32.mrf.mxu1 }
 0x4c9   :  { %v2500_v5 = vmul.f32 -1.442695, %v972_v23  ;;  %v973_v61 = vadd.f32 %v2497_v22, %v898_v20  ;;  %v975_v58 = vadd.f32 %v2499_v3, %v969_v25 }
 0x4cb   :  { %2901 = vpow2.f32 %v2500_v5  ;;  %v2501_v47 = vmul.f32 -1.442695, %v973_v61  ;;  %v2502_v50 = vmul.f32 -1.442695, %v975_v58 }
 0x4cd   :  { %2903 = vpow2.f32 %v2501_v47 }
 0x4ce   :  { %2905 = vpow2.f32 %v2502_v50 }
 0x4d8   :  { %v2902_v48 = vpop.eup %2901 }
 0x4d9   :  { %v979_v60 = vadd.f32 1.0, %v2902_v48  ;;  %v1004_v48 = vpop.permute.xlu0 %1003 }
 0x4da   :  { %v2904_v23 = vpop.eup %2903  ;;  %vm1005_vm10 = vcmp.eq.s32.totalorder %v1004_v48, 1  ;;  %v4941_v48 = vld [vmem:[#allocation13_spill] sm:$0xff] }
 0x4db   :  { %2907 = vrcp.f32 %v979_v60  ;;  %v985_v20 = vadd.f32 1.0, %v2904_v23  ;;  %v2906_v22 = vpop.eup %2905  ;;  %v4932_v60 = vld [vmem:[#allocation14_spill] sm:$0xff] }
 0x4dc   :  { %2909 = vtanh.f32 %v974_v59  ;;  %v992_v46 = vadd.f32 1.0, %v2906_v22  ;;  %v4931_v59 = vld [vmem:[#allocation5_spill] sm:$0xff]  ;;  %v4933_v23 = vld [vmem:[#allocation6_spill] sm:$0xff]  ;;  %v4935_v22 = vld [vmem:[#allocation7_spill] sm:$0xff] }
 0x4dd   :  { %2911 = vrcp.f32 %v985_v20  ;;  %v4934_v20 = vld [vmem:[#allocation16_spill] sm:$0xff] }
 0x4de   :  { %2913 = vrcp.f32 %v992_v46  ;;  %v4930_v46 = vld [vmem:[#allocation12_spill] sm:$0xff] }
 0x4e8   :  { %v2908_v47 = vpop.eup %2907 }
 0x4e9   :  { %v2910_v61 = vpop.eup %2909 }
 0x4ea   :  { %v2912_v5 = vpop.eup %2911  ;;  %v996_v25 = vmul.f32 %v2910_v61, %v2908_v47  ;;  %v4936_v47 = vld [vmem:[#allocation17_spill] sm:$0xff] }
 0x4eb   :  { %v995_v3 = vmul.f32 %v2912_v5, %v3834_v0  ;;  %v2914_v52 = vpop.eup %2913  ;;  %v4928_v0 = vld [vmem:[#allocation10_spill] sm:$0xff]  ;;  %v4937_v61 = vld [vmem:[#allocation9_spill] sm:$0xff] }
 0x4ec   :  { %v4938_v5 = vld [vmem:[#allocation18_spill] sm:$0xff] }
 0x4ed   :  { %v4236_v44 = vadd.f32 %v996_v25, %v995_v3  ;;  %v4939_v25 = vld [vmem:[#allocation11_spill] sm:$0xff] }
 0x4ee   :  { %v4940_v3 = vld [vmem:[#allocation19_spill] sm:$0xff] }
 0x4ef   :  { %2915 = vtanh.f32 %v4236_v44 }
 0x4fc   :  { %v2916_v50 = vpop.eup %2915 }
 0x4fd   :  { %v999_v51 = vmul.f32 %v2916_v50, %v2914_v52  ;;  %v4942_v52 = vld [vmem:[#allocation20_spill] sm:$0xff]  ;;  %v4943_v50 = vld [vmem:[#allocation15_spill] sm:$0xff] }
 0x4ff   :  { %v4240_v58 = vsel %vm1005_vm10, %v999_v51, %v3838_v56  ;;  %1077 = vmatmul.mubr.f32.vlgmr.msra.gmra.mxu0 %v999_v51  ;;  %1148 = vmatmul.mubr.f32.vlgmr.msra.gmra.mxu1 %v999_v51  ;;  %v4929_v56 = vld [vmem:[#allocation4_spill] sm:$0xff]  ;;  %v4944_v51 = vmov 0.0  }
 0x500   :  { %1195 = vmatpush1.msra.mxu0 %v3843_v62  ;;  %1266 = vmatpush1.msra.mxu1 %v3849_v55 }
 0x501   :  { %1196 = vmatprep.subr.mxu0 %v3855_v57  ;;  %1267 = vmatprep.subr.mxu1 %v3861_v63 }
 0x502   :  { %1197 = vmatpush1.msra.mxu0 %v3867_v49  ;;  %1268 = vmatpush1.msra.mxu1 %v3873_v45 }
 0x503   :  { %1198 = vmatprep.subr.mxu0 %v3879_v54  ;;  %1269 = vmatprep.subr.mxu1 %v3885_v53 }
 0x504   :  { %1199 = vmatpush1.msra.mxu0 %v3891_v10  ;;  %1270 = vmatpush1.msra.mxu1 %v3897_v1 }
 0x505   :  { %1200 = vmatprep.subr.mxu0 %v3903_v2  ;;  %1271 = vmatprep.subr.mxu1 %v3909_v4 }
 0x506   :  { %1201 = vmatpush1.msra.mxu0 %v3915_v6  ;;  %1272 = vmatpush1.msra.mxu1 %v3921_v7 }
 0x507   :  { %1202 = vmatprep.subr.mxu0 %v3927_v8  ;;  %1273 = vmatprep.subr.mxu1 %v3933_v9 }
 0x508   :  { %1203 = vmatpush1.msra.mxu0 %v3939_v11  ;;  %1274 = vmatpush1.msra.mxu1 %v3945_v12 }
 0x509   :  { %1204 = vmatprep.subr.mxu0 %v3951_v13  ;;  %1275 = vmatprep.subr.mxu1 %v3957_v14 }
 0x50a   :  { %1205 = vmatpush1.msra.mxu0 %v3963_v15  ;;  %1276 = vmatpush1.msra.mxu1 %v3969_v16 }
 0x50b   :  { %1206 = vmatprep.subr.mxu0 %v3975_v17  ;;  %1277 = vmatprep.subr.mxu1 %v3981_v18 }
 0x50c   :  { %1207 = vmatpush1.msra.mxu0 %v3987_v19  ;;  %1278 = vmatpush1.msra.mxu1 %v3993_v21 }
 0x50d   :  { %1208 = vmatprep.subr.mxu0 %v3999_v24  ;;  %1279 = vmatprep.subr.mxu1 %v4005_v26 }
 0x50e   :  { %1209 = vmatpush1.msra.mxu0 %v4011_v27  ;;  %1280 = vmatpush1.msra.mxu1 %v4017_v28 }
 0x50f   :  { %1210 = vmatprep.subr.mxu0 %v4023_v29  ;;  %1281 = vmatprep.subr.mxu1 %v4029_v30 }
 0x510   :  { %1211 = vmatpush1.msra.mxu0 %v4035_v31  ;;  %1282 = vmatpush1.msra.mxu1 %v4041_v32 }
 0x511   :  { %1212 = vmatprep.subr.mxu0 %v4047_v33  ;;  %1283 = vmatprep.subr.mxu1 %v4053_v34 }
 0x512   :  { %1213 = vmatpush1.msra.mxu0 %v4059_v35  ;;  %1284 = vmatpush1.msra.mxu1 %v4065_v36 }
 0x513   :  { %1214 = vmatprep.subr.mxu0 %v4071_v37  ;;  %1285 = vmatprep.subr.mxu1 %v4077_v38 }
 0x514   :  { %1215 = vmatpush1.msra.mxu0 %v4083_v39  ;;  %1286 = vmatpush1.msra.mxu1 %v4089_v40 }
 0x515   :  { %1216 = vmatprep.subr.mxu0 %v4095_v41  ;;  %1287 = vmatprep.subr.mxu1 %v4101_v42 }
 0x516   :  { %1217 = vmatpush1.msra.mxu0 %v4107_v43  ;;  %1288 = vmatpush1.msra.mxu1 %v4928_v0 }
 0x517   :  { %1218 = vmatprep.subr.mxu0 %v4929_v56  ;;  %1289 = vmatprep.subr.mxu1 %v4930_v46 }
 0x518   :  { %1219 = vmatpush1.msra.mxu0 %v4931_v59  ;;  %1290 = vmatpush1.msra.mxu1 %v4932_v60  ;;  %v2505_v60 = vld [vmem:[%s4723_s1 + $0xb0] sm:$0xff] }
 0x519   :  { %1220 = vmatprep.subr.mxu0 %v4933_v23  ;;  %1291 = vmatprep.subr.mxu1 %v4934_v20  ;;  %v4945_v20 = vld [vmem:[#allocation21_spill] sm:$0xff] }
 0x51a   :  { %1221 = vmatpush1.msra.mxu0 %v4935_v22  ;;  %1292 = vmatpush1.msra.mxu1 %v4936_v47  ;;  %v4946_v47 = vld [vmem:[#allocation2_spill] sm:$0xff] }
 0x51b   :  { %1222 = vmatprep.subr.mxu0 %v4937_v61  ;;  %1293 = vmatprep.subr.mxu1 %v4938_v5  ;;  %v4947_v61 = vld [vmem:[#allocation3_spill] sm:$0xff]  ;;  %v4948_v5 = vld [vmem:[#allocation8_spill] sm:$0xff] }
 0x51c   :  { %1223 = vmatpush1.msra.mxu0 %v4939_v25  ;;  %1294 = vmatpush1.msra.mxu1 %v4940_v3  ;;  %vm1364_vm11 = vcmp.eq.s32.totalorder %v4948_v5, 7  ;;  %v4949_v25 = vmov 0  }
 0x51d   :  { %1224 = vmatprep.subr.mxu0 %v4941_v48  ;;  %1295 = vmatprep.subr.mxu1 %v4942_v52  ;;  %v1365_v3 = vsel %vm1364_vm11, 1, %v4949_v25  ;;  %v2503_v52 = vld [vmem:[%s4723_s1 + $0xa0] sm:$0xff] }
 0x51e   :  { %1225 = vmatpush1.msra.mxu0 %v4943_v50  ;;  %1258 = vmatprep.mubr.f32.mxu0 %v4944_v51 }
 0x51f   :  { %1296 = vmatpush1.msra.mxu1 %v4945_v20  ;;  %1329 = vmatprep.mubr.f32.mxu1 %v4944_v51  ;;  %v2504_v20 = vld [vmem:[%s4723_s1 + $0xa8] sm:$0xff] }
 0x520   :  { %1376 = vmatprep.subr.mxu0 %v4946_v47  ;;  %1447 = vmatprep.subr.mxu1 %v4947_v61 }
 0x521   :  { %1367 = vperm.xlu0 %2755, %v1365_v3   ;;  %v2506_v3 = vld [vmem:[%s4723_s1 + $0xb8] sm:$0xff] }
 0x5bf   :  { %v1078_v50 = vpop.f32.mrf.mxu0  ;;  %v1149_v61 = vpop.f32.mrf.mxu1 }
 0x5c0   :  { %v1154_v48 = vadd.f32 %v2503_v52, %v1078_v50  ;;  %v1156_v52 = vadd.f32 %v2505_v60, %v1149_v61 }
 0x5c1   :  { %v1080_v51 = vpop.f32.mrf.mxu0  ;;  %v1151_v25 = vpop.f32.mrf.mxu1 }
 0x5c2   :  { %v2507_v22 = vmul.f32 -1.442695, %v1154_v48  ;;  %v1155_v47 = vadd.f32 %v2504_v20, %v1080_v51  ;;  %v1157_v5 = vadd.f32 %v2506_v3, %v1151_v25 }
 0x5c4   :  { %2917 = vpow2.f32 %v2507_v22  ;;  %v2508_v23 = vmul.f32 -1.442695, %v1155_v47  ;;  %v2509_v59 = vmul.f32 -1.442695, %v1157_v5 }
 0x5c6   :  { %2919 = vpow2.f32 %v2508_v23 }
 0x5c7   :  { %2921 = vpow2.f32 %v2509_v59 }
 0x5d1   :  { %v2918_v46 = vpop.eup %2917 }
 0x5d2   :  { %v1161_v50 = vadd.f32 1.0, %v2918_v46  ;;  %v1186_v46 = vpop.permute.xlu1 %1185 }
 0x5d3   :  { %v2920_v48 = vpop.eup %2919  ;;  %vm1187_vm12 = vcmp.eq.s32.totalorder %v1186_v46, 1  ;;  %v2763_v46 = vld [vmem:[%s4724_s4 + $0x68] sm:$0xff]  }
 0x5d4   :  { %2923 = vrcp.f32 %v1161_v50  ;;  %v1167_v20 = vadd.f32 1.0, %v2920_v48  ;;  %v2922_v23 = vpop.eup %2921 }
 0x5d5   :  { %2925 = vtanh.f32 %v1156_v52  ;;  %v1174_v56 = vadd.f32 1.0, %v2922_v23  ;;  %v1368_v52 = vpop.permute.xlu0 %1367 }
 0x5d6   :  { %2927 = vrcp.f32 %v1167_v20  ;;  %vm1369_vm14 = vcmp.eq.s32.totalorder %v1368_v52, 1 }
 0x5d7   :  { %2929 = vrcp.f32 %v1174_v56 }
 0x5e1   :  { %v2924_v22 = vpop.eup %2923 }
 0x5e2   :  { %v2926_v51 = vpop.eup %2925 }
 0x5e3   :  { %v2928_v47 = vpop.eup %2927  ;;  %v1178_v25 = vmul.f32 %v2926_v51, %v2924_v22  ;;  %v2757_v22 = vld [vmem:[%s4724_s4 + $0x78] sm:$0xff]  }
 0x5e4   :  { %v1177_v3 = vmul.f32 %v2928_v47, %v4236_v44  ;;  %v2930_v60 = vpop.eup %2929  ;;  %v2759_v51 = vld [vmem:[%s4725_s5 + $0x38] sm:$0xff]   ;;  %v2760_v47 = vld [vmem:[%s4724_s4 + $0x70] sm:$0xff]  }
 0x5e6   :  { %v4323_v0 = vadd.f32 %v1178_v25, %v1177_v3  ;;  %v2761_v25 = vld [vmem:[%s4724_s4 + $0x30] sm:$0xff]  }
 0x5e7   :  { %v2762_v3 = vld [vmem:[%s4725_s5 + $0x30] sm:$0xff]  }
 0x5e8   :  { %2931 = vtanh.f32 %v4323_v0 }
 0x5f5   :  { %v2932_v59 = vpop.eup %2931 }
 0x5f6   :  { %v1181_v5 = vmul.f32 %v2932_v59, %v2930_v60  ;;  %v2764_v60 = vld [vmem:[%s4724_s4 + $0x28] sm:$0xff]  }
 0x5f7   :  { %v2765_v59 = vld [vmem:[%s4725_s5 + $0x28] sm:$0xff]  }
 0x5f8   :  { %v4327_v61 = vsel %vm1187_vm12, %v1181_v5, %v4240_v58  ;;  %1259 = vmatmul.mubr.f32.vlgmr.msra.gmra.mxu0 %v1181_v5  ;;  %1330 = vmatmul.mubr.f32.vlgmr.msra.gmra.mxu1 %v1181_v5  ;;  %v2766_v5 = vld [vmem:[%s4724_s4 + $0x60] sm:$0xff]  }
 0x5f9   :  { %1377 = vmatpush1.msra.mxu0 %v3843_v62  ;;  %1448 = vmatpush1.msra.mxu1 %v3849_v55  ;;  %v4950_v62 = vld [vmem:[#allocation10_spill] sm:$0xff]  ;;  %v4951_v55 = vld [vmem:[#allocation4_spill] sm:$0xff] }
 0x5fa   :  { %1378 = vmatprep.subr.mxu0 %v3855_v57  ;;  %1449 = vmatprep.subr.mxu1 %v3861_v63  ;;  %v4952_v57 = vld [vmem:[#allocation12_spill] sm:$0xff]  ;;  %v4953_v63 = vld [vmem:[#allocation5_spill] sm:$0xff] }
 0x5fb   :  { %1379 = vmatpush1.msra.mxu0 %v3867_v49  ;;  %1450 = vmatpush1.msra.mxu1 %v3873_v45  ;;  %v4954_v49 = vld [vmem:[#allocation14_spill] sm:$0xff] }
 0x5fc   :  { %1380 = vmatprep.subr.mxu0 %v3879_v54  ;;  %1451 = vmatprep.subr.mxu1 %v3885_v53  ;;  %v4955_v45 = vld [vmem:[#allocation6_spill] sm:$0xff]  ;;  %v4956_v54 = vld [vmem:[#allocation16_spill] sm:$0xff]  ;;  %v4957_v53 = vld [vmem:[#allocation7_spill] sm:$0xff] }
 0x5fd   :  { %1381 = vmatpush1.msra.mxu0 %v3891_v10  ;;  %1452 = vmatpush1.msra.mxu1 %v3897_v1  ;;  %v4958_v10 = vld [vmem:[#allocation17_spill] sm:$0xff] }
 0x5fe   :  { %1382 = vmatprep.subr.mxu0 %v3903_v2  ;;  %1453 = vmatprep.subr.mxu1 %v3909_v4  ;;  %v4959_v1 = vld [vmem:[#allocation9_spill] sm:$0xff]  ;;  %v4960_v2 = vld [vmem:[#allocation18_spill] sm:$0xff]  ;;  %v4961_v4 = vld [vmem:[#allocation11_spill] sm:$0xff] }
 0x5ff   :  { %1383 = vmatpush1.msra.mxu0 %v3915_v6  ;;  %1454 = vmatpush1.msra.mxu1 %v3921_v7  ;;  %v4962_v6 = vld [vmem:[#allocation19_spill] sm:$0xff]  ;;  %v4963_v7 = vld [vmem:[#allocation13_spill] sm:$0xff] }
 0x600   :  { %1384 = vmatprep.subr.mxu0 %v3927_v8  ;;  %1455 = vmatprep.subr.mxu1 %v3933_v9  ;;  %v4964_v8 = vld [vmem:[#allocation20_spill] sm:$0xff]  ;;  %v4965_v9 = vld [vmem:[#allocation15_spill] sm:$0xff] }
 0x601   :  { %1385 = vmatpush1.msra.mxu0 %v3939_v11  ;;  %1456 = vmatpush1.msra.mxu1 %v3945_v12  ;;  %v4966_v11 = vmov 0.0   ;;  %v4967_v12 = vld [vmem:[#allocation21_spill] sm:$0xff] }
 0x602   :  { %1386 = vmatprep.subr.mxu0 %v3951_v13  ;;  %1457 = vmatprep.subr.mxu1 %v3957_v14  ;;  %v4968_v13 = vld [vmem:[#allocation8_spill] sm:$0xff]  ;;  %v4969_v14 = vmov 0  }
 0x603   :  { %1387 = vmatpush1.msra.mxu0 %v3963_v15  ;;  %1458 = vmatpush1.msra.mxu1 %v3969_v16  ;;  %vm1546_vm13 = vcmp.eq.s32.totalorder %v4968_v13, 8  ;;  %v2510_v16 = vld [vmem:[%s4723_s1 + $0xc0] sm:$0xff]  ;;  %v2781_v13 = vld [vmem:[%s4724_s4 + $0xf8] sm:$0xff]  }
 0x604   :  { %1388 = vmatprep.subr.mxu0 %v3975_v17  ;;  %1459 = vmatprep.subr.mxu1 %v3981_v18  ;;  %v1547_v15 = vsel %vm1546_vm13, 1, %v4969_v14  ;;  %v2511_v18 = vld [vmem:[%s4723_s1 + $0xc8] sm:$0xff]  ;;  %v2783_v14 = vld [vmem:[%s4724_s4 + $0x178] sm:$0xff]  }
 0x605   :  { %1389 = vmatpush1.msra.mxu0 %v3987_v19  ;;  %1460 = vmatpush1.msra.mxu1 %v3993_v21 }
 0x606   :  { %1390 = vmatprep.subr.mxu0 %v3999_v24  ;;  %1461 = vmatprep.subr.mxu1 %v4005_v26 }
 0x607   :  { %1391 = vmatpush1.msra.mxu0 %v4011_v27  ;;  %1462 = vmatpush1.msra.mxu1 %v4017_v28 }
 0x608   :  { %1392 = vmatprep.subr.mxu0 %v4023_v29  ;;  %1463 = vmatprep.subr.mxu1 %v4029_v30  ;;  %v2513_v29 = vld [vmem:[%s4723_s1 + $0xd8] sm:$0xff] }
 0x609   :  { %1393 = vmatpush1.msra.mxu0 %v4035_v31  ;;  %1464 = vmatpush1.msra.mxu1 %v4041_v32  ;;  %v2512_v32 = vld [vmem:[%s4723_s1 + $0xd0] sm:$0xff] }
 0x60a   :  { %1394 = vmatprep.subr.mxu0 %v4047_v33  ;;  %1465 = vmatprep.subr.mxu1 %v4053_v34 }
 0x60b   :  { %1395 = vmatpush1.msra.mxu0 %v4059_v35  ;;  %1466 = vmatpush1.msra.mxu1 %v4065_v36 }
 0x60c   :  { %1396 = vmatprep.subr.mxu0 %v4071_v37  ;;  %1467 = vmatprep.subr.mxu1 %v4077_v38 }
 0x60d   :  { %1397 = vmatpush1.msra.mxu0 %v4083_v39  ;;  %1468 = vmatpush1.msra.mxu1 %v4089_v40 }
 0x60e   :  { %1398 = vmatprep.subr.mxu0 %v4095_v41  ;;  %1469 = vmatprep.subr.mxu1 %v4101_v42 }
 0x60f   :  { %1399 = vmatpush1.msra.mxu0 %v4107_v43  ;;  %1470 = vmatpush1.msra.mxu1 %v4950_v62  ;;  %v2768_v62 = vld [vmem:[%s4725_s5 + $0x20] sm:$0xff]  }
 0x610   :  { %1400 = vmatprep.subr.mxu0 %v4951_v55  ;;  %1471 = vmatprep.subr.mxu1 %v4952_v57  ;;  %v2769_v55 = vld [vmem:[%s4724_s4 + $0x58] sm:$0xff]  }
 0x611   :  { %1401 = vmatpush1.msra.mxu0 %v4953_v63  ;;  %1472 = vmatpush1.msra.mxu1 %v4954_v49  ;;  %v2770_v57 = vld [vmem:[%s4724_s4 + $0x18] sm:$0xff]   ;;  %v2772_v49 = vld [vmem:[%s4724_s4 + $0x50] sm:$0xff]  }
 0x612   :  { %1402 = vmatprep.subr.mxu0 %v4955_v45  ;;  %1473 = vmatprep.subr.mxu1 %v4956_v54  ;;  %v2771_v63 = vld [vmem:[%s4725_s5 + $0x18] sm:$0xff]   ;;  %v2773_v45 = vld [vmem:[%s4724_s4 + $0x10] sm:$0xff]  }
 0x613   :  { %1403 = vmatpush1.msra.mxu0 %v4957_v53  ;;  %1474 = vmatpush1.msra.mxu1 %v4958_v10  ;;  %v2774_v54 = vld [vmem:[%s4725_s5 + $0x10] sm:$0xff]   ;;  %v2775_v53 = vld [vmem:[%s4724_s4 + $0x48] sm:$0xff]  }
 0x614   :  { %1404 = vmatprep.subr.mxu0 %v4959_v1  ;;  %1475 = vmatprep.subr.mxu1 %v4960_v2  ;;  %v2776_v10 = vld [vmem:[%s4724_s4 + $0x8] sm:$0xff]   ;;  %v2778_v2 = vld [vmem:[%s4724_s4 + $0x40] sm:$0xff]  }
 0x615   :  { %1405 = vmatpush1.msra.mxu0 %v4961_v4  ;;  %1476 = vmatpush1.msra.mxu1 %v4962_v6  ;;  %v2777_v1 = vld [vmem:[%s4725_s5 + $0x8] sm:$0xff]   ;;  %v2779_v4 = vld [vmem:[%s4724_s4] sm:$0xff]  }
 0x616   :  { %1406 = vmatprep.subr.mxu0 %v4963_v7  ;;  %1477 = vmatprep.subr.mxu1 %v4964_v8  ;;  %v1554_v6 = vld [vmem:[%s4726_s3 + $0x8] sm:$0xff]  ;;  %v1553_v8 = vld [vmem:[%s4726_s3] sm:$0xff] }
 0x617   :  { %1407 = vmatpush1.msra.mxu0 %v4965_v9  ;;  %1440 = vmatprep.mubr.f32.mxu0 %v4966_v11  ;;  %v1562_v7 = vpack.c.bf16 %v1554_v6, %v1554_v6  ;;  %v2780_v9 = vld [vmem:[%s4725_s5] sm:$0xff]   ;;  %v2785_v6 = vld [vmem:[%s4724_s4 + $0xf0] sm:$0xff]  }
 0x618   :  { %1478 = vmatpush1.msra.mxu1 %v4967_v12  ;;  %1511 = vmatprep.mubr.f32.mxu1 %v4966_v11  ;;  %v1561_v12 = vpack.c.bf16 %v1553_v8, %v1553_v8  ;;  %v2790_v8 = vld [vmem:[%s4724_s4 + $0xa8] sm:$0xff]  }
 0x619   :  { %2712 = vmatprep.subr.bf16.mxu0 %v4966_v11  ;;  %1549 = vperm.xlu1 %2756, %v1547_v15   ;;  %v2784_v15 = vld [vmem:[%s4724_s4 + $0x138] sm:$0xff]  }
 0x61a   :  { %2615 = vmatprep.subr.bf16.mxu1 %v2757_v22  ;;  %v2519_v22 = vld [vmem:[%s4723_s1 + $0xf0] sm:$0xff] }
 0x6b8   :  { %v1260_v17 = vpop.f32.mrf.mxu0  ;;  %v1331_v27 = vpop.f32.mrf.mxu1 }
 0x6b9   :  { %v1336_v19 = vadd.f32 %v2510_v16, %v1260_v17  ;;  %v1338_v35 = vadd.f32 %v2512_v32, %v1331_v27  ;;  %v2787_v16 = vld [vmem:[%s4724_s4 + $0x170] sm:$0xff]   ;;  %v2800_v27 = vld [vmem:[%s4724_s4 + $0x118] sm:$0xff]   ;;  %v2811_v32 = vld [vmem:[%s4724_s4 + $0x140] sm:$0xff]  }
 0x6ba   :  { %v1262_v21 = vpop.f32.mrf.mxu0  ;;  %v1333_v30 = vpop.f32.mrf.mxu1  ;;  %v2788_v17 = vld [vmem:[%s4724_s4 + $0x130] sm:$0xff]  }
 0x6bb   :  { %v2514_v24 = vmul.f32 -1.442695, %v1336_v19  ;;  %v1337_v26 = vadd.f32 %v2511_v18, %v1262_v21  ;;  %v1339_v31 = vadd.f32 %v2513_v29, %v1333_v30  ;;  %v2791_v18 = vld [vmem:[%s4724_s4 + $0x168] sm:$0xff]   ;;  %v2795_v21 = vld [vmem:[%s4724_s4 + $0x160] sm:$0xff]   ;;  %v2804_v29 = vld [vmem:[%s4724_s4 + $0x110] sm:$0xff]  }
 0x6bc   :  { %v2792_v19 = vld [vmem:[%s4724_s4 + $0x128] sm:$0xff]  }
 0x6bd   :  { %2933 = vpow2.f32 %v2514_v24  ;;  %v2515_v28 = vmul.f32 -1.442695, %v1337_v26  ;;  %v2516_v33 = vmul.f32 -1.442695, %v1339_v31  ;;  %v2796_v24 = vld [vmem:[%s4724_s4 + $0x120] sm:$0xff]   ;;  %v2799_v26 = vld [vmem:[%s4724_s4 + $0x158] sm:$0xff]  }
 0x6be   :  { %v2807_v30 = vld [vmem:[%s4724_s4 + $0x148] sm:$0xff]  }
 0x6bf   :  { %2935 = vpow2.f32 %v2515_v28  ;;  %v2803_v28 = vld [vmem:[%s4724_s4 + $0x150] sm:$0xff]   ;;  %v2808_v31 = vld [vmem:[%s4724_s4 + $0x108] sm:$0xff]  }
 0x6c0   :  { %2937 = vpow2.f32 %v2516_v33  ;;  %v2812_v33 = vld [vmem:[%s4724_s4 + $0x100] sm:$0xff]  }
 0x6ca   :  { %v2934_v34 = vpop.eup %2933 }
 0x6cb   :  { %v1343_v36 = vadd.f32 1.0, %v2934_v34  ;;  %v1558_v34 = vld [vmem:[%s4726_s3 + $0x28] sm:$0xff] }
 0x6cc   :  { %v2936_v37 = vpop.eup %2935 }
 0x6cd   :  { %2939 = vrcp.f32 %v1343_v36  ;;  %v1349_v38 = vadd.f32 1.0, %v2936_v37  ;;  %v2938_v39 = vpop.eup %2937  ;;  %v1557_v36 = vld [vmem:[%s4726_s3 + $0x20] sm:$0xff] }
 0x6ce   :  { %2941 = vtanh.f32 %v1338_v35  ;;  %v1356_v43 = vadd.f32 1.0, %v2938_v39  ;;  %v1566_v35 = vpack.c.bf16 %v1558_v34, %v1558_v34  ;;  %v1565_v37 = vpack.c.bf16 %v1557_v36, %v1557_v36  ;;  %v2818_v34 = vld [vmem:[%s4724_s4 + $0x1a8] sm:$0xff]   ;;  %v2820_v36 = vld [vmem:[%s4724_s4 + $0x1a0] sm:$0xff]  }
 0x6cf   :  { %2943 = vrcp.f32 %v1349_v38  ;;  %v2517_v38 = vld [vmem:[%s4723_s1 + $0xe0] sm:$0xff] }
 0x6d0   :  { %2945 = vrcp.f32 %v1356_v43 }
 0x6da   :  { %v2940_v40 = vpop.eup %2939 }
 0x6db   :  { %v2942_v41 = vpop.eup %2941 }
 0x6dc   :  { %v2944_v42 = vpop.eup %2943  ;;  %v1360_v44 = vmul.f32 %v2942_v41, %v2940_v40  ;;  %v2518_v40 = vld [vmem:[%s4723_s1 + $0xe8] sm:$0xff] }
 0x6dd   :  { %v1359_v58 = vmul.f32 %v2944_v42, %v4323_v0  ;;  %v2946_v50 = vpop.eup %2945  ;;  %v2758_v0 = vld [vmem:[%s4724_s4 + $0x38] sm:$0xff]  }
 0x6df   :  { %v4409_v56 = vadd.f32 %v1360_v44, %v1359_v58 }
 0x6e1   :  { %2947 = vtanh.f32 %v4409_v56 }
 0x6ee   :  { %v2948_v48 = vpop.eup %2947 }
 0x6ef   :  { %v1363_v20 = vmul.f32 %v2948_v48, %v2946_v50  ;;  %v2520_v50 = vld [vmem:[%s4723_s1 + $0xf8] sm:$0xff] }
 0x6f1   :  { %v4413_v23 = vsel %vm1369_vm14, %v1363_v20, %v4327_v61  ;;  %1441 = vmatmul.mubr.f32.vlgmr.msra.gmra.mxu0 %v1363_v20  ;;  %1512 = vmatmul.mubr.f32.vlgmr.msra.gmra.mxu1 %v1363_v20  ;;  %v2767_v61 = vld [vmem:[%s4724_s4 + $0x20] sm:$0xff]  }
 0x6f2   :  { %2616 = vmatpush3.bf16.msra.mxu1 %v2758_v0  ;;  %2713 = vmatpush3.bf16.msra.mxu0 %v2759_v51 }
 0x6f3   :  { %2617 = vmatprep.subr.bf16.mxu1 %v2760_v47  ;;  %2714 = vmatprep.subr.bf16.mxu0 %v4966_v11 }
 0x6f4   :  { %2218 = vmatprep.mubr.bf16.mxu1 %v1562_v7  ;;  %2728 = vmatprep.mubr.msk.bf16.mxu0 %vm3032_vm15, %v4966_v11  ;;  %v2786_v7 = vld [vmem:[%s4724_s4 + $0xb0] sm:$0xff]  }
 0x6f6   :  { %2618 = vmatpush3.bf16.msra.mxu1 %v2761_v25  ;;  %2715 = vmatpush3.bf16.msra.mxu0 %v2762_v3 }
 0x6f7   :  { %2619 = vmatprep.subr.bf16.mxu1 %v2763_v46  ;;  %2716 = vmatprep.subr.bf16.mxu0 %v4966_v11 }
 0x6fa   :  { %2620 = vmatpush3.bf16.msra.mxu1 %v2764_v60  ;;  %2717 = vmatpush3.bf16.msra.mxu0 %v2765_v59 }
 0x6fb   :  { %2621 = vmatprep.subr.bf16.mxu1 %v2766_v5  ;;  %2718 = vmatprep.subr.bf16.mxu0 %v4966_v11 }
 0x6fe   :  { %2622 = vmatpush3.bf16.msra.mxu1 %v2767_v61  ;;  %2719 = vmatpush3.bf16.msra.mxu0 %v2768_v62 }
 0x6ff   :  { %2623 = vmatprep.subr.bf16.mxu1 %v2769_v55  ;;  %2720 = vmatprep.subr.bf16.mxu0 %v4966_v11 }
 0x702   :  { %2624 = vmatpush3.bf16.msra.mxu1 %v2770_v57  ;;  %2721 = vmatpush3.bf16.msra.mxu0 %v2771_v63 }
 0x703   :  { %2625 = vmatprep.subr.bf16.mxu1 %v2772_v49  ;;  %2722 = vmatprep.subr.bf16.mxu0 %v4966_v11 }
 0x706   :  { %2626 = vmatpush3.bf16.msra.mxu1 %v2773_v45  ;;  %2723 = vmatpush3.bf16.msra.mxu0 %v2774_v54  ;;  %v1550_v45 = vpop.permute.xlu1 %1549 }
 0x707   :  { %2627 = vmatprep.subr.bf16.mxu1 %v2775_v53  ;;  %2724 = vmatprep.subr.bf16.mxu0 %v4966_v11  ;;  %v1556_v53 = vld [vmem:[%s4726_s3 + $0x18] sm:$0xff]  ;;  %vm1551_vm0 = vcmp.eq.s32.totalorder %v1550_v45, 1 }
 0x70a   :  { %2628 = vmatpush3.bf16.msra.mxu1 %v2776_v10  ;;  %2725 = vmatpush3.bf16.msra.mxu0 %v2777_v1 }
 0x70b   :  { %2629 = vmatprep.subr.bf16.mxu1 %v2778_v2  ;;  %2726 = vmatprep.subr.bf16.mxu0 %v4966_v11  ;;  %v2782_v2 = vld [vmem:[%s4724_s4 + $0xb8] sm:$0xff]  }
 0x70e   :  { %2630 = vmatpush3.bf16.msra.mxu1 %v2779_v4  ;;  %2727 = vmatpush3.bf16.msra.mxu0 %v2780_v9  ;;  %v1564_v4 = vpack.c.bf16 %v1556_v53, %v1556_v53  ;;  %v2793_v9 = vld [vmem:[%s4724_s4 + $0xe0] sm:$0xff]  }
 0x70f   :  { %2637 = vmatprep.subr.bf16.mxu0 %v2781_v13  ;;  %2659 = vmatprep.subr.bf16.mxu1 %v2783_v14  ;;  %v2797_v13 = vld [vmem:[%s4724_s4 + $0xd8] sm:$0xff]  }
 0x710   :  { %v2798_v14 = vld [vmem:[%s4724_s4 + $0x98] sm:$0xff]  }
 0x711   :  { %2219 = vmatmul.mubr.bf16.vlgmr.msra.gmra.mxu1 %v1561_v12  ;;  %v2794_v12 = vld [vmem:[%s4724_s4 + $0xa0] sm:$0xff]  }
 0x712   :  { %2660 = vmatpush3.bf16.msra.mxu1 %v2784_v15  ;;  %2298 = vmatprep.mubr.bf16.mxu1 %v1566_v35  ;;  %v2801_v15 = vld [vmem:[%s4724_s4 + $0xd0] sm:$0xff]   ;;  %v2819_v35 = vld [vmem:[%s4724_s4 + $0x1e0] sm:$0xff]  }
 0x713   :  { %2661 = vmatprep.subr.bf16.mxu1 %v2787_v16  ;;  %v2802_v16 = vld [vmem:[%s4724_s4 + $0x90] sm:$0xff]  }
 0x716   :  { %2662 = vmatpush3.bf16.msra.mxu1 %v2788_v17  ;;  %v2805_v17 = vld [vmem:[%s4724_s4 + $0xc8] sm:$0xff]  }
 0x717   :  { %2663 = vmatprep.subr.bf16.mxu1 %v2791_v18  ;;  %v2806_v18 = vld [vmem:[%s4724_s4 + $0x88] sm:$0xff]  }
 0x71a   :  { %2664 = vmatpush3.bf16.msra.mxu1 %v2792_v19  ;;  %v2809_v19 = vld [vmem:[%s4724_s4 + $0xc0] sm:$0xff]  }
 0x71b   :  { %2665 = vmatprep.subr.bf16.mxu1 %v2795_v21  ;;  %v2810_v21 = vld [vmem:[%s4724_s4 + $0x80] sm:$0xff]  }
 0x71e   :  { %2666 = vmatpush3.bf16.msra.mxu1 %v2796_v24  ;;  %v1555_v24 = vld [vmem:[%s4726_s3 + $0x10] sm:$0xff] }
 0x71f   :  { %2667 = vmatprep.subr.bf16.mxu1 %v2799_v26  ;;  %v2813_v26 = vld [vmem:[%s4724_s4 + $0x1f8] sm:$0xff]  }
 0x722   :  { %2668 = vmatpush3.bf16.msra.mxu1 %v2800_v27  ;;  %v1560_v27 = vld [vmem:[%s4726_s3 + $0x38] sm:$0xff] }
 0x723   :  { %2669 = vmatprep.subr.bf16.mxu1 %v2803_v28  ;;  %v1563_v28 = vpack.c.bf16 %v1555_v24, %v1555_v24 }
 0x726   :  { %2670 = vmatpush3.bf16.msra.mxu1 %v2804_v29  ;;  %v2814_v29 = vld [vmem:[%s4724_s4 + $0x1b8] sm:$0xff]  }
 0x727   :  { %2671 = vmatprep.subr.bf16.mxu1 %v2807_v30  ;;  %v1568_v30 = vpack.c.bf16 %v1560_v27, %v1560_v27 }
 0x72a   :  { %2672 = vmatpush3.bf16.msra.mxu1 %v2808_v31  ;;  %v2815_v31 = vld [vmem:[%s4724_s4 + $0x1f0] sm:$0xff]  }
 0x72b   :  { %2673 = vmatprep.subr.bf16.mxu1 %v2811_v32  ;;  %v2816_v32 = vld [vmem:[%s4724_s4 + $0x1b0] sm:$0xff]  }
 0x72e   :  { %2674 = vmatpush3.bf16.msra.mxu1 %v2812_v33  ;;  %v2817_v33 = vld [vmem:[%s4724_s4 + $0x1e8] sm:$0xff]  }
 0x72f   :  { %2732 = vmatprep.subr.bf16.mxu1 %v4966_v11 }
 0x731   :  { %2299 = vmatmul.mubr.bf16.vlgmr.msra.gmra.mxu1 %v1565_v37  ;;  %v2821_v37 = vld [vmem:[%s4724_s4 + $0x1d8] sm:$0xff]  }
 0x732   :  { %2748 = vmatprep.mubr.msk.bf16.mxu1 %vm3032_vm15, %v4966_v11 }
 0x7b1   :  { %v1442_v39 = vpop.f32.mrf.mxu0  ;;  %v1513_v58 = vpop.f32.mrf.mxu1 }
 0x7b2   :  { %v1518_v41 = vadd.f32 %v2517_v38, %v1442_v39  ;;  %v1520_v47 = vadd.f32 %v2519_v22, %v1513_v58  ;;  %v2822_v38 = vld [vmem:[%s4724_s4 + $0x198] sm:$0xff]   ;;  %v2823_v39 = vld [vmem:[%s4724_s4 + $0x1d0] sm:$0xff]  }
 0x7b3   :  { %v1444_v42 = vpop.f32.mrf.mxu0  ;;  %v1515_v48 = vpop.f32.mrf.mxu1  ;;  %v1559_v58 = vld [vmem:[%s4726_s3 + $0x30] sm:$0xff] }
 0x7b4   :  { %v2521_v43 = vmul.f32 -1.442695, %v1518_v41  ;;  %v1519_v44 = vadd.f32 %v2518_v40, %v1444_v42  ;;  %v1521_v20 = vadd.f32 %v2520_v50, %v1515_v48  ;;  %v2824_v40 = vld [vmem:[%s4724_s4 + $0x190] sm:$0xff]   ;;  %v2825_v41 = vld [vmem:[%s4724_s4 + $0x1c8] sm:$0xff]  }
 0x7b5   :  { %v2826_v42 = vld [vmem:[%s4724_s4 + $0x188] sm:$0xff]  }
 0x7b6   :  { %2949 = vpow2.f32 %v2521_v43  ;;  %v2522_v52 = vmul.f32 -1.442695, %v1519_v44  ;;  %v2523_v0 = vmul.f32 -1.442695, %v1521_v20  ;;  %v2827_v43 = vld [vmem:[%s4724_s4 + $0x1c0] sm:$0xff]  }
 0x7b7   :  { %v2828_v44 = vld [vmem:[%s4724_s4 + $0x180] sm:$0xff]  }
 0x7b8   :  { %2951 = vpow2.f32 %v2522_v52  ;;  %v1567_v52 = vpack.c.bf16 %v1559_v58, %v1559_v58 }
 0x7b9   :  { %2953 = vpow2.f32 %v2523_v0 }
 0x7c3   :  { %v2950_v51 = vpop.eup %2949 }
 0x7c4   :  { %v1525_v25 = vadd.f32 1.0, %v2950_v51 }
 0x7c5   :  { %v2952_v3 = vpop.eup %2951 }
 0x7c6   :  { %2955 = vrcp.f32 %v1525_v25  ;;  %v1531_v46 = vadd.f32 1.0, %v2952_v3  ;;  %v2954_v60 = vpop.eup %2953 }
 0x7c7   :  { %2957 = vtanh.f32 %v1520_v47  ;;  %v1538_v62 = vadd.f32 1.0, %v2954_v60 }
 0x7c8   :  { %2959 = vrcp.f32 %v1531_v46  ;;  %v2829_v46 = vld [vmem:[%s4727_s7 + $0x38] sm:$0xff]  }
 0x7c9   :  { %2961 = vrcp.f32 %v1538_v62  ;;  %2733 = vmatpush3.bf16.msra.mxu1 %v2829_v46  ;;  %v2833_v62 = vld [vmem:[%s4727_s7 + $0x18] sm:$0xff]  }
 0x7ca   :  { %2734 = vmatprep.subr.bf16.mxu1 %v4966_v11 }
 0x7d1   :  { %v2631_v50 = vpop.f32.mrf.mxu1 }
 0x7d3   :  { %v2956_v59 = vpop.eup %2955  ;;  %v2632_v48 = vpop.f32.mrf.mxu1 }
 0x7d4   :  { %v2958_v5 = vpop.eup %2957  ;;  %v2633_v20 = vadd.f32 %v2632_v48, %v2631_v50 }
 0x7d5   :  { %v2960_v61 = vpop.eup %2959  ;;  %v1542_v55 = vmul.f32 %v2958_v5, %v2956_v59  ;;  %v2634_v22 = vpop.f32.mrf.mxu1  ;;  %v2830_v59 = vld [vmem:[%s4727_s7 + $0x30] sm:$0xff]   ;;  %v2831_v5 = vld [vmem:[%s4727_s7 + $0x28] sm:$0xff]  }
 0x7d6   :  { %v1541_v57 = vmul.f32 %v2960_v61, %v4409_v56  ;;  %v2962_v49 = vpop.eup %2961  ;;  %2735 = vmatpush3.bf16.msra.mxu1 %v2830_v59  ;;  %v2832_v61 = vld [vmem:[%s4727_s7 + $0x20] sm:$0xff]  }
 0x7d7   :  { %v2635_v0 = vpop.f32.mrf.mxu1  ;;  %2736 = vmatprep.subr.bf16.mxu1 %v4966_v11 }
 0x7d8   :  { %v1543_v63 = vadd.f32 %v1542_v55, %v1541_v57  ;;  %v2834_v55 = vld [vmem:[%s4727_s7 + $0x10] sm:$0xff]   ;;  %v2835_v57 = vld [vmem:[%s4727_s7 + $0x8] sm:$0xff]  }
 0x7da   :  { %2963 = vtanh.f32 %v1543_v63  ;;  %2737 = vmatpush3.bf16.msra.mxu1 %v2831_v5  ;;  %v2836_v63 = vld [vmem:[%s4727_s7] sm:$0xff]  }
 0x7db   :  { %2738 = vmatprep.subr.bf16.mxu1 %v4966_v11 }
 0x7de   :  { %2739 = vmatpush3.bf16.msra.mxu1 %v2832_v61 }
 0x7df   :  { %2740 = vmatprep.subr.bf16.mxu1 %v4966_v11 }
 0x7e2   :  { %2741 = vmatpush3.bf16.msra.mxu1 %v2833_v62 }
 0x7e3   :  { %2742 = vmatprep.subr.bf16.mxu1 %v4966_v11 }
 0x7e6   :  { %2743 = vmatpush3.bf16.msra.mxu1 %v2834_v55 }
 0x7e7   :  { %v2964_v54 = vpop.eup %2963  ;;  %2744 = vmatprep.subr.bf16.mxu1 %v4966_v11 }
 0x7e8   :  { %v1545_v10 = vmul.f32 %v2964_v54, %v2962_v49 }
 0x7ea   :  { %v1552_v1 = vsel %vm1551_vm0, %v1545_v10, %v4413_v23  ;;  %v2789_v23 = vld [vmem:[%s4724_s4 + $0xe8] sm:$0xff]   ;;  %2745 = vmatpush3.bf16.msra.mxu1 %v2835_v57 }
 0x7eb   :  { %v1697_v56 = vpack.c.bf16 %v1552_v1, %v1552_v1  ;;  %2746 = vmatprep.subr.bf16.mxu1 %v4966_v11 }
 0x7ed   :  { %2729 = vmatmul.mubr.bf16.vlgmr.msra.gmra.mxu0 %v1697_v56 }
 0x7ee   :  { %2638 = vmatpush3.bf16.msra.mxu0 %v2782_v2  ;;  %2258 = vmatprep.mubr.bf16.mxu0 %v1564_v4 }
 0x7ef   :  { %2639 = vmatprep.subr.bf16.mxu0 %v2785_v6  ;;  %2747 = vmatpush3.bf16.msra.mxu1 %v2836_v63 }
 0x7f1   :  { %v2675_v51 = vpop.f32.mrf.mxu1 }
 0x7f2   :  { %2640 = vmatpush3.bf16.msra.mxu0 %v2786_v7 }
 0x7f3   :  { %2641 = vmatprep.subr.bf16.mxu0 %v2789_v23  ;;  %v2676_v47 = vpop.f32.mrf.mxu1 }
 0x7f4   :  { %v2677_v25 = vadd.f32 %v2676_v47, %v2675_v51 }
 0x7f5   :  { %v2678_v3 = vpop.f32.mrf.mxu1 }
 0x7f6   :  { %2642 = vmatpush3.bf16.msra.mxu0 %v2790_v8 }
 0x7f7   :  { %2643 = vmatprep.subr.bf16.mxu0 %v2793_v9  ;;  %v2679_v60 = vpop.f32.mrf.mxu1 }
 0x7fa   :  { %2644 = vmatpush3.bf16.msra.mxu0 %v2794_v12  ;;  %v2596_v12 = vld [vmem:[%s4728_s6] ss:$0 sm:$0xff] }
 0x7fb   :  { %2645 = vmatprep.subr.bf16.mxu0 %v2797_v13 }
 0x7fe   :  { %2646 = vmatpush3.bf16.msra.mxu0 %v2798_v14 }
 0x7ff   :  { %2647 = vmatprep.subr.bf16.mxu0 %v2801_v15 }
 0x802   :  { %2648 = vmatpush3.bf16.msra.mxu0 %v2802_v16 }
 0x803   :  { %2649 = vmatprep.subr.bf16.mxu0 %v2805_v17 }
 0x806   :  { %2650 = vmatpush3.bf16.msra.mxu0 %v2806_v18 }
 0x807   :  { %2651 = vmatprep.subr.bf16.mxu0 %v2809_v19  ;;  %v2597_v19 = vld [vmem:[%s4729_s8] ss:$0 sm:$0xff] }
 0x80a   :  { %2652 = vmatpush3.bf16.msra.mxu0 %v2810_v21 }
 0x80b   :  { %2681 = vmatprep.subr.bf16.mxu0 %v2813_v26 }
 0x80d   :  { %2259 = vmatmul.mubr.bf16.vlgmr.msra.gmra.mxu0 %v1563_v28 }
 0x80e   :  { %2682 = vmatpush3.bf16.msra.mxu0 %v2814_v29  ;;  %2338 = vmatprep.mubr.bf16.mxu0 %v1568_v30 }
 0x80f   :  { %2683 = vmatprep.subr.bf16.mxu0 %v2815_v31 }
 0x812   :  { %2684 = vmatpush3.bf16.msra.mxu0 %v2816_v32 }
 0x813   :  { %2685 = vmatprep.subr.bf16.mxu0 %v2817_v33 }
 0x816   :  { %2686 = vmatpush3.bf16.msra.mxu0 %v2818_v34 }
 0x817   :  { %2687 = vmatprep.subr.bf16.mxu0 %v2819_v35 }
 0x81a   :  { %2688 = vmatpush3.bf16.msra.mxu0 %v2820_v36 }
 0x81b   :  { %2689 = vmatprep.subr.bf16.mxu0 %v2821_v37 }
 0x81e   :  { %2690 = vmatpush3.bf16.msra.mxu0 %v2822_v38 }
 0x81f   :  { %2691 = vmatprep.subr.bf16.mxu0 %v2823_v39 }
 0x822   :  { %2692 = vmatpush3.bf16.msra.mxu0 %v2824_v40 }
 0x823   :  { %2693 = vmatprep.subr.bf16.mxu0 %v2825_v41 }
 0x826   :  { %2694 = vmatpush3.bf16.msra.mxu0 %v2826_v42 }
 0x827   :  { %2695 = vmatprep.subr.bf16.mxu0 %v2827_v43 }
 0x82a   :  { %2696 = vmatpush3.bf16.msra.mxu0 %v2828_v44 }
 0x82d   :  { %2339 = vmatmul.mubr.bf16.vlgmr.msra.gmra.mxu0 %v1567_v52 }
 0x8ad   :  { %v1796_v49 = vpop.f32.mrf.mxu0 }
 0x8ae   :  { %v2221_v2 = vadd.f32 %v2633_v20, %v1796_v49 }
 0x8af   :  { %v2730_v45 = vpop.f32.mrf.mxu0 }
 0x8b1   :  { %v1799_v54 = vpop.f32.mrf.mxu0 }
 0x8b3   :  { %v2731_v53 = vpop.f32.mrf.mxu0 }
 0x8cd   :  { %v2653_v10 = vpop.f32.mrf.mxu0 }
 0x8cf   :  { %v2654_v1 = vpop.f32.mrf.mxu0 }
 0x8d0   :  { %v2655_v4 = vadd.f32 %v2654_v1, %v2653_v10 }
 0x8d1   :  { %v2656_v56 = vpop.f32.mrf.mxu0 }
 0x8d2   :  { %v2261_v6 = vadd.f32 %v2655_v4, %v2221_v2 }
 0x8d3   :  { %v2657_v7 = vpop.f32.mrf.mxu0 }
 0x8d4   :  { %v2301_v23 = vadd.f32 %v2677_v25, %v2261_v6 }
 0x8ed   :  { %v2697_v8 = vpop.f32.mrf.mxu0 }
 0x8ef   :  { %v2698_v9 = vpop.f32.mrf.mxu0 }
 0x8f0   :  { %v2699_v11 = vadd.f32 %v2698_v9, %v2697_v8 }
 0x8f1   :  { %v2700_v13 = vpop.f32.mrf.mxu0 }
 0x8f2   :  { %v2341_v14 = vadd.f32 %v2699_v11, %v2301_v23 }
 0x8f3   :  { %v2701_v15 = vpop.f32.mrf.mxu0 }
 0x8f4   :  { %v2353_v16 = vadd.f32 %v2596_v12, %v2341_v14 }
 0x8f6   :  { %v2354_v17 = vmax.f32 %v2353_v16, 0.0 }
 0x8f8   :  { %v2355_v18 = vpack.c.bf16 %v2354_v17, %v2354_v17 }
 0x8fa   :  { %2749 = vmatmul.mubr.bf16.vlgmr.msra.gmra.mxu1 %v2355_v18 }
 0x9ba   :  { %v2461_v21 = vpop.f32.mrf.mxu1 }
 0x9bb   :  { %v2462_v24 = vadd.f32 %v2597_v19, %v2461_v21 }
 0x9bc   :  { %v2750_v26 = vpop.f32.mrf.mxu1 }
 0x9bd   :  { %2467 = vst [vmem:[%s4730_s9] sm:$0xff] %v2462_v24 }
 0x9be   :  { %v2464_v27 = vpop.f32.mrf.mxu1 }
 0x9c0   :  { %v2751_v28 = vpop.f32.mrf.mxu1 }

// kernel: _forward_impl.2
= control target key start
LH: loop header
LB: loop body
LE: loop exit
PB: predicated region body
PF: predicated region fallthrough
CT: control target
= control target key end

     0   :  { %v8478_v0 = vmov 1   ;;  %v8480_v1 = vmov 0   ;;  %v8476_v9 = vmov 2   ;;  %vm1484_vm0 = vcmask 523264   ;;  %s8468_s0 = inlined_call_operand.vmem [shape: f32[8,64,3], index: 0, kind: input, shape index: {}]   ;;  %s8469_s3 = inlined_call_operand.vmem [shape: bf16[64,128], index: 3, kind: input, shape index: {}]   ;;  %s8470_s1 = inlined_call_operand.vmem [shape: f32[3,64], index: 1, kind: input, shape index: {}]   ;;  %s8471_s2 = inlined_call_operand.vmem [shape: f32[1,64], index: 2, kind: input, shape index: {}]   ;;  %s8472_s5 = inlined_call_operand.vmem [shape: bf16[128,1024], index: 5, kind: input, shape index: {}]   ;;  %s8473_s4 = inlined_call_operand.vmem [shape: f32[1,128], index: 4, kind: input, shape index: {}]   ;;  %s8474_s6 = inlined_call_operand.vmem [shape: f32[1,1024], index: 6, kind: input, shape index: {}]   ;;  %s8475_s7 = inlined_call_operand.vmem [shape: f32[1,8,1024], index: 7, kind: output, shape index: {}]  }
   0x1   :  { %5690 = vset.pattern.permute.xlu1 %v8478_v0  ;;  %5689 = vset.pattern.permute.xlu0 %v8480_v1  ;;  %v49_v2 = vld [vmem:[%s8468_s0] sm:$0xff]  ;;  %v5845_v3 = vld [vmem:[%s8468_s0 + $0x8] sm:$0xff]  ;;  %v51_v4 = vld [vmem:[%s8468_s0 + $0x10] sm:$0xff]  ;;  %vm5216_vm1 = vcmask 1041409   ;;  %vm5218_vm2 = vcmask 1042434   ;;  %vm5220_vm3 = vcmask 1043459  }
   0x2   :  { %503 = vperm.xlu1 %5690, %v49_v2   ;;  %116 = vperm.xlu0 %5689, %v49_v2   ;;  %v52_v5 = vld [vmem:[%s8468_s0 + $0x18] sm:$0xff]  ;;  %v5859_v6 = vld [vmem:[%s8468_s0 + $0x20] sm:$0xff]  ;;  %v5866_v7 = vld [vmem:[%s8468_s0 + $0x48] sm:$0xff]  ;;  %vm5222_vm4 = vcmask 1044484   ;;  %vm5224_vm5 = vcmask 1045509   ;;  %vm5226_vm6 = vcmask 1046534  }
   0x3   :  { %v5872_v8 = vld [vmem:[%s8468_s0 + $0x50] sm:$0xff]  ;;  %v5879_v10 = vld [vmem:[%s8468_s0 + $0x60] sm:$0xff]  ;;  %v5885_v11 = vld [vmem:[%s8468_s0 + $0x88] sm:$0xff]  ;;  %vm5228_vm7 = vcmask 1047559  }
   0x4   :  { %v54_v12 = vld [vmem:[%s8468_s0 + $0x28] sm:$0xff]  ;;  %v5894_v13 = vld [vmem:[%s8468_s0 + $0x90] sm:$0xff]  ;;  %v5901_v14 = vld [vmem:[%s8468_s0 + $0xa0] sm:$0xff] }
   0x5   :  { %v55_v15 = vld [vmem:[%s8468_s0 + $0x30] sm:$0xff]  ;;  %v5914_v16 = vld [vmem:[%s8468_s0 + $0x38] sm:$0xff]  ;;  %v5923_v17 = vld [vmem:[%s8468_s0 + $0x68] sm:$0xff] }
   0x6   :  { %507 = vperm.xlu1 %5690, %v5845_v3   ;;  %121 = vperm.xlu0 %5689, %v5845_v3   ;;  %v5930_v18 = vld [vmem:[%s8468_s0 + $0x70] sm:$0xff]  ;;  %v57_v19 = vld [vmem:[%s8468_s0 + $0x40] sm:$0xff]  ;;  %v5941_v20 = vld [vmem:[%s8468_s0 + $0xa8] sm:$0xff] }
   0x7   :  { %v5948_v21 = vld [vmem:[%s8468_s0 + $0xb0] sm:$0xff]  ;;  %v60_v23 = vld [vmem:[%s8468_s0 + $0x58] sm:$0xff]  ;;  %v5965_v24 = vld [vmem:[%s8468_s0 + $0xe8] sm:$0xff] }
   0x8   :  { %v5955_v22 = vld [vmem:[%s8468_s0 + $0xd0] sm:$0xff]  ;;  %v5985_v27 = vld [vmem:[%s8468_s0 + $0x128] sm:$0xff]  ;;  %v5774_v28 = vld [vmem:[%s8469_s3 + $0x18] sm:$0xff]  }
   0x9   :  { %v5971_v25 = vld [vmem:[%s8468_s0 + $0xf0] sm:$0xff]  ;;  %8503 = vst [vmem:[#allocation2_spill] sm:$0xff] %v5985_v27  ;;  %5606 = vmatprep.subr.bf16.mxu0 %v5774_v28  ;;  %5678 = vmatprep.subr.bf16.mxu1 %v5774_v28  ;;  %v5776_v31 = vld [vmem:[%s8469_s3 + $0x8] sm:$0xff]   ;;  %v5777_v32 = vld [vmem:[%s8469_s3] sm:$0xff]  }
   0xa   :  { %5691 = vset.pattern.permute.xlu1 %v8480_v1  ;;  %126 = vperm.xlu0 %5689, %v51_v4   ;;  %v5978_v26 = vld [vmem:[%s8468_s0 + $0x110] sm:$0xff]  ;;  %v64_v33 = vld [vmem:[%s8468_s0 + $0x78] sm:$0xff]  ;;  %v65_v41 = vld [vmem:[%s8468_s0 + $0x80] sm:$0xff] }
   0xb   :  { %131 = vperm.xlu1 %5691, %v52_v5   ;;  %v5995_v29 = vld [vmem:[%s8468_s0 + $0x130] sm:$0xff]  ;;  %5607 = vmatpush3.bf16.msra.mxu0 %v5774_v28  ;;  %v6041_v39 = vld [vmem:[%s8468_s0 + $0xb8] sm:$0xff]  ;;  %v6055_v43 = vld [vmem:[%s8468_s0 + $0xc8] sm:$0xff] }
   0xc   :  { %8504 = vst [vmem:[#allocation3_spill] sm:$0xff] %v5995_v29  ;;  %v5775_v30 = vld [vmem:[%s8469_s3 + $0x10] sm:$0xff]   ;;  %5682 = vmatpush3.bf16.msra.mxu1 %v5774_v28  ;;  %v6066_v46 = vld [vmem:[%s8468_s0 + $0xe0] sm:$0xff]  ;;  %v6076_v49 = vld [vmem:[%s8468_s0 + $0xf8] sm:$0xff] }
   0xd   :  { %5608 = vmatprep.subr.bf16.mxu0 %v5775_v30  ;;  %5679 = vmatprep.subr.bf16.mxu1 %v5775_v30  ;;  %v68_v51 = vld [vmem:[%s8468_s0 + $0x98] sm:$0xff]  ;;  %v6090_v53 = vld [vmem:[%s8468_s0 + $0x108] sm:$0xff]  ;;  %v6101_v56 = vld [vmem:[%s8468_s0 + $0x120] sm:$0xff] }
   0xe   :  { %136 = vperm.xlu0 %5689, %v5859_v6   ;;  %8505 = vst [vmem:[#allocation4_spill] sm:$0xff] %v6101_v56  ;;  %v6112_v59 = vld [vmem:[%s8468_s0 + $0x138] sm:$0xff]  ;;  %v6121_v61 = vld [vmem:[%s8468_s0 + $0x148] sm:$0xff]  ;;  %v6130_v63 = vld [vmem:[%s8468_s0 + $0x160] sm:$0xff] }
   0xf   :  { %5692 = vset.pattern.permute.xlu1 %v8478_v0  ;;  %5609 = vmatpush3.bf16.msra.mxu0 %v5775_v30  ;;  %8506 = vst [vmem:[#allocation5_spill] sm:$0xff] %v6112_v59  ;;  %8508 = vst [vmem:[#allocation7_spill] sm:$0xff] %v6121_v61 }
  0x10   :  { %515 = vperm.xlu1 %5692, %v52_v5   ;;  %5683 = vmatpush3.bf16.msra.mxu1 %v5775_v30 }
  0x11   :  { %5610 = vmatprep.subr.bf16.mxu0 %v5776_v31  ;;  %5680 = vmatprep.subr.bf16.mxu1 %v5776_v31 }
  0x12   :  { %161 = vperm.xlu0 %5689, %v5866_v7  }
  0x13   :  { %5611 = vmatpush3.bf16.msra.mxu0 %v5776_v31 }
  0x14   :  { %5693 = vset.pattern.permute.xlu1 %v8476_v9  ;;  %5684 = vmatpush3.bf16.msra.mxu1 %v5776_v31 }
  0x15   :  { %891 = vperm.xlu1 %5693, %v49_v2   ;;  %5612 = vmatprep.subr.bf16.mxu0 %v5777_v32 }
  0x16   :  { %166 = vperm.xlu0 %5689, %v5872_v8   ;;  %5681 = vmatprep.subr.bf16.mxu1 %v5777_v32 }
  0x17   :  { %5613 = vmatpush3.bf16.msra.mxu0 %v5777_v32 }
  0x18   :  { %5685 = vmatpush3.bf16.msra.mxu1 %v5777_v32 }
  0x19   :  { %899 = vperm.xlu1 %5693, %v51_v4  }
  0x1a   :  { %176 = vperm.xlu0 %5689, %v5879_v10  }
  0x1d   :  { %903 = vperm.xlu1 %5693, %v52_v5  }
  0x1e   :  { %201 = vperm.xlu0 %5689, %v5885_v11  }
  0x21   :  { %5694 = vset.pattern.permute.xlu1 %v8480_v1 }
  0x22   :  { %141 = vperm.xlu1 %5694, %v54_v12   ;;  %206 = vperm.xlu0 %5689, %v5894_v13  }
  0x26   :  { %5695 = vset.pattern.permute.xlu1 %v8478_v0  ;;  %216 = vperm.xlu0 %5689, %v5901_v14  }
  0x27   :  { %519 = vperm.xlu1 %5695, %v5859_v6  }
  0x2a   :  { %5714 = vset.pattern.permute.xlu0 %v8478_v0 }
  0x2b   :  { %5696 = vset.pattern.permute.xlu1 %v8480_v1  ;;  %511 = vperm.xlu0 %5714, %v51_v4   ;;  %v96_v4 = vld [vmem:[%s8468_s0 + $0x178] sm:$0xff] }
  0x2c   :  { %146 = vperm.xlu1 %5696, %v55_v15  }
  0x2f   :  { %523 = vperm.xlu0 %5714, %v54_v12  }
  0x30   :  { %151 = vperm.xlu1 %5696, %v5914_v16  }
  0x33   :  { %527 = vperm.xlu0 %5714, %v55_v15  }
  0x34   :  { %5697 = vset.pattern.permute.xlu1 %v8478_v0 }
  0x35   :  { %531 = vperm.xlu1 %5697, %v5914_v16  }
  0x37   :  { %543 = vperm.xlu0 %5714, %v5872_v8  }
  0x39   :  { %5698 = vset.pattern.permute.xlu1 %v8476_v9 }
  0x3a   :  { %911 = vperm.xlu1 %5698, %v54_v12  }
  0x3b   :  { %555 = vperm.xlu0 %5714, %v5923_v17  }
  0x3e   :  { %915 = vperm.xlu1 %5698, %v55_v15   ;;  %v104_v15 = vld [vmem:[%s8468_s0 + $0x1b8] sm:$0xff] }
  0x3f   :  { %559 = vperm.xlu0 %5714, %v5930_v18  }
  0x42   :  { %5699 = vset.pattern.permute.xlu1 %v8480_v1 }
  0x43   :  { %156 = vperm.xlu1 %5699, %v57_v19   ;;  %575 = vperm.xlu0 %5714, %v5894_v13  }
  0x47   :  { %5700 = vset.pattern.permute.xlu1 %v8478_v0  ;;  %587 = vperm.xlu0 %5714, %v5941_v20  }
  0x48   :  { %535 = vperm.xlu1 %5700, %v57_v19  }
  0x4b   :  { %591 = vperm.xlu0 %5714, %v5948_v21  }
  0x4c   :  { %539 = vperm.xlu1 %5700, %v5866_v7  }
  0x4f   :  { %607 = vperm.xlu0 %5714, %v5955_v22  }
  0x50   :  { %5701 = vset.pattern.permute.xlu1 %v8480_v1 }
  0x51   :  { %171 = vperm.xlu1 %5701, %v60_v23  }
  0x53   :  { %619 = vperm.xlu0 %5714, %v5965_v24  }
  0x55   :  { %5702 = vset.pattern.permute.xlu1 %v8478_v0 }
  0x56   :  { %547 = vperm.xlu1 %5702, %v60_v23  }
  0x57   :  { %623 = vperm.xlu0 %5714, %v5971_v25  }
  0x5a   :  { %5703 = vset.pattern.permute.xlu1 %v8476_v9 }
  0x5b   :  { %923 = vperm.xlu1 %5703, %v57_v19   ;;  %639 = vperm.xlu0 %5714, %v5978_v26  }
  0x5f   :  { %931 = vperm.xlu1 %5703, %v5872_v8   ;;  %651 = vperm.xlu0 %5714, %v5985_v27  }
  0x63   :  { %935 = vperm.xlu1 %5703, %v60_v23   ;;  %655 = vperm.xlu0 %5714, %v5995_v29  }
  0x67   :  { %5704 = vset.pattern.permute.xlu1 %v8480_v1  ;;  %5738 = vset.pattern.permute.xlu0 %v8476_v9 }
  0x68   :  { %181 = vperm.xlu1 %5704, %v5923_v17   ;;  %895 = vperm.xlu0 %5738, %v5845_v3  }
  0x6c   :  { %5705 = vset.pattern.permute.xlu1 %v8478_v0  ;;  %907 = vperm.xlu0 %5738, %v5859_v6  }
  0x6d   :  { %551 = vperm.xlu1 %5705, %v5879_v10  }
  0x70   :  { %919 = vperm.xlu0 %5738, %v5914_v16  }
  0x71   :  { %5706 = vset.pattern.permute.xlu1 %v8480_v1 }
  0x72   :  { %186 = vperm.xlu1 %5706, %v5930_v18  }
  0x74   :  { %927 = vperm.xlu0 %5738, %v5866_v7   ;;  %v6148_v7 = vld [vmem:[%s8468_s0 + $0x188] sm:$0xff] }
  0x76   :  { %191 = vperm.xlu1 %5706, %v64_v33  }
  0x78   :  { %939 = vperm.xlu0 %5738, %v5879_v10  }
  0x7a   :  { %5707 = vset.pattern.permute.xlu1 %v8478_v0 }
  0x7b   :  { %563 = vperm.xlu1 %5707, %v64_v33  }
  0x7c   :  { %951 = vperm.xlu0 %5738, %v64_v33   ;;  %v434_v33 = vlaneseq }
  0x7d   :  { %v6023_v34 = vpop.permute.xlu1 %503  ;;  %v6025_v35 = vpop.permute.xlu0 %116 }
  0x7f   :  { %5708 = vset.pattern.permute.xlu1 %v8476_v9 }
  0x80   :  { %943 = vperm.xlu1 %5708, %v5923_v17   ;;  %959 = vperm.xlu0 %5738, %v5885_v11  }
  0x81   :  { %v6030_v36 = vpop.permute.xlu1 %507  ;;  %v6032_v37 = vpop.permute.xlu0 %121 }
  0x84   :  { %947 = vperm.xlu1 %5708, %v5930_v18   ;;  %971 = vperm.xlu0 %5738, %v5901_v14  }
  0x85   :  { %v6036_v38 = vpop.permute.xlu0 %126 }
  0x86   :  { %v6043_v40 = vpop.permute.xlu1 %131 }
  0x88   :  { %5709 = vset.pattern.permute.xlu1 %v8480_v1  ;;  %983 = vperm.xlu0 %5738, %v6041_v39  }
  0x89   :  { %196 = vperm.xlu1 %5709, %v65_v41   ;;  %v6050_v42 = vpop.permute.xlu0 %136 }
  0x8b   :  { %v6057_v44 = vpop.permute.xlu1 %515 }
  0x8c   :  { %991 = vperm.xlu0 %5738, %v6055_v43  }
  0x8d   :  { %5710 = vset.pattern.permute.xlu1 %v8478_v0  ;;  %v6061_v45 = vpop.permute.xlu0 %161 }
  0x8e   :  { %567 = vperm.xlu1 %5710, %v65_v41  }
  0x90   :  { %v6068_v47 = vpop.permute.xlu1 %891  ;;  %1003 = vperm.xlu0 %5738, %v6066_v46  }
  0x91   :  { %v6071_v48 = vpop.permute.xlu0 %166 }
  0x92   :  { %571 = vperm.xlu1 %5710, %v5885_v11   ;;  %v6159_v11 = vld [vmem:[%s8468_s0 + $0x1a0] sm:$0xff] }
  0x94   :  { %v6079_v50 = vpop.permute.xlu1 %899  ;;  %1015 = vperm.xlu0 %5738, %v6076_v49  }
  0x95   :  { %v6085_v52 = vpop.permute.xlu0 %176 }
  0x96   :  { %5711 = vset.pattern.permute.xlu1 %v8480_v1 }
  0x97   :  { %211 = vperm.xlu1 %5711, %v68_v51  }
  0x98   :  { %v6093_v54 = vpop.permute.xlu1 %903  ;;  %1023 = vperm.xlu0 %5738, %v6090_v53  }
  0x99   :  { %v6096_v55 = vpop.permute.xlu0 %201 }
  0x9b   :  { %5712 = vset.pattern.permute.xlu1 %v8478_v0 }
  0x9c   :  { %579 = vperm.xlu1 %5712, %v68_v51   ;;  %1035 = vperm.xlu0 %5738, %v6101_v56  }
  0x9d   :  { %v6105_v57 = vpop.permute.xlu1 %141  ;;  %v6107_v58 = vpop.permute.xlu0 %206 }
  0xa0   :  { %5713 = vset.pattern.permute.xlu1 %v8476_v9  ;;  %1047 = vperm.xlu0 %5738, %v6112_v59  }
  0xa1   :  { %955 = vperm.xlu1 %5713, %v65_v41   ;;  %v6116_v60 = vpop.permute.xlu0 %216  ;;  %v6209_v41 = vshrl.u32 %v434_v33, 7 }
  0xa2   :  { %8507 = vst [vmem:[#allocation6_spill] sm:$0xff] %v6116_v60  ;;  %v6123_v62 = vpop.permute.xlu1 %519 }
  0xa3   :  { %8512 = vst [vmem:[#allocation11_spill] sm:$0xff] %v6209_v41  ;;  %v8486_v33 = vsub.s32 0, %v6209_v41 }
  0xa4   :  { %1055 = vperm.xlu0 %5738, %v6121_v61  }
  0xa5   :  { %963 = vperm.xlu1 %5713, %v5894_v13  }
  0xa6   :  { %v6132_v2 = vpop.permute.xlu0 %511 }
  0xa7   :  { %v6134_v3 = vpop.permute.xlu1 %146 }
  0xa8   :  { %1067 = vperm.xlu0 %5738, %v6130_v63  }
  0xa9   :  { %967 = vperm.xlu1 %5713, %v68_v51  }
  0xaa   :  { %v6140_v5 = vpop.permute.xlu0 %523 }
  0xab   :  { %v6142_v6 = vpop.permute.xlu1 %151 }
  0xac   :  { %1079 = vperm.xlu0 %5738, %v96_v4   ;;  %v6216_v4 = vld [vmem:[%s8468_s0 + $0xc0] sm:$0xff] }
  0xad   :  { %5715 = vset.pattern.permute.xlu1 %v8480_v1 }
  0xae   :  { %221 = vperm.xlu1 %5715, %v5941_v20   ;;  %v6151_v8 = vpop.permute.xlu0 %527 }
  0xb0   :  { %v6153_v10 = vpop.permute.xlu1 %531  ;;  %1087 = vperm.xlu0 %5738, %v6148_v7  }
  0xb2   :  { %5716 = vset.pattern.permute.xlu1 %v8478_v0  ;;  %v6162_v12 = vpop.permute.xlu0 %543 }
  0xb3   :  { %583 = vperm.xlu1 %5716, %v5901_v14   ;;  %v6180_v14 = vld [vmem:[%s8468_s0 + $0x1c8] sm:$0xff] }
  0xb4   :  { %1099 = vperm.xlu0 %5738, %v6159_v11  }
  0xb5   :  { %v6166_v13 = vpop.permute.xlu1 %911 }
  0xb6   :  { %v6171_v16 = vpop.permute.xlu0 %555 }
  0xb7   :  { %5717 = vset.pattern.permute.xlu1 %v8480_v1 }
  0xb8   :  { %226 = vperm.xlu1 %5717, %v5948_v21   ;;  %1111 = vperm.xlu0 %5738, %v104_v15   ;;  %v113_v15 = vld [vmem:[%s8470_s1] sm:$0x7] }
  0xb9   :  { %v6175_v17 = vpop.permute.xlu1 %915  ;;  %v6242_v59 = vrot.slane %v113_v15, %v8486_v33 }
  0xba   :  { %v6182_v18 = vpop.permute.xlu0 %559 }
  0xbb   :  { %v440_v33 = vmul.f32 %v6242_v59, %v6036_v38  ;;  %v441_v38 = vmul.f32 %v6242_v59, %v6043_v40  ;;  %v439_v40 = vmul.f32 %v6242_v59, %v6032_v37 }
  0xbc   :  { %231 = vperm.xlu1 %5717, %v6041_v39   ;;  %1119 = vperm.xlu0 %5738, %v6180_v14  }
  0xbe   :  { %v6186_v19 = vpop.permute.xlu1 %156  ;;  %v6188_v23 = vpop.permute.xlu0 %575 }
  0xc0   :  { %5718 = vset.pattern.permute.xlu1 %v8478_v0  ;;  %5766 = vset.pattern.permute.xlu0 %v8480_v1 }
  0xc1   :  { %595 = vperm.xlu1 %5718, %v6041_v39   ;;  %241 = vperm.xlu0 %5766, %v6055_v43  }
  0xc2   :  { %v6194_v28 = vpop.permute.xlu0 %587 }
  0xc3   :  { %8509 = vst [vmem:[#allocation8_spill] sm:$0xff] %v6194_v28  ;;  %v6196_v30 = vpop.permute.xlu1 %535  ;;  %v438_v28 = vmul.f32 %v6242_v59, %v6025_v35  ;;  %v6277_v35 = vld [vmem:[%s8468_s0 + $0x150] sm:$0xff] }
  0xc5   :  { %5719 = vset.pattern.permute.xlu1 %v8476_v9  ;;  %246 = vperm.xlu0 %5766, %v5955_v22  }
  0xc6   :  { %975 = vperm.xlu1 %5719, %v5941_v20   ;;  %v6201_v31 = vpop.permute.xlu0 %591 }
  0xc7   :  { %8510 = vst [vmem:[#allocation9_spill] sm:$0xff] %v6201_v31  ;;  %v6203_v32 = vpop.permute.xlu1 %539 }
  0xc9   :  { %256 = vperm.xlu0 %5766, %v6066_v46  }
  0xca   :  { %979 = vperm.xlu1 %5719, %v5948_v21   ;;  %v6207_v39 = vpop.permute.xlu0 %607  ;;  %v8485_v21 = vsub.s32 1, %v6209_v41 }
  0xcb   :  { %8511 = vst [vmem:[#allocation10_spill] sm:$0xff] %v6207_v39  ;;  %v8515_v39 = vmov 1  }
  0xcc   :  { %v6211_v51 = vpop.permute.xlu1 %171 }
  0xcd   :  { %281 = vperm.xlu0 %5766, %v6090_v53  }
  0xce   :  { %5720 = vset.pattern.permute.xlu1 %v8480_v1  ;;  %v6220_v20 = vpop.permute.xlu0 %619  ;;  %v8488_v1 = vsub.s32 2, %v6209_v41 }
  0xcf   :  { %8513 = vst [vmem:[#allocation12_spill] sm:$0xff] %v6220_v20  ;;  %236 = vperm.xlu1 %5720, %v6216_v4   ;;  %v6237_v20 = vrot.slane %v113_v15, %v8485_v21 }
  0xd1   :  { %v6228_v9 = vpop.permute.xlu1 %547  ;;  %286 = vperm.xlu0 %5766, %v5978_v26   ;;  %v762_v21 = vmul.f32 %v6237_v20, %v6023_v34  ;;  %v6272_v34 = vld [vmem:[%s8468_s0 + $0xd8] sm:$0xff]  ;;  %v763_v27 = vmul.f32 %v6237_v20, %v6030_v36  ;;  %v443_v36 = vmul.f32 %v6242_v59, %v6105_v57  ;;  %v442_v57 = vmul.f32 %v6242_v59, %v6050_v42 }
  0xd2   :  { %v6231_v0 = vpop.permute.xlu0 %623  ;;  %v448_v42 = vmul.f32 %v6242_v59, %v6071_v48  ;;  %v770_v48 = vmul.f32 %v6237_v20, %v6196_v30  ;;  %v446_v30 = vmul.f32 %v6242_v59, %v6186_v19  ;;  %v771_v19 = vmul.f32 %v6237_v20, %v6203_v32 }
  0xd3   :  { %8514 = vst [vmem:[#allocation13_spill] sm:$0xff] %v6231_v0  ;;  %5721 = vset.pattern.permute.xlu1 %v8515_v39  ;;  %v6251_v0 = vrot.slane %v113_v15, %v8488_v1  ;;  %v826_v41 = vadd.f32 %v762_v21, %v438_v28  ;;  %v6303_v21 = vld [vmem:[%s8471_s2] ss:$0 sm:$0xff] }
  0xd4   :  { %599 = vperm.xlu1 %5721, %v6216_v4  }
  0xd5   :  { %296 = vperm.xlu0 %5766, %v6101_v56   ;;  %v765_v56 = vmul.f32 %v6237_v20, %v6057_v44  ;;  %v1153_v44 = vmul.f32 %v6251_v0, %v6093_v54  ;;  %v1152_v28 = vmul.f32 %v6251_v0, %v6079_v50 }
  0xd6   :  { %v6245_v29 = vpop.permute.xlu1 %923  ;;  %v6247_v31 = vpop.permute.xlu0 %639 }
  0xd7   :  { %8516 = vst [vmem:[#allocation14_spill] sm:$0xff] %v6247_v31  ;;  %v764_v31 = vmul.f32 %v6237_v20, %v6132_v2  ;;  %v8518_v2 = vmov 0  }
  0xd8   :  { %603 = vperm.xlu1 %5721, %v6055_v43   ;;  %v1150_v43 = vmul.f32 %v6251_v0, %v6068_v47 }
  0xd9   :  { %321 = vperm.xlu0 %5766, %v6121_v61   ;;  %v828_v61 = vadd.f32 %v764_v31, %v440_v33  ;;  %v767_v31 = vmul.f32 %v6237_v20, %v6140_v5  ;;  %v1155_v33 = vmul.f32 %v6251_v0, %v6166_v13 }
  0xda   :  { %v6265_v15 = vpop.permute.xlu1 %931  ;;  %v6267_v1 = vpop.permute.xlu0 %651  ;;  %v1214_v54 = vadd.f32 %v1150_v43, %v826_v41 }
  0xdb   :  { %8517 = vst [vmem:[#allocation15_spill] sm:$0xff] %v6267_v1  ;;  %v829_v1 = vadd.f32 %v765_v56, %v441_v38  ;;  %v1216_v37 = vadd.f32 %v1152_v28, %v828_v61  ;;  %v831_v5 = vadd.f32 %v767_v31, %v443_v36  ;;  %v766_v61 = vmul.f32 %v6237_v20, %v6123_v62 }
  0xdc   :  { %5722 = vset.pattern.permute.xlu1 %v8518_v2  ;;  %v1285_v43 = vadd.f32 %v6303_v21, %v1214_v54  ;;  %v444_v62 = vmul.f32 %v6242_v59, %v6134_v3  ;;  %v8519_v28 = vmov 2  }
  0xdd   :  { %251 = vperm.xlu1 %5722, %v6272_v34   ;;  %326 = vperm.xlu0 %5766, %v6277_v35   ;;  %v1217_v56 = vadd.f32 %v1153_v44, %v829_v1  ;;  %v827_v1 = vadd.f32 %v763_v27, %v439_v40  ;;  %v447_v27 = vmul.f32 %v6242_v59, %v6061_v45  ;;  %v6337_v45 = vld [vmem:[%s8468_s0 + $0x190] sm:$0xff] }
  0xde   :  { %v6292_v60 = vpop.permute.xlu1 %935  ;;  %v6294_v47 = vpop.permute.xlu0 %655  ;;  %v1287_v44 = vadd.f32 %v6303_v21, %v1216_v37  ;;  %v1219_v40 = vadd.f32 %v1155_v33, %v831_v5  ;;  %v1349_v31 = vmax.f32 %v1285_v43, 0.0 }
  0xdf   :  { %v1288_v50 = vadd.f32 %v6303_v21, %v1217_v56 }
  0xe0   :  { %v1351_v5 = vmax.f32 %v1287_v44, 0.0 }
  0xe1   :  { %5723 = vset.pattern.permute.xlu1 %v8515_v39  ;;  %336 = vperm.xlu0 %5766, %v6130_v63   ;;  %v768_v63 = vmul.f32 %v6237_v20, %v6151_v8  ;;  %v1156_v8 = vmul.f32 %v6251_v0, %v6175_v17  ;;  %v1352_v56 = vmax.f32 %v1288_v50, 0.0  ;;  %v830_v17 = vadd.f32 %v766_v61, %v442_v57 }
  0xe2   :  { %611 = vperm.xlu1 %5723, %v6272_v34   ;;  %v445_v50 = vmul.f32 %v6242_v59, %v6142_v6  ;;  %v773_v6 = vmul.f32 %v6237_v20, %v6228_v9 }
  0xe3   :  { %v6313_v41 = vpop.permute.xlu1 %181  ;;  %v896_v38 = vpop.permute.xlu0 %895  ;;  %v832_v36 = vadd.f32 %v768_v63, %v444_v62  ;;  %v772_v63 = vmul.f32 %v6237_v20, %v6162_v12  ;;  %v1161_v12 = vmul.f32 %v6251_v0, %v6292_v60  ;;  %v1414_v9 = vpack.c.bf16 %v1352_v56, %v1351_v5 }
  0xe4   :  { %v1151_v13 = vmul.f32 %v6251_v0, %v896_v38  ;;  %v1158_v38 = vmul.f32 %v6251_v0, %v6245_v29  ;;  %v835_v56 = vadd.f32 %v771_v19, %v447_v27 }
  0xe5   :  { %361 = vperm.xlu0 %5766, %v6148_v7   ;;  %v769_v7 = vmul.f32 %v6237_v20, %v6153_v10  ;;  %v1290_v10 = vadd.f32 %v6303_v21, %v1219_v40 }
  0xe6   :  { %v1215_v54 = vadd.f32 %v1151_v13, %v827_v1  ;;  %5724 = vset.pattern.permute.xlu1 %v8519_v28  ;;  %v834_v13 = vadd.f32 %v770_v48, %v446_v30 }
  0xe7   :  { %987 = vperm.xlu1 %5724, %v6216_v4   ;;  %v908_v3 = vpop.permute.xlu0 %907  ;;  %v1220_v4 = vadd.f32 %v1156_v8, %v832_v36  ;;  %v833_v61 = vadd.f32 %v769_v7, %v445_v50  ;;  %v1354_v8 = vmax.f32 %v1290_v10, 0.0 }
  0xe8   :  { %v1154_v37 = vmul.f32 %v6251_v0, %v908_v3  ;;  %v552_v33 = vpop.permute.xlu1 %551  ;;  %v1286_v1 = vadd.f32 %v6303_v21, %v1215_v54  ;;  %v449_v54 = vmul.f32 %v6242_v59, %v6211_v51  ;;  %v1222_v32 = vadd.f32 %v1158_v38, %v834_v13 }
  0xe9   :  { %366 = vperm.xlu0 %5766, %v6337_v45   ;;  %v1160_v51 = vmul.f32 %v6251_v0, %v6265_v15 }
  0xea   :  { %v1218_v43 = vadd.f32 %v1154_v37, %v830_v17  ;;  %v1350_v57 = vmax.f32 %v1286_v1, 0.0  ;;  %v837_v17 = vadd.f32 %v773_v6, %v449_v54  ;;  %v1293_v50 = vadd.f32 %v6303_v21, %v1222_v32 }
  0xeb   :  { %995 = vperm.xlu1 %5724, %v5955_v22   ;;  %v920_v44 = vpop.permute.xlu0 %919  ;;  %v1291_v22 = vadd.f32 %v6303_v21, %v1220_v4  ;;  %v450_v4 = vmul.f32 %v6242_v59, %v6085_v52  ;;  %v6398_v52 = vld [vmem:[%s8468_s0 + $0x1e0] sm:$0xff] }
  0xec   :  { %v1289_v40 = vadd.f32 %v6303_v21, %v1218_v43  ;;  %v1157_v29 = vmul.f32 %v6251_v0, %v920_v44  ;;  %v1413_v62 = vpack.c.bf16 %v1350_v57, %v1349_v31  ;;  %v836_v31 = vadd.f32 %v772_v63, %v448_v42 }
  0xed   :  { %v6367_v7 = vpop.permute.xlu1 %186  ;;  %376 = vperm.xlu0 %5766, %v6159_v11   ;;  %v1225_v1 = vadd.f32 %v1161_v12, %v837_v17  ;;  %v1355_v42 = vmax.f32 %v1291_v22, 0.0 }
  0xee   :  { %v1353_v48 = vmax.f32 %v1289_v40, 0.0  ;;  %v1221_v3 = vadd.f32 %v1157_v29, %v833_v61  ;;  %5614 = vmatprep.mubr.msk.bf16.mxu0 %vm1484_vm0, %v1413_v62  ;;  %v1224_v27 = vadd.f32 %v1160_v51, %v836_v31  ;;  %v1357_v61 = vmax.f32 %v1293_v50, 0.0 }
  0xef   :  { %999 = vperm.xlu1 %5724, %v6272_v34   ;;  %5615 = vmatmul.mubr.msk.bf16.vlgmr.msra.gmra.mxu0 %vm1484_vm0, %v1414_v9  ;;  %v928_v60 = vpop.permute.xlu0 %927  ;;  %v6384_v34 = vld [vmem:[%s8468_s0 + $0x1d0] sm:$0xff]  ;;  %v1296_v57 = vadd.f32 %v6303_v21, %v1225_v1  ;;  %v451_v29 = vmul.f32 %v6242_v59, %v6313_v41  ;;  %v452_v17 = vmul.f32 %v6242_v59, %v6367_v7  ;;  %v6429_v7 = vld [vmem:[%s8468_s0 + $0x168] sm:$0xff] }
  0xf0   :  { %v1415_v36 = vpack.c.bf16 %v1354_v8, %v1353_v48  ;;  %v1292_v11 = vadd.f32 %v6303_v21, %v1221_v3  ;;  %v1159_v37 = vmul.f32 %v6251_v0, %v928_v60  ;;  %v1295_v44 = vadd.f32 %v6303_v21, %v1224_v27 }
  0xf1   :  { %v192_v5 = vpop.permute.xlu1 %191  ;;  %401 = vperm.xlu0 %5766, %v6180_v14   ;;  %v774_v14 = vmul.f32 %v6237_v20, %v552_v33  ;;  %v775_v33 = vmul.f32 %v6237_v20, %v6171_v16  ;;  %v1360_v12 = vmax.f32 %v1296_v57, 0.0  ;;  %v776_v3 = vmul.f32 %v6237_v20, %v6182_v18 }
  0xf2   :  { %v1356_v10 = vmax.f32 %v1292_v11, 0.0  ;;  %v1223_v15 = vadd.f32 %v1159_v37, %v835_v56  ;;  %5618 = vmatprep.mubr.msk.bf16.mxu0 %vm1484_vm0, %v1415_v36  ;;  %v453_v54 = vmul.f32 %v6242_v59, %v192_v5  ;;  %v1359_v32 = vmax.f32 %v1295_v44, 0.0  ;;  %v6460_v44 = vld [vmem:[%s8468_s0 + $0x100] sm:$0xff] }
  0xf3   :  { %5725 = vset.pattern.permute.xlu1 %v8518_v2  ;;  %v940_v30 = vpop.permute.xlu0 %939  ;;  %v838_v62 = vadd.f32 %v774_v14, %v450_v4  ;;  %v839_v31 = vadd.f32 %v775_v33, %v451_v29  ;;  %v840_v37 = vadd.f32 %v776_v3, %v452_v17 }
  0xf4   :  { %v1416_v38 = vpack.c.bf16 %v1356_v10, %v1355_v42  ;;  %v1294_v43 = vadd.f32 %v6303_v21, %v1223_v15  ;;  %261 = vperm.xlu1 %5725, %v5965_v24   ;;  %v1162_v13 = vmul.f32 %v6251_v0, %v940_v30  ;;  %v1418_v51 = vpack.c.bf16 %v1360_v12, %v1359_v32 }
  0xf5   :  { %406 = vperm.xlu0 %5766, %v6384_v34   ;;  %v456_v12 = vmul.f32 %v6242_v59, %v6107_v58  ;;  %v2015_v58 = vld [vmem:[%s8472_s5 + $0x188] sm:$0xff] }
  0xf6   :  { %v1358_v63 = vmax.f32 %v1294_v43, 0.0  ;;  %v564_v6 = vpop.permute.xlu1 %563  ;;  %v1226_v16 = vadd.f32 %v1162_v13, %v838_v62  ;;  %v6447_v13 = vld [vmem:[%s8468_s0 + $0x170] sm:$0xff] }
  0xf7   :  { %v777_v19 = vmul.f32 %v6237_v20, %v564_v6  ;;  %5619 = vmatmul.mubr.msk.bf16.gmra.mxu0 %vm1484_vm0, %v1416_v38  ;;  %v952_v40 = vpop.permute.xlu0 %951 }
  0xf8   :  { %v1417_v8 = vpack.c.bf16 %v1358_v63, %v1357_v61  ;;  %5726 = vset.pattern.permute.xlu1 %v8515_v39  ;;  %v1165_v22 = vmul.f32 %v6251_v0, %v952_v40  ;;  %v1297_v60 = vadd.f32 %v6303_v21, %v1226_v16 }
  0xf9   :  { %615 = vperm.xlu1 %5726, %v6066_v46   ;;  %416 = vperm.xlu0 %5766, %v6398_v52   ;;  %v841_v9 = vadd.f32 %v777_v19, %v453_v54  ;;  %v455_v19 = vmul.f32 %v6242_v59, %v6096_v55  ;;  %v2023_v55 = vld [vmem:[%s8472_s5 + $0x1c8] sm:$0xff] }
  0xfa   :  { %5622 = vmatprep.mubr.msk.bf16.mxu0 %vm1484_vm0, %v1417_v8  ;;  %v1361_v42 = vmax.f32 %v1297_v60, 0.0  ;;  %v2027_v54 = vld [vmem:[%s8472_s5 + $0x1e8] sm:$0xff] }
  0xfb   :  { %v944_v48 = vpop.permute.xlu1 %943  ;;  %v960_v41 = vpop.permute.xlu0 %959  ;;  %v1229_v56 = vadd.f32 %v1165_v22, %v841_v9  ;;  %v5565_v9 = vcombine.high %v2023_v55, %v2027_v54  ;;  %v780_v22 = vmul.f32 %v6237_v20, %v6188_v23 }
  0xfc   :  { %v1163_v46 = vmul.f32 %v6251_v0, %v944_v48 }
  0xfd   :  { %5727 = vset.pattern.permute.xlu1 %v8518_v2  ;;  %5767 = vset.pattern.permute.xlu0 %v8515_v39  ;;  %v1300_v50 = vadd.f32 %v6303_v21, %v1229_v56 }
  0xfe   :  { %v1227_v36 = vadd.f32 %v1163_v46, %v839_v31  ;;  %266 = vperm.xlu1 %5727, %v5971_v25   ;;  %671 = vperm.xlu0 %5767, %v6277_v35   ;;  %v2019_v46 = vld [vmem:[%s8472_s5 + $0x1a8] sm:$0xff] }
  0xff   :  { %v948_v18 = vpop.permute.xlu1 %947  ;;  %5623 = vmatmul.mubr.msk.bf16.gmra.mxu0 %vm1484_vm0, %v1418_v51  ;;  %v6424_v11 = vpop.permute.xlu0 %971  ;;  %v1364_v38 = vmax.f32 %v1300_v50, 0.0  ;;  %2745 = vmatprep.subr.bf16.mxu0 %v5565_v9  ;;  %v5557_v23 = vcombine.high %v2015_v58, %v2019_v46  ;;  %v844_v51 = vadd.f32 %v780_v22, %v456_v12  ;;  %v2007_v50 = vld [vmem:[%s8472_s5 + $0x148] sm:$0xff] }
 0x100   :  { %v1298_v1 = vadd.f32 %v6303_v21, %v1227_v36  ;;  %v1164_v5 = vmul.f32 %v6251_v0, %v948_v18  ;;  %v5556_v36 = vcombine.low %v2015_v58, %v2019_v46  ;;  %v1991_v9 = vld [vmem:[%s8472_s5 + $0xc8] sm:$0xff] }
 0x101   :  { %v1995_v22 = vld [vmem:[%s8472_s5 + $0xe8] sm:$0xff] }
 0x102   :  { %v1362_v10 = vmax.f32 %v1298_v1, 0.0  ;;  %v1228_v15 = vadd.f32 %v1164_v5, %v840_v37  ;;  %271 = vperm.xlu1 %5727, %v6076_v49   ;;  %683 = vperm.xlu0 %5767, %v6429_v7   ;;  %v6498_v37 = vld [vmem:[%s8468_s0 + $0x118] sm:$0xff]  ;;  %v1983_v58 = vld [vmem:[%s8472_s5 + $0x88] sm:$0xff] }
 0x103   :  { %v6436_v27 = vpop.permute.xlu0 %983  ;;  %v1987_v46 = vld [vmem:[%s8472_s5 + $0xa8] sm:$0xff] }
 0x104   :  { %v1299_v30 = vadd.f32 %v6303_v21, %v1228_v15  ;;  %v197_v4 = vpop.permute.xlu1 %196  ;;  %v1419_v14 = vpack.c.bf16 %v1362_v10, %v1361_v42  ;;  %v2011_v10 = vld [vmem:[%s8472_s5 + $0x168] sm:$0xff] }
 0x105   :  { %v454_v32 = vmul.f32 %v6242_v59, %v197_v4 }
 0x106   :  { %v1363_v43 = vmax.f32 %v1299_v30, 0.0  ;;  %5728 = vset.pattern.permute.xlu1 %v8515_v39  ;;  %5626 = vmatprep.mubr.msk.bf16.mxu0 %vm1484_vm0, %v1419_v14  ;;  %v5549_v30 = vcombine.high %v2007_v50, %v2011_v10 }
 0x107   :  { %627 = vperm.xlu1 %5728, %v6076_v49   ;;  %v6442_v61 = vpop.permute.xlu0 %991  ;;  %687 = vperm.xlu0 %5767, %v6447_v13  }
 0x108   :  { %v1420_v57 = vpack.c.bf16 %v1364_v38, %v1363_v43  ;;  %v5548_v43 = vcombine.low %v2007_v50, %v2011_v10  ;;  %v1971_v50 = vld [vmem:[%s8472_s5 + $0x28] sm:$0xff] }
 0x109   :  { %v568_v63 = vpop.permute.xlu1 %567 }
 0x10a   :  { %5627 = vmatmul.mubr.msk.bf16.gmra.mxu0 %vm1484_vm0, %v1420_v57  ;;  %v778_v8 = vmul.f32 %v6237_v20, %v568_v63 }
 0x10b   :  { %5729 = vset.pattern.permute.xlu1 %v8519_v28  ;;  %v6453_v33 = vpop.permute.xlu0 %1003  ;;  %703 = vperm.xlu0 %5767, %v6337_v45  }
 0x10c   :  { %1007 = vperm.xlu1 %5729, %v5965_v24   ;;  %v842_v31 = vadd.f32 %v778_v8, %v454_v32  ;;  %v5533_v32 = vcombine.high %v1991_v9, %v1995_v22 }
 0x10d   :  { %v572_v6 = vpop.permute.xlu1 %571 }
 0x10e   :  { %v779_v40 = vmul.f32 %v6237_v20, %v572_v6 }
 0x10f   :  { %v6466_v24 = vpop.permute.xlu0 %1015 }
 0x110   :  { %1011 = vperm.xlu1 %5729, %v5971_v25   ;;  %v843_v29 = vadd.f32 %v779_v40, %v455_v19  ;;  %v1167_v25 = vmul.f32 %v6251_v0, %v960_v41  ;;  %v5564_v41 = vcombine.low %v2023_v55, %v2027_v54  ;;  %v2003_v40 = vld [vmem:[%s8472_s5 + $0x128] sm:$0xff] }
 0x112   :  { %v212_v49 = vpop.permute.xlu1 %211  ;;  %v1231_v48 = vadd.f32 %v1167_v25, %v843_v29  ;;  %2746 = vmatpush1.bf16.msra.mxu0 %v5564_v41 }
 0x113   :  { %v6481_v16 = vpop.permute.xlu0 %1023  ;;  %2747 = vmatprep.subr.bf16.mxu0 %v5557_v23  ;;  %v457_v15 = vmul.f32 %v6242_v59, %v212_v49  ;;  %v1999_v49 = vld [vmem:[%s8472_s5 + $0x108] sm:$0xff] }
 0x114   :  { %5730 = vset.pattern.permute.xlu1 %v8518_v2  ;;  %v1302_v60 = vadd.f32 %v6303_v21, %v1231_v48  ;;  %v5541_v25 = vcombine.high %v1999_v49, %v2003_v40  ;;  %v5540_v55 = vcombine.low %v1999_v49, %v2003_v40  ;;  %v8522_v40 = vld [vmem:[#allocation8_spill] sm:$0xff] }
 0x115   :  { %276 = vperm.xlu1 %5730, %v6460_v44  }
 0x116   :  { %2748 = vmatpush1.bf16.msra.mxu0 %v5556_v36  ;;  %v1366_v4 = vmax.f32 %v1302_v60, 0.0  ;;  %v5524_v60 = vcombine.low %v1983_v58, %v1987_v46 }
 0x117   :  { %v580_v62 = vpop.permute.xlu1 %579  ;;  %v6500_v1 = vpop.permute.xlu0 %1035  ;;  %2749 = vmatprep.subr.bf16.mxu0 %v5549_v30 }
 0x118   :  { %v781_v5 = vmul.f32 %v6237_v20, %v580_v62 }
 0x119   :  { %5731 = vset.pattern.permute.xlu1 %v8515_v39 }
 0x11a   :  { %631 = vperm.xlu1 %5731, %v6460_v44   ;;  %v845_v63 = vadd.f32 %v781_v5, %v457_v15  ;;  %2750 = vmatpush1.bf16.msra.mxu0 %v5548_v43  ;;  %v6575_v43 = vld [vmem:[%s8468_s0 + $0x1b0] sm:$0xff] }
 0x11b   :  { %v6521_v29 = vpop.permute.xlu0 %1047  ;;  %2751 = vmatprep.subr.bf16.mxu0 %v5541_v25  ;;  %v783_v25 = vmul.f32 %v6237_v20, %v8522_v40 }
 0x11c   :  { %v956_v3 = vpop.permute.xlu1 %955 }
 0x11d   :  { %v1166_v17 = vmul.f32 %v6251_v0, %v956_v3  ;;  %v5532_v3 = vcombine.low %v1991_v9, %v1995_v22 }
 0x11e   :  { %635 = vperm.xlu1 %5731, %v6090_v53   ;;  %2752 = vmatpush1.bf16.msra.mxu0 %v5540_v55 }
 0x11f   :  { %v1230_v56 = vadd.f32 %v1166_v17, %v842_v31  ;;  %v6535_v31 = vpop.permute.xlu0 %1055  ;;  %2753 = vmatprep.subr.bf16.mxu0 %v5533_v32 }
 0x120   :  { %v964_v18 = vpop.permute.xlu1 %963 }
 0x121   :  { %v1301_v42 = vadd.f32 %v6303_v21, %v1230_v56  ;;  %v1168_v53 = vmul.f32 %v6251_v0, %v964_v18  ;;  %v1979_v56 = vld [vmem:[%s8472_s5 + $0x68] sm:$0xff] }
 0x122   :  { %5732 = vset.pattern.permute.xlu1 %v8518_v2  ;;  %2754 = vmatpush1.bf16.msra.mxu0 %v5532_v3 }
 0x123   :  { %v1365_v14 = vmax.f32 %v1301_v42, 0.0  ;;  %v1232_v38 = vadd.f32 %v1168_v53, %v844_v51  ;;  %291 = vperm.xlu1 %5732, %v6498_v37   ;;  %v5525_v51 = vcombine.high %v1983_v58, %v1987_v46  ;;  %v6552_v36 = vpop.permute.xlu0 %1067  ;;  %v6557_v53 = vld [vmem:[%s8468_s0 + $0x1a8] sm:$0xff] }
 0x124   :  { %v968_v57 = vpop.permute.xlu1 %967  ;;  %715 = vperm.xlu0 %5767, %v6557_v53  }
 0x125   :  { %v1169_v6 = vmul.f32 %v6251_v0, %v968_v57  ;;  %v1421_v19 = vpack.c.bf16 %v1366_v4, %v1365_v14  ;;  %v1303_v62 = vadd.f32 %v6303_v21, %v1232_v38  ;;  %2755 = vmatprep.subr.bf16.mxu0 %v5525_v51  ;;  %v8520_v4 = vld [vmem:[#allocation6_spill] sm:$0xff] }
 0x126   :  { %2756 = vmatpush1.bf16.msra.mxu0 %v5524_v60  ;;  %v458_v14 = vmul.f32 %v6242_v59, %v8520_v4  ;;  %v8521_v57 = vld [vmem:[#allocation2_spill] sm:$0xff] }
 0x127   :  { %v1233_v8 = vadd.f32 %v1169_v6, %v845_v63  ;;  %5733 = vset.pattern.permute.xlu1 %v8515_v39  ;;  %5630 = vmatprep.mubr.msk.bf16.mxu0 %vm1484_vm0, %v1421_v19  ;;  %v1367_v48 = vmax.f32 %v1303_v62, 0.0  ;;  %v1170_v63 = vmul.f32 %v6251_v0, %v6424_v11  ;;  %v1173_v11 = vmul.f32 %v6251_v0, %v6436_v27 }
 0x128   :  { %643 = vperm.xlu1 %5733, %v6498_v37   ;;  %719 = vperm.xlu0 %5767, %v6575_v43  }
 0x129   :  { %v1304_v54 = vadd.f32 %v6303_v21, %v1233_v8  ;;  %v222_v12 = vpop.permute.xlu1 %221 }
 0x12a   :  { %v459_v62 = vmul.f32 %v6242_v59, %v222_v12 }
 0x12b   :  { %v1368_v41 = vmax.f32 %v1304_v54, 0.0  ;;  %v8523_v54 = vld [vmem:[#allocation4_spill] sm:$0xff] }
 0x12c   :  { %5734 = vset.pattern.permute.xlu1 %v8519_v28  ;;  %735 = vperm.xlu0 %5767, %v6384_v34   ;;  %v8524_v34 = vld [vmem:[#allocation9_spill] sm:$0xff] }
 0x12d   :  { %1019 = vperm.xlu1 %5734, %v6460_v44   ;;  %v1422_v17 = vpack.c.bf16 %v1368_v41, %v1367_v48  ;;  %v1975_v44 = vld [vmem:[%s8472_s5 + $0x48] sm:$0xff]  ;;  %v784_v48 = vmul.f32 %v6237_v20, %v8524_v34  ;;  %v847_v41 = vadd.f32 %v783_v25, %v459_v62  ;;  %v5779_v25 = vld [vmem:[%s8468_s0 + $0x130] sm:$0xff] }
 0x12e   :  { %v584_v23 = vpop.permute.xlu1 %583  ;;  %v5517_v18 = vcombine.high %v1975_v44, %v1979_v56  ;;  %v5516_v42 = vcombine.low %v1975_v44, %v1979_v56 }
 0x12f   :  { %5631 = vmatmul.mubr.msk.bf16.gmra.mxu0 %vm1484_vm0, %v1422_v17  ;;  %v782_v38 = vmul.f32 %v6237_v20, %v584_v23  ;;  %v8525_v23 = vld [vmem:[#allocation3_spill] sm:$0xff] }
 0x130   :  { %2757 = vmatprep.subr.bf16.mxu0 %v5517_v18 }
 0x131   :  { %1027 = vperm.xlu1 %5734, %v5978_v26   ;;  %v1967_v26 = vld [vmem:[%s8472_s5 + $0x8] sm:$0xff]  ;;  %2758 = vmatpush1.bf16.msra.mxu0 %v5516_v42  ;;  %v846_v6 = vadd.f32 %v782_v38, %v458_v14 }
 0x132   :  { %v5509_v10 = vcombine.high %v1967_v26, %v1971_v50  ;;  %v5508_v30 = vcombine.low %v1967_v26, %v1971_v50  ;;  %v8526_v50 = vld [vmem:[#allocation5_spill] sm:$0xff] }
 0x133   :  { %v227_v5 = vpop.permute.xlu1 %226  ;;  %v1234_v9 = vadd.f32 %v1170_v63, %v846_v6 }
 0x134   :  { %2759 = vmatprep.subr.bf16.mxu0 %v5509_v10  ;;  %v460_v12 = vmul.f32 %v6242_v59, %v227_v5 }
 0x135   :  { %1031 = vperm.xlu1 %5734, %v6498_v37   ;;  %v6570_v37 = vpop.permute.xlu0 %1079  ;;  %2760 = vmatpush1.bf16.msra.mxu0 %v5508_v30  ;;  %v1305_v17 = vadd.f32 %v6303_v21, %v1234_v9  ;;  %v1175_v9 = vmul.f32 %v6251_v0, %v6442_v61 }
 0x136   :  { %v848_v60 = vadd.f32 %v784_v48, %v460_v12 }
 0x137   :  { %v232_v15 = vpop.permute.xlu1 %231  ;;  %v1369_v18 = vmax.f32 %v1305_v17, 0.0 }
 0x138   :  { %v461_v8 = vmul.f32 %v6242_v59, %v232_v15 }
 0x139   :  { %5735 = vset.pattern.permute.xlu1 %v8518_v2  ;;  %v6589_v55 = vpop.permute.xlu0 %1087 }
 0x13a   :  { %301 = vperm.xlu1 %5735, %v8521_v57  }
 0x13c   :  { %v596_v19 = vpop.permute.xlu1 %595 }
 0x13d   :  { %v785_v49 = vmul.f32 %v6237_v20, %v596_v19  ;;  %v6601_v27 = vpop.permute.xlu0 %1099  ;;  %v5778_v19 = vld [vmem:[%s8468_s0 + $0x128] sm:$0xff] }
 0x13e   :  { %5736 = vset.pattern.permute.xlu1 %v8515_v39 }
 0x13f   :  { %647 = vperm.xlu1 %5736, %v8523_v54   ;;  %v849_v22 = vadd.f32 %v785_v49, %v461_v8  ;;  %v89_v8 = vld [vmem:[%s8468_s0 + $0x140] sm:$0xff] }
 0x141   :  { %v976_v32 = vpop.permute.xlu1 %975  ;;  %v1237_v58 = vadd.f32 %v1173_v11, %v849_v22  ;;  %v6608_v30 = vpop.permute.xlu0 %1111 }
 0x142   :  { %v1171_v3 = vmul.f32 %v6251_v0, %v976_v32 }
 0x143   :  { %5737 = vset.pattern.permute.xlu1 %v8518_v2  ;;  %v1308_v5 = vadd.f32 %v6303_v21, %v1237_v58 }
 0x144   :  { %v1235_v46 = vadd.f32 %v1171_v3, %v847_v41  ;;  %306 = vperm.xlu1 %5737, %v8525_v23   ;;  %v8527_v41 = vld [vmem:[#allocation10_spill] sm:$0xff] }
 0x145   :  { %v980_v51 = vpop.permute.xlu1 %979  ;;  %v1372_v14 = vmax.f32 %v1308_v5, 0.0  ;;  %v6613_v6 = vpop.permute.xlu0 %1119  ;;  %v788_v12 = vmul.f32 %v6237_v20, %v8527_v41  ;;  %v92_v5 = vld [vmem:[%s8468_s0 + $0x158] sm:$0xff] }
 0x146   :  { %v1306_v44 = vadd.f32 %v6303_v21, %v1235_v46  ;;  %v1172_v56 = vmul.f32 %v6251_v0, %v980_v51  ;;  %v8528_v51 = vld [vmem:[#allocation7_spill] sm:$0xff] }
 0x148   :  { %v1370_v42 = vmax.f32 %v1306_v44, 0.0  ;;  %v1236_v26 = vadd.f32 %v1172_v56, %v848_v60  ;;  %311 = vperm.xlu1 %5737, %v8526_v50  }
 0x149   :  { %v242_v40 = vpop.permute.xlu0 %241 }
 0x14a   :  { %v1307_v10 = vadd.f32 %v6303_v21, %v1236_v26  ;;  %v237_v15 = vpop.permute.xlu1 %236  ;;  %v1423_v4 = vpack.c.bf16 %v1370_v42, %v1369_v18  ;;  %v463_v11 = vmul.f32 %v6242_v59, %v242_v40 }
 0x14b   :  { %v462_v3 = vmul.f32 %v6242_v59, %v237_v15 }
 0x14c   :  { %v1371_v38 = vmax.f32 %v1307_v10, 0.0  ;;  %5739 = vset.pattern.permute.xlu1 %v8515_v39  ;;  %5634 = vmatprep.mubr.msk.bf16.mxu0 %vm1484_vm0, %v1423_v4 }
 0x14d   :  { %659 = vperm.xlu1 %5739, %v8526_v50   ;;  %v247_v34 = vpop.permute.xlu0 %246 }
 0x14e   :  { %v1424_v57 = vpack.c.bf16 %v1372_v14, %v1371_v38  ;;  %v464_v58 = vmul.f32 %v6242_v59, %v247_v34  ;;  %v6659_v34 = vld [vmem:[%s8468_s0 + $0x1e8] sm:$0xff] }
 0x14f   :  { %v600_v63 = vpop.permute.xlu1 %599  ;;  %747 = vperm.xlu0 %5767, %v6659_v34  }
 0x150   :  { %5635 = vmatmul.mubr.msk.bf16.gmra.mxu0 %vm1484_vm0, %v1424_v57  ;;  %v786_v48 = vmul.f32 %v6237_v20, %v600_v63  ;;  %v852_v56 = vadd.f32 %v788_v12, %v464_v58 }
 0x151   :  { %5740 = vset.pattern.permute.xlu1 %v8519_v28 }
 0x152   :  { %1039 = vperm.xlu1 %5740, %v5778_v19   ;;  %v850_v23 = vadd.f32 %v786_v48, %v462_v3  ;;  %v257_v48 = vpop.permute.xlu0 %256  ;;  %v1178_v3 = vmul.f32 %v6251_v0, %v6453_v33  ;;  %v5780_v33 = vld [vmem:[%s8468_s0 + $0x160] sm:$0xff] }
 0x153   :  { %v604_v49 = vpop.permute.xlu1 %603 }
 0x154   :  { %v787_v54 = vmul.f32 %v6237_v20, %v604_v49 }
 0x156   :  { %1043 = vperm.xlu1 %5740, %v5779_v25   ;;  %v851_v22 = vadd.f32 %v787_v54, %v463_v11 }
 0x158   :  { %v252_v62 = vpop.permute.xlu1 %251  ;;  %v1239_v17 = vadd.f32 %v1175_v9, %v851_v22 }
 0x159   :  { %v465_v15 = vmul.f32 %v6242_v59, %v252_v62 }
 0x15a   :  { %5741 = vset.pattern.permute.xlu1 %v8518_v2  ;;  %v1310_v60 = vadd.f32 %v6303_v21, %v1239_v17 }
 0x15b   :  { %316 = vperm.xlu1 %5741, %v89_v8  }
 0x15c   :  { %v1374_v10 = vmax.f32 %v1310_v60, 0.0 }
 0x15d   :  { %v612_v32 = vpop.permute.xlu1 %611 }
 0x15e   :  { %v789_v42 = vmul.f32 %v6237_v20, %v612_v32 }
 0x15f   :  { %5742 = vset.pattern.permute.xlu1 %v8515_v39 }
 0x160   :  { %663 = vperm.xlu1 %5742, %v89_v8   ;;  %v853_v57 = vadd.f32 %v789_v42, %v465_v15 }
 0x162   :  { %v988_v46 = vpop.permute.xlu1 %987 }
 0x163   :  { %v1174_v61 = vmul.f32 %v6251_v0, %v988_v46 }
 0x164   :  { %667 = vperm.xlu1 %5742, %v8528_v51  }
 0x165   :  { %v1238_v44 = vadd.f32 %v1174_v61, %v850_v23  ;;  %v8529_v23 = vld [vmem:[#allocation12_spill] sm:$0xff] }
 0x166   :  { %v996_v18 = vpop.permute.xlu1 %995  ;;  %v791_v61 = vmul.f32 %v6237_v20, %v8529_v23  ;;  %v1183_v23 = vmul.f32 %v6251_v0, %v6481_v16 }
 0x167   :  { %v1309_v26 = vadd.f32 %v6303_v21, %v1238_v44  ;;  %v1176_v50 = vmul.f32 %v6251_v0, %v996_v18  ;;  %v1181_v44 = vmul.f32 %v6251_v0, %v6466_v24 }
 0x168   :  { %5743 = vset.pattern.permute.xlu1 %v8518_v2 }
 0x169   :  { %v1373_v4 = vmax.f32 %v1309_v26, 0.0  ;;  %v1240_v14 = vadd.f32 %v1176_v50, %v852_v56  ;;  %331 = vperm.xlu1 %5743, %v92_v5  }
 0x16a   :  { %v1000_v38 = vpop.permute.xlu1 %999 }
 0x16b   :  { %v1177_v63 = vmul.f32 %v6251_v0, %v1000_v38  ;;  %v1425_v19 = vpack.c.bf16 %v1374_v10, %v1373_v4  ;;  %v1311_v49 = vadd.f32 %v6303_v21, %v1240_v14 }
 0x16d   :  { %v1241_v40 = vadd.f32 %v1177_v63, %v853_v57  ;;  %5744 = vset.pattern.permute.xlu1 %v8515_v39  ;;  %5638 = vmatprep.mubr.msk.bf16.mxu0 %vm1484_vm0, %v1425_v19  ;;  %v1375_v62 = vmax.f32 %v1311_v49, 0.0 }
 0x16e   :  { %675 = vperm.xlu1 %5744, %v92_v5  }
 0x16f   :  { %v1312_v25 = vadd.f32 %v6303_v21, %v1241_v40  ;;  %v262_v54 = vpop.permute.xlu1 %261 }
 0x170   :  { %v467_v51 = vmul.f32 %v6242_v59, %v262_v54  ;;  %v5781_v54 = vld [vmem:[%s8468_s0 + $0x178] sm:$0xff] }
 0x171   :  { %v1376_v11 = vmax.f32 %v1312_v25, 0.0 }
 0x172   :  { %5745 = vset.pattern.permute.xlu1 %v8519_v28  ;;  %v855_v26 = vadd.f32 %v791_v61, %v467_v51 }
 0x173   :  { %1051 = vperm.xlu1 %5745, %v89_v8   ;;  %v1426_v9 = vpack.c.bf16 %v1376_v11, %v1375_v62  ;;  %v6665_v8 = vld [vmem:[%s8468_s0 + $0x1f0] sm:$0xff] }
 0x174   :  { %v616_v22 = vpop.permute.xlu1 %615  ;;  %751 = vperm.xlu0 %5767, %v6665_v8  }
 0x175   :  { %5639 = vmatmul.mubr.msk.bf16.gmra.mxu0 %vm1484_vm0, %v1426_v9  ;;  %v790_v12 = vmul.f32 %v6237_v20, %v616_v22 }
 0x177   :  { %1059 = vperm.xlu1 %5745, %v6277_v35   ;;  %v466_v35 = vmul.f32 %v6242_v59, %v257_v48 }
 0x178   :  { %5772 = vset.pattern.permute.xlu0 %v8519_v28 }
 0x179   :  { %v267_v32 = vpop.permute.xlu1 %266  ;;  %v854_v17 = vadd.f32 %v790_v12, %v466_v35  ;;  %1131 = vperm.xlu0 %5772, %v6398_v52   ;;  %v6710_v35 = vld [vmem:[%s8468_s0 + $0x1f8] sm:$0xff] }
 0x17a   :  { %v468_v50 = vmul.f32 %v6242_v59, %v267_v32 }
 0x17b   :  { %1063 = vperm.xlu1 %5745, %v92_v5   ;;  %v1242_v56 = vadd.f32 %v1178_v3, %v854_v17  ;;  %v8530_v5 = vld [vmem:[#allocation13_spill] sm:$0xff]  ;;  %v282_v3 = vpop.permute.xlu0 %281 }
 0x17c   :  { %v792_v42 = vmul.f32 %v6237_v20, %v8530_v5 }
 0x17d   :  { %v272_v41 = vpop.permute.xlu1 %271  ;;  %v1313_v15 = vadd.f32 %v6303_v21, %v1242_v56  ;;  %1143 = vperm.xlu0 %5772, %v6710_v35  }
 0x17e   :  { %v469_v60 = vmul.f32 %v6242_v59, %v272_v41  ;;  %v856_v38 = vadd.f32 %v792_v42, %v468_v50 }
 0x17f   :  { %5746 = vset.pattern.permute.xlu1 %v8518_v2  ;;  %v1377_v19 = vmax.f32 %v1313_v15, 0.0 }
 0x180   :  { %341 = vperm.xlu1 %5746, %v6429_v7  }
 0x182   :  { %v628_v58 = vpop.permute.xlu1 %627 }
 0x183   :  { %v793_v46 = vmul.f32 %v6237_v20, %v628_v58  ;;  %v97_v58 = vld [vmem:[%s8468_s0 + $0x180] sm:$0xff] }
 0x184   :  { %5747 = vset.pattern.permute.xlu1 %v8515_v39 }
 0x185   :  { %679 = vperm.xlu1 %5747, %v5780_v33   ;;  %v857_v18 = vadd.f32 %v793_v46, %v469_v60 }
 0x187   :  { %v1008_v52 = vpop.permute.xlu1 %1007  ;;  %v1245_v4 = vadd.f32 %v1181_v44, %v857_v18  ;;  %v8531_v18 = vld [vmem:[#allocation14_spill] sm:$0xff] }
 0x188   :  { %v1179_v10 = vmul.f32 %v6251_v0, %v1008_v52  ;;  %v796_v52 = vmul.f32 %v6237_v20, %v8531_v18 }
 0x189   :  { %5748 = vset.pattern.permute.xlu1 %v8518_v2  ;;  %v1316_v49 = vadd.f32 %v6303_v21, %v1245_v4  ;;  %v100_v4 = vld [vmem:[%s8468_s0 + $0x198] sm:$0xff] }
 0x18a   :  { %v1243_v14 = vadd.f32 %v1179_v10, %v855_v26  ;;  %346 = vperm.xlu1 %5748, %v6447_v13   ;;  %v5782_v26 = vld [vmem:[%s8468_s0 + $0x188] sm:$0xff] }
 0x18b   :  { %v1012_v24 = vpop.permute.xlu1 %1011  ;;  %v1380_v22 = vmax.f32 %v1316_v49, 0.0 }
 0x18c   :  { %v1314_v57 = vadd.f32 %v6303_v21, %v1243_v14  ;;  %v1180_v63 = vmul.f32 %v6251_v0, %v1012_v24 }
 0x18e   :  { %v1378_v40 = vmax.f32 %v1314_v57, 0.0  ;;  %v1244_v25 = vadd.f32 %v1180_v63, %v856_v38  ;;  %351 = vperm.xlu1 %5748, %v5781_v54  }
 0x190   :  { %v1315_v62 = vadd.f32 %v6303_v21, %v1244_v25  ;;  %v277_v11 = vpop.permute.xlu1 %276  ;;  %v1427_v9 = vpack.c.bf16 %v1378_v40, %v1377_v19 }
 0x191   :  { %v470_v33 = vmul.f32 %v6242_v59, %v277_v11 }
 0x192   :  { %v1379_v32 = vmax.f32 %v1315_v62, 0.0  ;;  %5749 = vset.pattern.permute.xlu1 %v8515_v39  ;;  %5642 = vmatprep.mubr.msk.bf16.mxu0 %vm1484_vm0, %v1427_v9 }
 0x193   :  { %691 = vperm.xlu1 %5749, %v5781_v54  }
 0x194   :  { %v1428_v48 = vpack.c.bf16 %v1380_v22, %v1379_v32 }
 0x195   :  { %v632_v41 = vpop.permute.xlu1 %631 }
 0x196   :  { %5643 = vmatmul.mubr.msk.bf16.gmra.mxu0 %vm1484_vm0, %v1428_v48  ;;  %v794_v60 = vmul.f32 %v6237_v20, %v632_v41  ;;  %v6746_v41 = vld [vmem:[%s8473_s4] ss:$0 sm:$0xff] }
 0x197   :  { %5750 = vset.pattern.permute.xlu1 %v8519_v28  ;;  %2777 = vmatprep.mubr.bf16.mxu0 %v8518_v2 }
 0x198   :  { %1071 = vperm.xlu1 %5750, %v6429_v7   ;;  %v471_v7 = vmul.f32 %v6242_v59, %v282_v3  ;;  %v858_v5 = vadd.f32 %v794_v60, %v470_v33 }
 0x199   :  { %v636_v12 = vpop.permute.xlu1 %635 }
 0x19a   :  { %v795_v46 = vmul.f32 %v6237_v20, %v636_v12 }
 0x19c   :  { %1075 = vperm.xlu1 %5750, %v6447_v13   ;;  %v859_v61 = vadd.f32 %v795_v46, %v471_v7  ;;  %v287_v13 = vpop.permute.xlu0 %286 }
 0x19d   :  { %v472_v42 = vmul.f32 %v6242_v59, %v287_v13 }
 0x19e   :  { %v292_v17 = vpop.permute.xlu1 %291  ;;  %v1247_v44 = vadd.f32 %v1183_v23, %v859_v61 }
 0x19f   :  { %v860_v14 = vadd.f32 %v796_v52, %v472_v42  ;;  %v473_v63 = vmul.f32 %v6242_v59, %v292_v17 }
 0x1a0   :  { %5751 = vset.pattern.permute.xlu1 %v8518_v2  ;;  %v1318_v10 = vadd.f32 %v6303_v21, %v1247_v44  ;;  %v297_v62 = vpop.permute.xlu0 %296 }
 0x1a1   :  { %356 = vperm.xlu1 %5751, %v97_v58  }
 0x1a2   :  { %v1382_v25 = vmax.f32 %v1318_v10, 0.0 }
 0x1a3   :  { %v644_v51 = vpop.permute.xlu1 %643 }
 0x1a4   :  { %v797_v24 = vmul.f32 %v6237_v20, %v644_v51  ;;  %v6751_v46 = vpop.permute.xlu0 %321 }
 0x1a5   :  { %5752 = vset.pattern.permute.xlu1 %v8515_v39 }
 0x1a6   :  { %695 = vperm.xlu1 %5752, %v97_v58   ;;  %v861_v11 = vadd.f32 %v797_v24, %v473_v63 }
 0x1a8   :  { %v1020_v56 = vpop.permute.xlu1 %1019 }
 0x1a9   :  { %v1182_v16 = vmul.f32 %v6251_v0, %v1020_v56 }
 0x1aa   :  { %699 = vperm.xlu1 %5752, %v5782_v26  }
 0x1ab   :  { %v1246_v50 = vadd.f32 %v1182_v16, %v858_v5 }
 0x1ac   :  { %v1028_v15 = vpop.permute.xlu1 %1027 }
 0x1ad   :  { %v1184_v38 = vmul.f32 %v6251_v0, %v1028_v15  ;;  %v1317_v57 = vadd.f32 %v6303_v21, %v1246_v50 }
 0x1ae   :  { %5753 = vset.pattern.permute.xlu1 %v8518_v2 }
 0x1af   :  { %v1248_v19 = vadd.f32 %v1184_v38, %v860_v14  ;;  %371 = vperm.xlu1 %5753, %v100_v4   ;;  %v5616_v49 = vpop.f32.mrf.mxu0  ;;  %v1381_v40 = vmax.f32 %v1317_v57, 0.0 }
 0x1b0   :  { %v1032_v54 = vpop.permute.xlu1 %1031  ;;  %v1624_v50 = vadd.f32 %v5616_v49, %v6746_v41 }
 0x1b1   :  { %v1185_v9 = vmul.f32 %v6251_v0, %v1032_v54  ;;  %v1615_v22 = vpop.f32.mrf.mxu0  ;;  %v1429_v32 = vpack.c.bf16 %v1382_v25, %v1381_v40  ;;  %v1319_v48 = vadd.f32 %v6303_v21, %v1248_v19  ;;  %v474_v40 = vmul.f32 %v6242_v59, %v297_v62 }
 0x1b2   :  { %v1616_v17 = vadd.f32 %v6746_v41, %v1615_v22  ;;  %v1872_v14 = vmax.f32 %v1624_v50, 0.0 }
 0x1b3   :  { %v1249_v12 = vadd.f32 %v1185_v9, %v861_v11  ;;  %5754 = vset.pattern.permute.xlu1 %v8515_v39  ;;  %v5617_v3 = vpop.f32.mrf.mxu0  ;;  %5646 = vmatprep.mubr.msk.bf16.mxu1 %vm1484_vm0, %v1429_v32  ;;  %v1383_v60 = vmax.f32 %v1319_v48, 0.0  ;;  %v1186_v11 = vmul.f32 %v6251_v0, %v6500_v1  ;;  %v5783_v1 = vld [vmem:[%s8468_s0 + $0x1a0] sm:$0xff] }
 0x1b4   :  { %707 = vperm.xlu1 %5754, %v100_v4   ;;  %v1870_v44 = vmax.f32 %v1616_v17, 0.0  ;;  %v1627_v5 = vadd.f32 %v5617_v3, %v6746_v41 }
 0x1b5   :  { %v1320_v7 = vadd.f32 %v6303_v21, %v1249_v12  ;;  %v302_v23 = vpop.permute.xlu1 %301  ;;  %v1618_v61 = vpop.f32.mrf.mxu0 }
 0x1b6   :  { %v1619_v51 = vadd.f32 %v6746_v41, %v1618_v61  ;;  %v6759_v21 = vpop.permute.xlu0 %326  ;;  %v475_v12 = vmul.f32 %v6242_v59, %v302_v23  ;;  %v1189_v23 = vmul.f32 %v6251_v0, %v6521_v29  ;;  %v800_v29 = vmul.f32 %v6237_v20, %v6294_v47 }
 0x1b7   :  { %v1384_v13 = vmax.f32 %v1320_v7, 0.0  ;;  %v5620_v33 = vpop.f32.mrf.mxu0 }
 0x1b8   :  { %v1871_v56 = vmax.f32 %v1619_v51, 0.0  ;;  %5755 = vset.pattern.permute.xlu1 %v8519_v28  ;;  %v1640_v7 = vadd.f32 %v5620_v33, %v6746_v41  ;;  %v8532_v51 = vld [vmem:[#allocation15_spill] sm:$0xff] }
 0x1b9   :  { %1083 = vperm.xlu1 %5755, %v97_v58   ;;  %v1631_v18 = vpop.f32.mrf.mxu0  ;;  %v1430_v52 = vpack.c.bf16 %v1384_v13, %v1383_v60  ;;  %v1873_v58 = vmax.f32 %v1627_v5, 0.0  ;;  %v799_v60 = vmul.f32 %v6237_v20, %v8532_v51 }
 0x1ba   :  { %v6757_v42 = vpack.c.bf16 %v1871_v56, %v1870_v44  ;;  %v648_v16 = vpop.permute.xlu1 %647  ;;  %v6766_v24 = vpop.permute.xlu0 %336  ;;  %v1632_v49 = vadd.f32 %v6746_v41, %v1631_v18 }
 0x1bb   :  { %v5621_v26 = vpop.f32.mrf.mxu0  ;;  %5647 = vmatmul.mubr.msk.bf16.vlgmr.msra.gmra.mxu1 %vm1484_vm0, %v1430_v52  ;;  %v6768_v38 = vpack.c.bf16 %v1873_v58, %v1872_v14  ;;  %v863_v52 = vadd.f32 %v799_v60, %v475_v12  ;;  %v6811_v58 = vld [vmem:[%s8471_s2] ss:$0 sm:$0xff]  ;;  %v5785_v12 = vld [vmem:[%s8468_s0 + $0x1b8] sm:$0xff] }
 0x1bc   :  { %2778 = vmatmul.mubr.bf16.vlgmr.msra.gmra.mxu0 %v6757_v42  ;;  %v1874_v9 = vmax.f32 %v1632_v49, 0.0  ;;  %v1643_v62 = vadd.f32 %v5621_v26, %v6746_v41  ;;  %v1876_v26 = vmax.f32 %v1640_v7, 0.0 }
 0x1bd   :  { %1091 = vperm.xlu1 %5755, %v6337_v45   ;;  %2787 = vmatprep.mubr.bf16.mxu0 %v8518_v2  ;;  %v1634_v10 = vpop.f32.mrf.mxu0  ;;  %v798_v45 = vmul.f32 %v6237_v20, %v648_v16 }
 0x1be   :  { %v1635_v57 = vadd.f32 %v6746_v41, %v1634_v10  ;;  %v6780_v25 = vpop.permute.xlu0 %361  ;;  %v1877_v18 = vmax.f32 %v1643_v62, 0.0 }
 0x1bf   :  { %v307_v15 = vpop.permute.xlu1 %306  ;;  %v6771_v63 = vpop.f32.mrf.mxu0  ;;  %v862_v22 = vadd.f32 %v798_v45, %v474_v40 }
 0x1c0   :  { %v476_v5 = vmul.f32 %v6242_v59, %v307_v15  ;;  %v6815_v15 = vpack.c.bf16 %v1877_v18, %v1876_v26  ;;  %v1656_v26 = vadd.f32 %v6771_v63, %v6746_v41 }
 0x1c1   :  { %1095 = vperm.xlu1 %5755, %v100_v4   ;;  %v1875_v4 = vmax.f32 %v1635_v57, 0.0  ;;  %v1647_v54 = vpop.f32.mrf.mxu0  ;;  %v1250_v13 = vadd.f32 %v1186_v11, %v862_v22 }
 0x1c2   :  { %v6800_v56 = vpop.permute.xlu0 %366  ;;  %v864_v49 = vadd.f32 %v800_v29, %v476_v5  ;;  %v1648_v11 = vadd.f32 %v6746_v41, %v1647_v54 }
 0x1c3   :  { %v312_v19 = vpop.permute.xlu1 %311  ;;  %v6787_v3 = vpack.c.bf16 %v1875_v4, %v1874_v9  ;;  %v5625_v61 = vpop.f32.mrf.mxu0  ;;  %v1321_v10 = vadd.f32 %v6811_v58, %v1250_v13 }
 0x1c4   :  { %2788 = vmatmul.mubr.bf16.gmra.mxu0 %v6768_v38  ;;  %v477_v17 = vmul.f32 %v6242_v59, %v312_v19  ;;  %v1878_v60 = vmax.f32 %v1648_v11, 0.0  ;;  %v1659_v18 = vadd.f32 %v5625_v61, %v6746_v41 }
 0x1c5   :  { %5756 = vset.pattern.permute.xlu1 %v8518_v2  ;;  %2797 = vmatprep.mubr.bf16.mxu0 %v8518_v2  ;;  %v1650_v50 = vpop.f32.mrf.mxu0  ;;  %v1385_v22 = vmax.f32 %v1321_v10, 0.0 }
 0x1c6   :  { %381 = vperm.xlu1 %5756, %v6557_v53   ;;  %v1651_v45 = vadd.f32 %v6746_v41, %v1650_v50  ;;  %v6820_v4 = vpop.permute.xlu0 %376  ;;  %v1881_v50 = vmax.f32 %v1659_v18, 0.0 }
 0x1c8   :  { %v660_v32 = vpop.permute.xlu1 %659 }
 0x1c9   :  { %v801_v48 = vmul.f32 %v6237_v20, %v660_v32 }
 0x1ca   :  { %5757 = vset.pattern.permute.xlu1 %v8515_v39  ;;  %v5628_v9 = vpop.f32.mrf.mxu0 }
 0x1cb   :  { %711 = vperm.xlu1 %5757, %v5783_v1   ;;  %v865_v44 = vadd.f32 %v801_v48, %v477_v17  ;;  %v1879_v17 = vmax.f32 %v1651_v45, 0.0 }
 0x1cc   :  { %2798 = vmatmul.mubr.bf16.gmra.mxu0 %v6787_v3  ;;  %v1663_v51 = vpop.f32.mrf.mxu0 }
 0x1cd   :  { %v1040_v33 = vpop.permute.xlu1 %1039  ;;  %2807 = vmatprep.mubr.bf16.mxu0 %v8518_v2  ;;  %v1253_v14 = vadd.f32 %v1189_v23, %v865_v44  ;;  %v6832_v44 = vpop.permute.xlu0 %401 }
 0x1ce   :  { %v1187_v16 = vmul.f32 %v6251_v0, %v1040_v33  ;;  %v6835_v33 = vpack.c.bf16 %v1879_v17, %v1878_v60  ;;  %v5629_v5 = vpop.f32.mrf.mxu0 }
 0x1cf   :  { %5758 = vset.pattern.permute.xlu1 %v8518_v2  ;;  %v1324_v32 = vadd.f32 %v6811_v58, %v1253_v14  ;;  %v1880_v14 = vmax.f32 %v1656_v26, 0.0  ;;  %v5786_v26 = vld [vmem:[%s8468_s0 + $0x1c8] sm:$0xff] }
 0x1d0   :  { %v1251_v57 = vadd.f32 %v1187_v16, %v863_v52  ;;  %386 = vperm.xlu1 %5758, %v6575_v43   ;;  %v1666_v29 = vpop.f32.mrf.mxu0 }
 0x1d1   :  { %v1044_v19 = vpop.permute.xlu1 %1043  ;;  %v1388_v23 = vmax.f32 %v1324_v32, 0.0  ;;  %v6844_v61 = vpop.permute.xlu0 %406  ;;  %v1667_v63 = vadd.f32 %v6746_v41, %v1666_v29  ;;  %v1191_v32 = vmul.f32 %v6251_v0, %v6535_v31 }
 0x1d2   :  { %v1322_v40 = vadd.f32 %v6811_v58, %v1251_v57  ;;  %v1188_v47 = vmul.f32 %v6251_v0, %v1044_v19  ;;  %v6846_v57 = vpack.c.bf16 %v1881_v50, %v1880_v14  ;;  %v1664_v19 = vadd.f32 %v6746_v41, %v1663_v51  ;;  %v108_v14 = vld [vmem:[%s8468_s0 + $0x1d8] sm:$0xff] }
 0x1d3   :  { %v480_v51 = vmul.f32 %v6242_v59, %v6759_v21 }
 0x1d4   :  { %v1386_v62 = vmax.f32 %v1322_v40, 0.0  ;;  %v1252_v48 = vadd.f32 %v1188_v47, %v864_v49  ;;  %391 = vperm.xlu1 %5758, %v5785_v12   ;;  %2808 = vmatmul.mubr.bf16.gmra.mxu0 %v6815_v15  ;;  %v479_v49 = vmul.f32 %v6242_v59, %v6751_v46  ;;  %v1882_v46 = vmax.f32 %v1664_v19, 0.0 }
 0x1d5   :  { %2817 = vmatprep.mubr.bf16.mxu0 %v8518_v2  ;;  %v6860_v47 = vpop.permute.xlu0 %416 }
 0x1d6   :  { %v1431_v7 = vpack.c.bf16 %v1386_v62, %v1385_v22  ;;  %v1323_v1 = vadd.f32 %v6811_v58, %v1252_v48  ;;  %v317_v54 = vpop.permute.xlu1 %316  ;;  %v1675_v62 = vadd.f32 %v5629_v5, %v6746_v41 }
 0x1d7   :  { %v478_v31 = vmul.f32 %v6242_v59, %v317_v54 }
 0x1d8   :  { %v1387_v13 = vmax.f32 %v1323_v1, 0.0  ;;  %5759 = vset.pattern.permute.xlu1 %v8515_v39  ;;  %5650 = vmatprep.mubr.msk.bf16.mxu1 %vm1484_vm0, %v1431_v7  ;;  %v1672_v7 = vadd.f32 %v5628_v9, %v6746_v41 }
 0x1d9   :  { %723 = vperm.xlu1 %5759, %v5785_v12   ;;  %v672_v12 = vpop.permute.xlu0 %671 }
 0x1da   :  { %v1432_v52 = vpack.c.bf16 %v1388_v23, %v1387_v13  ;;  %v804_v60 = vmul.f32 %v6237_v20, %v672_v12  ;;  %v1885_v23 = vmax.f32 %v1675_v62, 0.0  ;;  %v1884_v5 = vmax.f32 %v1672_v7, 0.0 }
 0x1db   :  { %v664_v16 = vpop.permute.xlu1 %663 }
 0x1dc   :  { %5651 = vmatmul.mubr.msk.bf16.gmra.mxu1 %vm1484_vm0, %v1432_v52  ;;  %2818 = vmatmul.mubr.bf16.gmra.mxu0 %v6835_v33  ;;  %v802_v17 = vmul.f32 %v6237_v20, %v664_v16  ;;  %v868_v54 = vadd.f32 %v804_v60, %v480_v51  ;;  %v6885_v29 = vpack.c.bf16 %v1885_v23, %v1884_v5 }
 0x1dd   :  { %5760 = vset.pattern.permute.xlu1 %v8519_v28  ;;  %2827 = vmatprep.mubr.bf16.mxu0 %v8518_v2 }
 0x1de   :  { %1103 = vperm.xlu1 %5760, %v6557_v53   ;;  %v6858_v53 = vld [vmem:[%s8468_s0 + $0x1c0] sm:$0xff]  ;;  %v866_v18 = vadd.f32 %v802_v17, %v478_v31 }
 0x1df   :  { %v668_v10 = vpop.permute.xlu1 %667 }
 0x1e0   :  { %v803_v45 = vmul.f32 %v6237_v20, %v668_v10 }
 0x1e2   :  { %1107 = vperm.xlu1 %5760, %v6575_v43   ;;  %v1883_v43 = vmax.f32 %v1667_v63, 0.0  ;;  %v867_v11 = vadd.f32 %v803_v45, %v479_v49 }
 0x1e4   :  { %v332_v40 = vpop.permute.xlu1 %331  ;;  %2828 = vmatmul.mubr.bf16.gmra.mxu0 %v6846_v57  ;;  %v6868_v48 = vpack.c.bf16 %v1883_v43, %v1882_v46  ;;  %v1255_v1 = vadd.f32 %v1191_v32, %v867_v11  ;;  %v2022_v32 = vld [vmem:[%s8472_s5 + $0x1c0] sm:$0xff] }
 0x1e5   :  { %2837 = vmatprep.mubr.bf16.mxu0 %v8518_v2  ;;  %v481_v46 = vmul.f32 %v6242_v59, %v332_v40 }
 0x1e6   :  { %5761 = vset.pattern.permute.xlu1 %v8518_v2  ;;  %v1326_v16 = vadd.f32 %v6811_v58, %v1255_v1 }
 0x1e7   :  { %396 = vperm.xlu1 %5761, %v6858_v53  }
 0x1e8   :  { %v1390_v43 = vmax.f32 %v1326_v16, 0.0 }
 0x1e9   :  { %v676_v22 = vpop.permute.xlu1 %675 }
 0x1ea   :  { %v805_v63 = vmul.f32 %v6237_v20, %v676_v22  ;;  %v2026_v22 = vld [vmem:[%s8472_s5 + $0x1e0] sm:$0xff] }
 0x1eb   :  { %5762 = vset.pattern.permute.xlu1 %v8515_v39  ;;  %v5562_v40 = vcombine.low %v2022_v32, %v2026_v22  ;;  %v5563_v7 = vcombine.high %v2022_v32, %v2026_v22  ;;  %v2018_v32 = vld [vmem:[%s8472_s5 + $0x1a0] sm:$0xff] }
 0x1ec   :  { %727 = vperm.xlu1 %5762, %v6858_v53   ;;  %2838 = vmatmul.mubr.bf16.gmra.mxu0 %v6868_v48  ;;  %v869_v31 = vadd.f32 %v805_v63, %v481_v46 }
 0x1ed   :  { %2847 = vmatprep.mubr.bf16.mxu0 %v8518_v2  ;;  %2392 = vmatprep.subr.bf16.mxu1 %v5563_v7  ;;  %v2006_v7 = vld [vmem:[%s8472_s5 + $0x140] sm:$0xff] }
 0x1ee   :  { %v1052_v13 = vpop.permute.xlu1 %1051  ;;  %2393 = vmatpush1.bf16.msra.mxu1 %v5562_v40 }
 0x1ef   :  { %v1190_v52 = vmul.f32 %v6251_v0, %v1052_v13  ;;  %v5632_v9 = vpop.f32.mrf.mxu0 }
 0x1f0   :  { %731 = vperm.xlu1 %5762, %v5786_v26  }
 0x1f1   :  { %v1254_v21 = vadd.f32 %v1190_v52, %v866_v18  ;;  %v1679_v50 = vpop.f32.mrf.mxu0 }
 0x1f2   :  { %v1060_v10 = vpop.permute.xlu1 %1059  ;;  %v1680_v11 = vadd.f32 %v6746_v41, %v1679_v50  ;;  %v1688_v50 = vadd.f32 %v5632_v9, %v6746_v41  ;;  %v5787_v9 = vld [vmem:[%s8468_s0 + $0x1d0] sm:$0xff] }
 0x1f3   :  { %v1325_v19 = vadd.f32 %v6811_v58, %v1254_v21  ;;  %v1192_v49 = vmul.f32 %v6251_v0, %v1060_v10  ;;  %v5633_v45 = vpop.f32.mrf.mxu0 }
 0x1f4   :  { %5763 = vset.pattern.permute.xlu1 %v8518_v2  ;;  %2848 = vmatmul.mubr.bf16.gmra.mxu0 %v6885_v29  ;;  %v1886_v13 = vmax.f32 %v1680_v11, 0.0  ;;  %v1691_v16 = vadd.f32 %v5633_v45, %v6746_v41  ;;  %v1888_v45 = vmax.f32 %v1688_v50, 0.0  ;;  %v2014_v11 = vld [vmem:[%s8472_s5 + $0x180] sm:$0xff] }
 0x1f5   :  { %v1389_v62 = vmax.f32 %v1325_v19, 0.0  ;;  %v1256_v12 = vadd.f32 %v1192_v49, %v868_v54  ;;  %411 = vperm.xlu1 %5763, %v108_v14   ;;  %v1682_v17 = vpop.f32.mrf.mxu0  ;;  %2857 = vmatprep.mubr.bf16.mxu0 %v8518_v2  ;;  %v5555_v22 = vcombine.high %v2014_v11, %v2018_v32 }
 0x1f6   :  { %v1683_v1 = vadd.f32 %v6746_v41, %v1682_v17  ;;  %v1064_v51 = vpop.permute.xlu1 %1063  ;;  %v1889_v19 = vmax.f32 %v1691_v16, 0.0 }
 0x1f7   :  { %v1433_v60 = vpack.c.bf16 %v1390_v43, %v1389_v62  ;;  %v1193_v23 = vmul.f32 %v6251_v0, %v1064_v51  ;;  %v1327_v52 = vadd.f32 %v6811_v58, %v1256_v12  ;;  %2394 = vmatprep.subr.bf16.mxu1 %v5555_v22  ;;  %v482_v12 = vmul.f32 %v6242_v59, %v6766_v24 }
 0x1f8   :  { %v1887_v18 = vmax.f32 %v1683_v1, 0.0  ;;  %v6919_v46 = vpack.c.bf16 %v1889_v19, %v1888_v45  ;;  %v2010_v1 = vld [vmem:[%s8472_s5 + $0x160] sm:$0xff] }
 0x1f9   :  { %v1257_v5 = vadd.f32 %v1193_v23, %v869_v31  ;;  %5764 = vset.pattern.permute.xlu1 %v8515_v39  ;;  %5654 = vmatprep.mubr.msk.bf16.mxu1 %vm1484_vm0, %v1433_v60  ;;  %v1391_v10 = vmax.f32 %v1327_v52, 0.0  ;;  %v5547_v51 = vcombine.high %v2006_v7, %v2010_v1  ;;  %v684_v31 = vpop.permute.xlu0 %683  ;;  %v1194_v23 = vmul.f32 %v6251_v0, %v6552_v36  ;;  %v1998_v36 = vld [vmem:[%s8472_s5 + $0x100] sm:$0xff] }
 0x1fa   :  { %v6910_v26 = vpack.c.bf16 %v1887_v18, %v1886_v13  ;;  %739 = vperm.xlu1 %5764, %v108_v14  }
 0x1fb   :  { %v1328_v21 = vadd.f32 %v6811_v58, %v1257_v5  ;;  %v342_v54 = vpop.permute.xlu1 %341  ;;  %v807_v5 = vmul.f32 %v6237_v20, %v684_v31 }
 0x1fc   :  { %2858 = vmatmul.mubr.bf16.gmra.mxu0 %v6910_v26  ;;  %v483_v52 = vmul.f32 %v6242_v59, %v342_v54  ;;  %v2002_v54 = vld [vmem:[%s8472_s5 + $0x120] sm:$0xff] }
 0x1fd   :  { %v1392_v63 = vmax.f32 %v1328_v21, 0.0  ;;  %2867 = vmatprep.mubr.bf16.mxu0 %v8518_v2  ;;  %v688_v50 = vpop.permute.xlu0 %687  ;;  %v5539_v45 = vcombine.high %v1998_v36, %v2002_v54 }
 0x1fe   :  { %5765 = vset.pattern.permute.xlu1 %v8519_v28 }
 0x1ff   :  { %v1434_v49 = vpack.c.bf16 %v1392_v63, %v1391_v10  ;;  %1115 = vperm.xlu1 %5765, %v6858_v53   ;;  %v5554_v53 = vcombine.low %v2014_v11, %v2018_v32  ;;  %v5788_v63 = vld [vmem:[%s8468_s0 + $0x1e0] sm:$0xff]  ;;  %v871_v11 = vadd.f32 %v807_v5, %v483_v52 }
 0x200   :  { %v680_v43 = vpop.permute.xlu1 %679  ;;  %v1990_v52 = vld [vmem:[%s8472_s5 + $0xc0] sm:$0xff] }
 0x201   :  { %5655 = vmatmul.mubr.msk.bf16.gmra.mxu1 %vm1484_vm0, %v1434_v49  ;;  %v806_v17 = vmul.f32 %v6237_v20, %v680_v43  ;;  %v5538_v49 = vcombine.low %v1998_v36, %v2002_v54  ;;  %v1197_v43 = vmul.f32 %v6251_v0, %v6570_v37  ;;  %v1994_v5 = vld [vmem:[%s8472_s5 + $0xe0] sm:$0xff] }
 0x202   :  { %2395 = vmatpush1.bf16.msra.mxu1 %v5554_v53  ;;  %v808_v53 = vmul.f32 %v6237_v20, %v688_v50 }
 0x203   :  { %1123 = vperm.xlu1 %5765, %v5787_v9   ;;  %v870_v60 = vadd.f32 %v806_v17, %v482_v12  ;;  %2396 = vmatprep.subr.bf16.mxu1 %v5547_v51 }
 0x204   :  { %2868 = vmatmul.mubr.bf16.gmra.mxu0 %v6919_v46 }
 0x205   :  { %v347_v62 = vpop.permute.xlu1 %346  ;;  %2877 = vmatprep.mubr.bf16.mxu0 %v8518_v2  ;;  %v1258_v21 = vadd.f32 %v1194_v23, %v870_v60 }
 0x206   :  { %v484_v32 = vmul.f32 %v6242_v59, %v347_v62 }
 0x207   :  { %1127 = vperm.xlu1 %5765, %v108_v14   ;;  %v5546_v14 = vcombine.low %v2006_v7, %v2010_v1  ;;  %v1329_v17 = vadd.f32 %v6811_v58, %v1258_v21 }
 0x208   :  { %v872_v51 = vadd.f32 %v808_v53, %v484_v32 }
 0x209   :  { %v352_v40 = vpop.permute.xlu1 %351  ;;  %2397 = vmatpush1.bf16.msra.mxu1 %v5546_v14 }
 0x20a   :  { %v485_v13 = vmul.f32 %v6242_v59, %v352_v40  ;;  %2398 = vmatprep.subr.bf16.mxu1 %v5539_v45 }
 0x20b   :  { %5768 = vset.pattern.permute.xlu1 %v8518_v2 }
 0x20c   :  { %421 = vperm.xlu1 %5768, %v6659_v34  }
 0x20d   :  { %2399 = vmatpush1.bf16.msra.mxu1 %v5538_v49 }
 0x20e   :  { %v692_v24 = vpop.permute.xlu1 %691 }
 0x20f   :  { %v809_v18 = vmul.f32 %v6237_v20, %v692_v24  ;;  %v1393_v24 = vmax.f32 %v1329_v17, 0.0  ;;  %v487_v17 = vmul.f32 %v6242_v59, %v6780_v25 }
 0x210   :  { %5769 = vset.pattern.permute.xlu1 %v8515_v39  ;;  %v5636_v16 = vpop.f32.mrf.mxu0 }
 0x211   :  { %v873_v10 = vadd.f32 %v809_v18, %v485_v13  ;;  %743 = vperm.xlu1 %5769, %v5788_v63   ;;  %v5531_v63 = vcombine.high %v1990_v52, %v1994_v5 }
 0x212   :  { %v1695_v19 = vpop.f32.mrf.mxu0 }
 0x213   :  { %v1072_v9 = vpop.permute.xlu1 %1071  ;;  %v1261_v40 = vadd.f32 %v1197_v43, %v873_v10  ;;  %v1696_v7 = vadd.f32 %v6746_v41, %v1695_v19  ;;  %v5530_v10 = vcombine.low %v1990_v52, %v1994_v5  ;;  %2400 = vmatprep.subr.bf16.mxu1 %v5531_v63  ;;  %v1704_v43 = vadd.f32 %v5636_v16, %v6746_v41 }
 0x214   :  { %v1195_v22 = vmul.f32 %v6251_v0, %v1072_v9  ;;  %v5637_v12 = vpop.f32.mrf.mxu0  ;;  %v488_v5 = vmul.f32 %v6242_v59, %v6800_v56 }
 0x215   :  { %5770 = vset.pattern.permute.xlu1 %v8518_v2  ;;  %v1332_v23 = vadd.f32 %v6811_v58, %v1261_v40  ;;  %v1890_v13 = vmax.f32 %v1696_v7, 0.0  ;;  %v1707_v36 = vadd.f32 %v5637_v12, %v6746_v41  ;;  %2401 = vmatpush1.bf16.msra.mxu1 %v5530_v10  ;;  %v1199_v40 = vmul.f32 %v6251_v0, %v6589_v55  ;;  %v1974_v55 = vld [vmem:[%s8472_s5 + $0x40] sm:$0xff] }
 0x216   :  { %v1259_v1 = vadd.f32 %v1195_v22, %v871_v11  ;;  %426 = vperm.xlu1 %5770, %v6665_v8   ;;  %v1698_v37 = vpop.f32.mrf.mxu0  ;;  %v1892_v22 = vmax.f32 %v1704_v43, 0.0 }
 0x217   :  { %v1699_v62 = vadd.f32 %v6746_v41, %v1698_v37  ;;  %v1076_v14 = vpop.permute.xlu1 %1075  ;;  %v1396_v9 = vmax.f32 %v1332_v23, 0.0  ;;  %v1893_v32 = vmax.f32 %v1707_v36, 0.0  ;;  %v1970_v23 = vld [vmem:[%s8472_s5 + $0x20] sm:$0xff] }
 0x218   :  { %v1330_v31 = vadd.f32 %v6811_v58, %v1259_v1  ;;  %v1196_v60 = vmul.f32 %v6251_v0, %v1076_v14 }
 0x219   :  { %v1891_v18 = vmax.f32 %v1699_v62, 0.0  ;;  %v6990_v16 = vpack.c.bf16 %v1893_v32, %v1892_v22 }
 0x21a   :  { %v1394_v21 = vmax.f32 %v1330_v31, 0.0  ;;  %v1260_v50 = vadd.f32 %v1196_v60, %v872_v51  ;;  %431 = vperm.xlu1 %5770, %v6710_v35  }
 0x21b   :  { %v6980_v54 = vpack.c.bf16 %v1891_v18, %v1890_v13  ;;  %v704_v13 = vpop.permute.xlu0 %703 }
 0x21c   :  { %v1435_v19 = vpack.c.bf16 %v1394_v21, %v1393_v24  ;;  %v1331_v49 = vadd.f32 %v6811_v58, %v1260_v50  ;;  %v357_v45 = vpop.permute.xlu1 %356  ;;  %v1966_v24 = vld [vmem:[%s8472_s5] sm:$0xff]  ;;  %v812_v50 = vmul.f32 %v6237_v20, %v704_v13 }
 0x21d   :  { %2878 = vmatmul.mubr.bf16.gmra.mxu0 %v6980_v54  ;;  %v5506_v18 = vcombine.low %v1966_v24, %v1970_v23  ;;  %v5507_v52 = vcombine.high %v1966_v24, %v1970_v23  ;;  %v486_v21 = vmul.f32 %v6242_v59, %v357_v45 }
 0x21e   :  { %v1395_v11 = vmax.f32 %v1331_v49, 0.0  ;;  %5771 = vset.pattern.permute.xlu1 %v8515_v39  ;;  %5658 = vmatprep.mubr.msk.bf16.mxu1 %vm1484_vm0, %v1435_v19  ;;  %v876_v43 = vadd.f32 %v812_v50, %v488_v5 }
 0x21f   :  { %755 = vperm.xlu1 %5771, %v6710_v35   ;;  %2887 = vmatprep.mubr.bf16.mxu0 %v8518_v2 }
 0x220   :  { %v1436_v53 = vpack.c.bf16 %v1396_v9, %v1395_v11 }
 0x221   :  { %v696_v12 = vpop.permute.xlu1 %695 }
 0x222   :  { %5659 = vmatmul.mubr.msk.bf16.gmra.mxu1 %vm1484_vm0, %v1436_v53  ;;  %v810_v60 = vmul.f32 %v6237_v20, %v696_v12 }
 0x223   :  { %5773 = vset.pattern.permute.xlu1 %v8519_v28  ;;  %v1982_v28 = vld [vmem:[%s8472_s5 + $0x80] sm:$0xff] }
 0x224   :  { %1135 = vperm.xlu1 %5773, %v6659_v34   ;;  %v1986_v34 = vld [vmem:[%s8472_s5 + $0xa0] sm:$0xff]  ;;  %v874_v63 = vadd.f32 %v810_v60, %v486_v21 }
 0x225   :  { %v700_v39 = vpop.permute.xlu1 %699  ;;  %2888 = vmatmul.mubr.bf16.gmra.mxu0 %v6990_v16  ;;  %v5523_v25 = vcombine.high %v1982_v28, %v1986_v34  ;;  %v5522_v62 = vcombine.low %v1982_v28, %v1986_v34 }
 0x226   :  { %v811_v35 = vmul.f32 %v6237_v20, %v700_v39  ;;  %2897 = vmatprep.mubr.bf16.mxu0 %v8518_v2  ;;  %v7039_v39 = vld [vmem:[%s8472_s5 + $0x1f0] sm:$0xff] }
 0x227   :  { %2402 = vmatprep.subr.bf16.mxu1 %v5523_v25  ;;  %v2029_v25 = vld [vmem:[%s8472_s5 + $0x1f8] sm:$0xff] }
 0x228   :  { %v875_v7 = vadd.f32 %v811_v35, %v487_v17  ;;  %1139 = vperm.xlu1 %5773, %v6665_v8   ;;  %2403 = vmatpush1.bf16.msra.mxu1 %v5522_v62  ;;  %v1978_v8 = vld [vmem:[%s8472_s5 + $0x60] sm:$0xff]  ;;  %v7034_v17 = vld [vmem:[%s8472_s5 + $0x1d0] sm:$0xff]  ;;  %v2025_v35 = vld [vmem:[%s8472_s5 + $0x1d8] sm:$0xff] }
 0x229   :  { %v5514_v14 = vcombine.low %v1974_v55, %v1978_v8  ;;  %v5515_v51 = vcombine.high %v1974_v55, %v1978_v8  ;;  %v5566_v28 = vcombine.low %v7034_v17, %v7039_v39  ;;  %v5567_v34 = vcombine.high %v7034_v17, %v7039_v39  ;;  %v2004_v17 = vld [vmem:[%s8472_s5 + $0x130] sm:$0xff] }
 0x22a   :  { %v1263_v1 = vadd.f32 %v1199_v40, %v875_v7  ;;  %v372_v37 = vpop.permute.xlu1 %371  ;;  %v5568_v55 = vcombine.low %v2025_v35, %v2029_v25  ;;  %v5569_v8 = vcombine.high %v2025_v35, %v2029_v25 }
 0x22b   :  { %2404 = vmatprep.subr.bf16.mxu1 %v5515_v51  ;;  %v489_v53 = vmul.f32 %v6242_v59, %v372_v37 }
 0x22c   :  { %2405 = vmatpush1.bf16.msra.mxu1 %v5514_v14  ;;  %v1334_v49 = vadd.f32 %v6811_v58, %v1263_v1  ;;  %3451 = vmatprep.subr.bf16.mxu0 %v5569_v8 }
 0x22d   :  { %2406 = vmatprep.subr.bf16.mxu1 %v5507_v52  ;;  %3452 = vmatpush1.bf16.msra.mxu0 %v5568_v55 }
 0x22e   :  { %v1398_v40 = vmax.f32 %v1334_v49, 0.0 }
 0x22f   :  { %v708_v31 = vpop.permute.xlu1 %707 }
 0x230   :  { %2407 = vmatpush1.bf16.msra.mxu1 %v5506_v18  ;;  %v813_v56 = vmul.f32 %v6237_v20, %v708_v31 }
 0x231   :  { %3098 = vmatprep.subr.bf16.mxu1 %v5567_v34 }
 0x232   :  { %v877_v31 = vadd.f32 %v813_v56, %v489_v53  ;;  %v490_v53 = vmul.f32 %v6242_v59, %v6820_v4  ;;  %v2017_v4 = vld [vmem:[%s8472_s5 + $0x198] sm:$0xff] }
 0x234   :  { %v1084_v10 = vpop.permute.xlu1 %1083 }
 0x235   :  { %v1198_v36 = vmul.f32 %v6251_v0, %v1084_v10  ;;  %v5640_v19 = vpop.f32.mrf.mxu0 }
 0x237   :  { %v1262_v9 = vadd.f32 %v1198_v36, %v874_v63  ;;  %v1711_v11 = vpop.f32.mrf.mxu0  ;;  %v1720_v63 = vadd.f32 %v5640_v19, %v6746_v41  ;;  %v1202_v19 = vmul.f32 %v6251_v0, %v6601_v27 }
 0x238   :  { %v1092_v32 = vpop.permute.xlu1 %1091  ;;  %v1712_v7 = vadd.f32 %v6746_v41, %v1711_v11 }
 0x239   :  { %v1333_v45 = vadd.f32 %v6811_v58, %v1262_v9  ;;  %v1200_v22 = vmul.f32 %v6251_v0, %v1092_v32  ;;  %v5641_v12 = vpop.f32.mrf.mxu0  ;;  %v1896_v11 = vmax.f32 %v1720_v63, 0.0 }
 0x23a   :  { %v1894_v23 = vmax.f32 %v1712_v7, 0.0  ;;  %v1723_v5 = vadd.f32 %v5641_v12, %v6746_v41  ;;  %v2021_v7 = vld [vmem:[%s8472_s5 + $0x1b8] sm:$0xff] }
 0x23b   :  { %v1397_v1 = vmax.f32 %v1333_v45, 0.0  ;;  %v1264_v37 = vadd.f32 %v1200_v22, %v876_v43  ;;  %v1714_v62 = vpop.f32.mrf.mxu0  ;;  %v5560_v34 = vcombine.low %v2017_v4, %v2021_v7  ;;  %v5561_v25 = vcombine.high %v2017_v4, %v2021_v7 }
 0x23c   :  { %v1715_v14 = vadd.f32 %v6746_v41, %v1714_v62  ;;  %v1096_v51 = vpop.permute.xlu1 %1095  ;;  %v1897_v43 = vmax.f32 %v1723_v5, 0.0 }
 0x23d   :  { %v1437_v60 = vpack.c.bf16 %v1398_v40, %v1397_v1  ;;  %v1201_v24 = vmul.f32 %v6251_v0, %v1096_v51  ;;  %v1335_v18 = vadd.f32 %v6811_v58, %v1264_v37  ;;  %v716_v1 = vpop.permute.xlu0 %715  ;;  %3453 = vmatprep.subr.bf16.mxu0 %v5561_v25 }
 0x23e   :  { %v1895_v13 = vmax.f32 %v1715_v14, 0.0  ;;  %v7067_v45 = vpack.c.bf16 %v1897_v43, %v1896_v11  ;;  %3454 = vmatpush1.bf16.msra.mxu0 %v5560_v34  ;;  %v815_v62 = vmul.f32 %v6237_v20, %v716_v1 }
 0x23f   :  { %v1265_v52 = vadd.f32 %v1201_v24, %v877_v31  ;;  %5662 = vmatprep.mubr.msk.bf16.mxu1 %vm1484_vm0, %v1437_v60  ;;  %v1399_v36 = vmax.f32 %v1335_v18, 0.0  ;;  %v1205_v60 = vmul.f32 %v6251_v0, %v6608_v30 }
 0x240   :  { %v7057_v21 = vpack.c.bf16 %v1895_v13, %v1894_v23 }
 0x241   :  { %v1336_v50 = vadd.f32 %v6811_v58, %v1265_v52  ;;  %v382_v10 = vpop.permute.xlu1 %381  ;;  %v720_v24 = vpop.permute.xlu0 %719 }
 0x242   :  { %2898 = vmatmul.mubr.bf16.gmra.mxu0 %v7057_v21  ;;  %v491_v55 = vmul.f32 %v6242_v59, %v382_v10  ;;  %v816_v13 = vmul.f32 %v6237_v20, %v720_v24 }
 0x243   :  { %v1400_v49 = vmax.f32 %v1336_v50, 0.0  ;;  %2907 = vmatprep.mubr.bf16.mxu0 %v8518_v2 }
 0x244   :  { %v879_v18 = vadd.f32 %v815_v62, %v491_v55 }
 0x245   :  { %v1438_v9 = vpack.c.bf16 %v1400_v49, %v1399_v36 }
 0x246   :  { %v712_v32 = vpop.permute.xlu1 %711 }
 0x247   :  { %v814_v56 = vmul.f32 %v6237_v20, %v712_v32  ;;  %5663 = vmatmul.mubr.msk.bf16.gmra.mxu1 %vm1484_vm0, %v1438_v9 }
 0x249   :  { %v878_v22 = vadd.f32 %v814_v56, %v490_v53 }
 0x24a   :  { %2908 = vmatmul.mubr.bf16.gmra.mxu0 %v7067_v45 }
 0x24b   :  { %v1266_v12 = vadd.f32 %v1202_v19, %v878_v22  ;;  %v387_v35 = vpop.permute.xlu1 %386  ;;  %2917 = vmatprep.mubr.bf16.mxu0 %v8518_v2 }
 0x24c   :  { %v492_v52 = vmul.f32 %v6242_v59, %v387_v35 }
 0x24d   :  { %v1337_v63 = vadd.f32 %v6811_v58, %v1266_v12 }
 0x24e   :  { %v880_v11 = vadd.f32 %v816_v13, %v492_v52 }
 0x24f   :  { %v392_v40 = vpop.permute.xlu1 %391  ;;  %v1401_v22 = vmax.f32 %v1337_v63, 0.0  ;;  %v2030_v63 = vld [vmem:[%s8474_s6] sm:$0xff] }
 0x250   :  { %v493_v8 = vmul.f32 %v6242_v59, %v392_v40 }
 0x254   :  { %v724_v27 = vpop.permute.xlu1 %723 }
 0x255   :  { %v817_v37 = vmul.f32 %v6237_v20, %v724_v27 }
 0x256   :  { %v5644_v14 = vpop.f32.mrf.mxu0 }
 0x257   :  { %v881_v51 = vadd.f32 %v817_v37, %v493_v8  ;;  %v1736_v27 = vadd.f32 %v5644_v14, %v6746_v41 }
 0x258   :  { %v1727_v31 = vpop.f32.mrf.mxu0 }
 0x259   :  { %v1104_v23 = vpop.permute.xlu1 %1103  ;;  %v1728_v10 = vadd.f32 %v6746_v41, %v1727_v31  ;;  %v1269_v36 = vadd.f32 %v1205_v60, %v881_v51  ;;  %v1900_v51 = vmax.f32 %v1736_v27, 0.0 }
 0x25a   :  { %v1203_v5 = vmul.f32 %v6251_v0, %v1104_v23  ;;  %v5645_v50 = vpop.f32.mrf.mxu0  ;;  %v1207_v23 = vmul.f32 %v6251_v0, %v6613_v6  ;;  %v8533_v6 = vld [vmem:[#allocation11_spill] sm:$0xff] }
 0x25b   :  { %v1898_v56 = vmax.f32 %v1728_v10, 0.0  ;;  %v1340_v35 = vadd.f32 %v6811_v58, %v1269_v36  ;;  %v1739_v12 = vadd.f32 %v5645_v50, %v6746_v41  ;;  %v736_v50 = vpop.permute.xlu0 %735  ;;  %v496_v36 = vmul.f32 %v6242_v59, %v6844_v61 }
 0x25c   :  { %v1267_v49 = vadd.f32 %v1203_v5, %v879_v18  ;;  %v1730_v43 = vpop.f32.mrf.mxu0 }
 0x25d   :  { %v1731_v9 = vadd.f32 %v6746_v41, %v1730_v43  ;;  %v1108_v30 = vpop.permute.xlu1 %1107  ;;  %v1404_v37 = vmax.f32 %v1340_v35, 0.0  ;;  %v1901_v55 = vmax.f32 %v1739_v12, 0.0  ;;  %v495_v41 = vmul.f32 %v6242_v59, %v6832_v44 }
 0x25e   :  { %v1338_v32 = vadd.f32 %v6811_v58, %v1267_v49  ;;  %v1204_v53 = vmul.f32 %v6251_v0, %v1108_v30  ;;  %v820_v49 = vmul.f32 %v6237_v20, %v736_v50 }
 0x25f   :  { %v1899_v19 = vmax.f32 %v1731_v9, 0.0  ;;  %v7103_v60 = vpack.c.bf16 %v1901_v55, %v1900_v51  ;;  %v2046_v9 = vsub.s32 3, %v8533_v6  ;;  %v2013_v51 = vld [vmem:[%s8472_s5 + $0x178] sm:$0xff] }
 0x260   :  { %v1402_v40 = vmax.f32 %v1338_v32, 0.0  ;;  %v1268_v4 = vadd.f32 %v1204_v53, %v880_v11  ;;  %v8534_v53 = vsub.s32 2, %v8533_v6 }
 0x261   :  { %v7095_v7 = vpack.c.bf16 %v1899_v19, %v1898_v56 }
 0x262   :  { %v1439_v34 = vpack.c.bf16 %v1402_v40, %v1401_v22  ;;  %v1339_v25 = vadd.f32 %v6811_v58, %v1268_v4  ;;  %v397_v1 = vpop.permute.xlu1 %396  ;;  %v7124_v56 = vrot.slane %v2030_v63, %v8534_v53  ;;  %v884_v4 = vadd.f32 %v820_v49, %v496_v36 }
 0x263   :  { %2918 = vmatmul.mubr.bf16.gmra.mxu0 %v7095_v7  ;;  %v494_v44 = vmul.f32 %v6242_v59, %v397_v1 }
 0x264   :  { %v1403_v62 = vmax.f32 %v1339_v25, 0.0  ;;  %5666 = vmatprep.mubr.msk.bf16.mxu1 %vm1484_vm0, %v1439_v34  ;;  %2927 = vmatprep.mubr.bf16.mxu0 %v8518_v2  ;;  %v7128_v34 = vrot.slane %v2030_v63, %v2046_v9 }
 0x266   :  { %v1440_v8 = vpack.c.bf16 %v1404_v37, %v1403_v62 }
 0x267   :  { %v728_v31 = vpop.permute.xlu1 %727 }
 0x268   :  { %5667 = vmatmul.mubr.msk.bf16.gmra.mxu1 %vm1484_vm0, %v1440_v8  ;;  %v818_v10 = vmul.f32 %v6237_v20, %v728_v31  ;;  %v2009_v8 = vld [vmem:[%s8472_s5 + $0x158] sm:$0xff] }
 0x269   :  { %v5552_v36 = vcombine.low %v2009_v8, %v2013_v51  ;;  %v5553_v49 = vcombine.high %v2009_v8, %v2013_v51 }
 0x26a   :  { %v882_v30 = vadd.f32 %v818_v10, %v494_v44 }
 0x26b   :  { %v732_v24 = vpop.permute.xlu1 %731  ;;  %2928 = vmatmul.mubr.bf16.gmra.mxu0 %v7103_v60  ;;  %3455 = vmatprep.subr.bf16.mxu0 %v5553_v49 }
 0x26c   :  { %v819_v14 = vmul.f32 %v6237_v20, %v732_v24  ;;  %2937 = vmatprep.mubr.bf16.mxu0 %v8518_v2  ;;  %v7143_v24 = vld [vmem:[%s8473_s4] ss:$0 sm:$0xff]  ;;  %3456 = vmatpush1.bf16.msra.mxu0 %v5552_v36 }
 0x26e   :  { %v883_v13 = vadd.f32 %v819_v14, %v495_v41 }
 0x270   :  { %v1271_v18 = vadd.f32 %v1207_v23, %v883_v13  ;;  %v412_v52 = vpop.permute.xlu1 %411 }
 0x271   :  { %v497_v1 = vmul.f32 %v6242_v59, %v412_v52 }
 0x272   :  { %v1342_v19 = vadd.f32 %v6811_v58, %v1271_v18 }
 0x274   :  { %v1406_v31 = vmax.f32 %v1342_v19, 0.0 }
 0x275   :  { %v740_v5 = vpop.permute.xlu1 %739 }
 0x276   :  { %v821_v35 = vmul.f32 %v6237_v20, %v740_v5 }
 0x278   :  { %v885_v23 = vadd.f32 %v821_v35, %v497_v1 }
 0x27a   :  { %v1116_v43 = vpop.permute.xlu1 %1115 }
 0x27b   :  { %v1206_v11 = vmul.f32 %v6251_v0, %v1116_v43  ;;  %v5648_v32 = vpop.f32.mrf.mxu1 }
 0x27c   :  { %v2779_v22 = vpop.f32.mrf.mxu0 }
 0x27d   :  { %v1270_v40 = vadd.f32 %v1206_v11, %v882_v30  ;;  %v1743_v61 = vpop.f32.mrf.mxu1  ;;  %v2780_v37 = vadd.f32 %v2779_v22, %v7124_v56 }
 0x27e   :  { %v1124_v12 = vpop.permute.xlu1 %1123  ;;  %v2781_v25 = vpop.f32.mrf.mxu0  ;;  %v1744_v41 = vadd.f32 %v7143_v24, %v1743_v61 }
 0x27f   :  { %v1341_v27 = vadd.f32 %v6811_v58, %v1270_v40  ;;  %v1208_v62 = vmul.f32 %v6251_v0, %v1124_v12  ;;  %v5649_v55 = vpop.f32.mrf.mxu1  ;;  %v2782_v50 = vadd.f32 %v2781_v25, %v7128_v34  ;;  %v3806_v9 = vmax.f32 %v2780_v37, 0.0 }
 0x280   :  { %v2783_v14 = vpop.f32.mrf.mxu0  ;;  %v1902_v53 = vmax.f32 %v1744_v41, 0.0  ;;  %v1755_v1 = vadd.f32 %v7143_v24, %v5649_v55 }
 0x281   :  { %v1405_v13 = vmax.f32 %v1341_v27, 0.0  ;;  %v1272_v18 = vadd.f32 %v1208_v62, %v884_v4  ;;  %v2784_v52 = vadd.f32 %v2783_v14, %v7124_v56  ;;  %v1746_v5 = vpop.f32.mrf.mxu1  ;;  %v3807_v25 = vmax.f32 %v2782_v50, 0.0 }
 0x282   :  { %v1747_v10 = vadd.f32 %v7143_v24, %v1746_v5  ;;  %v1128_v63 = vpop.permute.xlu1 %1127  ;;  %v2785_v44 = vpop.f32.mrf.mxu0  ;;  %v1752_v14 = vadd.f32 %v7143_v24, %v5648_v32 }
 0x283   :  { %v1441_v43 = vpack.c.bf16 %v1406_v31, %v1405_v13  ;;  %v3814_v30 = vmax.f32 %v2784_v52, 0.0  ;;  %v1209_v11 = vmul.f32 %v6251_v0, %v1128_v63  ;;  %v1343_v19 = vadd.f32 %v6811_v58, %v1272_v18  ;;  %v7165_v63 = vpop.permute.xlu0 %747 }
 0x284   :  { %v1903_v22 = vmax.f32 %v1747_v10, 0.0  ;;  %v2786_v35 = vadd.f32 %v2785_v44, %v7128_v34  ;;  %v2789_v40 = vpop.f32.mrf.mxu0 }
 0x285   :  { %v4342_v61 = vmax.f32 %v3806_v9, %v3814_v30  ;;  %v1273_v4 = vadd.f32 %v1209_v11, %v885_v23  ;;  %v2790_v12 = vadd.f32 %v2789_v40, %v7124_v56  ;;  %5670 = vmatprep.mubr.msk.bf16.mxu1 %vm1484_vm0, %v1441_v43  ;;  %v1407_v23 = vmax.f32 %v1343_v19, 0.0 }
 0x286   :  { %v7155_v27 = vpack.c.bf16 %v1903_v22, %v1902_v53  ;;  %v3815_v37 = vmax.f32 %v2786_v35, 0.0  ;;  %v2791_v62 = vpop.f32.mrf.mxu0  ;;  %v1904_v43 = vmax.f32 %v1752_v14, 0.0 }
 0x287   :  { %v1344_v8 = vadd.f32 %v6811_v58, %v1273_v4  ;;  %v3822_v51 = vmax.f32 %v2790_v12, 0.0  ;;  %v2792_v31 = vadd.f32 %v2791_v62, %v7128_v34  ;;  %v7159_v41 = vpop.permute.xlu1 %421  ;;  %v1905_v58 = vmax.f32 %v1755_v1, 0.0  ;;  %v7174_v12 = vpop.permute.xlu0 %751 }
 0x288   :  { %v4355_v13 = vmax.f32 %v3807_v25, %v3815_v37  ;;  %v2793_v18 = vpop.f32.mrf.mxu0  ;;  %2938 = vmatmul.mubr.bf16.gmra.mxu0 %v7155_v27 }
 0x289   :  { %v1408_v52 = vmax.f32 %v1344_v8, 0.0  ;;  %v4343_v55 = vmax.f32 %v4342_v61, %v3822_v51  ;;  %v3823_v5 = vmax.f32 %v2792_v31, 0.0  ;;  %v2794_v50 = vadd.f32 %v2793_v18, %v7124_v56  ;;  %2947 = vmatprep.mubr.bf16.mxu0 %v8518_v2 }
 0x28a   :  { %v2795_v10 = vpop.f32.mrf.mxu0  ;;  %v7170_v22 = vpack.c.bf16 %v1905_v58, %v1904_v43 }
 0x28b   :  { %v1442_v44 = vpack.c.bf16 %v1408_v52, %v1407_v23  ;;  %v4356_v36 = vmax.f32 %v4355_v13, %v3823_v5  ;;  %v3830_v49 = vmax.f32 %v2794_v50, 0.0  ;;  %v2796_v32 = vadd.f32 %v2795_v10, %v7128_v34  ;;  %v1132_v52 = vpop.permute.xlu0 %1131  ;;  %v2001_v10 = vld [vmem:[%s8472_s5 + $0x118] sm:$0xff] }
 0x28c   :  { %v744_v9 = vpop.permute.xlu1 %743  ;;  %v2799_v30 = vpop.f32.mrf.mxu0 }
 0x28d   :  { %v4344_v11 = vmax.f32 %v4343_v55, %v3830_v49  ;;  %v3831_v53 = vmax.f32 %v2796_v32, 0.0  ;;  %v2800_v19 = vadd.f32 %v2799_v30, %v7124_v56  ;;  %5671 = vmatmul.mubr.msk.bf16.gmra.mxu1 %vm1484_vm0, %v1442_v44  ;;  %v822_v13 = vmul.f32 %v6237_v20, %v744_v9  ;;  %v2005_v49 = vld [vmem:[%s8472_s5 + $0x138] sm:$0xff] }
 0x28e   :  { %v2801_v35 = vpop.f32.mrf.mxu0  ;;  %v498_v44 = vmul.f32 %v6242_v59, %v6860_v47  ;;  %v5544_v9 = vcombine.low %v2001_v10, %v2005_v49 }
 0x28f   :  { %v3838_v40 = vmax.f32 %v2800_v19, 0.0  ;;  %v2802_v61 = vadd.f32 %v2801_v35, %v7128_v34  ;;  %v4357_v25 = vmax.f32 %v4356_v36, %v3831_v53  ;;  %v5545_v19 = vcombine.high %v2001_v10, %v2005_v49 }
 0x290   :  { %v2803_v4 = vpop.f32.mrf.mxu0  ;;  %2948 = vmatmul.mubr.bf16.gmra.mxu0 %v7170_v22  ;;  %v886_v30 = vadd.f32 %v822_v13, %v498_v44 }
 0x291   :  { %v4345_v1 = vmax.f32 %v4344_v11, %v3838_v40  ;;  %v3839_v37 = vmax.f32 %v2802_v61, 0.0  ;;  %v2804_v62 = vadd.f32 %v2803_v4, %v7124_v56  ;;  %v427_v8 = vpop.permute.xlu1 %426  ;;  %2957 = vmatprep.mubr.bf16.mxu0 %v8518_v2  ;;  %v1210_v11 = vmul.f32 %v6251_v0, %v1132_v52  ;;  %3457 = vmatprep.subr.bf16.mxu0 %v5545_v19 }
 0x292   :  { %v2805_v51 = vpop.f32.mrf.mxu0  ;;  %3458 = vmatpush1.bf16.msra.mxu0 %v5544_v9 }
 0x293   :  { %v4358_v31 = vmax.f32 %v4357_v25, %v3839_v37  ;;  %v3846_v14 = vmax.f32 %v2804_v62, 0.0  ;;  %v2806_v23 = vadd.f32 %v2805_v51, %v7128_v34  ;;  %v1144_v51 = vpop.permute.xlu0 %1143 }
 0x294   :  { %v2809_v18 = vpop.f32.mrf.mxu0 }
 0x295   :  { %v4346_v55 = vmax.f32 %v4345_v1, %v3846_v14  ;;  %v3847_v5 = vmax.f32 %v2806_v23, 0.0  ;;  %v2810_v50 = vadd.f32 %v2809_v18, %v7124_v56  ;;  %v432_v58 = vpop.permute.xlu1 %431  ;;  %v499_v14 = vmul.f32 %v6242_v59, %v7159_v41 }
 0x296   :  { %v2811_v36 = vpop.f32.mrf.mxu0  ;;  %v501_v18 = vmul.f32 %v6242_v59, %v432_v58  ;;  %v5790_v58 = vld [vmem:[%s8471_s2] ss:$0 sm:$0xff] }
 0x297   :  { %v3854_v32 = vmax.f32 %v2810_v50, 0.0  ;;  %v2812_v43 = vadd.f32 %v2811_v36, %v7128_v34  ;;  %v4359_v35 = vmax.f32 %v4358_v31, %v3847_v5  ;;  %v1274_v31 = vadd.f32 %v1210_v11, %v886_v30 }
 0x298   :  { %v2813_v53 = vpop.f32.mrf.mxu0  ;;  %v1213_v36 = vmul.f32 %v6251_v0, %v1144_v51 }
 0x299   :  { %v4347_v40 = vmax.f32 %v4346_v55, %v3854_v32  ;;  %v3855_v61 = vmax.f32 %v2812_v43, 0.0  ;;  %v2814_v4 = vadd.f32 %v2813_v53, %v7124_v56  ;;  %v823_v55 = vmul.f32 %v6237_v20, %v7165_v63 }
 0x29a   :  { %v756_v47 = vpop.permute.xlu1 %755  ;;  %v2815_v25 = vpop.f32.mrf.mxu0  ;;  %v1345_v30 = vadd.f32 %v5790_v58, %v1274_v31  ;;  %v500_v63 = vmul.f32 %v6242_v59, %v427_v8 }
 0x29b   :  { %v7192_v1 = vmax.f32 %v4359_v35, %v3855_v61  ;;  %v3862_v37 = vmax.f32 %v2814_v4, 0.0  ;;  %v825_v62 = vmul.f32 %v6237_v20, %v756_v47  ;;  %v887_v32 = vadd.f32 %v823_v55, %v499_v14 }
 0x29c   :  { %v5652_v23 = vpop.f32.mrf.mxu1  ;;  %v2819_v13 = vpop.f32.mrf.mxu0  ;;  %v824_v61 = vmul.f32 %v6237_v20, %v7174_v12  ;;  %v1409_v31 = vmax.f32 %v1345_v30, 0.0 }
 0x29d   :  { %v7198_v52 = vmax.f32 %v4347_v40, %v3862_v37  ;;  %v889_v10 = vadd.f32 %v825_v62, %v501_v18  ;;  %v2820_v44 = vadd.f32 %v2819_v13, %v7124_v56 }
 0x29e   :  { %v1759_v5 = vpop.f32.mrf.mxu1  ;;  %v2821_v50 = vpop.f32.mrf.mxu0  ;;  %v888_v18 = vadd.f32 %v824_v61, %v500_v63 }
 0x29f   :  { %v1136_v49 = vpop.permute.xlu1 %1135  ;;  %v1760_v11 = vadd.f32 %v7143_v24, %v1759_v5  ;;  %v3870_v4 = vmax.f32 %v2820_v44, 0.0  ;;  %v1277_v47 = vadd.f32 %v1213_v36, %v889_v10  ;;  %v2822_v37 = vadd.f32 %v2821_v50, %v7128_v34 }
 0x2a0   :  { %v1211_v41 = vmul.f32 %v6251_v0, %v1136_v49  ;;  %v5653_v43 = vpop.f32.mrf.mxu1  ;;  %v2823_v9 = vpop.f32.mrf.mxu0 }
 0x2a1   :  { %v2824_v19 = vadd.f32 %v2823_v9, %v7124_v56  ;;  %v1906_v55 = vmax.f32 %v1760_v11, 0.0  ;;  %v1348_v44 = vadd.f32 %v5790_v58, %v1277_v47  ;;  %v1771_v50 = vadd.f32 %v7143_v24, %v5653_v43 }
 0x2a2   :  { %v1275_v53 = vadd.f32 %v1211_v41, %v887_v32  ;;  %v1762_v35 = vpop.f32.mrf.mxu1  ;;  %v2825_v40 = vpop.f32.mrf.mxu0  ;;  %v3871_v9 = vmax.f32 %v2822_v37, 0.0 }
 0x2a3   :  { %v1140_v62 = vpop.permute.xlu1 %1139  ;;  %v3878_v14 = vmax.f32 %v2824_v19, 0.0  ;;  %v1763_v13 = vadd.f32 %v7143_v24, %v1762_v35  ;;  %v2826_v59 = vadd.f32 %v2825_v40, %v7128_v34  ;;  %v1768_v40 = vadd.f32 %v7143_v24, %v5652_v23 }
 0x2a4   :  { %v1346_v51 = vadd.f32 %v5790_v58, %v1275_v53  ;;  %v2829_v8 = vpop.f32.mrf.mxu0  ;;  %v1212_v5 = vmul.f32 %v6251_v0, %v1140_v62  ;;  %v2816_v0 = vadd.f32 %v2815_v25, %v7128_v34  ;;  %v1412_v37 = vmax.f32 %v1348_v44, 0.0 }
 0x2a5   :  { %v4446_v32 = vmax.f32 %v3870_v4, %v3878_v14  ;;  %v1907_v20 = vmax.f32 %v1763_v13, 0.0  ;;  %v3879_v12 = vmax.f32 %v2826_v59, 0.0  ;;  %v2830_v41 = vadd.f32 %v2829_v8, %v7124_v56 }
 0x2a6   :  { %v1410_v49 = vmax.f32 %v1346_v51, 0.0  ;;  %v2831_v10 = vpop.f32.mrf.mxu0  ;;  %v1276_v36 = vadd.f32 %v1212_v5, %v888_v18  ;;  %v1909_v25 = vmax.f32 %v1771_v50, 0.0  ;;  %v3863_v18 = vmax.f32 %v2816_v0, 0.0  ;;  %v2020_v0 = vld [vmem:[%s8472_s5 + $0x1b0] sm:$0xff] }
 0x2a7   :  { %v7219_v19 = vpack.c.bf16 %v1907_v20, %v1906_v55  ;;  %v2832_v30 = vadd.f32 %v2831_v10, %v7128_v34  ;;  %v3886_v35 = vmax.f32 %v2830_v41, 0.0  ;;  %v4459_v61 = vmax.f32 %v3871_v9, %v3879_v12 }
 0x2a8   :  { %v1443_v53 = vpack.c.bf16 %v1410_v49, %v1409_v31  ;;  %v2833_v63 = vpop.f32.mrf.mxu0  ;;  %v1347_v11 = vadd.f32 %v5790_v58, %v1276_v36  ;;  %v1908_v55 = vmax.f32 %v1768_v40, 0.0  ;;  %v4349_v12 = vrot.slane %v7198_v52, 4 }
 0x2a9   :  { %v3887_v4 = vmax.f32 %v2832_v30, 0.0  ;;  %v2834_v43 = vadd.f32 %v2833_v63, %v7124_v56  ;;  %2958 = vmatmul.mubr.bf16.gmra.mxu0 %v7219_v19  ;;  %v4447_v51 = vmax.f32 %v4446_v32, %v3886_v35  ;;  %v2016_v63 = vld [vmem:[%s8472_s5 + $0x190] sm:$0xff] }
 0x2aa   :  { %5674 = vmatprep.mubr.msk.bf16.mxu1 %vm1484_vm0, %v1443_v53  ;;  %v2835_v47 = vpop.f32.mrf.mxu0  ;;  %v1411_v62 = vmax.f32 %v1347_v11, 0.0  ;;  %2967 = vmatprep.mubr.bf16.mxu0 %v8518_v2  ;;  %v7233_v10 = vpack.c.bf16 %v1909_v25, %v1908_v55  ;;  %v4361_v53 = vmax.f32 %v7192_v1, %v3863_v18 }
 0x2ab   :  { %v2836_v14 = vadd.f32 %v2835_v47, %v7128_v34  ;;  %v4460_v58 = vmax.f32 %v4459_v61, %v3887_v4  ;;  %v3894_v13 = vmax.f32 %v2834_v43, 0.0  ;;  %v4350_v61 = vmax.f32 %v7198_v52, %v4349_v12 }
 0x2ac   :  { %v2839_v23 = vpop.f32.mrf.mxu0  ;;  %v1444_v59 = vpack.c.bf16 %v1412_v37, %v1411_v62  ;;  %v5559_v37 = vcombine.high %v2016_v63, %v2020_v0  ;;  %v2008_v62 = vld [vmem:[%s8472_s5 + $0x150] sm:$0xff] }
 0x2ad   :  { %v3895_v8 = vmax.f32 %v2836_v14, 0.0  ;;  %v2840_v31 = vadd.f32 %v2839_v23, %v7124_v56  ;;  %v4448_v5 = vmax.f32 %v4447_v51, %v3894_v13  ;;  %v2012_v51 = vld [vmem:[%s8472_s5 + $0x170] sm:$0xff]  ;;  %v4362_v14 = vrot.slane %v4361_v53, 4 }
 0x2ae   :  { %v2841_v49 = vpop.f32.mrf.mxu0  ;;  %5675 = vmatmul.mubr.msk.bf16.gmra.mxu1 %vm1484_vm0, %v1444_v59  ;;  %v4351_v13 = vrot.slane %v4350_v61, 2  ;;  %v5558_v59 = vcombine.low %v2016_v63, %v2020_v0 }
 0x2af   :  { %v3902_v20 = vmax.f32 %v2840_v31, 0.0  ;;  %v2842_v32 = vadd.f32 %v2841_v49, %v7128_v34  ;;  %2424 = vmatprep.mubr.bf16.mxu1 %v8518_v2  ;;  %v4461_v50 = vmax.f32 %v4460_v58, %v3895_v8  ;;  %v5551_v8 = vcombine.high %v2008_v62, %v2012_v51 }
 0x2b0   :  { %v2843_v44 = vpop.f32.mrf.mxu0  ;;  %v4363_v49 = vmax.f32 %v4361_v53, %v4362_v14 }
 0x2b1   :  { %v4449_v36 = vmax.f32 %v4448_v5, %v3902_v20  ;;  %v3903_v41 = vmax.f32 %v2842_v32, 0.0  ;;  %v2844_v9 = vadd.f32 %v2843_v44, %v7124_v56  ;;  %2968 = vmatmul.mubr.bf16.gmra.mxu0 %v7233_v10  ;;  %v2000_v32 = vld [vmem:[%s8472_s5 + $0x110] sm:$0xff]  ;;  %v4352_v44 = vmax.f32 %v4350_v61, %v4351_v13 }
 0x2b2   :  { %v2845_v30 = vpop.f32.mrf.mxu0  ;;  %2977 = vmatprep.mubr.bf16.mxu0 %v8518_v2  ;;  %v5543_v53 = vcombine.high %v2000_v32, %v2004_v17  ;;  %v5542_v61 = vcombine.low %v2000_v32, %v2004_v17 }
 0x2b3   :  { %v4462_v11 = vmax.f32 %v4461_v50, %v3903_v41  ;;  %v3910_v35 = vmax.f32 %v2844_v9, 0.0  ;;  %v2846_v40 = vadd.f32 %v2845_v30, %v7128_v34  ;;  %v4364_v30 = vrot.slane %v4363_v49, 2 }
 0x2b4   :  { %v2849_v1 = vpop.f32.mrf.mxu0 }
 0x2b5   :  { %v4450_v4 = vmax.f32 %v4449_v36, %v3910_v35  ;;  %v3911_v43 = vmax.f32 %v2846_v40, 0.0  ;;  %v2850_v47 = vadd.f32 %v2849_v1, %v7124_v56  ;;  %v5550_v36 = vcombine.low %v2008_v62, %v2012_v51 }
 0x2b6   :  { %v2851_v25 = vpop.f32.mrf.mxu0  ;;  %2425 = vmatmul.mubr.bf16.vlgmr.msra.gmra.mxu1 %v6757_v42  ;;  %v4353_v40 = vrot.slane %v4352_v44, 1  ;;  %v4365_v62 = vmax.f32 %v4363_v49, %v4364_v30 }
 0x2b7   :  { %v3918_v58 = vmax.f32 %v2850_v47, 0.0  ;;  %v2852_v52 = vadd.f32 %v2851_v25, %v7128_v34  ;;  %3099 = vmatpush1.bf16.msra.mxu1 %v5566_v28  ;;  %2434 = vmatprep.mubr.bf16.mxu1 %v8518_v2  ;;  %v4463_v31 = vmax.f32 %v4462_v11, %v3911_v43 }
 0x2b8   :  { %v2853_v23 = vpop.f32.mrf.mxu0  ;;  %3100 = vmatprep.subr.bf16.mxu1 %v5559_v37 }
 0x2b9   :  { %v4451_v18 = vmax.f32 %v4450_v4, %v3918_v58  ;;  %v3919_v55 = vmax.f32 %v2852_v52, 0.0  ;;  %v2854_v5 = vadd.f32 %v2853_v23, %v7124_v56 }
 0x2ba   :  { %v2855_v20 = vpop.f32.mrf.mxu0 }
 0x2bb   :  { %v4464_v39 = vmax.f32 %v4463_v31, %v3919_v55  ;;  %v3926_v28 = vmax.f32 %v2854_v5, 0.0  ;;  %v2856_v12 = vadd.f32 %v2855_v20, %v7128_v34  ;;  %3101 = vmatpush1.bf16.msra.mxu1 %v5558_v59  ;;  %v1996_v55 = vld [vmem:[%s8472_s5 + $0xf0] sm:$0xff] }
 0x2bc   :  { %v2859_v50 = vpop.f32.mrf.mxu0  ;;  %3102 = vmatprep.subr.bf16.mxu1 %v5551_v8  ;;  %v4354_v8 = vmax.f32 %v4352_v44, %v4353_v40 }
 0x2bd   :  { %v4452_v41 = vmax.f32 %v4451_v18, %v3926_v28  ;;  %v3927_v9 = vmax.f32 %v2856_v12, 0.0  ;;  %v2860_v63 = vadd.f32 %v2859_v50, %v7124_v56  ;;  %v1992_v18 = vld [vmem:[%s8472_s5 + $0xd0] sm:$0xff] }
 0x2be   :  { %v2861_v0 = vpop.f32.mrf.mxu0  ;;  %2435 = vmatmul.mubr.bf16.gmra.mxu1 %v6768_v38  ;;  %v5534_v30 = vcombine.low %v1992_v18, %v1996_v55  ;;  %v5535_v40 = vcombine.high %v1992_v18, %v1996_v55 }
 0x2bf   :  { %v4453_v11 = vrot.slane %v4452_v41, 4  ;;  %v4465_v35 = vmax.f32 %v4464_v39, %v3927_v9  ;;  %2444 = vmatprep.mubr.bf16.mxu1 %v8518_v2  ;;  %3103 = vmatpush1.bf16.msra.mxu1 %v5550_v36  ;;  %v3934_v51 = vmax.f32 %v2860_v63, 0.0  ;;  %v2862_v14 = vadd.f32 %v2861_v0, %v7128_v34 }
 0x2c0   :  { %v2863_v1 = vpop.f32.mrf.mxu0  ;;  %3104 = vmatprep.subr.bf16.mxu1 %v5543_v53  ;;  %v4366_v39 = vrot.slane %v4365_v62, 1 }
 0x2c1   :  { %v4454_v4 = vmax.f32 %v4452_v41, %v4453_v11  ;;  %v4466_v43 = vrot.slane %v4465_v35, 4  ;;  %v2864_v47 = vadd.f32 %v2863_v1, %v7124_v56  ;;  %v5656_v37 = vpop.f32.mrf.mxu1  ;;  %v3935_v28 = vmax.f32 %v2862_v14, 0.0 }
 0x2c2   :  { %v2865_v25 = vpop.f32.mrf.mxu0  ;;  %v4367_v14 = vmax.f32 %v4365_v62, %v4366_v39 }
 0x2c3   :  { %v4455_v58 = vrot.slane %v4454_v4, 2  ;;  %v4467_v52 = vmax.f32 %v4465_v35, %v4466_v43  ;;  %v3942_v13 = vmax.f32 %v2864_v47, 0.0  ;;  %v2866_v23 = vadd.f32 %v2865_v25, %v7128_v34  ;;  %v1775_v59 = vpop.f32.mrf.mxu1  ;;  %3105 = vmatpush1.bf16.msra.mxu1 %v5542_v61  ;;  %v1993_v47 = vld [vmem:[%s8472_s5 + $0xd8] sm:$0xff] }
 0x2c4   :  { %v2869_v31 = vpop.f32.mrf.mxu0  ;;  %v1776_v12 = vadd.f32 %v7143_v24, %v1775_v59  ;;  %3106 = vmatprep.subr.bf16.mxu1 %v5535_v40 }
 0x2c5   :  { %v4456_v5 = vmax.f32 %v4454_v4, %v4455_v58  ;;  %v4468_v49 = vrot.slane %v4467_v52, 2  ;;  %v4550_v20 = vmax.f32 %v3934_v51, %v3942_v13  ;;  %v3943_v32 = vmax.f32 %v2866_v23, 0.0  ;;  %v5657_v17 = vpop.f32.mrf.mxu1  ;;  %v1997_v51 = vld [vmem:[%s8472_s5 + $0xf8] sm:$0xff] }
 0x2c6   :  { %v2870_v44 = vadd.f32 %v2869_v31, %v7124_v56  ;;  %v2871_v50 = vpop.f32.mrf.mxu0  ;;  %2445 = vmatmul.mubr.bf16.gmra.mxu1 %v6787_v3  ;;  %v1910_v25 = vmax.f32 %v1776_v12, 0.0  ;;  %v1787_v18 = vadd.f32 %v7143_v24, %v5657_v17  ;;  %v1988_v12 = vld [vmem:[%s8472_s5 + $0xb0] sm:$0xff] }
 0x2c7   :  { %v4457_v36 = vrot.slane %v4456_v5, 1  ;;  %v4469_v41 = vmax.f32 %v4467_v52, %v4468_v49  ;;  %v2872_v9 = vadd.f32 %v2871_v50, %v7128_v34  ;;  %v1778_v53 = vpop.f32.mrf.mxu1  ;;  %v4563_v63 = vmax.f32 %v3935_v28, %v3943_v32  ;;  %2454 = vmatprep.mubr.bf16.mxu1 %v8518_v2  ;;  %3107 = vmatpush1.bf16.msra.mxu1 %v5534_v30 }
 0x2c8   :  { %v3950_v0 = vmax.f32 %v2870_v44, 0.0  ;;  %v1779_v11 = vadd.f32 %v7143_v24, %v1778_v53  ;;  %v2873_v35 = vpop.f32.mrf.mxu0  ;;  %v5537_v49 = vcombine.high %v1993_v47, %v1997_v51  ;;  %v1985_v44 = vld [vmem:[%s8472_s5 + $0x98] sm:$0xff] }
 0x2c9   :  { %v4458_v1 = vmax.f32 %v4456_v5, %v4457_v36  ;;  %v4470_v61 = vrot.slane %v4469_v41, 1  ;;  %v3951_v4 = vmax.f32 %v2872_v9, 0.0  ;;  %v2874_v43 = vadd.f32 %v2873_v35, %v7124_v56  ;;  %v1989_v9 = vld [vmem:[%s8472_s5 + $0xb8] sm:$0xff] }
 0x2ca   :  { %v4551_v58 = vmax.f32 %v4550_v20, %v3950_v0  ;;  %v1911_v52 = vmax.f32 %v1779_v11, 0.0  ;;  %v5536_v5 = vcombine.low %v1993_v47, %v1997_v51  ;;  %v1784_v20 = vadd.f32 %v7143_v24, %v5656_v37  ;;  %3459 = vmatprep.subr.bf16.mxu0 %v5537_v49  ;;  %v2875_v28 = vpop.f32.mrf.mxu0  ;;  %v1984_v37 = vld [vmem:[%s8472_s5 + $0x90] sm:$0xff] }
 0x2cb   :  { %v7295_v13 = vsel %vm5216_vm1, %v4458_v1, %v4354_v8  ;;  %v4471_v23 = vmax.f32 %v4469_v41, %v4470_v61  ;;  %v4564_v59 = vmax.f32 %v4563_v63, %v3951_v4  ;;  %v3958_v31 = vmax.f32 %v2874_v43, 0.0 }
 0x2cc   :  { %v7298_v55 = vpack.c.bf16 %v1911_v52, %v1910_v25  ;;  %v1913_v8 = vmax.f32 %v1787_v18, 0.0  ;;  %3460 = vmatpush1.bf16.msra.mxu0 %v5536_v5  ;;  %v1912_v17 = vmax.f32 %v1784_v20, 0.0  ;;  %v2876_v50 = vadd.f32 %v2875_v28, %v7128_v34 }
 0x2cd   :  { %v7301_v32 = vsel %vm5216_vm1, %v4471_v23, %v4367_v14  ;;  %v4552_v62 = vmax.f32 %v4551_v58, %v3958_v31  ;;  %v5526_v36 = vcombine.low %v1984_v37, %v1988_v12  ;;  %v5527_v41 = vcombine.high %v1984_v37, %v1988_v12 }
 0x2ce   :  { %2978 = vmatmul.mubr.bf16.gmra.mxu0 %v7298_v55  ;;  %2455 = vmatmul.mubr.bf16.gmra.mxu1 %v6815_v15  ;;  %v7308_v39 = vpack.c.bf16 %v1913_v8, %v1912_v17  ;;  %v5528_v53 = vcombine.low %v1985_v44, %v1989_v9  ;;  %v5529_v30 = vcombine.high %v1985_v44, %v1989_v9  ;;  %v3959_v0 = vmax.f32 %v2876_v50, 0.0 }
 0x2cf   :  { %2987 = vmatprep.mubr.bf16.mxu0 %v8518_v2  ;;  %2464 = vmatprep.mubr.bf16.mxu1 %v8518_v2 }
 0x2d0   :  { %3108 = vmatprep.subr.bf16.mxu1 %v5527_v41  ;;  %3461 = vmatprep.subr.bf16.mxu0 %v5529_v30  ;;  %v4565_v4 = vmax.f32 %v4564_v59, %v3959_v0 }
 0x2d1   :  { %3109 = vmatpush1.bf16.msra.mxu1 %v5526_v36  ;;  %3462 = vmatpush1.bf16.msra.mxu0 %v5528_v53 }
 0x2d6   :  { %2988 = vmatmul.mubr.bf16.gmra.mxu0 %v7308_v39  ;;  %2465 = vmatmul.mubr.bf16.gmra.mxu1 %v6835_v33 }
 0x2d7   :  { %2997 = vmatprep.mubr.bf16.mxu0 %v8518_v2  ;;  %2474 = vmatprep.mubr.bf16.mxu1 %v8518_v2 }
 0x2dd   :  { %v2879_v63 = vpop.f32.mrf.mxu0 }
 0x2de   :  { %v2880_v11 = vadd.f32 %v2879_v63, %v7124_v56  ;;  %2475 = vmatmul.mubr.bf16.gmra.mxu1 %v6846_v57 }
 0x2df   :  { %v2881_v35 = vpop.f32.mrf.mxu0  ;;  %2484 = vmatprep.mubr.bf16.mxu1 %v8518_v2 }
 0x2e0   :  { %v3966_v40 = vmax.f32 %v2880_v11, 0.0  ;;  %v2882_v1 = vadd.f32 %v2881_v35, %v7128_v34 }
 0x2e1   :  { %v2883_v61 = vpop.f32.mrf.mxu0 }
 0x2e2   :  { %v4553_v43 = vmax.f32 %v4552_v62, %v3966_v40  ;;  %v3967_v47 = vmax.f32 %v2882_v1, 0.0  ;;  %v2884_v51 = vadd.f32 %v2883_v61, %v7124_v56  ;;  %v5660_v14 = vpop.f32.mrf.mxu1 }
 0x2e3   :  { %v2885_v25 = vpop.f32.mrf.mxu0 }
 0x2e4   :  { %v4566_v58 = vmax.f32 %v4565_v4, %v3967_v47  ;;  %v3974_v52 = vmax.f32 %v2884_v51, 0.0  ;;  %v2886_v23 = vadd.f32 %v2885_v25, %v7128_v34  ;;  %v1791_v31 = vpop.f32.mrf.mxu1 }
 0x2e5   :  { %v2889_v18 = vpop.f32.mrf.mxu0  ;;  %v1792_v17 = vadd.f32 %v7143_v24, %v1791_v31 }
 0x2e6   :  { %v4554_v5 = vmax.f32 %v4553_v43, %v3974_v52  ;;  %v3975_v49 = vmax.f32 %v2886_v23, 0.0  ;;  %v2890_v20 = vadd.f32 %v2889_v18, %v7124_v56  ;;  %v5661_v8 = vpop.f32.mrf.mxu1  ;;  %2485 = vmatmul.mubr.bf16.gmra.mxu1 %v6868_v48  ;;  %v1800_v43 = vadd.f32 %v7143_v24, %v5660_v14 }
 0x2e7   :  { %v2891_v59 = vpop.f32.mrf.mxu0  ;;  %2494 = vmatprep.mubr.bf16.mxu1 %v8518_v2  ;;  %v1914_v53 = vmax.f32 %v1792_v17, 0.0  ;;  %v1803_v40 = vadd.f32 %v7143_v24, %v5661_v8 }
 0x2e8   :  { %v3982_v62 = vmax.f32 %v2890_v20, 0.0  ;;  %v2892_v28 = vadd.f32 %v2891_v59, %v7128_v34  ;;  %v1794_v37 = vpop.f32.mrf.mxu1  ;;  %v4567_v50 = vmax.f32 %v4566_v58, %v3975_v49  ;;  %v1916_v23 = vmax.f32 %v1800_v43, 0.0 }
 0x2e9   :  { %v1795_v12 = vadd.f32 %v7143_v24, %v1794_v37  ;;  %v2893_v44 = vpop.f32.mrf.mxu0  ;;  %v1917_v25 = vmax.f32 %v1803_v40, 0.0 }
 0x2ea   :  { %v4555_v36 = vmax.f32 %v4554_v5, %v3982_v62  ;;  %v3983_v41 = vmax.f32 %v2892_v28, 0.0  ;;  %v2894_v9 = vadd.f32 %v2893_v44, %v7124_v56  ;;  %v1977_v44 = vld [vmem:[%s8472_s5 + $0x58] sm:$0xff] }
 0x2eb   :  { %v1915_v30 = vmax.f32 %v1795_v12, 0.0  ;;  %v2895_v63 = vpop.f32.mrf.mxu0  ;;  %v7349_v5 = vpack.c.bf16 %v1917_v25, %v1916_v23  ;;  %v1976_v25 = vld [vmem:[%s8472_s5 + $0x50] sm:$0xff] }
 0x2ec   :  { %v4568_v0 = vmax.f32 %v4567_v50, %v3983_v41  ;;  %v3990_v11 = vmax.f32 %v2894_v9, 0.0  ;;  %v2896_v35 = vadd.f32 %v2895_v63, %v7128_v34  ;;  %v1981_v50 = vld [vmem:[%s8472_s5 + $0x78] sm:$0xff] }
 0x2ed   :  { %v7342_v1 = vpack.c.bf16 %v1915_v30, %v1914_v53  ;;  %v5520_v41 = vcombine.low %v1977_v44, %v1981_v50  ;;  %v1969_v53 = vld [vmem:[%s8472_s5 + $0x18] sm:$0xff] }
 0x2ee   :  { %v4556_v61 = vmax.f32 %v4555_v36, %v3990_v11  ;;  %v3991_v4 = vmax.f32 %v2896_v35, 0.0  ;;  %2495 = vmatmul.mubr.bf16.gmra.mxu1 %v6885_v29  ;;  %v1973_v30 = vld [vmem:[%s8472_s5 + $0x38] sm:$0xff] }
 0x2ef   :  { %2998 = vmatmul.mubr.bf16.gmra.mxu0 %v7342_v1  ;;  %2504 = vmatprep.mubr.bf16.mxu1 %v8518_v2  ;;  %v5513_v11 = vcombine.high %v1969_v53, %v1973_v30  ;;  %v5512_v40 = vcombine.low %v1969_v53, %v1973_v30 }
 0x2f0   :  { %v4557_v47 = vrot.slane %v4556_v61, 4  ;;  %v4569_v51 = vmax.f32 %v4568_v0, %v3991_v4  ;;  %3007 = vmatprep.mubr.bf16.mxu0 %v8518_v2 }
 0x2f2   :  { %v4558_v58 = vmax.f32 %v4556_v61, %v4557_v47  ;;  %v4570_v52 = vrot.slane %v4569_v51, 4 }
 0x2f4   :  { %v4559_v31 = vrot.slane %v4558_v58, 2  ;;  %v4571_v18 = vmax.f32 %v4569_v51, %v4570_v52 }
 0x2f6   :  { %v4560_v49 = vmax.f32 %v4558_v58, %v4559_v31  ;;  %v4572_v14 = vrot.slane %v4571_v18, 2  ;;  %2505 = vmatmul.mubr.bf16.gmra.mxu1 %v6910_v26  ;;  %v1980_v58 = vld [vmem:[%s8472_s5 + $0x70] sm:$0xff] }
 0x2f7   :  { %3008 = vmatmul.mubr.bf16.gmra.mxu0 %v7349_v5  ;;  %2514 = vmatprep.mubr.bf16.mxu1 %v8518_v2  ;;  %v5518_v23 = vcombine.low %v1976_v25, %v1980_v58  ;;  %v5519_v31 = vcombine.high %v1976_v25, %v1980_v58 }
 0x2f8   :  { %v4561_v20 = vrot.slane %v4560_v49, 1  ;;  %v4573_v8 = vmax.f32 %v4571_v18, %v4572_v14  ;;  %3017 = vmatprep.mubr.bf16.mxu0 %v8518_v2 }
 0x2f9   :  { %3110 = vmatprep.subr.bf16.mxu1 %v5519_v31 }
 0x2fa   :  { %v4562_v17 = vmax.f32 %v4560_v49, %v4561_v20  ;;  %v4574_v59 = vrot.slane %v4573_v8, 1  ;;  %3111 = vmatpush1.bf16.msra.mxu1 %v5518_v23 }
 0x2fc   :  { %v7357_v62 = vsel %vm5218_vm2, %v4562_v17, %v7295_v13  ;;  %v4575_v28 = vmax.f32 %v4573_v8, %v4574_v59  ;;  %v5521_v13 = vcombine.high %v1977_v44, %v1981_v50 }
 0x2fe   :  { %v7361_v37 = vsel %vm5218_vm2, %v4575_v28, %v7301_v32  ;;  %2515 = vmatmul.mubr.bf16.gmra.mxu1 %v6919_v46  ;;  %3463 = vmatprep.subr.bf16.mxu0 %v5521_v13 }
 0x2ff   :  { %2524 = vmatprep.mubr.bf16.mxu1 %v8518_v2  ;;  %3464 = vmatpush1.bf16.msra.mxu0 %v5520_v41 }
 0x300   :  { %3465 = vmatprep.subr.bf16.mxu0 %v5513_v11 }
 0x302   :  { %v2899_v12 = vpop.f32.mrf.mxu0 }
 0x303   :  { %v2900_v9 = vadd.f32 %v2899_v12, %v7124_v56  ;;  %3466 = vmatpush1.bf16.msra.mxu0 %v5512_v40 }
 0x304   :  { %v2901_v36 = vpop.f32.mrf.mxu0 }
 0x305   :  { %v3998_v61 = vmax.f32 %v2900_v9, 0.0  ;;  %v2902_v4 = vadd.f32 %v2901_v36, %v7128_v34 }
 0x306   :  { %v2903_v32 = vpop.f32.mrf.mxu0  ;;  %2525 = vmatmul.mubr.bf16.gmra.mxu1 %v6980_v54 }
 0x307   :  { %v2904_v63 = vadd.f32 %v2903_v32, %v7124_v56  ;;  %v5664_v0 = vpop.f32.mrf.mxu1  ;;  %2534 = vmatprep.mubr.bf16.mxu1 %v8518_v2  ;;  %v3999_v59 = vmax.f32 %v2902_v4, 0.0 }
 0x308   :  { %v2905_v35 = vpop.f32.mrf.mxu0  ;;  %v1816_v4 = vadd.f32 %v7143_v24, %v5664_v0 }
 0x309   :  { %v4006_v43 = vmax.f32 %v2904_v63, 0.0  ;;  %v2906_v47 = vadd.f32 %v2905_v35, %v7128_v34  ;;  %v1807_v51 = vpop.f32.mrf.mxu1 }
 0x30a   :  { %v2909_v52 = vpop.f32.mrf.mxu0  ;;  %v1808_v8 = vadd.f32 %v7143_v24, %v1807_v51 }
 0x30b   :  { %v4654_v18 = vmax.f32 %v3998_v61, %v4006_v43  ;;  %v4007_v49 = vmax.f32 %v2906_v47, 0.0  ;;  %v2910_v14 = vadd.f32 %v2909_v52, %v7124_v56  ;;  %v5665_v20 = vpop.f32.mrf.mxu1  ;;  %v1920_v47 = vmax.f32 %v1816_v4, 0.0 }
 0x30c   :  { %v2911_v17 = vpop.f32.mrf.mxu0  ;;  %v1918_v53 = vmax.f32 %v1808_v8, 0.0  ;;  %v1819_v35 = vadd.f32 %v7143_v24, %v5665_v20 }
 0x30d   :  { %v4014_v28 = vmax.f32 %v2910_v14, 0.0  ;;  %v2912_v12 = vadd.f32 %v2911_v17, %v7128_v34  ;;  %v1810_v44 = vpop.f32.mrf.mxu1  ;;  %v4667_v36 = vmax.f32 %v3999_v59, %v4007_v49  ;;  %v1968_v49 = vld [vmem:[%s8472_s5 + $0x10] sm:$0xff] }
 0x30e   :  { %v1811_v50 = vadd.f32 %v7143_v24, %v1810_v44  ;;  %v2913_v13 = vpop.f32.mrf.mxu0  ;;  %2535 = vmatmul.mubr.bf16.gmra.mxu1 %v6990_v16  ;;  %v1921_v43 = vmax.f32 %v1819_v35, 0.0  ;;  %v1972_v14 = vld [vmem:[%s8472_s5 + $0x30] sm:$0xff] }
 0x30f   :  { %v4655_v41 = vmax.f32 %v4654_v18, %v4014_v28  ;;  %v4015_v9 = vmax.f32 %v2912_v12, 0.0  ;;  %v2914_v32 = vadd.f32 %v2913_v13, %v7124_v56  ;;  %2544 = vmatprep.mubr.bf16.mxu1 %v8518_v2  ;;  %v5510_v8 = vcombine.low %v1968_v49, %v1972_v14 }
 0x310   :  { %v1919_v30 = vmax.f32 %v1811_v50, 0.0  ;;  %v7404_v51 = vpack.c.bf16 %v1921_v43, %v1920_v47  ;;  %v2915_v25 = vpop.f32.mrf.mxu0  ;;  %v5511_v17 = vcombine.high %v1968_v49, %v1972_v14 }
 0x311   :  { %v4668_v63 = vmax.f32 %v4667_v36, %v4015_v9  ;;  %v4022_v11 = vmax.f32 %v2914_v32, 0.0  ;;  %v2916_v24 = vadd.f32 %v2915_v25, %v7128_v34 }
 0x312   :  { %v7397_v40 = vpack.c.bf16 %v1919_v30, %v1918_v53  ;;  %3112 = vmatprep.subr.bf16.mxu1 %v5511_v17 }
 0x313   :  { %v4656_v61 = vmax.f32 %v4655_v41, %v4022_v11  ;;  %v4023_v58 = vmax.f32 %v2916_v24, 0.0  ;;  %3113 = vmatpush1.bf16.msra.mxu1 %v5510_v8 }
 0x314   :  { %3018 = vmatmul.mubr.bf16.gmra.mxu0 %v7397_v40 }
 0x315   :  { %3027 = vmatprep.mubr.bf16.mxu0 %v8518_v2  ;;  %v4669_v59 = vmax.f32 %v4668_v63, %v4023_v58 }
 0x316   :  { %2545 = vmatmul.mubr.bf16.gmra.mxu1 %v7057_v21 }
 0x317   :  { %2554 = vmatprep.mubr.bf16.mxu1 %v8518_v2 }
 0x31c   :  { %3028 = vmatmul.mubr.bf16.gmra.mxu0 %v7404_v51 }
 0x31d   :  { %3037 = vmatprep.mubr.bf16.mxu0 %v8518_v2 }
 0x31e   :  { %2555 = vmatmul.mubr.bf16.gmra.mxu1 %v7067_v45 }
 0x31f   :  { %2564 = vmatprep.mubr.bf16.mxu1 %v8518_v2 }
 0x323   :  { %v2919_v0 = vpop.f32.mrf.mxu0 }
 0x324   :  { %v2920_v52 = vadd.f32 %v2919_v0, %v7124_v56 }
 0x325   :  { %v2921_v23 = vpop.f32.mrf.mxu0 }
 0x326   :  { %v4030_v31 = vmax.f32 %v2920_v52, 0.0  ;;  %v2922_v18 = vadd.f32 %v2921_v23, %v7128_v34  ;;  %2565 = vmatmul.mubr.bf16.gmra.mxu1 %v7095_v7 }
 0x327   :  { %v2923_v20 = vpop.f32.mrf.mxu0  ;;  %2574 = vmatprep.mubr.bf16.mxu1 %v8518_v2 }
 0x328   :  { %v4657_v28 = vmax.f32 %v4656_v61, %v4030_v31  ;;  %v4031_v12 = vmax.f32 %v2922_v18, 0.0  ;;  %v2924_v44 = vadd.f32 %v2923_v20, %v7124_v56  ;;  %v5668_v50 = vpop.f32.mrf.mxu1  ;;  %v7427_v61 = vld [vmem:[%s8473_s4] ss:$0 sm:$0xff] }
 0x329   :  { %v2925_v13 = vpop.f32.mrf.mxu0 }
 0x32a   :  { %v4670_v36 = vmax.f32 %v4669_v59, %v4031_v12  ;;  %v4038_v41 = vmax.f32 %v2924_v44, 0.0  ;;  %v2926_v9 = vadd.f32 %v2925_v13, %v7128_v34  ;;  %v1823_v32 = vpop.f32.mrf.mxu1 }
 0x32b   :  { %v2929_v53 = vpop.f32.mrf.mxu0  ;;  %v1824_v4 = vadd.f32 %v7427_v61, %v1823_v32 }
 0x32c   :  { %v4658_v30 = vmax.f32 %v4657_v28, %v4038_v41  ;;  %v4039_v11 = vmax.f32 %v2926_v9, 0.0  ;;  %v2930_v63 = vadd.f32 %v2929_v53, %v7124_v56  ;;  %v5669_v35 = vpop.f32.mrf.mxu1 }
 0x32d   :  { %v2931_v43 = vpop.f32.mrf.mxu0  ;;  %v1922_v49 = vmax.f32 %v1824_v4, 0.0  ;;  %v1835_v28 = vadd.f32 %v7427_v61, %v5669_v35 }
 0x32e   :  { %v4046_v47 = vmax.f32 %v2930_v63, 0.0  ;;  %v2932_v25 = vadd.f32 %v2931_v43, %v7128_v34  ;;  %v1826_v24 = vpop.f32.mrf.mxu1  ;;  %2575 = vmatmul.mubr.bf16.gmra.mxu1 %v7103_v60  ;;  %v4671_v52 = vmax.f32 %v4670_v36, %v4039_v11  ;;  %v1832_v36 = vadd.f32 %v7427_v61, %v5668_v50 }
 0x32f   :  { %v1827_v0 = vadd.f32 %v7427_v61, %v1826_v24  ;;  %v2933_v58 = vpop.f32.mrf.mxu0  ;;  %2584 = vmatprep.mubr.bf16.mxu1 %v8518_v2  ;;  %v1925_v32 = vmax.f32 %v1835_v28, 0.0 }
 0x330   :  { %v4659_v23 = vmax.f32 %v4658_v30, %v4046_v47  ;;  %v4047_v31 = vmax.f32 %v2932_v25, 0.0  ;;  %v2934_v18 = vadd.f32 %v2933_v58, %v7124_v56  ;;  %v1924_v11 = vmax.f32 %v1832_v36, 0.0 }
 0x331   :  { %v1923_v14 = vmax.f32 %v1827_v0, 0.0  ;;  %v2935_v20 = vpop.f32.mrf.mxu0 }
 0x332   :  { %v4672_v8 = vmax.f32 %v4671_v52, %v4047_v31  ;;  %v4054_v17 = vmax.f32 %v2934_v18, 0.0  ;;  %v2936_v59 = vadd.f32 %v2935_v20, %v7128_v34  ;;  %v7444_v4 = vpack.c.bf16 %v1925_v32, %v1924_v11 }
 0x333   :  { %v7437_v12 = vpack.c.bf16 %v1923_v14, %v1922_v49 }
 0x334   :  { %v4660_v44 = vmax.f32 %v4659_v23, %v4054_v17  ;;  %v4055_v13 = vmax.f32 %v2936_v59, 0.0  ;;  %8535 = vst [vmem:[#allocation6_spill] sm:$0xff] %v7444_v4 }
 0x335   :  { %3038 = vmatmul.mubr.bf16.gmra.mxu0 %v7437_v12 }
 0x336   :  { %v4661_v41 = vrot.slane %v4660_v44, 4  ;;  %v4673_v9 = vmax.f32 %v4672_v8, %v4055_v13  ;;  %3047 = vmatprep.mubr.bf16.mxu0 %v8518_v2  ;;  %2585 = vmatmul.mubr.bf16.gmra.mxu1 %v7155_v27 }
 0x337   :  { %2594 = vmatprep.mubr.bf16.mxu1 %v8518_v2 }
 0x338   :  { %v4662_v53 = vmax.f32 %v4660_v44, %v4661_v41  ;;  %v4674_v30 = vrot.slane %v4673_v9, 4 }
 0x33a   :  { %v4663_v63 = vrot.slane %v4662_v53, 2  ;;  %v4675_v35 = vmax.f32 %v4673_v9, %v4674_v30 }
 0x33c   :  { %v4664_v43 = vmax.f32 %v4662_v53, %v4663_v63  ;;  %v4676_v50 = vrot.slane %v4675_v35, 2 }
 0x33d   :  { %3048 = vmatmul.mubr.bf16.gmra.mxu0 %v7444_v4 }
 0x33e   :  { %v4665_v47 = vrot.slane %v4664_v43, 1  ;;  %v4677_v25 = vmax.f32 %v4675_v35, %v4676_v50  ;;  %3057 = vmatprep.mubr.bf16.mxu0 %v8518_v2  ;;  %2595 = vmatmul.mubr.bf16.gmra.mxu1 %v7170_v22 }
 0x33f   :  { %2604 = vmatprep.mubr.bf16.mxu1 %v8518_v2 }
 0x340   :  { %v4666_v24 = vmax.f32 %v4664_v43, %v4665_v47  ;;  %v4678_v0 = vrot.slane %v4677_v25, 1 }
 0x342   :  { %v7452_v58 = vsel %vm5220_vm3, %v4666_v24, %v7357_v62  ;;  %v4679_v52 = vmax.f32 %v4677_v25, %v4678_v0 }
 0x344   :  { %v7456_v23 = vsel %vm5220_vm3, %v4679_v52, %v7361_v37 }
 0x346   :  { %2605 = vmatmul.mubr.bf16.gmra.mxu1 %v7219_v19 }
 0x347   :  { %2614 = vmatprep.mubr.bf16.mxu1 %v8518_v2 }
 0x348   :  { %v2939_v31 = vpop.f32.mrf.mxu0 }
 0x349   :  { %v2940_v49 = vadd.f32 %v2939_v31, %v7124_v56 }
 0x34a   :  { %v2941_v18 = vpop.f32.mrf.mxu0 }
 0x34b   :  { %v4062_v62 = vmax.f32 %v2940_v49, 0.0  ;;  %v2942_v59 = vadd.f32 %v2941_v18, %v7128_v34 }
 0x34c   :  { %v2943_v14 = vpop.f32.mrf.mxu0 }
 0x34d   :  { %v2944_v20 = vadd.f32 %v2943_v14, %v7124_v56  ;;  %v5672_v8 = vpop.f32.mrf.mxu1  ;;  %v4063_v11 = vmax.f32 %v2942_v59, 0.0 }
 0x34e   :  { %v2945_v17 = vpop.f32.mrf.mxu0  ;;  %2615 = vmatmul.mubr.bf16.gmra.mxu1 %v7233_v10  ;;  %v1848_v59 = vadd.f32 %v7427_v61, %v5672_v8 }
 0x34f   :  { %v4070_v28 = vmax.f32 %v2944_v20, 0.0  ;;  %v2946_v37 = vadd.f32 %v2945_v17, %v7128_v34  ;;  %v1839_v44 = vpop.f32.mrf.mxu1  ;;  %2624 = vmatprep.mubr.bf16.mxu1 %v8518_v2 }
 0x350   :  { %v2949_v13 = vpop.f32.mrf.mxu0  ;;  %v1840_v53 = vadd.f32 %v7427_v61, %v1839_v44 }
 0x351   :  { %v4758_v36 = vmax.f32 %v4062_v62, %v4070_v28  ;;  %v4071_v41 = vmax.f32 %v2946_v37, 0.0  ;;  %v2950_v9 = vadd.f32 %v2949_v13, %v7124_v56  ;;  %v5673_v32 = vpop.f32.mrf.mxu1  ;;  %v1928_v37 = vmax.f32 %v1848_v59, 0.0 }
 0x352   :  { %v2951_v30 = vpop.f32.mrf.mxu0  ;;  %v1926_v31 = vmax.f32 %v1840_v53, 0.0  ;;  %v1851_v20 = vadd.f32 %v7427_v61, %v5673_v32 }
 0x353   :  { %v4078_v63 = vmax.f32 %v2950_v9, 0.0  ;;  %v2952_v35 = vadd.f32 %v2951_v30, %v7128_v34  ;;  %v1842_v43 = vpop.f32.mrf.mxu1  ;;  %v4771_v25 = vmax.f32 %v4063_v11, %v4071_v41 }
 0x354   :  { %v1843_v50 = vadd.f32 %v7427_v61, %v1842_v43  ;;  %v2953_v47 = vpop.f32.mrf.mxu0  ;;  %v1929_v28 = vmax.f32 %v1851_v20, 0.0 }
 0x355   :  { %v4759_v24 = vmax.f32 %v4758_v36, %v4078_v63  ;;  %v4079_v0 = vmax.f32 %v2952_v35, 0.0  ;;  %v2954_v52 = vadd.f32 %v2953_v47, %v7124_v56 }
 0x356   :  { %v1927_v18 = vmax.f32 %v1843_v50, 0.0  ;;  %2625 = vmatmul.mubr.bf16.gmra.mxu1 %v7298_v55  ;;  %v7480_v44 = vpack.c.bf16 %v1929_v28, %v1928_v37  ;;  %v2955_v13 = vpop.f32.mrf.mxu0 }
 0x357   :  { %v4772_v49 = vmax.f32 %v4771_v25, %v4079_v0  ;;  %v4086_v14 = vmax.f32 %v2954_v52, 0.0  ;;  %2634 = vmatprep.mubr.bf16.mxu1 %v8518_v2  ;;  %v2956_v36 = vadd.f32 %v2955_v13, %v7128_v34 }
 0x358   :  { %v7473_v17 = vpack.c.bf16 %v1927_v18, %v1926_v31  ;;  %8537 = vst [vmem:[#allocation8_spill] sm:$0xff] %v7480_v44 }
 0x359   :  { %v4760_v62 = vmax.f32 %v4759_v24, %v4086_v14  ;;  %v4087_v41 = vmax.f32 %v2956_v36, 0.0 }
 0x35a   :  { %8536 = vst [vmem:[#allocation2_spill] sm:$0xff] %v7473_v17  ;;  %3058 = vmatmul.mubr.bf16.gmra.mxu0 %v7473_v17 }
 0x35b   :  { %3067 = vmatprep.mubr.bf16.mxu0 %v8518_v2  ;;  %v4773_v63 = vmax.f32 %v4772_v49, %v4087_v41 }
 0x35e   :  { %2635 = vmatmul.mubr.bf16.gmra.mxu1 %v7308_v39 }
 0x35f   :  { %2644 = vmatprep.mubr.bf16.mxu1 %v8518_v2 }
 0x362   :  { %3068 = vmatmul.mubr.bf16.gmra.mxu0 %v7480_v44 }
 0x363   :  { %3077 = vmatprep.mubr.bf16.mxu0 %v8518_v2 }
 0x366   :  { %2645 = vmatmul.mubr.bf16.gmra.mxu1 %v7342_v1 }
 0x367   :  { %2654 = vmatprep.mubr.bf16.mxu1 %v8518_v2 }
 0x369   :  { %v2959_v8 = vpop.f32.mrf.mxu0 }
 0x36a   :  { %v2960_v9 = vadd.f32 %v2959_v8, %v7124_v56 }
 0x36b   :  { %v2961_v32 = vpop.f32.mrf.mxu0 }
 0x36c   :  { %v4094_v53 = vmax.f32 %v2960_v9, 0.0  ;;  %v2962_v30 = vadd.f32 %v2961_v32, %v7128_v34  ;;  %v5792_v9 = vld [vmem:[%s8474_s6] sm:$0xff]  ;;  %v8538_v32 = vsub.s32 0, %v8533_v6 }
 0x36d   :  { %v2963_v11 = vpop.f32.mrf.mxu0 }
 0x36e   :  { %v4761_v35 = vmax.f32 %v4760_v62, %v4094_v53  ;;  %v4095_v43 = vmax.f32 %v2962_v30, 0.0  ;;  %v2964_v50 = vadd.f32 %v2963_v11, %v7124_v56  ;;  %v5676_v47 = vpop.f32.mrf.mxu1  ;;  %2655 = vmatmul.mubr.bf16.gmra.mxu1 %v7349_v5  ;;  %v7503_v53 = vrot.slane %v5792_v9, %v8538_v32 }
 0x36f   :  { %v2965_v25 = vpop.f32.mrf.mxu0  ;;  %2664 = vmatprep.mubr.bf16.mxu1 %v8518_v2 }
 0x370   :  { %v4774_v24 = vmax.f32 %v4773_v63, %v4095_v43  ;;  %v4102_v0 = vmax.f32 %v2964_v50, 0.0  ;;  %v2966_v52 = vadd.f32 %v2965_v25, %v7128_v34  ;;  %v1855_v31 = vpop.f32.mrf.mxu1 }
 0x371   :  { %v2969_v18 = vpop.f32.mrf.mxu0  ;;  %v1856_v59 = vadd.f32 %v7427_v61, %v1855_v31 }
 0x372   :  { %v4762_v14 = vmax.f32 %v4761_v35, %v4102_v0  ;;  %v4103_v20 = vmax.f32 %v2966_v52, 0.0  ;;  %v2970_v49 = vadd.f32 %v2969_v18, %v7124_v56  ;;  %v5677_v62 = vpop.f32.mrf.mxu1  ;;  %v8539_v52 = vsub.s32 1, %v8533_v6 }
 0x373   :  { %v2971_v28 = vpop.f32.mrf.mxu0  ;;  %v1930_v50 = vmax.f32 %v1856_v59, 0.0  ;;  %v1864_v59 = vadd.f32 %v7427_v61, %v5676_v47 }
 0x374   :  { %v4110_v37 = vmax.f32 %v2970_v49, 0.0  ;;  %v2972_v13 = vadd.f32 %v2971_v28, %v7128_v34  ;;  %v1858_v36 = vpop.f32.mrf.mxu1  ;;  %v4775_v30 = vmax.f32 %v4774_v24, %v4103_v20  ;;  %v7509_v31 = vrot.slane %v5792_v9, %v8539_v52 }
 0x375   :  { %v1859_v8 = vadd.f32 %v7427_v61, %v1858_v36  ;;  %v2973_v41 = vpop.f32.mrf.mxu0  ;;  %v1867_v20 = vadd.f32 %v7427_v61, %v5677_v62  ;;  %v1932_v61 = vmax.f32 %v1864_v59, 0.0 }
 0x376   :  { %v4763_v11 = vmax.f32 %v4762_v14, %v4110_v37  ;;  %v4111_v63 = vmax.f32 %v2972_v13, 0.0  ;;  %v2974_v35 = vadd.f32 %v2973_v41, %v7124_v56  ;;  %v2426_v43 = vpop.f32.mrf.mxu1  ;;  %2665 = vmatmul.mubr.bf16.gmra.mxu1 %v7397_v40 }
 0x377   :  { %v1931_v25 = vmax.f32 %v1859_v8, 0.0  ;;  %v2975_v0 = vpop.f32.mrf.mxu0  ;;  %2674 = vmatprep.mubr.bf16.mxu1 %v8518_v2  ;;  %v2427_v37 = vadd.f32 %v2426_v43, %v7503_v53  ;;  %v1933_v62 = vmax.f32 %v1867_v20, 0.0 }
 0x378   :  { %v4776_v18 = vmax.f32 %v4775_v30, %v4111_v63  ;;  %v4118_v49 = vmax.f32 %v2974_v35, 0.0  ;;  %v2976_v24 = vadd.f32 %v2975_v0, %v7128_v34  ;;  %v2428_v14 = vpop.f32.mrf.mxu1 }
 0x379   :  { %v7514_v28 = vpack.c.bf16 %v1931_v25, %v1930_v50  ;;  %v2429_v41 = vadd.f32 %v2428_v14, %v7509_v31  ;;  %v3804_v35 = vmax.f32 %v2427_v37, 0.0  ;;  %v7526_v37 = vpack.c.bf16 %v1933_v62, %v1932_v61 }
 0x37a   :  { %v4764_v13 = vmax.f32 %v4763_v11, %v4118_v49  ;;  %v4119_v36 = vmax.f32 %v2976_v24, 0.0  ;;  %v2430_v8 = vpop.f32.mrf.mxu1 }
 0x37b   :  { %8540 = vst [vmem:[#allocation4_spill] sm:$0xff] %v7514_v28  ;;  %v2431_v9 = vadd.f32 %v2430_v8, %v7503_v53  ;;  %3078 = vmatmul.mubr.bf16.gmra.mxu0 %v7514_v28  ;;  %v3805_v0 = vmax.f32 %v2429_v41, 0.0  ;;  %8541 = vst [vmem:[#allocation9_spill] sm:$0xff] %v7526_v37 }
 0x37c   :  { %v4765_v32 = vrot.slane %v4764_v13, 4  ;;  %v4777_v30 = vmax.f32 %v4776_v18, %v4119_v36  ;;  %v2432_v63 = vpop.f32.mrf.mxu1  ;;  %3087 = vmatprep.mubr.bf16.mxu0 %v8518_v2 }
 0x37d   :  { %v3812_v50 = vmax.f32 %v2431_v9, 0.0  ;;  %v2433_v43 = vadd.f32 %v2432_v63, %v7509_v31 }
 0x37e   :  { %v4766_v47 = vmax.f32 %v4764_v13, %v4765_v32  ;;  %v4778_v11 = vrot.slane %v4777_v30, 4  ;;  %v2436_v25 = vpop.f32.mrf.mxu1  ;;  %2675 = vmatmul.mubr.bf16.gmra.mxu1 %v7404_v51 }
 0x37f   :  { %v4316_v52 = vmax.f32 %v3804_v35, %v3812_v50  ;;  %v3813_v49 = vmax.f32 %v2433_v43, 0.0  ;;  %v2437_v24 = vadd.f32 %v2436_v25, %v7503_v53  ;;  %2684 = vmatprep.mubr.bf16.mxu1 %v8518_v2 }
 0x380   :  { %v4767_v18 = vrot.slane %v4766_v47, 2  ;;  %v4779_v14 = vmax.f32 %v4777_v30, %v4778_v11  ;;  %v2438_v20 = vpop.f32.mrf.mxu1 }
 0x381   :  { %v4329_v36 = vmax.f32 %v3805_v0, %v3813_v49  ;;  %v3820_v8 = vmax.f32 %v2437_v24, 0.0  ;;  %v2439_v59 = vadd.f32 %v2438_v20, %v7509_v31 }
 0x382   :  { %v4768_v13 = vmax.f32 %v4766_v47, %v4767_v18  ;;  %v4780_v9 = vrot.slane %v4779_v14, 2  ;;  %v2440_v32 = vpop.f32.mrf.mxu1 }
 0x383   :  { %v4317_v63 = vmax.f32 %v4316_v52, %v3820_v8  ;;  %v3821_v41 = vmax.f32 %v2439_v59, 0.0  ;;  %v2441_v35 = vadd.f32 %v2440_v32, %v7503_v53  ;;  %3088 = vmatmul.mubr.bf16.gmra.mxu0 %v7526_v37 }
 0x384   :  { %v4769_v50 = vrot.slane %v4768_v13, 1  ;;  %v4781_v43 = vmax.f32 %v4779_v14, %v4780_v9  ;;  %v2442_v25 = vpop.f32.mrf.mxu1  ;;  %3483 = vmatprep.mubr.bf16.mxu0 %v8518_v2 }
 0x385   :  { %v4330_v30 = vmax.f32 %v4329_v36, %v3821_v41  ;;  %v3828_v62 = vmax.f32 %v2441_v35, 0.0  ;;  %v2443_v61 = vadd.f32 %v2442_v25, %v7509_v31 }
 0x386   :  { %v4770_v11 = vmax.f32 %v4768_v13, %v4769_v50  ;;  %v4782_v47 = vrot.slane %v4781_v43, 1  ;;  %v2446_v0 = vpop.f32.mrf.mxu1  ;;  %2685 = vmatmul.mubr.bf16.gmra.mxu1 %v7437_v12 }
 0x387   :  { %v4318_v52 = vmax.f32 %v4317_v63, %v3828_v62  ;;  %v3829_v49 = vmax.f32 %v2443_v61, 0.0  ;;  %v2447_v24 = vadd.f32 %v2446_v0, %v7503_v53  ;;  %2694 = vmatprep.mubr.bf16.mxu1 %v8518_v2 }
 0x388   :  { %v7538_v18 = vsel %vm5222_vm4, %v4770_v11, %v7452_v58  ;;  %v4783_v14 = vmax.f32 %v4781_v43, %v4782_v47  ;;  %v2448_v20 = vpop.f32.mrf.mxu1 }
 0x389   :  { %v4331_v36 = vmax.f32 %v4330_v30, %v3829_v49  ;;  %v3836_v8 = vmax.f32 %v2447_v24, 0.0  ;;  %v2449_v59 = vadd.f32 %v2448_v20, %v7509_v31 }
 0x38a   :  { %v7543_v13 = vsel %vm5222_vm4, %v4783_v14, %v7456_v23  ;;  %v2450_v9 = vpop.f32.mrf.mxu1 }
 0x38b   :  { %v4319_v32 = vmax.f32 %v4318_v52, %v3836_v8  ;;  %v3837_v63 = vmax.f32 %v2449_v59, 0.0  ;;  %v2451_v41 = vadd.f32 %v2450_v9, %v7503_v53  ;;  %3484 = vmatmul.mubr.bf16.vlgmr.msra.gmra.mxu0 %v6757_v42 }
 0x38c   :  { %v2452_v35 = vpop.f32.mrf.mxu1  ;;  %3493 = vmatprep.mubr.bf16.mxu0 %v8518_v2 }
 0x38d   :  { %v4332_v58 = vmax.f32 %v4331_v36, %v3837_v63  ;;  %v3844_v50 = vmax.f32 %v2451_v41, 0.0  ;;  %v2453_v43 = vadd.f32 %v2452_v35, %v7509_v31 }
 0x38e   :  { %v2979_v25 = vpop.f32.mrf.mxu0  ;;  %v2456_v30 = vpop.f32.mrf.mxu1  ;;  %2695 = vmatmul.mubr.bf16.gmra.mxu1 %v7444_v4 }
 0x38f   :  { %v4320_v23 = vmax.f32 %v4319_v32, %v3844_v50  ;;  %v3845_v62 = vmax.f32 %v2453_v43, 0.0  ;;  %v2457_v61 = vadd.f32 %v2456_v30, %v7503_v53  ;;  %2704 = vmatprep.mubr.bf16.mxu1 %v8518_v2  ;;  %v2980_v47 = vadd.f32 %v2979_v25, %v7124_v56 }
 0x390   :  { %v2981_v11 = vpop.f32.mrf.mxu0  ;;  %v2458_v0 = vpop.f32.mrf.mxu1 }
 0x391   :  { %v4333_v52 = vmax.f32 %v4332_v58, %v3845_v62  ;;  %v3852_v49 = vmax.f32 %v2457_v61, 0.0  ;;  %v2459_v24 = vadd.f32 %v2458_v0, %v7509_v31  ;;  %v4126_v63 = vmax.f32 %v2980_v47, 0.0 }
 0x392   :  { %v2983_v14 = vpop.f32.mrf.mxu0  ;;  %v2460_v20 = vpop.f32.mrf.mxu1  ;;  %v2982_v41 = vadd.f32 %v2981_v11, %v7128_v34 }
 0x393   :  { %v2984_v36 = vadd.f32 %v2983_v14, %v7124_v56  ;;  %v4321_v8 = vmax.f32 %v4320_v23, %v3852_v49  ;;  %v3853_v59 = vmax.f32 %v2459_v24, 0.0  ;;  %v2461_v9 = vadd.f32 %v2460_v20, %v7503_v53  ;;  %3494 = vmatmul.mubr.bf16.gmra.mxu0 %v6768_v38 }
 0x394   :  { %v2985_v32 = vpop.f32.mrf.mxu0  ;;  %v2462_v50 = vpop.f32.mrf.mxu1  ;;  %3503 = vmatprep.mubr.bf16.mxu0 %v8518_v2  ;;  %v4127_v14 = vmax.f32 %v2982_v41, 0.0 }
 0x395   :  { %v4134_v35 = vmax.f32 %v2984_v36, 0.0  ;;  %v2986_v58 = vadd.f32 %v2985_v32, %v7128_v34  ;;  %v4334_v43 = vmax.f32 %v4333_v52, %v3853_v59  ;;  %v3860_v25 = vmax.f32 %v2461_v9, 0.0 }
 0x396   :  { %v2463_v30 = vadd.f32 %v2462_v50, %v7509_v31  ;;  %v2989_v23 = vpop.f32.mrf.mxu0  ;;  %v2466_v0 = vpop.f32.mrf.mxu1  ;;  %2705 = vmatmul.mubr.bf16.gmra.mxu1 %v7473_v17 }
 0x397   :  { %v4862_v62 = vmax.f32 %v4126_v63, %v4134_v35  ;;  %v4135_v61 = vmax.f32 %v2986_v58, 0.0  ;;  %v2990_v47 = vadd.f32 %v2989_v23, %v7124_v56  ;;  %v7563_v49 = vmax.f32 %v4321_v8, %v3860_v25  ;;  %2714 = vmatprep.mubr.bf16.mxu1 %v8518_v2 }
 0x398   :  { %v3861_v11 = vmax.f32 %v2463_v30, 0.0  ;;  %v2991_v24 = vpop.f32.mrf.mxu0  ;;  %v2468_v52 = vpop.f32.mrf.mxu1  ;;  %v2467_v9 = vadd.f32 %v2466_v0, %v7503_v53 }
 0x399   :  { %v4142_v20 = vmax.f32 %v2990_v47, 0.0  ;;  %v2992_v36 = vadd.f32 %v2991_v24, %v7128_v34  ;;  %v4875_v63 = vmax.f32 %v4127_v14, %v4135_v61  ;;  %v2469_v25 = vadd.f32 %v2468_v52, %v7509_v31 }
 0x39a   :  { %v7567_v59 = vmax.f32 %v4334_v43, %v3861_v11  ;;  %v2993_v32 = vpop.f32.mrf.mxu0  ;;  %v2470_v58 = vpop.f32.mrf.mxu1  ;;  %v3868_v0 = vmax.f32 %v2467_v9, 0.0 }
 0x39b   :  { %v4863_v35 = vmax.f32 %v4862_v62, %v4142_v20  ;;  %v4143_v50 = vmax.f32 %v2992_v36, 0.0  ;;  %v2994_v8 = vadd.f32 %v2993_v32, %v7124_v56  ;;  %v2471_v30 = vadd.f32 %v2470_v58, %v7503_v53  ;;  %3504 = vmatmul.mubr.bf16.gmra.mxu0 %v6787_v3 }
 0x39c   :  { %v2472_v43 = vpop.f32.mrf.mxu1  ;;  %3513 = vmatprep.mubr.bf16.mxu0 %v8518_v2  ;;  %v3869_v24 = vmax.f32 %v2469_v25, 0.0 }
 0x39d   :  { %v7574_v41 = vmax.f32 %v4875_v63, %v4143_v50  ;;  %v4150_v23 = vmax.f32 %v2994_v8, 0.0  ;;  %v3876_v47 = vmax.f32 %v2471_v30, 0.0  ;;  %v2473_v62 = vadd.f32 %v2472_v43, %v7509_v31 }
 0x39e   :  { %v2476_v11 = vpop.f32.mrf.mxu1  ;;  %2715 = vmatmul.mubr.bf16.gmra.mxu1 %v7480_v44 }
 0x39f   :  { %v7578_v61 = vmax.f32 %v4863_v35, %v4150_v23  ;;  %v4420_v14 = vmax.f32 %v3868_v0, %v3876_v47  ;;  %v3877_v20 = vmax.f32 %v2473_v62, 0.0  ;;  %2724 = vmatprep.mubr.bf16.mxu1 %v8518_v2  ;;  %v2477_v52 = vadd.f32 %v2476_v11, %v7503_v53 }
 0x3a0   :  { %v2478_v36 = vpop.f32.mrf.mxu1 }
 0x3a1   :  { %v4433_v32 = vmax.f32 %v3869_v24, %v3877_v20  ;;  %v2479_v63 = vadd.f32 %v2478_v36, %v7509_v31  ;;  %v3884_v9 = vmax.f32 %v2477_v52, 0.0  ;;  %v4323_v24 = vrot.slane %v7563_v49, 4 }
 0x3a2   :  { %v2480_v50 = vpop.f32.mrf.mxu1 }
 0x3a3   :  { %v3885_v58 = vmax.f32 %v2479_v63, 0.0  ;;  %v2481_v35 = vadd.f32 %v2480_v50, %v7503_v53  ;;  %3514 = vmatmul.mubr.bf16.gmra.mxu0 %v6815_v15  ;;  %v4421_v8 = vmax.f32 %v4420_v14, %v3884_v9  ;;  %v2995_v14 = vpop.f32.mrf.mxu0 }
 0x3a4   :  { %v2482_v30 = vpop.f32.mrf.mxu1  ;;  %3523 = vmatprep.mubr.bf16.mxu0 %v8518_v2 }
 0x3a5   :  { %v4434_v25 = vmax.f32 %v4433_v32, %v3885_v58  ;;  %v3892_v23 = vmax.f32 %v2481_v35, 0.0  ;;  %v2483_v43 = vadd.f32 %v2482_v30, %v7509_v31  ;;  %v4324_v35 = vmax.f32 %v7563_v49, %v4323_v24 }
 0x3a6   :  { %v2486_v0 = vpop.f32.mrf.mxu1  ;;  %2725 = vmatmul.mubr.bf16.gmra.mxu1 %v7514_v28 }
 0x3a7   :  { %v4422_v47 = vmax.f32 %v4421_v8, %v3892_v23  ;;  %v3893_v62 = vmax.f32 %v2483_v43, 0.0  ;;  %v2487_v11 = vadd.f32 %v2486_v0, %v7503_v53  ;;  %2734 = vmatprep.mubr.bf16.mxu1 %v8518_v2  ;;  %v2996_v8 = vadd.f32 %v2995_v14, %v7128_v34 }
 0x3a8   :  { %v2488_v20 = vpop.f32.mrf.mxu1  ;;  %v4336_v0 = vrot.slane %v7567_v59, 4  ;;  %v4325_v24 = vrot.slane %v4324_v35, 2 }
 0x3a9   :  { %v4435_v52 = vmax.f32 %v4434_v25, %v3893_v62  ;;  %v3900_v36 = vmax.f32 %v2487_v11, 0.0  ;;  %v2489_v32 = vadd.f32 %v2488_v20, %v7509_v31  ;;  %v4151_v14 = vmax.f32 %v2996_v8, 0.0 }
 0x3aa   :  { %v2490_v63 = vpop.f32.mrf.mxu1  ;;  %v7610_v8 = vmax.f32 %v4324_v35, %v4325_v24 }
 0x3ab   :  { %v4423_v9 = vmax.f32 %v4422_v47, %v3900_v36  ;;  %v3901_v50 = vmax.f32 %v2489_v32, 0.0  ;;  %v2491_v58 = vadd.f32 %v2490_v63, %v7503_v53  ;;  %3524 = vmatmul.mubr.bf16.gmra.mxu0 %v6835_v33 }
 0x3ac   :  { %v2492_v30 = vpop.f32.mrf.mxu1  ;;  %3533 = vmatprep.mubr.bf16.mxu0 %v8518_v2 }
 0x3ad   :  { %v4436_v23 = vmax.f32 %v4435_v52, %v3901_v50  ;;  %v3908_v43 = vmax.f32 %v2491_v58, 0.0  ;;  %v2493_v25 = vadd.f32 %v2492_v30, %v7509_v31 }
 0x3ae   :  { %v2496_v62 = vpop.f32.mrf.mxu1  ;;  %2735 = vmatmul.mubr.bf16.gmra.mxu1 %v7526_v37  ;;  %v4337_v37 = vmax.f32 %v7567_v59, %v4336_v0 }
 0x3af   :  { %v2999_v47 = vpop.f32.mrf.mxu0  ;;  %v4424_v11 = vmax.f32 %v4423_v9, %v3908_v43  ;;  %v3909_v20 = vmax.f32 %v2493_v25, 0.0  ;;  %v2497_v36 = vadd.f32 %v2496_v62, %v7503_v53  ;;  %3130 = vmatprep.mubr.bf16.mxu1 %v8518_v2 }
 0x3b0   :  { %v3000_v49 = vadd.f32 %v2999_v47, %v7124_v56  ;;  %v2498_v52 = vpop.f32.mrf.mxu1 }
 0x3b1   :  { %v3001_v32 = vpop.f32.mrf.mxu0  ;;  %v4437_v63 = vmax.f32 %v4436_v23, %v3909_v20  ;;  %v3916_v50 = vmax.f32 %v2497_v36, 0.0  ;;  %v2499_v30 = vadd.f32 %v2498_v52, %v7509_v31  ;;  %v4877_v23 = vmax.f32 %v7574_v41, %v4151_v14 }
 0x3b2   :  { %v4158_v58 = vmax.f32 %v3000_v49, 0.0  ;;  %v3002_v9 = vadd.f32 %v3001_v32, %v7128_v34  ;;  %v2500_v43 = vpop.f32.mrf.mxu1  ;;  %v4338_v32 = vrot.slane %v4337_v37, 2 }
 0x3b3   :  { %v3003_v25 = vpop.f32.mrf.mxu0  ;;  %v4425_v62 = vmax.f32 %v4424_v11, %v3916_v50  ;;  %v3917_v28 = vmax.f32 %v2499_v30, 0.0  ;;  %v2501_v44 = vadd.f32 %v2500_v43, %v7503_v53  ;;  %3534 = vmatmul.mubr.bf16.gmra.mxu0 %v6846_v57 }
 0x3b4   :  { %v4865_v47 = vmax.f32 %v7578_v61, %v4158_v58  ;;  %v4159_v20 = vmax.f32 %v3002_v9, 0.0  ;;  %v3004_v36 = vadd.f32 %v3003_v25, %v7124_v56  ;;  %v2502_v59 = vpop.f32.mrf.mxu1  ;;  %3543 = vmatprep.mubr.bf16.mxu0 %v8518_v2  ;;  %v4327_v25 = vrot.slane %v7610_v8, 1 }
 0x3b5   :  { %v3005_v0 = vpop.f32.mrf.mxu0  ;;  %v4438_v49 = vmax.f32 %v4437_v63, %v3917_v28  ;;  %v3924_v11 = vmax.f32 %v2501_v44, 0.0  ;;  %v2503_v61 = vadd.f32 %v2502_v59, %v7509_v31 }
 0x3b6   :  { %v3006_v52 = vadd.f32 %v3005_v0, %v7128_v34  ;;  %v4878_v50 = vmax.f32 %v4877_v23, %v4159_v20  ;;  %v4166_v58 = vmax.f32 %v3004_v36, 0.0  ;;  %v2506_v35 = vpop.f32.mrf.mxu1  ;;  %3131 = vmatmul.mubr.bf16.vlgmr.msra.gmra.mxu1 %v6757_v42  ;;  %v4339_v36 = vmax.f32 %v4337_v37, %v4338_v32 }
 0x3b7   :  { %v3009_v41 = vpop.f32.mrf.mxu0  ;;  %v4426_v24 = vmax.f32 %v4425_v62, %v3924_v11  ;;  %v3925_v14 = vmax.f32 %v2503_v61, 0.0  ;;  %3140 = vmatprep.mubr.bf16.mxu1 %v8518_v2  ;;  %v2507_v28 = vadd.f32 %v2506_v35, %v7503_v53 }
 0x3b8   :  { %v4167_v30 = vmax.f32 %v3006_v52, 0.0  ;;  %v4866_v9 = vmax.f32 %v4865_v47, %v4166_v58  ;;  %v3010_v44 = vadd.f32 %v3009_v41, %v7124_v56  ;;  %v2508_v63 = vpop.f32.mrf.mxu1 }
 0x3b9   :  { %v3011_v43 = vpop.f32.mrf.mxu0  ;;  %v4427_v23 = vrot.slane %v4426_v24, 4  ;;  %v4439_v20 = vmax.f32 %v4438_v49, %v3925_v14  ;;  %v3932_v35 = vmax.f32 %v2507_v28, 0.0  ;;  %v2509_v17 = vadd.f32 %v2508_v63, %v7509_v31 }
 0x3ba   :  { %v4879_v59 = vmax.f32 %v4878_v50, %v4167_v30  ;;  %v4174_v42 = vmax.f32 %v3010_v44, 0.0  ;;  %v3012_v62 = vadd.f32 %v3011_v43, %v7128_v34  ;;  %v2510_v0 = vpop.f32.mrf.mxu1  ;;  %v4340_v44 = vrot.slane %v4339_v36, 1 }
 0x3bb   :  { %v3013_v11 = vpop.f32.mrf.mxu0  ;;  %v4428_v61 = vmax.f32 %v4426_v24, %v4427_v23  ;;  %v4440_v52 = vrot.slane %v4439_v20, 4  ;;  %v2511_v47 = vadd.f32 %v2510_v0, %v7503_v53  ;;  %3544 = vmatmul.mubr.bf16.gmra.mxu0 %v6868_v48 }
 0x3bc   :  { %v3014_v58 = vadd.f32 %v3013_v11, %v7124_v56  ;;  %v4867_v41 = vmax.f32 %v4866_v9, %v4174_v42  ;;  %v4175_v49 = vmax.f32 %v3012_v62, 0.0  ;;  %v2512_v37 = vpop.f32.mrf.mxu1  ;;  %3553 = vmatprep.mubr.bf16.mxu0 %v8518_v2  ;;  %v3933_v62 = vmax.f32 %v2509_v17, 0.0 }
 0x3bd   :  { %v3015_v32 = vpop.f32.mrf.mxu0  ;;  %v4429_v50 = vrot.slane %v4428_v61, 2  ;;  %v4441_v14 = vmax.f32 %v4439_v20, %v4440_v52  ;;  %v3940_v30 = vmax.f32 %v2511_v47, 0.0  ;;  %v2513_v23 = vadd.f32 %v2512_v37, %v7509_v31 }
 0x3be   :  { %v4182_v24 = vmax.f32 %v3014_v58, 0.0  ;;  %v4880_v43 = vmax.f32 %v4879_v59, %v4175_v49  ;;  %v3016_v0 = vadd.f32 %v3015_v32, %v7128_v34  ;;  %v2516_v11 = vpop.f32.mrf.mxu1  ;;  %3141 = vmatmul.mubr.bf16.gmra.mxu1 %v6768_v38  ;;  %v4328_v32 = vmax.f32 %v7610_v8, %v4327_v25 }
 0x3bf   :  { %v4430_v9 = vmax.f32 %v4428_v61, %v4429_v50  ;;  %v4442_v28 = vrot.slane %v4441_v14, 2  ;;  %v4524_v63 = vmax.f32 %v3932_v35, %v3940_v30  ;;  %3150 = vmatprep.mubr.bf16.mxu1 %v8518_v2  ;;  %v3941_v4 = vmax.f32 %v2513_v23, 0.0 }
 0x3c0   :  { %v4868_v42 = vmax.f32 %v4867_v41, %v4182_v24  ;;  %v4183_v20 = vmax.f32 %v3016_v0, 0.0  ;;  %v2517_v52 = vadd.f32 %v2516_v11, %v7503_v53  ;;  %v2518_v47 = vpop.f32.mrf.mxu1  ;;  %v4341_v23 = vmax.f32 %v4339_v36, %v4340_v44 }
 0x3c1   :  { %v4431_v59 = vrot.slane %v4430_v9, 1  ;;  %v4443_v58 = vmax.f32 %v4441_v14, %v4442_v28  ;;  %v2519_v37 = vadd.f32 %v2518_v47, %v7509_v31  ;;  %v4537_v38 = vmax.f32 %v3933_v62, %v3941_v4 }
 0x3c2   :  { %v4869_v49 = vrot.slane %v4868_v42, 4  ;;  %v4881_v61 = vmax.f32 %v4880_v43, %v4183_v20  ;;  %v3948_v50 = vmax.f32 %v2517_v52, 0.0  ;;  %v2520_v35 = vpop.f32.mrf.mxu1 }
 0x3c3   :  { %v4432_v41 = vmax.f32 %v4430_v9, %v4431_v59  ;;  %v4444_v30 = vrot.slane %v4443_v58, 1  ;;  %v3949_v17 = vmax.f32 %v2519_v37, 0.0  ;;  %3554 = vmatmul.mubr.bf16.gmra.mxu0 %v6885_v29  ;;  %v2521_v14 = vadd.f32 %v2520_v35, %v7503_v53 }
 0x3c4   :  { %v4870_v24 = vmax.f32 %v4868_v42, %v4869_v49  ;;  %v4882_v0 = vrot.slane %v4881_v61, 4  ;;  %v4525_v11 = vmax.f32 %v4524_v63, %v3948_v50  ;;  %v2522_v28 = vpop.f32.mrf.mxu1  ;;  %3563 = vmatprep.mubr.bf16.mxu0 %v8518_v2 }
 0x3c5   :  { %v7639_v8 = vsel %vm5216_vm1, %v4432_v41, %v4328_v32  ;;  %v4445_v4 = vmax.f32 %v4443_v58, %v4444_v30  ;;  %v4538_v43 = vmax.f32 %v4537_v38, %v3949_v17  ;;  %v3956_v62 = vmax.f32 %v2521_v14, 0.0 }
 0x3c6   :  { %v4871_v25 = vrot.slane %v4870_v24, 2  ;;  %v4883_v9 = vmax.f32 %v4881_v61, %v4882_v0  ;;  %v2523_v42 = vadd.f32 %v2522_v28, %v7509_v31  ;;  %v2526_v20 = vpop.f32.mrf.mxu1  ;;  %3151 = vmatmul.mubr.bf16.gmra.mxu1 %v6787_v3 }
 0x3c7   :  { %v7644_v36 = vsel %vm5216_vm1, %v4445_v4, %v4341_v23  ;;  %v2527_v63 = vadd.f32 %v2526_v20, %v7503_v53  ;;  %3160 = vmatprep.mubr.bf16.mxu1 %v8518_v2  ;;  %v4526_v47 = vmax.f32 %v4525_v11, %v3956_v62 }
 0x3c8   :  { %v4872_v44 = vmax.f32 %v4870_v24, %v4871_v25  ;;  %v4884_v52 = vrot.slane %v4883_v9, 2  ;;  %v3957_v59 = vmax.f32 %v2523_v42, 0.0  ;;  %v2528_v58 = vpop.f32.mrf.mxu1 }
 0x3c9   :  { %v3964_v37 = vmax.f32 %v2527_v63, 0.0  ;;  %v2529_v32 = vadd.f32 %v2528_v58, %v7509_v31 }
 0x3ca   :  { %v4873_v49 = vrot.slane %v4872_v44, 1  ;;  %v4885_v38 = vmax.f32 %v4883_v9, %v4884_v52  ;;  %v4539_v61 = vmax.f32 %v4538_v43, %v3957_v59  ;;  %v2530_v3 = vpop.f32.mrf.mxu1 }
 0x3cb   :  { %v4527_v35 = vmax.f32 %v4526_v47, %v3964_v37  ;;  %v3965_v41 = vmax.f32 %v2529_v32, 0.0  ;;  %v2531_v30 = vadd.f32 %v2530_v3, %v7503_v53  ;;  %3564 = vmatmul.mubr.bf16.gmra.mxu0 %v6910_v26 }
 0x3cc   :  { %v4874_v50 = vmax.f32 %v4872_v44, %v4873_v49  ;;  %v4886_v24 = vrot.slane %v4885_v38, 1  ;;  %v2532_v17 = vpop.f32.mrf.mxu1  ;;  %3573 = vmatprep.mubr.bf16.mxu0 %v8518_v2 }
 0x3cd   :  { %v4540_v0 = vmax.f32 %v4539_v61, %v3965_v41  ;;  %v3972_v11 = vmax.f32 %v2531_v30, 0.0  ;;  %v2533_v14 = vadd.f32 %v2532_v17, %v7509_v31 }
 0x3ce   :  { %v7654_v23 = vsel %vm5224_vm5, %v4874_v50, %v7538_v18  ;;  %v4887_v28 = vmax.f32 %v4885_v38, %v4886_v24  ;;  %v2536_v4 = vpop.f32.mrf.mxu1  ;;  %3161 = vmatmul.mubr.bf16.gmra.mxu1 %v6815_v15 }
 0x3cf   :  { %v4528_v25 = vmax.f32 %v4527_v35, %v3972_v11  ;;  %v3973_v43 = vmax.f32 %v2533_v14, 0.0  ;;  %v2537_v9 = vadd.f32 %v2536_v4, %v7503_v53  ;;  %3170 = vmatprep.mubr.bf16.mxu1 %v8518_v2 }
 0x3d0   :  { %v7662_v62 = vsel %vm5224_vm5, %v4887_v28, %v7543_v13  ;;  %v2538_v18 = vpop.f32.mrf.mxu1 }
 0x3d1   :  { %v4541_v42 = vmax.f32 %v4540_v0, %v3973_v43  ;;  %v3980_v20 = vmax.f32 %v2537_v9, 0.0  ;;  %v2539_v44 = vadd.f32 %v2538_v18, %v7509_v31 }
 0x3d2   :  { %v2540_v63 = vpop.f32.mrf.mxu1 }
 0x3d3   :  { %v4529_v52 = vmax.f32 %v4528_v25, %v3980_v20  ;;  %v3981_v47 = vmax.f32 %v2539_v44, 0.0  ;;  %v2541_v15 = vadd.f32 %v2540_v63, %v7503_v53  ;;  %3574 = vmatmul.mubr.bf16.gmra.mxu0 %v6919_v46 }
 0x3d4   :  { %v2542_v59 = vpop.f32.mrf.mxu1  ;;  %3583 = vmatprep.mubr.bf16.mxu0 %v8518_v2  ;;  %v7677_v43 = vpop.f32.mrf.mxu0 }
 0x3d5   :  { %v4542_v58 = vmax.f32 %v4541_v42, %v3981_v47  ;;  %v3988_v49 = vmax.f32 %v2541_v15, 0.0  ;;  %v2543_v13 = vadd.f32 %v2542_v59, %v7509_v31 }
 0x3d6   :  { %v2546_v37 = vpop.f32.mrf.mxu1  ;;  %3171 = vmatmul.mubr.bf16.gmra.mxu1 %v6835_v33 }
 0x3d7   :  { %v4530_v32 = vmax.f32 %v4529_v52, %v3988_v49  ;;  %v3989_v38 = vmax.f32 %v2543_v13, 0.0  ;;  %3180 = vmatprep.mubr.bf16.mxu1 %v8518_v2  ;;  %v2547_v61 = vadd.f32 %v2546_v37, %v7503_v53  ;;  %v7683_v13 = vpop.f32.mrf.mxu0 }
 0x3d8   :  { %v2548_v3 = vpop.f32.mrf.mxu1 }
 0x3d9   :  { %v4531_v50 = vrot.slane %v4530_v32, 4  ;;  %v4543_v35 = vmax.f32 %v4542_v58, %v3989_v38  ;;  %v2549_v41 = vadd.f32 %v2548_v3, %v7509_v31  ;;  %v3996_v11 = vmax.f32 %v2547_v61, 0.0 }
 0x3da   :  { %v2550_v30 = vpop.f32.mrf.mxu1 }
 0x3db   :  { %v4532_v24 = vmax.f32 %v4530_v32, %v4531_v50  ;;  %v4544_v17 = vrot.slane %v4543_v35, 4  ;;  %v2551_v0 = vadd.f32 %v2550_v30, %v7503_v53  ;;  %3584 = vmatmul.mubr.bf16.gmra.mxu0 %v6980_v54  ;;  %v3997_v9 = vmax.f32 %v2549_v41, 0.0 }
 0x3dc   :  { %v2552_v33 = vpop.f32.mrf.mxu1  ;;  %3593 = vmatprep.mubr.bf16.mxu0 %v8518_v2 }
 0x3dd   :  { %v4533_v14 = vrot.slane %v4532_v24, 2  ;;  %v4545_v28 = vmax.f32 %v4543_v35, %v4544_v17  ;;  %v4004_v4 = vmax.f32 %v2551_v0, 0.0  ;;  %v2553_v25 = vadd.f32 %v2552_v33, %v7509_v31  ;;  %v7692_v0 = vpop.f32.mrf.mxu0 }
 0x3de   :  { %v2556_v18 = vpop.f32.mrf.mxu1  ;;  %3181 = vmatmul.mubr.bf16.gmra.mxu1 %v6846_v57 }
 0x3df   :  { %v4534_v42 = vmax.f32 %v4532_v24, %v4533_v14  ;;  %v4546_v20 = vrot.slane %v4545_v28, 2  ;;  %v4628_v44 = vmax.f32 %v3996_v11, %v4004_v4  ;;  %v4005_v63 = vmax.f32 %v2553_v25, 0.0  ;;  %3190 = vmatprep.mubr.bf16.mxu1 %v8518_v2 }
 0x3e0   :  { %v2557_v52 = vadd.f32 %v2556_v18, %v7503_v53  ;;  %v2558_v47 = vpop.f32.mrf.mxu1 }
 0x3e1   :  { %v4535_v15 = vrot.slane %v4534_v42, 1  ;;  %v4547_v59 = vmax.f32 %v4545_v28, %v4546_v20  ;;  %v4641_v58 = vmax.f32 %v3997_v9, %v4005_v63  ;;  %v2559_v49 = vadd.f32 %v2558_v47, %v7509_v31 }
 0x3e2   :  { %v4012_v37 = vmax.f32 %v2557_v52, 0.0  ;;  %v2560_v32 = vpop.f32.mrf.mxu1 }
 0x3e3   :  { %v4536_v38 = vmax.f32 %v4534_v42, %v4535_v15  ;;  %v4548_v57 = vrot.slane %v4547_v59, 1  ;;  %v4013_v61 = vmax.f32 %v2559_v49, 0.0  ;;  %v2561_v3 = vadd.f32 %v2560_v32, %v7503_v53  ;;  %3594 = vmatmul.mubr.bf16.gmra.mxu0 %v6990_v16  ;;  %v7703_v42 = vpop.f32.mrf.mxu0 }
 0x3e4   :  { %v4629_v50 = vmax.f32 %v4628_v44, %v4012_v37  ;;  %v2562_v35 = vpop.f32.mrf.mxu1  ;;  %3603 = vmatprep.mubr.bf16.mxu0 %v8518_v2 }
 0x3e5   :  { %v7690_v41 = vsel %vm5218_vm2, %v4536_v38, %v7639_v8  ;;  %v4549_v30 = vmax.f32 %v4547_v59, %v4548_v57  ;;  %v4642_v24 = vmax.f32 %v4641_v58, %v4013_v61  ;;  %v4020_v17 = vmax.f32 %v2561_v3, 0.0  ;;  %v7709_v58 = vpop.f32.mrf.mxu0 }
 0x3e6   :  { %v2563_v11 = vadd.f32 %v2562_v35, %v7509_v31  ;;  %v2566_v33 = vpop.f32.mrf.mxu1  ;;  %3191 = vmatmul.mubr.bf16.gmra.mxu1 %v6868_v48 }
 0x3e7   :  { %v7698_v14 = vsel %vm5218_vm2, %v4549_v30, %v7644_v36  ;;  %v4630_v28 = vmax.f32 %v4629_v50, %v4020_v17  ;;  %v2567_v4 = vadd.f32 %v2566_v33, %v7503_v53  ;;  %3200 = vmatprep.mubr.bf16.mxu1 %v8518_v2  ;;  %v7715_v35 = vpop.f32.mrf.mxu0 }
 0x3e8   :  { %v4021_v8 = vmax.f32 %v2563_v11, 0.0  ;;  %v2568_v25 = vpop.f32.mrf.mxu1 }
 0x3e9   :  { %v4028_v9 = vmax.f32 %v2567_v4, 0.0  ;;  %v2569_v18 = vadd.f32 %v2568_v25, %v7509_v31 }
 0x3ea   :  { %v4643_v20 = vmax.f32 %v4642_v24, %v4021_v8  ;;  %v2570_v44 = vpop.f32.mrf.mxu1  ;;  %v7721_v8 = vpop.f32.mrf.mxu0 }
 0x3eb   :  { %v4631_v63 = vmax.f32 %v4630_v28, %v4028_v9  ;;  %v4029_v48 = vmax.f32 %v2569_v18, 0.0  ;;  %v2571_v52 = vadd.f32 %v2570_v44, %v7503_v53  ;;  %3604 = vmatmul.mubr.bf16.gmra.mxu0 %v7057_v21 }
 0x3ec   :  { %v2572_v36 = vpop.f32.mrf.mxu1  ;;  %3613 = vmatprep.mubr.bf16.mxu0 %v8518_v2 }
 0x3ed   :  { %v4644_v47 = vmax.f32 %v4643_v20, %v4029_v48  ;;  %v4036_v15 = vmax.f32 %v2571_v52, 0.0  ;;  %v2573_v59 = vadd.f32 %v2572_v36, %v7509_v31  ;;  %v7726_v52 = vpop.f32.mrf.mxu0 }
 0x3ee   :  { %v2576_v49 = vpop.f32.mrf.mxu1  ;;  %3201 = vmatmul.mubr.bf16.gmra.mxu1 %v6885_v29 }
 0x3ef   :  { %v4632_v37 = vmax.f32 %v4631_v63, %v4036_v15  ;;  %v4037_v32 = vmax.f32 %v2573_v59, 0.0  ;;  %v2577_v38 = vadd.f32 %v2576_v49, %v7503_v53  ;;  %3210 = vmatprep.mubr.bf16.mxu1 %v8518_v2 }
 0x3f0   :  { %v2578_v57 = vpop.f32.mrf.mxu1 }
 0x3f1   :  { %v4645_v61 = vmax.f32 %v4644_v47, %v4037_v32  ;;  %v4044_v3 = vmax.f32 %v2577_v38, 0.0  ;;  %v2579_v50 = vadd.f32 %v2578_v57, %v7509_v31 }
 0x3f2   :  { %v2580_v30 = vpop.f32.mrf.mxu1 }
 0x3f3   :  { %v4633_v24 = vmax.f32 %v4632_v37, %v4044_v3  ;;  %v4045_v17 = vmax.f32 %v2579_v50, 0.0  ;;  %v2581_v11 = vadd.f32 %v2580_v30, %v7503_v53  ;;  %3614 = vmatmul.mubr.bf16.gmra.mxu0 %v7067_v45 }
 0x3f4   :  { %v2582_v29 = vpop.f32.mrf.mxu1  ;;  %3623 = vmatprep.mubr.bf16.mxu0 %v8518_v2 }
 0x3f5   :  { %v4646_v33 = vmax.f32 %v4645_v61, %v4045_v17  ;;  %v4052_v28 = vmax.f32 %v2581_v11, 0.0  ;;  %v2583_v4 = vadd.f32 %v2582_v29, %v7509_v31  ;;  %v7730_v49 = vpop.f32.mrf.mxu0 }
 0x3f6   :  { %v2586_v25 = vpop.f32.mrf.mxu1  ;;  %3211 = vmatmul.mubr.bf16.gmra.mxu1 %v6910_v26 }
 0x3f7   :  { %v4634_v9 = vmax.f32 %v4633_v24, %v4052_v28  ;;  %v4053_v18 = vmax.f32 %v2583_v4, 0.0  ;;  %3220 = vmatprep.mubr.bf16.mxu1 %v8518_v2  ;;  %v2587_v48 = vadd.f32 %v2586_v25, %v7503_v53  ;;  %v7737_v11 = vpop.f32.mrf.mxu0 }
 0x3f8   :  { %v2588_v20 = vpop.f32.mrf.mxu1 }
 0x3f9   :  { %v4635_v44 = vrot.slane %v4634_v9, 4  ;;  %v4647_v63 = vmax.f32 %v4646_v33, %v4053_v18  ;;  %v2589_v26 = vadd.f32 %v2588_v20, %v7509_v31  ;;  %v4060_v57 = vmax.f32 %v2587_v48, 0.0 }
 0x3fa   :  { %v2590_v36 = vpop.f32.mrf.mxu1 }
 0x3fb   :  { %v4636_v47 = vmax.f32 %v4634_v9, %v4635_v44  ;;  %v4648_v15 = vrot.slane %v4647_v63, 4  ;;  %v2591_v59 = vadd.f32 %v2590_v36, %v7503_v53  ;;  %3624 = vmatmul.mubr.bf16.gmra.mxu0 %v7095_v7  ;;  %v4061_v29 = vmax.f32 %v2589_v26, 0.0 }
 0x3fc   :  { %v2592_v37 = vpop.f32.mrf.mxu1  ;;  %3633 = vmatprep.mubr.bf16.mxu0 %v8518_v2 }
 0x3fd   :  { %v4637_v32 = vrot.slane %v4636_v47, 2  ;;  %v4649_v38 = vmax.f32 %v4647_v63, %v4648_v15  ;;  %v4068_v61 = vmax.f32 %v2591_v59, 0.0  ;;  %v2593_v3 = vadd.f32 %v2592_v37, %v7509_v31 }
 0x3fe   :  { %v2596_v50 = vpop.f32.mrf.mxu1  ;;  %3221 = vmatmul.mubr.bf16.gmra.mxu1 %v6919_v46 }
 0x3ff   :  { %v4638_v30 = vmax.f32 %v4636_v47, %v4637_v32  ;;  %v4650_v24 = vrot.slane %v4649_v38, 2  ;;  %v4732_v17 = vmax.f32 %v4060_v57, %v4068_v61  ;;  %3230 = vmatprep.mubr.bf16.mxu1 %v8518_v2  ;;  %v4069_v33 = vmax.f32 %v2593_v3, 0.0  ;;  %v7742_v47 = vpop.f32.mrf.mxu0 }
 0x400   :  { %v2597_v28 = vadd.f32 %v2596_v50, %v7503_v53  ;;  %v2598_v4 = vpop.f32.mrf.mxu1 }
 0x401   :  { %v4639_v25 = vrot.slane %v4638_v30, 1  ;;  %v4651_v9 = vmax.f32 %v4649_v38, %v4650_v24  ;;  %v2599_v18 = vadd.f32 %v2598_v4, %v7509_v31  ;;  %v4745_v20 = vmax.f32 %v4061_v29, %v4069_v33  ;;  %v7758_v24 = vpop.f32.mrf.mxu0 }
 0x402   :  { %v4076_v44 = vmax.f32 %v2597_v28, 0.0  ;;  %v2600_v63 = vpop.f32.mrf.mxu1 }
 0x403   :  { %v4640_v46 = vmax.f32 %v4638_v30, %v4639_v25  ;;  %v4652_v48 = vrot.slane %v4651_v9, 1  ;;  %v4077_v36 = vmax.f32 %v2599_v18, 0.0  ;;  %3634 = vmatmul.mubr.bf16.gmra.mxu0 %v7103_v60  ;;  %v2601_v59 = vadd.f32 %v2600_v63, %v7503_v53 }
 0x404   :  { %v4733_v15 = vmax.f32 %v4732_v17, %v4076_v44  ;;  %v2602_v26 = vpop.f32.mrf.mxu1  ;;  %3643 = vmatprep.mubr.bf16.mxu0 %v8518_v2 }
 0x405   :  { %v7748_v37 = vsel %vm5220_vm3, %v4640_v46, %v7690_v41  ;;  %v4653_v32 = vmax.f32 %v4651_v9, %v4652_v48  ;;  %v4746_v38 = vmax.f32 %v4745_v20, %v4077_v36  ;;  %v4084_v57 = vmax.f32 %v2601_v59, 0.0 }
 0x406   :  { %v2603_v61 = vadd.f32 %v2602_v26, %v7509_v31  ;;  %v2606_v3 = vpop.f32.mrf.mxu1  ;;  %3231 = vmatmul.mubr.bf16.gmra.mxu1 %v6980_v54  ;;  %v3024_v48 = vadd.f32 %v7692_v0, %v7124_v56  ;;  %v3026_v36 = vadd.f32 %v7703_v42, %v7128_v34  ;;  %v3030_v0 = vadd.f32 %v7709_v58, %v7124_v56 }
 0x407   :  { %v7754_v50 = vsel %vm5220_vm3, %v4653_v32, %v7698_v14  ;;  %v2607_v30 = vadd.f32 %v2606_v3, %v7503_v53  ;;  %3240 = vmatprep.mubr.bf16.mxu1 %v8518_v2  ;;  %v4734_v41 = vmax.f32 %v4733_v15, %v4084_v57  ;;  %v3049_v14 = vpop.f32.mrf.mxu0  ;;  %v3022_v57 = vadd.f32 %v7683_v13, %v7128_v34 }
 0x408   :  { %v4085_v17 = vmax.f32 %v2603_v61, 0.0  ;;  %v2608_v29 = vpop.f32.mrf.mxu1  ;;  %v3036_v13 = vadd.f32 %v7726_v52, %v7128_v34 }
 0x409   :  { %v4092_v33 = vmax.f32 %v2607_v30, 0.0  ;;  %v2609_v28 = vadd.f32 %v2608_v29, %v7509_v31  ;;  %v7778_v61 = vpop.f32.mrf.mxu0  ;;  %v4199_v29 = vmax.f32 %v3026_v36, 0.0  ;;  %v3044_v36 = vadd.f32 %v7742_v47, %v7124_v56 }
 0x40a   :  { %v4747_v4 = vmax.f32 %v4746_v38, %v4085_v17  ;;  %v2610_v25 = vpop.f32.mrf.mxu1  ;;  %v3020_v38 = vadd.f32 %v7677_v43, %v7124_v56  ;;  %v4198_v17 = vmax.f32 %v3024_v48, 0.0  ;;  %v3034_v43 = vadd.f32 %v7721_v8, %v7124_v56 }
 0x40b   :  { %v4735_v9 = vmax.f32 %v4734_v41, %v4092_v33  ;;  %v4093_v54 = vmax.f32 %v2609_v28, 0.0  ;;  %v2611_v18 = vadd.f32 %v2610_v25, %v7503_v53  ;;  %3644 = vmatmul.mubr.bf16.gmra.mxu0 %v7155_v27  ;;  %v4191_v25 = vmax.f32 %v3022_v57, 0.0 }
 0x40c   :  { %v2612_v20 = vpop.f32.mrf.mxu1  ;;  %3653 = vmatprep.mubr.bf16.mxu0 %v8518_v2  ;;  %v4214_v48 = vmax.f32 %v3034_v43, 0.0  ;;  %v4230_v43 = vmax.f32 %v3044_v36, 0.0 }
 0x40d   :  { %v4748_v44 = vmax.f32 %v4747_v4, %v4093_v54  ;;  %v4100_v63 = vmax.f32 %v2611_v18, 0.0  ;;  %v2613_v46 = vadd.f32 %v2612_v20, %v7509_v31  ;;  %v3040_v54 = vadd.f32 %v7730_v49, %v7124_v56  ;;  %v3053_v18 = vpop.f32.mrf.mxu0 }
 0x40e   :  { %v2616_v15 = vpop.f32.mrf.mxu1  ;;  %3241 = vmatmul.mubr.bf16.gmra.mxu1 %v6990_v16  ;;  %v3032_v16 = vadd.f32 %v7715_v35, %v7128_v34  ;;  %v4190_v35 = vmax.f32 %v3020_v38, 0.0 }
 0x40f   :  { %v4736_v59 = vmax.f32 %v4735_v9, %v4100_v63  ;;  %v4101_v26 = vmax.f32 %v2613_v46, 0.0  ;;  %v2617_v32 = vadd.f32 %v2616_v15, %v7503_v53  ;;  %3250 = vmatprep.mubr.bf16.mxu1 %v8518_v2  ;;  %v4206_v9 = vmax.f32 %v3030_v0, 0.0 }
 0x410   :  { %v2618_v42 = vpop.f32.mrf.mxu1  ;;  %v4207_v8 = vmax.f32 %v3032_v16, 0.0  ;;  %v4966_v46 = vmax.f32 %v4190_v35, %v4198_v17  ;;  %v4222_v57 = vmax.f32 %v3040_v54, 0.0  ;;  %v3050_v0 = vadd.f32 %v3049_v14, %v7124_v56 }
 0x411   :  { %v4749_v3 = vmax.f32 %v4748_v44, %v4101_v26  ;;  %v4108_v30 = vmax.f32 %v2617_v32, 0.0  ;;  %v2619_v41 = vadd.f32 %v2618_v42, %v7509_v31  ;;  %v4215_v26 = vmax.f32 %v3036_v13, 0.0  ;;  %v3055_v42 = vpop.f32.mrf.mxu0 }
 0x412   :  { %v2620_v33 = vpop.f32.mrf.mxu1  ;;  %v4967_v38 = vmax.f32 %v4966_v46, %v4206_v9  ;;  %v4238_v9 = vmax.f32 %v3050_v0, 0.0  ;;  %v3046_v46 = vadd.f32 %v7758_v24, %v7128_v34  ;;  %v3052_v0 = vadd.f32 %v7778_v61, %v7128_v34 }
 0x413   :  { %v4737_v58 = vmax.f32 %v4736_v59, %v4108_v30  ;;  %v4109_v28 = vmax.f32 %v2619_v41, 0.0  ;;  %v2621_v4 = vadd.f32 %v2620_v33, %v7503_v53  ;;  %3654 = vmatmul.mubr.bf16.gmra.mxu0 %v7170_v22  ;;  %v4979_v59 = vmax.f32 %v4191_v25, %v4199_v29 }
 0x414   :  { %v2622_v20 = vpop.f32.mrf.mxu1  ;;  %3663 = vmatprep.mubr.bf16.mxu0 %v8518_v2  ;;  %v4968_v17 = vmax.f32 %v4967_v38, %v4214_v48  ;;  %v3042_v25 = vadd.f32 %v7737_v11, %v7128_v34 }
 0x415   :  { %v4750_v44 = vmax.f32 %v4749_v3, %v4109_v28  ;;  %v4116_v63 = vmax.f32 %v2621_v4, 0.0  ;;  %v2623_v52 = vadd.f32 %v2622_v20, %v7509_v31  ;;  %v4980_v30 = vmax.f32 %v4979_v59, %v4207_v8 }
 0x416   :  { %v2626_v15 = vpop.f32.mrf.mxu1  ;;  %3251 = vmatmul.mubr.bf16.gmra.mxu1 %v7057_v21  ;;  %v3054_v21 = vadd.f32 %v3053_v18, %v7124_v56  ;;  %v4969_v35 = vmax.f32 %v4968_v17, %v4222_v57  ;;  %v4223_v38 = vmax.f32 %v3042_v25, 0.0  ;;  %v4239_v25 = vmax.f32 %v3052_v0, 0.0 }
 0x417   :  { %v4738_v49 = vmax.f32 %v4737_v58, %v4116_v63  ;;  %v4117_v32 = vmax.f32 %v2623_v52, 0.0  ;;  %3260 = vmatprep.mubr.bf16.mxu1 %v8518_v2  ;;  %v2627_v16 = vadd.f32 %v2626_v15, %v7503_v53  ;;  %v4981_v58 = vmax.f32 %v4980_v30, %v4215_v26 }
 0x418   :  { %v2628_v3 = vpop.f32.mrf.mxu1  ;;  %v4970_v52 = vmax.f32 %v4969_v35, %v4230_v43  ;;  %v4246_v48 = vmax.f32 %v3054_v21, 0.0  ;;  %v3056_v43 = vadd.f32 %v3055_v42, %v7128_v34 }
 0x419   :  { %v4739_v41 = vrot.slane %v4738_v49, 4  ;;  %v4751_v47 = vmax.f32 %v4750_v44, %v4117_v32  ;;  %v2629_v29 = vadd.f32 %v2628_v3, %v7509_v31  ;;  %v4124_v54 = vmax.f32 %v2627_v16, 0.0 }
 0x41a   :  { %v2630_v33 = vpop.f32.mrf.mxu1  ;;  %v7801_v13 = vpop.f32.mrf.mxu0  ;;  %v4971_v57 = vmax.f32 %v4970_v52, %v4238_v9  ;;  %v4982_v35 = vmax.f32 %v4981_v58, %v4223_v38 }
 0x41b   :  { %v4740_v28 = vmax.f32 %v4738_v49, %v4739_v41  ;;  %v4752_v4 = vrot.slane %v4751_v47, 4  ;;  %v2631_v14 = vadd.f32 %v2630_v33, %v7503_v53  ;;  %3664 = vmatmul.mubr.bf16.gmra.mxu0 %v7219_v19  ;;  %v4125_v36 = vmax.f32 %v2629_v29, 0.0 }
 0x41c   :  { %v2632_v20 = vpop.f32.mrf.mxu1  ;;  %3673 = vmatprep.mubr.bf16.mxu0 %v8518_v2  ;;  %v7811_v15 = vpop.f32.mrf.mxu0  ;;  %v4972_v17 = vmax.f32 %v4971_v57, %v4246_v48 }
 0x41d   :  { %v4741_v18 = vrot.slane %v4740_v28, 2  ;;  %v4753_v8 = vmax.f32 %v4751_v47, %v4752_v4  ;;  %v4132_v44 = vmax.f32 %v2631_v14, 0.0  ;;  %v2633_v63 = vadd.f32 %v2632_v20, %v7509_v31 }
 0x41e   :  { %v2636_v59 = vpop.f32.mrf.mxu1  ;;  %3261 = vmatmul.mubr.bf16.gmra.mxu1 %v7067_v45  ;;  %v4231_v45 = vmax.f32 %v3046_v46, 0.0  ;;  %v7820_v29 = vpop.f32.mrf.mxu0  ;;  %v4973_v58 = vrot.slane %v4972_v17, 4 }
 0x41f   :  { %v4742_v11 = vmax.f32 %v4740_v28, %v4741_v18  ;;  %v4754_v26 = vrot.slane %v4753_v8, 2  ;;  %v4836_v49 = vmax.f32 %v4124_v54, %v4132_v44  ;;  %v4133_v32 = vmax.f32 %v2633_v63, 0.0  ;;  %3270 = vmatprep.mubr.bf16.mxu1 %v8518_v2 }
 0x420   :  { %v2637_v24 = vadd.f32 %v2636_v59, %v7503_v53  ;;  %v2638_v16 = vpop.f32.mrf.mxu1  ;;  %v4983_v44 = vmax.f32 %v4982_v35, %v4231_v45  ;;  %v4247_v63 = vmax.f32 %v3056_v43, 0.0  ;;  %v3065_v52 = vpop.f32.mrf.mxu0 }
 0x421   :  { %v4743_v3 = vrot.slane %v4742_v11, 1  ;;  %v4755_v30 = vmax.f32 %v4753_v8, %v4754_v26  ;;  %v4849_v41 = vmax.f32 %v4125_v36, %v4133_v32  ;;  %v2639_v47 = vadd.f32 %v2638_v16, %v7509_v31 }
 0x422   :  { %v4140_v21 = vmax.f32 %v2637_v24, 0.0  ;;  %v2640_v33 = vpop.f32.mrf.mxu1  ;;  %v3069_v0 = vpop.f32.mrf.mxu0  ;;  %v4974_v16 = vmax.f32 %v4972_v17, %v4973_v58  ;;  %v3066_v58 = vadd.f32 %v3065_v52, %v7128_v34 }
 0x423   :  { %v4744_v28 = vmax.f32 %v4742_v11, %v4743_v3  ;;  %v4756_v4 = vrot.slane %v4755_v30, 1  ;;  %v4141_v14 = vmax.f32 %v2639_v47, 0.0  ;;  %v2641_v61 = vadd.f32 %v2640_v33, %v7503_v53  ;;  %3674 = vmatmul.mubr.bf16.gmra.mxu0 %v7233_v10 }
 0x424   :  { %v4837_v9 = vmax.f32 %v4836_v49, %v4140_v21  ;;  %v2642_v54 = vpop.f32.mrf.mxu1  ;;  %3683 = vmatprep.mubr.bf16.mxu0 %v8518_v2  ;;  %v4984_v11 = vmax.f32 %v4983_v44, %v4239_v25  ;;  %v3071_v33 = vpop.f32.mrf.mxu0  ;;  %v3070_v52 = vadd.f32 %v3069_v0, %v7124_v56 }
 0x425   :  { %v7827_v42 = vsel %vm5222_vm4, %v4744_v28, %v7748_v37  ;;  %v4757_v20 = vmax.f32 %v4755_v30, %v4756_v4  ;;  %v4850_v18 = vmax.f32 %v4849_v41, %v4141_v14  ;;  %v4148_v8 = vmax.f32 %v2641_v61, 0.0 }
 0x426   :  { %v2643_v46 = vadd.f32 %v2642_v54, %v7509_v31  ;;  %v2646_v48 = vpop.f32.mrf.mxu1  ;;  %3271 = vmatmul.mubr.bf16.gmra.mxu1 %v7095_v7  ;;  %v4985_v57 = vmax.f32 %v4984_v11, %v4247_v63  ;;  %v4975_v4 = vrot.slane %v4974_v16, 2 }
 0x427   :  { %v7833_v36 = vsel %vm5222_vm4, %v4757_v20, %v7754_v50  ;;  %v4838_v59 = vmax.f32 %v4837_v9, %v4148_v8  ;;  %v2647_v37 = vadd.f32 %v2646_v48, %v7503_v53  ;;  %3280 = vmatprep.mubr.bf16.mxu1 %v8518_v2  ;;  %v3064_v48 = vadd.f32 %v7820_v29, %v7124_v56 }
 0x428   :  { %v4149_v26 = vmax.f32 %v2643_v46, 0.0  ;;  %v2648_v49 = vpop.f32.mrf.mxu1  ;;  %v4986_v21 = vrot.slane %v4985_v57, 4  ;;  %v4976_v44 = vmax.f32 %v4974_v16, %v4975_v4  ;;  %v3062_v29 = vadd.f32 %v7811_v15, %v7128_v34  ;;  %v7867_v15 = vld [vmem:[%s8474_s6] sm:$0xff] }
 0x429   :  { %v4156_v32 = vmax.f32 %v2647_v37, 0.0  ;;  %v2649_v38 = vadd.f32 %v2648_v49, %v7509_v31  ;;  %v2058_v37 = vsub.s32 6, %v8533_v6 }
 0x42a   :  { %v4851_v24 = vmax.f32 %v4850_v18, %v4149_v26  ;;  %v2650_v7 = vpop.f32.mrf.mxu1  ;;  %v4987_v20 = vmax.f32 %v4985_v57, %v4986_v21  ;;  %v3073_v18 = vpop.f32.mrf.mxu0  ;;  %v3060_v57 = vadd.f32 %v7801_v13, %v7124_v56  ;;  %v4977_v16 = vrot.slane %v4976_v44, 1 }
 0x42b   :  { %v4839_v3 = vmax.f32 %v4838_v59, %v4156_v32  ;;  %v4157_v30 = vmax.f32 %v2649_v38, 0.0  ;;  %v2651_v50 = vadd.f32 %v2650_v7, %v7503_v53  ;;  %3684 = vmatmul.mubr.bf16.gmra.mxu0 %v7298_v55  ;;  %v2062_v32 = vsub.s32 7, %v8533_v6 }
 0x42c   :  { %v2652_v41 = vpop.f32.mrf.mxu1  ;;  %3693 = vmatprep.mubr.bf16.mxu0 %v8518_v2  ;;  %v4988_v38 = vrot.slane %v4987_v20, 2  ;;  %v3074_v13 = vadd.f32 %v3073_v18, %v7124_v56  ;;  %v7870_v0 = vrot.slane %v7867_v15, %v2058_v37  ;;  %v4254_v4 = vmax.f32 %v3060_v57, 0.0 }
 0x42d   :  { %v4852_v47 = vmax.f32 %v4851_v24, %v4157_v30  ;;  %v4164_v45 = vmax.f32 %v2651_v50, 0.0  ;;  %v2653_v43 = vadd.f32 %v2652_v41, %v7509_v31  ;;  %v3075_v24 = vpop.f32.mrf.mxu0  ;;  %v4262_v41 = vmax.f32 %v3064_v48, 0.0 }
 0x42e   :  { %v2656_v28 = vpop.f32.mrf.mxu1  ;;  %3281 = vmatmul.mubr.bf16.gmra.mxu1 %v7103_v60 }
 0x42f   :  { %v4840_v17 = vmax.f32 %v4839_v3, %v4164_v45  ;;  %v4165_v14 = vmax.f32 %v2653_v43, 0.0  ;;  %v2657_v61 = vadd.f32 %v2656_v28, %v7503_v53  ;;  %3290 = vmatprep.mubr.bf16.mxu1 %v8518_v2  ;;  %v3072_v3 = vadd.f32 %v3071_v33, %v7128_v34 }
 0x430   :  { %v2658_v35 = vpop.f32.mrf.mxu1  ;;  %v7874_v33 = vrot.slane %v7867_v15, %v2062_v32  ;;  %v7876_v28 = vmax.f32 %v4987_v20, %v4988_v38 }
 0x431   :  { %v4853_v25 = vmax.f32 %v4852_v47, %v4165_v14  ;;  %v4172_v9 = vmax.f32 %v2657_v61, 0.0  ;;  %v2659_v54 = vadd.f32 %v2658_v35, %v7509_v31  ;;  %v4263_v47 = vmax.f32 %v3066_v58, 0.0 }
 0x432   :  { %v2660_v8 = vpop.f32.mrf.mxu1  ;;  %v4270_v14 = vmax.f32 %v3070_v52, 0.0  ;;  %v7878_v35 = vmax.f32 %v4976_v44, %v4977_v16  ;;  %v4990_v57 = vrot.slane %v7876_v28, 1 }
 0x433   :  { %v4841_v63 = vmax.f32 %v4840_v17, %v4172_v9  ;;  %v4173_v46 = vmax.f32 %v2659_v54, 0.0  ;;  %v2661_v60 = vadd.f32 %v2660_v8, %v7503_v53  ;;  %3694 = vmatmul.mubr.bf16.gmra.mxu0 %v7308_v39  ;;  %v4255_v17 = vmax.f32 %v3062_v29, 0.0 }
 0x434   :  { %v2662_v59 = vpop.f32.mrf.mxu1  ;;  %3703 = vmatprep.mubr.bf16.mxu0 %v8518_v2  ;;  %v5070_v8 = vmax.f32 %v4254_v4, %v4262_v41 }
 0x435   :  { %v4854_v11 = vmax.f32 %v4853_v25, %v4173_v46  ;;  %v4180_v26 = vmax.f32 %v2661_v60, 0.0  ;;  %v2663_v49 = vadd.f32 %v2662_v59, %v7509_v31  ;;  %v4271_v25 = vmax.f32 %v3072_v3, 0.0 }
 0x436   :  { %v2666_v7 = vpop.f32.mrf.mxu1  ;;  %3291 = vmatmul.mubr.bf16.gmra.mxu1 %v7155_v27  ;;  %v3076_v27 = vadd.f32 %v3075_v24, %v7128_v34  ;;  %v4278_v46 = vmax.f32 %v3074_v13, 0.0 }
 0x437   :  { %v4842_v30 = vmax.f32 %v4841_v63, %v4180_v26  ;;  %v4181_v50 = vmax.f32 %v2663_v49, 0.0  ;;  %3300 = vmatprep.mubr.bf16.mxu1 %v8518_v2  ;;  %v5083_v63 = vmax.f32 %v4255_v17, %v4263_v47  ;;  %v2667_v44 = vadd.f32 %v2666_v7, %v7503_v53 }
 0x438   :  { %v2668_v45 = vpop.f32.mrf.mxu1  ;;  %v4279_v20 = vmax.f32 %v3076_v27, 0.0 }
 0x439   :  { %v4843_v43 = vrot.slane %v4842_v30, 4  ;;  %v4855_v21 = vmax.f32 %v4854_v11, %v4181_v50  ;;  %v5071_v11 = vmax.f32 %v5070_v8, %v4270_v14  ;;  %v2669_v26 = vadd.f32 %v2668_v45, %v7509_v31 }
 0x43a   :  { %v2670_v61 = vpop.f32.mrf.mxu1  ;;  %v5084_v29 = vmax.f32 %v5083_v63, %v4271_v25  ;;  %v4188_v27 = vmax.f32 %v2667_v44, 0.0 }
 0x43b   :  { %v4844_v9 = vmax.f32 %v4842_v30, %v4843_v43  ;;  %v4856_v54 = vrot.slane %v4855_v21, 4  ;;  %v3079_v18 = vpop.f32.mrf.mxu0  ;;  %3704 = vmatmul.mubr.bf16.gmra.mxu0 %v7342_v1  ;;  %v2671_v49 = vadd.f32 %v2670_v61, %v7503_v53  ;;  %v5072_v7 = vmax.f32 %v5071_v11, %v4278_v46 }
 0x43c   :  { %v3080_v60 = vadd.f32 %v3079_v18, %v7124_v56  ;;  %v2672_v48 = vpop.f32.mrf.mxu1  ;;  %3713 = vmatprep.mubr.bf16.mxu0 %v8518_v2  ;;  %v5085_v47 = vmax.f32 %v5084_v29, %v4279_v20  ;;  %v4189_v43 = vmax.f32 %v2669_v26, 0.0 }
 0x43d   :  { %v4845_v58 = vrot.slane %v4844_v9, 2  ;;  %v4857_v59 = vmax.f32 %v4855_v21, %v4856_v54  ;;  %v3081_v37 = vpop.f32.mrf.mxu0  ;;  %v2673_v30 = vadd.f32 %v2672_v48, %v7509_v31  ;;  %v4196_v21 = vmax.f32 %v2671_v49, 0.0 }
 0x43e   :  { %v3082_v32 = vadd.f32 %v3081_v37, %v7128_v34  ;;  %v2676_v38 = vpop.f32.mrf.mxu1  ;;  %3301 = vmatmul.mubr.bf16.gmra.mxu1 %v7170_v22  ;;  %v4286_v3 = vmax.f32 %v3080_v60, 0.0 }
 0x43f   :  { %v4846_v52 = vmax.f32 %v4844_v9, %v4845_v58  ;;  %v4858_v24 = vrot.slane %v4857_v59, 2  ;;  %v3083_v16 = vpop.f32.mrf.mxu0  ;;  %3310 = vmatprep.mubr.bf16.mxu1 %v8518_v2  ;;  %v2677_v9 = vadd.f32 %v2676_v38, %v7503_v53  ;;  %v4197_v63 = vmax.f32 %v2673_v30, 0.0 }
 0x440   :  { %v3084_v50 = vadd.f32 %v3083_v16, %v7124_v56  ;;  %v2678_v41 = vpop.f32.mrf.mxu1  ;;  %v4287_v4 = vmax.f32 %v3082_v32, 0.0  ;;  %v5073_v8 = vmax.f32 %v5072_v7, %v4286_v3  ;;  %v4940_v7 = vmax.f32 %v4188_v27, %v4196_v21 }
 0x441   :  { %v4847_v13 = vrot.slane %v4846_v52, 1  ;;  %v4859_v45 = vmax.f32 %v4857_v59, %v4858_v24  ;;  %v3085_v22 = vpop.f32.mrf.mxu0  ;;  %v2679_v54 = vadd.f32 %v2678_v41, %v7509_v31 }
 0x442   :  { %v3086_v17 = vadd.f32 %v3085_v22, %v7128_v34  ;;  %v2680_v14 = vpop.f32.mrf.mxu1  ;;  %v4294_v46 = vmax.f32 %v3084_v50, 0.0  ;;  %v5086_v11 = vmax.f32 %v5085_v47, %v4287_v4  ;;  %v4953_v47 = vmax.f32 %v4189_v43, %v4197_v63 }
 0x443   :  { %v4848_v61 = vmax.f32 %v4846_v52, %v4847_v13  ;;  %v4860_v25 = vrot.slane %v4859_v45, 1  ;;  %v3089_v18 = vpop.f32.mrf.mxu0  ;;  %3714 = vmatmul.mubr.bf16.gmra.mxu0 %v7349_v5  ;;  %v2681_v44 = vadd.f32 %v2680_v14, %v7503_v53  ;;  %v4205_v52 = vmax.f32 %v2679_v54, 0.0 }
 0x444   :  { %v3090_v60 = vadd.f32 %v3089_v18, %v7124_v56  ;;  %v2682_v48 = vpop.f32.mrf.mxu1  ;;  %3723 = vmatprep.mubr.bf16.mxu0 %v8518_v2  ;;  %v4295_v59 = vmax.f32 %v3086_v17, 0.0  ;;  %v5074_v3 = vmax.f32 %v5073_v8, %v4294_v46 }
 0x445   :  { %v7900_v20 = vsel %vm5224_vm5, %v4848_v61, %v7827_v42  ;;  %v4861_v58 = vmax.f32 %v4859_v45, %v4860_v25  ;;  %v3091_v37 = vpop.f32.mrf.mxu0  ;;  %v2683_v49 = vadd.f32 %v2682_v48, %v7509_v31  ;;  %v4204_v42 = vmax.f32 %v2677_v9, 0.0 }
 0x446   :  { %v4302_v26 = vmax.f32 %v3090_v60, 0.0  ;;  %v3092_v32 = vadd.f32 %v3091_v37, %v7128_v34  ;;  %v2686_v38 = vpop.f32.mrf.mxu1  ;;  %3311 = vmatmul.mubr.bf16.gmra.mxu1 %v7219_v19  ;;  %v5087_v13 = vmax.f32 %v5086_v11, %v4295_v59  ;;  %v4212_v19 = vmax.f32 %v2681_v44, 0.0 }
 0x447   :  { %v7908_v29 = vsel %vm5224_vm5, %v4861_v58, %v7833_v36  ;;  %v2687_v24 = vadd.f32 %v2686_v38, %v7503_v53  ;;  %v3093_v16 = vpop.f32.mrf.mxu0  ;;  %3320 = vmatprep.mubr.bf16.mxu1 %v8518_v2  ;;  %v4213_v4 = vmax.f32 %v2683_v49, 0.0  ;;  %v4941_v25 = vmax.f32 %v4940_v7, %v4204_v42 }
 0x448   :  { %v4303_v30 = vmax.f32 %v3092_v32, 0.0  ;;  %v3094_v50 = vadd.f32 %v3093_v16, %v7124_v56  ;;  %v2688_v41 = vpop.f32.mrf.mxu1  ;;  %v5075_v22 = vmax.f32 %v5074_v3, %v4302_v26  ;;  %v4954_v9 = vmax.f32 %v4953_v47, %v4205_v52 }
 0x449   :  { %v2689_v45 = vadd.f32 %v2688_v41, %v7509_v31  ;;  %v3095_v36 = vpop.f32.mrf.mxu0  ;;  %v4220_v27 = vmax.f32 %v2687_v24, 0.0  ;;  %v4942_v46 = vmax.f32 %v4941_v25, %v4212_v19  ;;  %v7923_v59 = vmax.f32 %v7876_v28, %v4990_v57 }
 0x44a   :  { %v4310_v17 = vmax.f32 %v3094_v50, 0.0  ;;  %v3096_v14 = vadd.f32 %v3095_v36, %v7128_v34  ;;  %v2690_v61 = vpop.f32.mrf.mxu1  ;;  %v5088_v56 = vmax.f32 %v5087_v13, %v4303_v30  ;;  %v4955_v44 = vmax.f32 %v4954_v9, %v4213_v4 }
 0x44b   :  { %v2691_v21 = vadd.f32 %v2690_v61, %v7503_v53  ;;  %v3485_v54 = vpop.f32.mrf.mxu0  ;;  %3724 = vmatmul.mubr.bf16.gmra.mxu0 %v7397_v40  ;;  %v4221_v18 = vmax.f32 %v2689_v45, 0.0  ;;  %v4943_v49 = vmax.f32 %v4942_v46, %v4220_v27 }
 0x44c   :  { %v5076_v43 = vmax.f32 %v5075_v22, %v4310_v17  ;;  %v4311_v8 = vmax.f32 %v3096_v14, 0.0  ;;  %v2692_v63 = vpop.f32.mrf.mxu1  ;;  %3733 = vmatprep.mubr.bf16.mxu0 %v8518_v2  ;;  %v3486_v34 = vadd.f32 %v3485_v54, %v7870_v0 }
 0x44d   :  { %v4228_v60 = vmax.f32 %v2691_v21, 0.0  ;;  %v2693_v48 = vadd.f32 %v2692_v63, %v7509_v31  ;;  %v3487_v58 = vpop.f32.mrf.mxu0  ;;  %v4956_v16 = vmax.f32 %v4955_v44, %v4221_v18 }
 0x44e   :  { %v5077_v37 = vrot.slane %v5076_v43, 4  ;;  %v5089_v11 = vmax.f32 %v5088_v56, %v4311_v8  ;;  %v2696_v26 = vpop.f32.mrf.mxu1  ;;  %3321 = vmatmul.mubr.bf16.gmra.mxu1 %v7233_v10  ;;  %v3488_v38 = vadd.f32 %v3487_v58, %v7874_v33  ;;  %v3810_v30 = vmax.f32 %v3486_v34, 0.0 }
 0x44f   :  { %v4229_v32 = vmax.f32 %v2693_v48, 0.0  ;;  %v2697_v42 = vadd.f32 %v2696_v26, %v7503_v53  ;;  %v3489_v52 = vpop.f32.mrf.mxu0  ;;  %3330 = vmatprep.mubr.bf16.mxu1 %v8518_v2  ;;  %v4944_v3 = vmax.f32 %v4943_v49, %v4228_v60 }
 0x450   :  { %v5078_v24 = vmax.f32 %v5076_v43, %v5077_v37  ;;  %v5090_v28 = vrot.slane %v5089_v11, 4  ;;  %v3490_v57 = vadd.f32 %v3489_v52, %v7870_v0  ;;  %v2698_v7 = vpop.f32.mrf.mxu1  ;;  %v3811_v4 = vmax.f32 %v3488_v38, 0.0 }
 0x451   :  { %v4236_v50 = vmax.f32 %v2697_v42, 0.0  ;;  %v2699_v10 = vadd.f32 %v2698_v7, %v7509_v31  ;;  %v3491_v41 = vpop.f32.mrf.mxu0  ;;  %v4957_v22 = vmax.f32 %v4956_v16, %v4229_v32  ;;  %v5242_v16 = vsel %vm5226_vm6, %v7878_v35, %v7654_v23 }
 0x452   :  { %v5079_v47 = vrot.slane %v5078_v24, 2  ;;  %v5091_v13 = vmax.f32 %v5089_v11, %v5090_v28  ;;  %v3818_v19 = vmax.f32 %v3490_v57, 0.0  ;;  %v3492_v45 = vadd.f32 %v3491_v41, %v7874_v33  ;;  %v2700_v36 = vpop.f32.mrf.mxu1 }
 0x453   :  { %v4237_v17 = vmax.f32 %v2699_v10, 0.0  ;;  %v2701_v14 = vadd.f32 %v2700_v36, %v7503_v53  ;;  %v3495_v61 = vpop.f32.mrf.mxu0  ;;  %3734 = vmatmul.mubr.bf16.gmra.mxu0 %v7404_v51  ;;  %v4945_v56 = vmax.f32 %v4944_v3, %v4236_v50 }
 0x454   :  { %v5080_v25 = vmax.f32 %v5078_v24, %v5079_v47  ;;  %v5092_v9 = vrot.slane %v5091_v13, 2  ;;  %v4394_v27 = vmax.f32 %v3810_v30, %v3818_v19  ;;  %v3819_v21 = vmax.f32 %v3492_v45, 0.0  ;;  %v2702_v54 = vpop.f32.mrf.mxu1  ;;  %3743 = vmatprep.mubr.bf16.mxu0 %v8518_v2 }
 0x455   :  { %v4244_v43 = vmax.f32 %v2701_v14, 0.0  ;;  %v3496_v18 = vadd.f32 %v3495_v61, %v7870_v0  ;;  %v2703_v8 = vadd.f32 %v2702_v54, %v7509_v31  ;;  %v3497_v63 = vpop.f32.mrf.mxu0  ;;  %v4958_v44 = vmax.f32 %v4957_v22, %v4237_v17 }
 0x456   :  { %v5081_v46 = vrot.slane %v5080_v25, 1  ;;  %v5093_v60 = vmax.f32 %v5091_v13, %v5092_v9  ;;  %v4407_v34 = vmax.f32 %v3811_v4, %v3819_v21  ;;  %v3498_v48 = vadd.f32 %v3497_v63, %v7874_v33  ;;  %v2706_v58 = vpop.f32.mrf.mxu1  ;;  %3331 = vmatmul.mubr.bf16.gmra.mxu1 %v7298_v55 }
 0x457   :  { %v4946_v37 = vmax.f32 %v4945_v56, %v4244_v43  ;;  %v3826_v11 = vmax.f32 %v3496_v18, 0.0  ;;  %v4245_v26 = vmax.f32 %v2703_v8, 0.0  ;;  %v3499_v49 = vpop.f32.mrf.mxu0  ;;  %3340 = vmatprep.mubr.bf16.mxu1 %v8518_v2  ;;  %v5249_v47 = vsel %vm5226_vm6, %v7923_v59, %v7662_v62 }
 0x458   :  { %v5082_v32 = vmax.f32 %v5080_v25, %v5081_v46  ;;  %v5094_v38 = vrot.slane %v5093_v60, 1  ;;  %v3827_v42 = vmax.f32 %v3498_v48, 0.0  ;;  %v3500_v52 = vadd.f32 %v3499_v49, %v7870_v0  ;;  %v2708_v24 = vpop.f32.mrf.mxu1 }
 0x459   :  { %v4947_v28 = vrot.slane %v4946_v37, 4  ;;  %v4395_v57 = vmax.f32 %v4394_v27, %v3826_v11  ;;  %v4959_v55 = vmax.f32 %v4958_v44, %v4245_v26  ;;  %v3501_v7 = vpop.f32.mrf.mxu0  ;;  %v2050_v21 = vsub.s32 4, %v8533_v6 }
 0x45a   :  { %v5243_v3 = vsel %vm5228_vm7, %v5082_v32, %v5242_v16  ;;  %v5095_v30 = vmax.f32 %v5093_v60, %v5094_v38  ;;  %v4408_v50 = vmax.f32 %v4407_v34, %v3827_v42  ;;  %v3834_v10 = vmax.f32 %v3500_v52, 0.0  ;;  %v2710_v41 = vpop.f32.mrf.mxu1  ;;  %v8542_v38 = vld [vmem:[#allocation6_spill] sm:$0xff] }
 0x45b   :  { %5289 = vst [vmem:[%s8475_s7 + $0x10] sm:$0xff] %v5243_v3  ;;  %v3502_v23 = vadd.f32 %v3501_v7, %v7874_v33  ;;  %v3505_v35 = vpop.f32.mrf.mxu0  ;;  %3744 = vmatmul.mubr.bf16.gmra.mxu0 %v7437_v12  ;;  %v4948_v19 = vmax.f32 %v4946_v37, %v4947_v28  ;;  %v4960_v62 = vrot.slane %v4959_v55, 4  ;;  %v2711_v9 = vadd.f32 %v2710_v41, %v7503_v53 }
 0x45c   :  { %v5250_v13 = vsel %vm5228_vm7, %v5095_v30, %v5249_v47  ;;  %v4396_v45 = vmax.f32 %v4395_v57, %v3834_v10  ;;  %v3506_v36 = vadd.f32 %v3505_v35, %v7870_v0  ;;  %v2712_v22 = vpop.f32.mrf.mxu1  ;;  %3753 = vmatprep.mubr.bf16.mxu0 %v8518_v2  ;;  %v2054_v8 = vsub.s32 5, %v8533_v6 }
 0x45d   :  { %5290 = vst [vmem:[%s8475_s7 + $0x18] sm:$0xff] %v5250_v13  ;;  %v3835_v59 = vmax.f32 %v3502_v23, 0.0  ;;  %v3507_v4 = vpop.f32.mrf.mxu0  ;;  %v4949_v54 = vrot.slane %v4948_v19, 2  ;;  %v4961_v63 = vmax.f32 %v4959_v55, %v4960_v62  ;;  %v2707_v46 = vadd.f32 %v2706_v58, %v7503_v53 }
 0x45e   :  { %v3842_v17 = vmax.f32 %v3506_v36, 0.0  ;;  %v3508_v14 = vadd.f32 %v3507_v4, %v7874_v33  ;;  %v2716_v61 = vpop.f32.mrf.mxu1  ;;  %3341 = vmatmul.mubr.bf16.gmra.mxu1 %v7308_v39  ;;  %v2709_v34 = vadd.f32 %v2708_v24, %v7509_v31  ;;  %v4260_v11 = vmax.f32 %v2711_v9, 0.0 }
 0x45f   :  { %v4409_v25 = vmax.f32 %v4408_v50, %v3835_v59  ;;  %v3509_v27 = vpop.f32.mrf.mxu0  ;;  %3350 = vmatprep.mubr.bf16.mxu1 %v8518_v2  ;;  %v2713_v26 = vadd.f32 %v2712_v22, %v7509_v31  ;;  %v7972_v6 = vrot.slane %v7867_v15, %v2050_v21  ;;  %v4950_v58 = vmax.f32 %v4948_v19, %v4949_v54 }
 0x460   :  { %v4397_v56 = vmax.f32 %v4396_v45, %v3842_v17  ;;  %v3843_v43 = vmax.f32 %v3508_v14, 0.0  ;;  %v2718_v18 = vpop.f32.mrf.mxu1  ;;  %v3510_v60 = vadd.f32 %v3509_v27, %v7870_v0  ;;  %v7977_v24 = vrot.slane %v7867_v15, %v2054_v8 }
 0x461   :  { %v3511_v39 = vpop.f32.mrf.mxu0  ;;  %v4962_v28 = vrot.slane %v4961_v63, 2  ;;  %v4252_v57 = vmax.f32 %v2707_v46, 0.0  ;;  %v2717_v55 = vadd.f32 %v2716_v61, %v7503_v53  ;;  %v4253_v30 = vmax.f32 %v2709_v34, 0.0 }
 0x462   :  { %v4410_v48 = vmax.f32 %v4409_v25, %v3843_v43  ;;  %v3512_v44 = vadd.f32 %v3511_v39, %v7874_v33  ;;  %v2720_v37 = vpop.f32.mrf.mxu1  ;;  %v3850_v49 = vmax.f32 %v3510_v60, 0.0  ;;  %v2719_v50 = vadd.f32 %v2718_v18, %v7509_v31  ;;  %v8543_v60 = vld [vmem:[#allocation2_spill] sm:$0xff] }
 0x463   :  { %v3515_v32 = vpop.f32.mrf.mxu0  ;;  %3754 = vmatmul.mubr.bf16.gmra.mxu0 %v8542_v38  ;;  %v5044_v23 = vmax.f32 %v4252_v57, %v4260_v11  ;;  %v4261_v35 = vmax.f32 %v2713_v26, 0.0  ;;  %v2721_v13 = vadd.f32 %v2720_v37, %v7503_v53  ;;  %v4951_v45 = vrot.slane %v4950_v58, 1 }
 0x464   :  { %v3851_v42 = vmax.f32 %v3512_v44, 0.0  ;;  %v3516_v52 = vadd.f32 %v3515_v32, %v7870_v0  ;;  %v2722_v16 = vpop.f32.mrf.mxu1  ;;  %3763 = vmatprep.mubr.bf16.mxu0 %v8518_v2  ;;  %v4398_v7 = vmax.f32 %v4397_v56, %v3850_v49  ;;  %v4963_v4 = vmax.f32 %v4961_v63, %v4962_v28 }
 0x465   :  { %v3517_v3 = vpop.f32.mrf.mxu0  ;;  %v2723_v22 = vadd.f32 %v2722_v16, %v7509_v31  ;;  %v4268_v17 = vmax.f32 %v2717_v55, 0.0  ;;  %v4269_v25 = vmax.f32 %v2719_v50, 0.0  ;;  %v5057_v56 = vmax.f32 %v4253_v30, %v4261_v35 }
 0x466   :  { %v4411_v10 = vmax.f32 %v4410_v48, %v3851_v42  ;;  %v3858_v41 = vmax.f32 %v3516_v52, 0.0  ;;  %v2726_v47 = vpop.f32.mrf.mxu1  ;;  %3351 = vmatmul.mubr.bf16.gmra.mxu1 %v7342_v1  ;;  %v3518_v15 = vadd.f32 %v3517_v3, %v7874_v33  ;;  %v4276_v43 = vmax.f32 %v2721_v13, 0.0 }
 0x467   :  { %v3519_v19 = vpop.f32.mrf.mxu0  ;;  %3360 = vmatprep.mubr.bf16.mxu1 %v8518_v2  ;;  %v2727_v1 = vadd.f32 %v2726_v47, %v7503_v53  ;;  %v4952_v63 = vmax.f32 %v4950_v58, %v4951_v45  ;;  %v4277_v39 = vmax.f32 %v2723_v22, 0.0  ;;  %v4964_v37 = vrot.slane %v4963_v4, 1 }
 0x468   :  { %v4399_v36 = vmax.f32 %v4398_v7, %v3858_v41  ;;  %v3520_v62 = vadd.f32 %v3519_v19, %v7870_v0  ;;  %v2728_v59 = vpop.f32.mrf.mxu1  ;;  %v3859_v14 = vmax.f32 %v3518_v15, 0.0  ;;  %v5045_v11 = vmax.f32 %v5044_v23, %v4268_v17 }
 0x469   :  { %v3521_v61 = vpop.f32.mrf.mxu0  ;;  %v2729_v27 = vadd.f32 %v2728_v59, %v7509_v31  ;;  %v4284_v26 = vmax.f32 %v2727_v1, 0.0  ;;  %v5058_v42 = vmax.f32 %v5057_v56, %v4269_v25  ;;  %v4965_v35 = vmax.f32 %v4963_v4, %v4964_v37 }
 0x46a   :  { %v3866_v9 = vmax.f32 %v3520_v62, 0.0  ;;  %v3522_v21 = vadd.f32 %v3521_v61, %v7874_v33  ;;  %v2730_v54 = vpop.f32.mrf.mxu1  ;;  %v4412_v18 = vmax.f32 %v4411_v10, %v3859_v14  ;;  %v5046_v58 = vmax.f32 %v5045_v11, %v4276_v43 }
 0x46b   :  { %v2731_v8 = vadd.f32 %v2730_v54, %v7503_v53  ;;  %v3525_v46 = vpop.f32.mrf.mxu0  ;;  %3764 = vmatmul.mubr.bf16.gmra.mxu0 %v8543_v60  ;;  %v4285_v52 = vmax.f32 %v2729_v27, 0.0  ;;  %v5059_v50 = vmax.f32 %v5058_v42, %v4277_v39 }
 0x46c   :  { %v4400_v34 = vmax.f32 %v4399_v36, %v3866_v9  ;;  %v3867_v48 = vmax.f32 %v3522_v21, 0.0  ;;  %v2732_v44 = vpop.f32.mrf.mxu1  ;;  %3773 = vmatprep.mubr.bf16.mxu0 %v8518_v2  ;;  %v3526_v28 = vadd.f32 %v3525_v46, %v7870_v0  ;;  %v5047_v13 = vmax.f32 %v5046_v58, %v4284_v26  ;;  %v8544_v9 = vld [vmem:[#allocation8_spill] sm:$0xff] }
 0x46d   :  { %v2733_v49 = vadd.f32 %v2732_v44, %v7509_v31  ;;  %v3527_v32 = vpop.f32.mrf.mxu0  ;;  %v4292_v7 = vmax.f32 %v2731_v8, 0.0  ;;  %v5060_v45 = vmax.f32 %v5059_v50, %v4285_v52 }
 0x46e   :  { %v7994_v16 = vmax.f32 %v4412_v18, %v3867_v48  ;;  %v2736_v57 = vpop.f32.mrf.mxu1  ;;  %3361 = vmatmul.mubr.bf16.gmra.mxu1 %v7349_v5  ;;  %v4401_v55 = vrot.slane %v4400_v34, 4  ;;  %v3528_v41 = vadd.f32 %v3527_v32, %v7874_v33  ;;  %v3874_v36 = vmax.f32 %v3526_v28, 0.0 }
 0x46f   :  { %v2737_v3 = vadd.f32 %v2736_v57, %v7503_v53  ;;  %v3529_v30 = vpop.f32.mrf.mxu0  ;;  %3370 = vmatprep.mubr.bf16.mxu1 %v8518_v2  ;;  %v4293_v10 = vmax.f32 %v2733_v49, 0.0  ;;  %v5048_v14 = vmax.f32 %v5047_v13, %v4292_v7  ;;  %v8021_v57 = vsel %vm5226_vm6, %v4965_v35, %v7908_v29  ;;  %v8545_v35 = vld [vmem:[#allocation4_spill] sm:$0xff] }
 0x470   :  { %v3530_v47 = vadd.f32 %v3529_v30, %v7870_v0  ;;  %v2738_v23 = vpop.f32.mrf.mxu1  ;;  %v4402_v17 = vmax.f32 %v4400_v34, %v4401_v55  ;;  %v3875_v27 = vmax.f32 %v3528_v41, 0.0  ;;  %v4414_v34 = vrot.slane %v7994_v16, 4 }
 0x471   :  { %v4300_v15 = vmax.f32 %v2737_v3, 0.0  ;;  %v2739_v5 = vadd.f32 %v2738_v23, %v7509_v31  ;;  %v3531_v19 = vpop.f32.mrf.mxu0  ;;  %v5061_v4 = vmax.f32 %v5060_v45, %v4293_v10 }
 0x472   :  { %v3882_v22 = vmax.f32 %v3530_v47, 0.0  ;;  %v3532_v62 = vadd.f32 %v3531_v19, %v7874_v33  ;;  %v2740_v59 = vpop.f32.mrf.mxu1  ;;  %v8024_v3 = vmax.f32 %v7994_v16, %v4414_v34 }
 0x473   :  { %v4301_v1 = vmax.f32 %v2739_v5, 0.0  ;;  %v2741_v61 = vadd.f32 %v2740_v59, %v7503_v53  ;;  %v3535_v25 = vpop.f32.mrf.mxu0  ;;  %3774 = vmatmul.mubr.bf16.gmra.mxu0 %v8544_v9  ;;  %v5049_v43 = vmax.f32 %v5048_v14, %v4300_v15  ;;  %v8011_v53 = vsel %vm5226_vm6, %v4952_v63, %v7900_v20 }
 0x474   :  { %v4498_v21 = vmax.f32 %v3874_v36, %v3882_v22  ;;  %v3883_v54 = vmax.f32 %v3532_v62, 0.0  ;;  %v2742_v56 = vpop.f32.mrf.mxu1  ;;  %3783 = vmatprep.mubr.bf16.mxu0 %v8518_v2  ;;  %v3536_v8 = vadd.f32 %v3535_v25, %v7870_v0 }
 0x475   :  { %v4308_v18 = vmax.f32 %v2741_v61, 0.0  ;;  %v2743_v46 = vadd.f32 %v2742_v56, %v7509_v31  ;;  %v3537_v39 = vpop.f32.mrf.mxu0  ;;  %v5062_v11 = vmax.f32 %v5061_v4, %v4301_v1  ;;  %v4403_v31 = vrot.slane %v4402_v17, 2 }
 0x476   :  { %v4511_v48 = vmax.f32 %v3875_v27, %v3883_v54  ;;  %v3538_v44 = vadd.f32 %v3537_v39, %v7874_v33  ;;  %v3132_v37 = vpop.f32.mrf.mxu1  ;;  %3371 = vmatmul.mubr.bf16.gmra.mxu1 %v7397_v40  ;;  %v3890_v49 = vmax.f32 %v3536_v8, 0.0 }
 0x477   :  { %v5050_v26 = vmax.f32 %v5049_v43, %v4308_v18  ;;  %v4309_v32 = vmax.f32 %v2743_v46, 0.0  ;;  %v3539_v42 = vpop.f32.mrf.mxu0  ;;  %3380 = vmatprep.mubr.bf16.mxu1 %v8518_v2  ;;  %v3133_v20 = vadd.f32 %v3132_v37, %v7972_v6  ;;  %v8030_v5 = vmax.f32 %v4402_v17, %v4403_v31 }
 0x478   :  { %v3891_v52 = vmax.f32 %v3538_v44, 0.0  ;;  %v3540_v63 = vadd.f32 %v3539_v42, %v7870_v0  ;;  %v3134_v28 = vpop.f32.mrf.mxu1  ;;  %v4499_v40 = vmax.f32 %v4498_v21, %v3890_v49 }
 0x479   :  { %v5051_v58 = vrot.slane %v5050_v26, 4  ;;  %v5063_v55 = vmax.f32 %v5062_v11, %v4309_v32  ;;  %v3541_v7 = vpop.f32.mrf.mxu0  ;;  %v3135_v10 = vadd.f32 %v3134_v28, %v7977_v24  ;;  %v3808_v19 = vmax.f32 %v3133_v20, 0.0 }
 0x47a   :  { %v4512_v30 = vmax.f32 %v4511_v48, %v3891_v52  ;;  %v3898_v50 = vmax.f32 %v3540_v63, 0.0  ;;  %v3136_v41 = vpop.f32.mrf.mxu1  ;;  %v3542_v13 = vadd.f32 %v3541_v7, %v7874_v33 }
 0x47b   :  { %v5052_v47 = vmax.f32 %v5050_v26, %v5051_v58  ;;  %v5064_v23 = vrot.slane %v5063_v55, 4  ;;  %v3137_v15 = vadd.f32 %v3136_v41, %v7972_v6  ;;  %v3545_v29 = vpop.f32.mrf.mxu0  ;;  %3784 = vmatmul.mubr.bf16.gmra.mxu0 %v8545_v35  ;;  %v3809_v61 = vmax.f32 %v3135_v10, 0.0 }
 0x47c   :  { %v4500_v45 = vmax.f32 %v4499_v40, %v3898_v50  ;;  %v3546_v16 = vadd.f32 %v3545_v29, %v7870_v0  ;;  %v3138_v36 = vpop.f32.mrf.mxu1  ;;  %3793 = vmatprep.mubr.bf16.mxu0 %v8518_v2  ;;  %v3899_v59 = vmax.f32 %v3542_v13, 0.0 }
 0x47d   :  { %v5053_v22 = vrot.slane %v5052_v47, 2  ;;  %v5065_v62 = vmax.f32 %v5063_v55, %v5064_v23  ;;  %v3816_v14 = vmax.f32 %v3137_v15, 0.0  ;;  %v3547_v1 = vpop.f32.mrf.mxu0  ;;  %v3139_v4 = vadd.f32 %v3138_v36, %v7977_v24  ;;  %v8546_v55 = vld [vmem:[#allocation9_spill] sm:$0xff] }
 0x47e   :  { %v3906_v25 = vmax.f32 %v3546_v16, 0.0  ;;  %v3548_v27 = vadd.f32 %v3547_v1, %v7874_v33  ;;  %v3142_v17 = vpop.f32.mrf.mxu1  ;;  %3381 = vmatmul.mubr.bf16.gmra.mxu1 %v7404_v51  ;;  %v4513_v56 = vmax.f32 %v4512_v30, %v3899_v59 }
 0x47f   :  { %v5054_v21 = vmax.f32 %v5052_v47, %v5053_v22  ;;  %v5066_v54 = vrot.slane %v5065_v62, 2  ;;  %v4368_v43 = vmax.f32 %v3808_v19, %v3816_v14  ;;  %v3549_v18 = vpop.f32.mrf.mxu0  ;;  %3390 = vmatprep.mubr.bf16.mxu1 %v8518_v2  ;;  %v3817_v46 = vmax.f32 %v3139_v4, 0.0 }
 0x480   :  { %v4501_v8 = vmax.f32 %v4500_v45, %v3906_v25  ;;  %v3907_v39 = vmax.f32 %v3548_v27, 0.0  ;;  %v3143_v34 = vadd.f32 %v3142_v17, %v7972_v6  ;;  %v3144_v48 = vpop.f32.mrf.mxu1  ;;  %v3550_v11 = vadd.f32 %v3549_v18, %v7870_v0 }
 0x481   :  { %v5055_v44 = vrot.slane %v5054_v21, 1  ;;  %v5067_v37 = vmax.f32 %v5065_v62, %v5066_v54  ;;  %v3145_v26 = vadd.f32 %v3144_v48, %v7977_v24  ;;  %v3551_v51 = vpop.f32.mrf.mxu0  ;;  %v4381_v49 = vmax.f32 %v3809_v61, %v3817_v46 }
 0x482   :  { %v4514_v32 = vmax.f32 %v4513_v56, %v3907_v39  ;;  %v3824_v42 = vmax.f32 %v3143_v34, 0.0  ;;  %v3552_v31 = vadd.f32 %v3551_v51, %v7874_v33  ;;  %v3146_v52 = vpop.f32.mrf.mxu1  ;;  %v3914_v28 = vmax.f32 %v3550_v11, 0.0 }
 0x483   :  { %v5056_v20 = vmax.f32 %v5054_v21, %v5055_v44  ;;  %v5068_v63 = vrot.slane %v5067_v37, 1  ;;  %v3825_v58 = vmax.f32 %v3145_v26, 0.0  ;;  %v3555_v40 = vpop.f32.mrf.mxu0  ;;  %3794 = vmatmul.mubr.bf16.gmra.mxu0 %v8546_v55  ;;  %v3147_v50 = vadd.f32 %v3146_v52, %v7972_v6 }
 0x484   :  { %v4369_v7 = vmax.f32 %v4368_v43, %v3824_v42  ;;  %v3915_v30 = vmax.f32 %v3552_v31, 0.0  ;;  %v3556_v10 = vadd.f32 %v3555_v40, %v7870_v0  ;;  %v3148_v41 = vpop.f32.mrf.mxu1  ;;  %v4502_v13 = vmax.f32 %v4501_v8, %v3914_v28 }
 0x485   :  { %v5229_v47 = vsel %vm5228_vm7, %v5056_v20, %v8011_v53  ;;  %v5069_v23 = vmax.f32 %v5067_v37, %v5068_v63  ;;  %v4382_v15 = vmax.f32 %v4381_v49, %v3825_v58  ;;  %v3557_v29 = vpop.f32.mrf.mxu0  ;;  %v3832_v45 = vmax.f32 %v3147_v50, 0.0 }
 0x486   :  { %5287 = vst [vmem:[%s8475_s7] sm:$0xff] %v5229_v47  ;;  %v4515_v19 = vmax.f32 %v4514_v32, %v3915_v30  ;;  %v3922_v16 = vmax.f32 %v3556_v10, 0.0  ;;  %v3149_v36 = vadd.f32 %v3148_v41, %v7977_v24  ;;  %v3152_v22 = vpop.f32.mrf.mxu1  ;;  %3391 = vmatmul.mubr.bf16.gmra.mxu1 %v7437_v12  ;;  %v4416_v62 = vrot.slane %v8024_v3, 2 }
 0x487   :  { %v5236_v53 = vsel %vm5228_vm7, %v5069_v23, %v8021_v57  ;;  %v3558_v59 = vadd.f32 %v3557_v29, %v7874_v33  ;;  %v3153_v14 = vadd.f32 %v3152_v22, %v7972_v6  ;;  %v3559_v1 = vpop.f32.mrf.mxu0  ;;  %3400 = vmatprep.mubr.bf16.mxu1 %v8518_v2  ;;  %v4370_v61 = vmax.f32 %v4369_v7, %v3832_v45 }
 0x488   :  { %5288 = vst [vmem:[%s8475_s7 + $0x8] sm:$0xff] %v5236_v53  ;;  %v4503_v25 = vmax.f32 %v4502_v13, %v3922_v16  ;;  %v3833_v4 = vmax.f32 %v3149_v36, 0.0  ;;  %v3560_v12 = vadd.f32 %v3559_v1, %v7870_v0  ;;  %v3154_v27 = vpop.f32.mrf.mxu1  ;;  %v4405_v56 = vrot.slane %v8030_v5, 1 }
 0x489   :  { %v3923_v17 = vmax.f32 %v3558_v59, 0.0  ;;  %v3840_v21 = vmax.f32 %v3153_v14, 0.0  ;;  %v3155_v57 = vadd.f32 %v3154_v27, %v7977_v24  ;;  %v3561_v54 = vpop.f32.mrf.mxu0  ;;  %v4417_v11 = vmax.f32 %v8024_v3, %v4416_v62 }
 0x48a   :  { %v4383_v43 = vmax.f32 %v4382_v15, %v3833_v4  ;;  %v3930_v18 = vmax.f32 %v3560_v12, 0.0  ;;  %v3562_v8 = vadd.f32 %v3561_v54, %v7874_v33  ;;  %v3156_v46 = vpop.f32.mrf.mxu1  ;;  %v8070_v63 = vmax.f32 %v8030_v5, %v4405_v56 }
 0x48b   :  { %v4516_v39 = vmax.f32 %v4515_v19, %v3923_v17  ;;  %v4371_v34 = vmax.f32 %v4370_v61, %v3840_v21  ;;  %v3841_v48 = vmax.f32 %v3155_v57, 0.0  ;;  %v3157_v44 = vadd.f32 %v3156_v46, %v7972_v6  ;;  %v3565_v37 = vpop.f32.mrf.mxu0 }
 0x48c   :  { %v4504_v26 = vmax.f32 %v4503_v25, %v3930_v18  ;;  %v3931_v51 = vmax.f32 %v3562_v8, 0.0  ;;  %v3158_v49 = vpop.f32.mrf.mxu1  ;;  %v3566_v31 = vadd.f32 %v3565_v37, %v7870_v0  ;;  %v4418_v41 = vrot.slane %v4417_v11, 1 }
 0x48d   :  { %v4384_v32 = vmax.f32 %v4383_v43, %v3841_v48  ;;  %v3848_v42 = vmax.f32 %v3157_v44, 0.0  ;;  %v3159_v52 = vadd.f32 %v3158_v49, %v7977_v24  ;;  %v3567_v20 = vpop.f32.mrf.mxu0 }
 0x48e   :  { %v4505_v28 = vrot.slane %v4504_v26, 4  ;;  %v4517_v58 = vmax.f32 %v4516_v39, %v3931_v51  ;;  %v3162_v40 = vpop.f32.mrf.mxu1  ;;  %3401 = vmatmul.mubr.bf16.gmra.mxu1 %v8542_v38  ;;  %v3568_v30 = vadd.f32 %v3567_v20, %v7874_v33  ;;  %v3938_v15 = vmax.f32 %v3566_v31, 0.0 }
 0x48f   :  { %v4372_v7 = vmax.f32 %v4371_v34, %v3848_v42  ;;  %v3849_v3 = vmax.f32 %v3159_v52, 0.0  ;;  %v3163_v50 = vadd.f32 %v3162_v40, %v7972_v6  ;;  %v3569_v10 = vpop.f32.mrf.mxu0  ;;  %3410 = vmatprep.mubr.bf16.mxu1 %v8518_v2  ;;  %v4419_v44 = vmax.f32 %v4417_v11, %v4418_v41 }
 0x490   :  { %v4506_v47 = vmax.f32 %v4504_v26, %v4505_v28  ;;  %v4518_v23 = vrot.slane %v4517_v58, 4  ;;  %v3570_v5 = vadd.f32 %v3569_v10, %v7870_v0  ;;  %v3164_v13 = vpop.f32.mrf.mxu1  ;;  %v3939_v59 = vmax.f32 %v3568_v30, 0.0 }
 0x491   :  { %v4385_v29 = vmax.f32 %v4384_v32, %v3849_v3  ;;  %v3856_v19 = vmax.f32 %v3163_v50, 0.0  ;;  %v3165_v38 = vadd.f32 %v3164_v13, %v7977_v24  ;;  %v3571_v45 = vpop.f32.mrf.mxu0 }
 0x492   :  { %v4507_v16 = vrot.slane %v4506_v47, 2  ;;  %v4519_v36 = vmax.f32 %v4517_v58, %v4518_v23  ;;  %v3946_v22 = vmax.f32 %v3570_v5, 0.0  ;;  %v3572_v62 = vadd.f32 %v3571_v45, %v7874_v33  ;;  %v3166_v53 = vpop.f32.mrf.mxu1 }
 0x493   :  { %v4373_v14 = vmax.f32 %v4372_v7, %v3856_v19  ;;  %v3857_v1 = vmax.f32 %v3165_v38, 0.0  ;;  %v3167_v61 = vadd.f32 %v3166_v53, %v7972_v6  ;;  %v3575_v25 = vpop.f32.mrf.mxu0 }
 0x494   :  { %v4508_v4 = vmax.f32 %v4506_v47, %v4507_v16  ;;  %v4520_v12 = vrot.slane %v4519_v36, 2  ;;  %v4602_v27 = vmax.f32 %v3938_v15, %v3946_v22  ;;  %v3947_v17 = vmax.f32 %v3572_v62, 0.0  ;;  %v3168_v21 = vpop.f32.mrf.mxu1 }
 0x495   :  { %v4386_v57 = vmax.f32 %v4385_v29, %v3857_v1  ;;  %v3864_v54 = vmax.f32 %v3167_v61, 0.0  ;;  %v3576_v56 = vadd.f32 %v3575_v25, %v7870_v0  ;;  %v3169_v43 = vadd.f32 %v3168_v21, %v7977_v24  ;;  %v3577_v18 = vpop.f32.mrf.mxu0 }
 0x496   :  { %v4509_v8 = vrot.slane %v4508_v4, 1  ;;  %v4521_v46 = vmax.f32 %v4519_v36, %v4520_v12  ;;  %v4615_v39 = vmax.f32 %v3939_v59, %v3947_v17  ;;  %v3578_v34 = vadd.f32 %v3577_v18, %v7874_v33  ;;  %v3172_v48 = vpop.f32.mrf.mxu1  ;;  %3411 = vmatmul.mubr.bf16.gmra.mxu1 %v8543_v60 }
 0x497   :  { %v4374_v37 = vmax.f32 %v4373_v14, %v3864_v54  ;;  %v3954_v26 = vmax.f32 %v3576_v56, 0.0  ;;  %v3865_v51 = vmax.f32 %v3169_v43, 0.0  ;;  %v3579_v49 = vpop.f32.mrf.mxu0  ;;  %3420 = vmatprep.mubr.bf16.mxu1 %v8518_v2  ;;  %v3173_v7 = vadd.f32 %v3172_v48, %v7972_v6 }
 0x498   :  { %v4510_v32 = vmax.f32 %v4508_v4, %v4509_v8  ;;  %v4522_v42 = vrot.slane %v4521_v46, 1  ;;  %v3955_v31 = vmax.f32 %v3578_v34, 0.0  ;;  %v3580_v52 = vadd.f32 %v3579_v49, %v7870_v0  ;;  %v3174_v20 = vpop.f32.mrf.mxu1 }
 0x499   :  { %v4375_v28 = vrot.slane %v4374_v37, 4  ;;  %v4603_v58 = vmax.f32 %v4602_v27, %v3954_v26  ;;  %v4387_v40 = vmax.f32 %v4386_v57, %v3865_v51  ;;  %v3581_v3 = vpop.f32.mrf.mxu0  ;;  %v3175_v47 = vadd.f32 %v3174_v20, %v7977_v24 }
 0x49a   :  { %v8089_v60 = vsel %vm5216_vm1, %v4510_v32, %v8070_v63  ;;  %v4523_v11 = vmax.f32 %v4521_v46, %v4522_v42  ;;  %v4616_v30 = vmax.f32 %v4615_v39, %v3955_v31  ;;  %v3962_v50 = vmax.f32 %v3580_v52, 0.0  ;;  %v3176_v10 = vpop.f32.mrf.mxu1 }
 0x49b   :  { %v4388_v41 = vrot.slane %v4387_v40, 4  ;;  %v3582_v23 = vadd.f32 %v3581_v3, %v7874_v33  ;;  %v3585_v5 = vpop.f32.mrf.mxu0  ;;  %v3177_v29 = vadd.f32 %v3176_v10, %v7972_v6  ;;  %v4376_v38 = vmax.f32 %v4374_v37, %v4375_v28 }
 0x49c   :  { %v8094_v13 = vsel %vm5216_vm1, %v4523_v11, %v4419_v44  ;;  %v4604_v15 = vmax.f32 %v4603_v58, %v3962_v50  ;;  %v3586_v19 = vadd.f32 %v3585_v5, %v7870_v0  ;;  %v3178_v63 = vpop.f32.mrf.mxu1  ;;  %v3872_v45 = vmax.f32 %v3173_v7, 0.0 }
 0x49d   :  { %v3963_v16 = vmax.f32 %v3582_v23, 0.0  ;;  %v3587_v36 = vpop.f32.mrf.mxu0  ;;  %v3880_v22 = vmax.f32 %v3177_v29, 0.0  ;;  %v3179_v53 = vadd.f32 %v3178_v63, %v7977_v24  ;;  %v4389_v1 = vmax.f32 %v4387_v40, %v4388_v41 }
 0x49e   :  { %v3970_v62 = vmax.f32 %v3586_v19, 0.0  ;;  %v3588_v59 = vadd.f32 %v3587_v36, %v7874_v33  ;;  %v3182_v14 = vpop.f32.mrf.mxu1  ;;  %3421 = vmatmul.mubr.bf16.gmra.mxu1 %v8544_v9  ;;  %v3873_v61 = vmax.f32 %v3175_v47, 0.0  ;;  %v4377_v56 = vrot.slane %v4376_v38, 2 }
 0x49f   :  { %v4617_v25 = vmax.f32 %v4616_v30, %v3963_v16  ;;  %v3183_v4 = vadd.f32 %v3182_v14, %v7972_v6  ;;  %v3589_v12 = vpop.f32.mrf.mxu0  ;;  %3430 = vmatprep.mubr.bf16.mxu1 %v8518_v2  ;;  %v4472_v27 = vmax.f32 %v3872_v45, %v3880_v22  ;;  %v3881_v21 = vmax.f32 %v3179_v53, 0.0 }
 0x4a0   :  { %v4605_v17 = vmax.f32 %v4604_v15, %v3970_v62  ;;  %v3971_v57 = vmax.f32 %v3588_v59, 0.0  ;;  %v3184_v54 = vpop.f32.mrf.mxu1  ;;  %v3590_v18 = vadd.f32 %v3589_v12, %v7870_v0  ;;  %v4390_v44 = vrot.slane %v4389_v1, 2 }
 0x4a1   :  { %v3888_v43 = vmax.f32 %v3183_v4, 0.0  ;;  %v3591_v8 = vpop.f32.mrf.mxu0  ;;  %v4485_v46 = vmax.f32 %v3873_v61, %v3881_v21  ;;  %v3185_v39 = vadd.f32 %v3184_v54, %v7977_v24  ;;  %v4378_v20 = vmax.f32 %v4376_v38, %v4377_v56 }
 0x4a2   :  { %v4618_v9 = vmax.f32 %v4617_v25, %v3971_v57  ;;  %v3592_v34 = vadd.f32 %v3591_v8, %v7874_v33  ;;  %v3186_v48 = vpop.f32.mrf.mxu1  ;;  %v3978_v26 = vmax.f32 %v3590_v18, 0.0  ;;  %v4391_v5 = vmax.f32 %v4389_v1, %v4390_v44 }
 0x4a3   :  { %v4473_v37 = vmax.f32 %v4472_v27, %v3888_v43  ;;  %v3595_v51 = vpop.f32.mrf.mxu0  ;;  %v3889_v49 = vmax.f32 %v3185_v39, 0.0  ;;  %v3187_v42 = vadd.f32 %v3186_v48, %v7972_v6  ;;  %v4379_v22 = vrot.slane %v4378_v20, 1 }
 0x4a4   :  { %v3979_v32 = vmax.f32 %v3592_v34, 0.0  ;;  %v3596_v31 = vadd.f32 %v3595_v51, %v7870_v0  ;;  %v3188_v52 = vpop.f32.mrf.mxu1  ;;  %v4606_v28 = vmax.f32 %v4605_v17, %v3978_v26  ;;  %v4392_v4 = vrot.slane %v4391_v5, 1 }
 0x4a5   :  { %v3189_v58 = vadd.f32 %v3188_v52, %v7977_v24  ;;  %v3597_v40 = vpop.f32.mrf.mxu0  ;;  %v4486_v7 = vmax.f32 %v4485_v46, %v3889_v49  ;;  %v3896_v11 = vmax.f32 %v3187_v42, 0.0  ;;  %v8119_v18 = vmax.f32 %v4378_v20, %v4379_v22 }
 0x4a6   :  { %v4619_v3 = vmax.f32 %v4618_v9, %v3979_v32  ;;  %v3986_v30 = vmax.f32 %v3596_v31, 0.0  ;;  %v3192_v50 = vpop.f32.mrf.mxu1  ;;  %3431 = vmatmul.mubr.bf16.gmra.mxu1 %v8545_v35  ;;  %v3598_v41 = vadd.f32 %v3597_v40, %v7874_v33  ;;  %v8124_v26 = vmax.f32 %v4391_v5, %v4392_v4 }
 0x4a7   :  { %v3897_v10 = vmax.f32 %v3189_v58, 0.0  ;;  %v3193_v47 = vadd.f32 %v3192_v50, %v7972_v6  ;;  %v3599_v23 = vpop.f32.mrf.mxu0  ;;  %3440 = vmatprep.mubr.bf16.mxu1 %v8518_v2  ;;  %v4474_v15 = vmax.f32 %v4473_v37, %v3896_v11 }
 0x4a8   :  { %v4607_v29 = vmax.f32 %v4606_v28, %v3986_v30  ;;  %v3600_v19 = vadd.f32 %v3599_v23, %v7870_v0  ;;  %v3194_v63 = vpop.f32.mrf.mxu1  ;;  %v3987_v45 = vmax.f32 %v3598_v41, 0.0 }
 0x4a9   :  { %v4487_v38 = vmax.f32 %v4486_v7, %v3897_v10  ;;  %v3904_v16 = vmax.f32 %v3193_v47, 0.0  ;;  %v3195_v36 = vadd.f32 %v3194_v63, %v7977_v24  ;;  %v3601_v35 = vpop.f32.mrf.mxu0 }
 0x4aa   :  { %v3994_v62 = vmax.f32 %v3600_v19, 0.0  ;;  %v3602_v53 = vadd.f32 %v3601_v35, %v7874_v33  ;;  %v3196_v59 = vpop.f32.mrf.mxu1  ;;  %v4620_v14 = vmax.f32 %v4619_v3, %v3987_v45 }
 0x4ab   :  { %v4475_v61 = vmax.f32 %v4474_v15, %v3904_v16  ;;  %v3905_v2 = vmax.f32 %v3195_v36, 0.0  ;;  %v3197_v1 = vadd.f32 %v3196_v59, %v7972_v6  ;;  %v3605_v25 = vpop.f32.mrf.mxu0 }
 0x4ac   :  { %v4608_v12 = vmax.f32 %v4607_v29, %v3994_v62  ;;  %v3995_v27 = vmax.f32 %v3602_v53, 0.0  ;;  %v3198_v17 = vpop.f32.mrf.mxu1  ;;  %v3606_v54 = vadd.f32 %v3605_v25, %v7870_v0 }
 0x4ad   :  { %v4488_v21 = vmax.f32 %v4487_v38, %v3905_v2  ;;  %v3912_v57 = vmax.f32 %v3197_v1, 0.0  ;;  %v3199_v56 = vadd.f32 %v3198_v17, %v7977_v24  ;;  %v3607_v43 = vpop.f32.mrf.mxu0 }
 0x4ae   :  { %v4609_v8 = vrot.slane %v4608_v12, 4  ;;  %v4621_v46 = vmax.f32 %v4620_v14, %v3995_v27  ;;  %v3202_v9 = vpop.f32.mrf.mxu1  ;;  %3441 = vmatmul.mubr.bf16.gmra.mxu1 %v8546_v55  ;;  %v3608_v48 = vadd.f32 %v3607_v43, %v7874_v33  ;;  %v4002_v31 = vmax.f32 %v3606_v54, 0.0 }
 0x4af   :  { %v4476_v39 = vmax.f32 %v4475_v61, %v3912_v57  ;;  %v3913_v34 = vmax.f32 %v3199_v56, 0.0  ;;  %v3203_v44 = vadd.f32 %v3202_v9, %v7972_v6  ;;  %v3609_v37 = vpop.f32.mrf.mxu0 }
 0x4b0   :  { %v4610_v51 = vmax.f32 %v4608_v12, %v4609_v8  ;;  %v4622_v49 = vrot.slane %v4621_v46, 4  ;;  %v3610_v32 = vadd.f32 %v3609_v37, %v7870_v0  ;;  %v3204_v42 = vpop.f32.mrf.mxu1  ;;  %v4003_v30 = vmax.f32 %v3608_v48, 0.0 }
 0x4b1   :  { %v4489_v52 = vmax.f32 %v4488_v21, %v3913_v34  ;;  %v3920_v20 = vmax.f32 %v3203_v44, 0.0  ;;  %v3205_v28 = vadd.f32 %v3204_v42, %v7977_v24  ;;  %v3611_v55 = vpop.f32.mrf.mxu0 }
 0x4b2   :  { %v4611_v58 = vrot.slane %v4610_v51, 2  ;;  %v4623_v40 = vmax.f32 %v4621_v46, %v4622_v49  ;;  %v4010_v7 = vmax.f32 %v3610_v32, 0.0  ;;  %v3612_v3 = vadd.f32 %v3611_v55, %v7874_v33  ;;  %v3206_v11 = vpop.f32.mrf.mxu1 }
 0x4b3   :  { %v4477_v50 = vmax.f32 %v4476_v39, %v3920_v20  ;;  %v3921_v10 = vmax.f32 %v3205_v28, 0.0  ;;  %v3207_v41 = vadd.f32 %v3206_v11, %v7972_v6  ;;  %v3615_v47 = vpop.f32.mrf.mxu0 }
 0x4b4   :  { %v4612_v23 = vmax.f32 %v4610_v51, %v4611_v58  ;;  %v4624_v5 = vrot.slane %v4623_v40, 2  ;;  %v4706_v15 = vmax.f32 %v4002_v31, %v4010_v7  ;;  %v4011_v29 = vmax.f32 %v3612_v3, 0.0  ;;  %v3208_v19 = vpop.f32.mrf.mxu1 }
 0x4b5   :  { %v4490_v63 = vmax.f32 %v4489_v52, %v3921_v10  ;;  %v3928_v38 = vmax.f32 %v3207_v41, 0.0  ;;  %v3616_v45 = vadd.f32 %v3615_v47, %v7870_v0  ;;  %v3209_v16 = vadd.f32 %v3208_v19, %v7977_v24  ;;  %v3617_v36 = vpop.f32.mrf.mxu0 }
 0x4b6   :  { %v4613_v35 = vrot.slane %v4612_v23, 1  ;;  %v4625_v22 = vmax.f32 %v4623_v40, %v4624_v5  ;;  %v4719_v62 = vmax.f32 %v4003_v30, %v4011_v29  ;;  %v3618_v53 = vadd.f32 %v3617_v36, %v7874_v33  ;;  %v3212_v59 = vpop.f32.mrf.mxu1 }
 0x4b7   :  { %v4478_v14 = vmax.f32 %v4477_v50, %v3928_v38  ;;  %v4018_v61 = vmax.f32 %v3616_v45, 0.0  ;;  %v3929_v2 = vmax.f32 %v3209_v16, 0.0  ;;  %v3213_v1 = vadd.f32 %v3212_v59, %v7972_v6  ;;  %v3619_v25 = vpop.f32.mrf.mxu0 }
 0x4b8   :  { %v4614_v4 = vmax.f32 %v4612_v23, %v4613_v35  ;;  %v4626_v12 = vrot.slane %v4625_v22, 1  ;;  %v4019_v27 = vmax.f32 %v3618_v53, 0.0  ;;  %v3620_v17 = vadd.f32 %v3619_v25, %v7870_v0  ;;  %v3214_v21 = vpop.f32.mrf.mxu1 }
 0x4b9   :  { %v4479_v57 = vrot.slane %v4478_v14, 4  ;;  %v4707_v54 = vmax.f32 %v4706_v15, %v4018_v61  ;;  %v4491_v56 = vmax.f32 %v4490_v63, %v3929_v2  ;;  %v3936_v43 = vmax.f32 %v3213_v1, 0.0  ;;  %v3621_v8 = vpop.f32.mrf.mxu0 }
 0x4ba   :  { %v8137_v46 = vsel %vm5218_vm2, %v4614_v4, %v8089_v60  ;;  %v4627_v9 = vmax.f32 %v4625_v22, %v4626_v12  ;;  %v4720_v39 = vmax.f32 %v4719_v62, %v4019_v27  ;;  %v4026_v34 = vmax.f32 %v3620_v17, 0.0  ;;  %v3216_v48 = vpop.f32.mrf.mxu1 }
 0x4bb   :  { %v4480_v44 = vmax.f32 %v4478_v14, %v4479_v57  ;;  %v4492_v37 = vrot.slane %v4491_v56, 4  ;;  %v3215_v51 = vadd.f32 %v3214_v21, %v7977_v24  ;;  %v3622_v49 = vadd.f32 %v3621_v8, %v7874_v33  ;;  %v3625_v32 = vpop.f32.mrf.mxu0 }
 0x4bc   :  { %v8143_v42 = vsel %vm5218_vm2, %v4627_v9, %v8094_v13  ;;  %v4708_v31 = vmax.f32 %v4707_v54, %v4026_v34  ;;  %v3217_v52 = vadd.f32 %v3216_v48, %v7972_v6  ;;  %v3626_v60 = vadd.f32 %v3625_v32, %v7870_v0  ;;  %v3218_v20 = vpop.f32.mrf.mxu1 }
 0x4bd   :  { %v4481_v28 = vrot.slane %v4480_v44, 2  ;;  %v4493_v55 = vmax.f32 %v4491_v56, %v4492_v37  ;;  %v3937_v58 = vmax.f32 %v3215_v51, 0.0  ;;  %v4027_v40 = vmax.f32 %v3622_v49, 0.0  ;;  %v3627_v7 = vpop.f32.mrf.mxu0 }
 0x4be   :  { %v3944_v3 = vmax.f32 %v3217_v52, 0.0  ;;  %v4034_v11 = vmax.f32 %v3626_v60, 0.0  ;;  %v3219_v30 = vadd.f32 %v3218_v20, %v7977_v24  ;;  %v3628_v50 = vadd.f32 %v3627_v7, %v7874_v33  ;;  %v3222_v10 = vpop.f32.mrf.mxu1 }
 0x4bf   :  { %v4482_v13 = vmax.f32 %v4480_v44, %v4481_v28  ;;  %v4494_v41 = vrot.slane %v4493_v55, 2  ;;  %v4721_v47 = vmax.f32 %v4720_v39, %v4027_v40  ;;  %v3223_v23 = vadd.f32 %v3222_v10, %v7972_v6  ;;  %v3629_v5 = vpop.f32.mrf.mxu0 }
 0x4c0   :  { %v4576_v15 = vmax.f32 %v3936_v43, %v3944_v3  ;;  %v4709_v29 = vmax.f32 %v4708_v31, %v4034_v11  ;;  %v3945_v19 = vmax.f32 %v3219_v30, 0.0  ;;  %v4035_v63 = vmax.f32 %v3628_v50, 0.0  ;;  %v3224_v38 = vpop.f32.mrf.mxu1 }
 0x4c1   :  { %v4483_v45 = vrot.slane %v4482_v13, 1  ;;  %v4495_v16 = vmax.f32 %v4493_v55, %v4494_v41  ;;  %v3952_v36 = vmax.f32 %v3223_v23, 0.0  ;;  %v3630_v35 = vadd.f32 %v3629_v5, %v7870_v0  ;;  %v3631_v22 = vpop.f32.mrf.mxu0 }
 0x4c2   :  { %v4589_v62 = vmax.f32 %v3937_v58, %v3945_v19  ;;  %v4722_v53 = vmax.f32 %v4721_v47, %v4035_v63  ;;  %v3225_v59 = vadd.f32 %v3224_v38, %v7977_v24  ;;  %v3632_v14 = vadd.f32 %v3631_v22, %v7874_v33  ;;  %v3226_v61 = vpop.f32.mrf.mxu1 }
 0x4c3   :  { %v4484_v2 = vmax.f32 %v4482_v13, %v4483_v45  ;;  %v4496_v1 = vrot.slane %v4495_v16, 1  ;;  %v4577_v25 = vmax.f32 %v4576_v15, %v3952_v36  ;;  %v4042_v4 = vmax.f32 %v3630_v35, 0.0  ;;  %v3635_v12 = vpop.f32.mrf.mxu0 }
 0x4c4   :  { %v3953_v27 = vmax.f32 %v3225_v59, 0.0  ;;  %v4043_v17 = vmax.f32 %v3632_v14, 0.0  ;;  %v3227_v21 = vadd.f32 %v3226_v61, %v7972_v6  ;;  %v3636_v57 = vadd.f32 %v3635_v12, %v7870_v0  ;;  %v3228_v54 = vpop.f32.mrf.mxu1 }
 0x4c5   :  { %v8157_v56 = vsel %vm5216_vm1, %v4484_v2, %v8119_v18  ;;  %v4497_v43 = vmax.f32 %v4495_v16, %v4496_v1  ;;  %v4710_v8 = vmax.f32 %v4709_v29, %v4042_v4  ;;  %v3229_v9 = vadd.f32 %v3228_v54, %v7977_v24  ;;  %v3637_v39 = vpop.f32.mrf.mxu0 }
 0x4c6   :  { %v4590_v34 = vmax.f32 %v4589_v62, %v3953_v27  ;;  %v4723_v48 = vmax.f32 %v4722_v53, %v4043_v17  ;;  %v3960_v44 = vmax.f32 %v3227_v21, 0.0  ;;  %v4050_v37 = vmax.f32 %v3636_v57, 0.0  ;;  %v3232_v51 = vpop.f32.mrf.mxu1 }
 0x4c7   :  { %v8162_v49 = vsel %vm5216_vm1, %v4497_v43, %v8124_v26  ;;  %v3961_v32 = vmax.f32 %v3229_v9, 0.0  ;;  %v3638_v31 = vadd.f32 %v3637_v39, %v7874_v33  ;;  %v3233_v18 = vadd.f32 %v3232_v51, %v7972_v6  ;;  %v3639_v52 = vpop.f32.mrf.mxu0 }
 0x4c8   :  { %v4578_v60 = vmax.f32 %v4577_v25, %v3960_v44  ;;  %v4711_v20 = vmax.f32 %v4710_v8, %v4050_v37  ;;  %v3640_v28 = vadd.f32 %v3639_v52, %v7870_v0  ;;  %v3234_v55 = vpop.f32.mrf.mxu1 }
 0x4c9   :  { %v4591_v58 = vmax.f32 %v4590_v34, %v3961_v32  ;;  %v4051_v40 = vmax.f32 %v3638_v31, 0.0  ;;  %v3968_v7 = vmax.f32 %v3233_v18, 0.0  ;;  %v3235_v3 = vadd.f32 %v3234_v55, %v7977_v24  ;;  %v3641_v11 = vpop.f32.mrf.mxu0 }
 0x4ca   :  { %v4058_v30 = vmax.f32 %v3640_v28, 0.0  ;;  %v3642_v26 = vadd.f32 %v3641_v11, %v7874_v33  ;;  %v3236_v50 = vpop.f32.mrf.mxu1 }
 0x4cb   :  { %v4724_v10 = vmax.f32 %v4723_v48, %v4051_v40  ;;  %v4579_v13 = vmax.f32 %v4578_v60, %v3968_v7  ;;  %v3969_v41 = vmax.f32 %v3235_v3, 0.0  ;;  %v3237_v47 = vadd.f32 %v3236_v50, %v7972_v6  ;;  %v3645_v23 = vpop.f32.mrf.mxu0 }
 0x4cc   :  { %v4712_v5 = vmax.f32 %v4711_v20, %v4058_v30  ;;  %v4059_v15 = vmax.f32 %v3642_v26, 0.0  ;;  %v3238_v29 = vpop.f32.mrf.mxu1  ;;  %v3646_v38 = vadd.f32 %v3645_v23, %v7870_v0 }
 0x4cd   :  { %v4592_v19 = vmax.f32 %v4591_v58, %v3969_v41  ;;  %v3976_v63 = vmax.f32 %v3237_v47, 0.0  ;;  %v3239_v45 = vadd.f32 %v3238_v29, %v7977_v24  ;;  %v3647_v16 = vpop.f32.mrf.mxu0 }
 0x4ce   :  { %v4713_v36 = vrot.slane %v4712_v5, 4  ;;  %v4725_v35 = vmax.f32 %v4724_v10, %v4059_v15  ;;  %v3242_v22 = vpop.f32.mrf.mxu1  ;;  %v3648_v59 = vadd.f32 %v3647_v16, %v7874_v33  ;;  %v4066_v12 = vmax.f32 %v3646_v38, 0.0 }
 0x4cf   :  { %v4580_v62 = vmax.f32 %v4579_v13, %v3976_v63  ;;  %v3977_v53 = vmax.f32 %v3239_v45, 0.0  ;;  %v3243_v14 = vadd.f32 %v3242_v22, %v7972_v6  ;;  %v3649_v61 = vpop.f32.mrf.mxu0 }
 0x4d0   :  { %v4714_v2 = vmax.f32 %v4712_v5, %v4713_v36  ;;  %v4726_v1 = vrot.slane %v4725_v35, 4  ;;  %v3650_v25 = vadd.f32 %v3649_v61, %v7870_v0  ;;  %v3244_v4 = vpop.f32.mrf.mxu1  ;;  %v4067_v34 = vmax.f32 %v3648_v59, 0.0 }
 0x4d1   :  { %v4593_v27 = vmax.f32 %v4592_v19, %v3977_v53  ;;  %v3984_v17 = vmax.f32 %v3243_v14, 0.0  ;;  %v3245_v21 = vadd.f32 %v3244_v4, %v7977_v24  ;;  %v3651_v57 = vpop.f32.mrf.mxu0 }
 0x4d2   :  { %v4715_v54 = vrot.slane %v4714_v2, 2  ;;  %v4727_v43 = vmax.f32 %v4725_v35, %v4726_v1  ;;  %v4074_v8 = vmax.f32 %v3650_v25, 0.0  ;;  %v3652_v9 = vadd.f32 %v3651_v57, %v7874_v33  ;;  %v3246_v39 = vpop.f32.mrf.mxu1 }
 0x4d3   :  { %v4581_v48 = vmax.f32 %v4580_v62, %v3984_v17  ;;  %v3985_v44 = vmax.f32 %v3245_v21, 0.0  ;;  %v3247_v37 = vadd.f32 %v3246_v39, %v7972_v6  ;;  %v3655_v51 = vpop.f32.mrf.mxu0 }
 0x4d4   :  { %v4716_v32 = vmax.f32 %v4714_v2, %v4715_v54  ;;  %v4728_v31 = vrot.slane %v4727_v43, 2  ;;  %v4810_v18 = vmax.f32 %v4066_v12, %v4074_v8  ;;  %v4075_v52 = vmax.f32 %v3652_v9, 0.0  ;;  %v3248_v60 = vpop.f32.mrf.mxu1 }
 0x4d5   :  { %v4594_v20 = vmax.f32 %v4593_v27, %v3985_v44  ;;  %v3992_v28 = vmax.f32 %v3247_v37, 0.0  ;;  %v3656_v55 = vadd.f32 %v3655_v51, %v7870_v0  ;;  %v3249_v58 = vadd.f32 %v3248_v60, %v7977_v24  ;;  %v3657_v40 = vpop.f32.mrf.mxu0 }
 0x4d6   :  { %v4717_v7 = vrot.slane %v4716_v32, 1  ;;  %v4729_v3 = vmax.f32 %v4727_v43, %v4728_v31  ;;  %v4823_v11 = vmax.f32 %v4067_v34, %v4075_v52  ;;  %v3658_v30 = vadd.f32 %v3657_v40, %v7874_v33  ;;  %v3252_v26 = vpop.f32.mrf.mxu1 }
 0x4d7   :  { %v4582_v50 = vmax.f32 %v4581_v48, %v3992_v28  ;;  %v4082_v10 = vmax.f32 %v3656_v55, 0.0  ;;  %v3993_v13 = vmax.f32 %v3249_v58, 0.0  ;;  %v3253_v41 = vadd.f32 %v3252_v26, %v7972_v6  ;;  %v3659_v47 = vpop.f32.mrf.mxu0 }
 0x4d8   :  { %v4718_v23 = vmax.f32 %v4716_v32, %v4717_v7  ;;  %v4730_v5 = vrot.slane %v4729_v3, 1  ;;  %v4083_v15 = vmax.f32 %v3658_v30, 0.0  ;;  %v3660_v29 = vadd.f32 %v3659_v47, %v7870_v0  ;;  %v3254_v19 = vpop.f32.mrf.mxu1 }
 0x4d9   :  { %v4583_v63 = vrot.slane %v4582_v50, 4  ;;  %v4811_v38 = vmax.f32 %v4810_v18, %v4082_v10  ;;  %v4595_v45 = vmax.f32 %v4594_v20, %v3993_v13  ;;  %v4000_v16 = vmax.f32 %v3253_v41, 0.0  ;;  %v3661_v36 = vpop.f32.mrf.mxu0 }
 0x4da   :  { %v8185_v35 = vsel %vm5220_vm3, %v4718_v23, %v8137_v46  ;;  %v4731_v22 = vmax.f32 %v4729_v3, %v4730_v5  ;;  %v4824_v62 = vmax.f32 %v4823_v11, %v4083_v15  ;;  %v4090_v53 = vmax.f32 %v3660_v29, 0.0  ;;  %v3256_v59 = vpop.f32.mrf.mxu1 }
 0x4db   :  { %v4584_v14 = vmax.f32 %v4582_v50, %v4583_v63  ;;  %v4596_v61 = vrot.slane %v4595_v45, 4  ;;  %v3255_v2 = vadd.f32 %v3254_v19, %v7977_v24  ;;  %v3662_v1 = vadd.f32 %v3661_v36, %v7874_v33  ;;  %v3665_v25 = vpop.f32.mrf.mxu0 }
 0x4dc   :  { %v8191_v4 = vsel %vm5220_vm3, %v4731_v22, %v8143_v42  ;;  %v4812_v12 = vmax.f32 %v4811_v38, %v4090_v53  ;;  %v3257_v27 = vadd.f32 %v3256_v59, %v7972_v6  ;;  %v3666_v46 = vadd.f32 %v3665_v25, %v7870_v0  ;;  %v3258_v17 = vpop.f32.mrf.mxu1 }
 0x4dd   :  { %v4585_v21 = vrot.slane %v4584_v14, 2  ;;  %v4597_v57 = vmax.f32 %v4595_v45, %v4596_v61  ;;  %v4001_v54 = vmax.f32 %v3255_v2, 0.0  ;;  %v4091_v43 = vmax.f32 %v3662_v1, 0.0  ;;  %v3667_v8 = vpop.f32.mrf.mxu0 }
 0x4de   :  { %v4008_v9 = vmax.f32 %v3257_v27, 0.0  ;;  %v4098_v39 = vmax.f32 %v3666_v46, 0.0  ;;  %v3259_v34 = vadd.f32 %v3258_v17, %v7977_v24  ;;  %v3668_v48 = vadd.f32 %v3667_v8, %v7874_v33  ;;  %v3262_v44 = vpop.f32.mrf.mxu1 }
 0x4df   :  { %v4586_v42 = vmax.f32 %v4584_v14, %v4585_v21  ;;  %v4598_v37 = vrot.slane %v4597_v57, 2  ;;  %v4825_v51 = vmax.f32 %v4824_v62, %v4091_v43  ;;  %v3263_v32 = vadd.f32 %v3262_v44, %v7972_v6  ;;  %v3669_v31 = vpop.f32.mrf.mxu0 }
 0x4e0   :  { %v4680_v18 = vmax.f32 %v4000_v16, %v4008_v9  ;;  %v4813_v52 = vmax.f32 %v4812_v12, %v4098_v39  ;;  %v4009_v60 = vmax.f32 %v3259_v34, 0.0  ;;  %v4099_v20 = vmax.f32 %v3668_v48, 0.0  ;;  %v3264_v28 = vpop.f32.mrf.mxu1 }
 0x4e1   :  { %v4587_v55 = vrot.slane %v4586_v42, 1  ;;  %v4599_v58 = vmax.f32 %v4597_v57, %v4598_v37  ;;  %v4016_v40 = vmax.f32 %v3263_v32, 0.0  ;;  %v3670_v7 = vadd.f32 %v3669_v31, %v7870_v0  ;;  %v3671_v3 = vpop.f32.mrf.mxu0 }
 0x4e2   :  { %v4693_v11 = vmax.f32 %v4001_v54, %v4009_v60  ;;  %v4826_v30 = vmax.f32 %v4825_v51, %v4099_v20  ;;  %v3265_v26 = vadd.f32 %v3264_v28, %v7977_v24  ;;  %v3672_v50 = vadd.f32 %v3671_v3, %v7874_v33  ;;  %v3266_v10 = vpop.f32.mrf.mxu1 }
 0x4e3   :  { %v4588_v13 = vmax.f32 %v4586_v42, %v4587_v55  ;;  %v4600_v41 = vrot.slane %v4599_v58, 1  ;;  %v4681_v47 = vmax.f32 %v4680_v18, %v4016_v40  ;;  %v4106_v23 = vmax.f32 %v3670_v7, 0.0  ;;  %v3675_v5 = vpop.f32.mrf.mxu0 }
 0x4e4   :  { %v4017_v15 = vmax.f32 %v3265_v26, 0.0  ;;  %v4107_v29 = vmax.f32 %v3672_v50, 0.0  ;;  %v3267_v19 = vadd.f32 %v3266_v10, %v7972_v6  ;;  %v3676_v63 = vadd.f32 %v3675_v5, %v7870_v0  ;;  %v3268_v38 = vpop.f32.mrf.mxu1 }
 0x4e5   :  { %v8205_v45 = vsel %vm5218_vm2, %v4588_v13, %v8157_v56  ;;  %v4601_v16 = vmax.f32 %v4599_v58, %v4600_v41  ;;  %v4814_v36 = vmax.f32 %v4813_v52, %v4106_v23  ;;  %v3269_v22 = vadd.f32 %v3268_v38, %v7977_v24  ;;  %v3677_v62 = vpop.f32.mrf.mxu0 }
 0x4e6   :  { %v4694_v53 = vmax.f32 %v4693_v11, %v4017_v15  ;;  %v4827_v59 = vmax.f32 %v4826_v30, %v4107_v29  ;;  %v4024_v14 = vmax.f32 %v3267_v19, 0.0  ;;  %v4114_v61 = vmax.f32 %v3676_v63, 0.0  ;;  %v3272_v2 = vpop.f32.mrf.mxu1 }
 0x4e7   :  { %v8210_v1 = vsel %vm5218_vm2, %v4601_v16, %v8162_v49  ;;  %v4025_v25 = vmax.f32 %v3269_v22, 0.0  ;;  %v3678_v12 = vadd.f32 %v3677_v62, %v7874_v33  ;;  %v3273_v56 = vadd.f32 %v3272_v2, %v7972_v6  ;;  %v3679_v27 = vpop.f32.mrf.mxu0 }
 0x4e8   :  { %v4682_v46 = vmax.f32 %v4681_v47, %v4024_v14  ;;  %v4815_v17 = vmax.f32 %v4814_v36, %v4114_v61  ;;  %v3680_v21 = vadd.f32 %v3679_v27, %v7870_v0  ;;  %v3274_v57 = vpop.f32.mrf.mxu1 }
 0x4e9   :  { %v4695_v54 = vmax.f32 %v4694_v53, %v4025_v25  ;;  %v4115_v43 = vmax.f32 %v3678_v12, 0.0  ;;  %v4032_v8 = vmax.f32 %v3273_v56, 0.0  ;;  %v3275_v9 = vadd.f32 %v3274_v57, %v7977_v24  ;;  %v3681_v39 = vpop.f32.mrf.mxu0 }
 0x4ea   :  { %v4122_v34 = vmax.f32 %v3680_v21, 0.0  ;;  %v3682_v49 = vadd.f32 %v3681_v39, %v7874_v33  ;;  %v3276_v48 = vpop.f32.mrf.mxu1 }
 0x4eb   :  { %v4828_v44 = vmax.f32 %v4827_v59, %v4115_v43  ;;  %v4683_v42 = vmax.f32 %v4682_v46, %v4032_v8  ;;  %v4033_v37 = vmax.f32 %v3275_v9, 0.0  ;;  %v3277_v51 = vadd.f32 %v3276_v48, %v7972_v6  ;;  %v3685_v32 = vpop.f32.mrf.mxu0 }
 0x4ec   :  { %v4816_v31 = vmax.f32 %v4815_v17, %v4122_v34  ;;  %v4123_v18 = vmax.f32 %v3682_v49, 0.0  ;;  %v3278_v52 = vpop.f32.mrf.mxu1  ;;  %v3686_v28 = vadd.f32 %v3685_v32, %v7870_v0 }
 0x4ed   :  { %v4696_v60 = vmax.f32 %v4695_v54, %v4033_v37  ;;  %v4040_v20 = vmax.f32 %v3277_v51, 0.0  ;;  %v3279_v55 = vadd.f32 %v3278_v52, %v7977_v24  ;;  %v3687_v58 = vpop.f32.mrf.mxu0 }
 0x4ee   :  { %v4817_v40 = vrot.slane %v4816_v31, 4  ;;  %v4829_v7 = vmax.f32 %v4828_v44, %v4123_v18  ;;  %v3282_v3 = vpop.f32.mrf.mxu1  ;;  %v3688_v26 = vadd.f32 %v3687_v58, %v7874_v33  ;;  %v4130_v5 = vmax.f32 %v3686_v28, 0.0 }
 0x4ef   :  { %v4684_v11 = vmax.f32 %v4683_v42, %v4040_v20  ;;  %v4041_v30 = vmax.f32 %v3279_v55, 0.0  ;;  %v3283_v50 = vadd.f32 %v3282_v3, %v7972_v6  ;;  %v3689_v10 = vpop.f32.mrf.mxu0 }
 0x4f0   :  { %v4818_v13 = vmax.f32 %v4816_v31, %v4817_v40  ;;  %v4830_v41 = vrot.slane %v4829_v7, 4  ;;  %v3690_v47 = vadd.f32 %v3689_v10, %v7870_v0  ;;  %v3284_v23 = vpop.f32.mrf.mxu1  ;;  %v4131_v53 = vmax.f32 %v3688_v26, 0.0 }
 0x4f1   :  { %v4697_v15 = vmax.f32 %v4696_v60, %v4041_v30  ;;  %v4048_v29 = vmax.f32 %v3283_v50, 0.0  ;;  %v3285_v19 = vadd.f32 %v3284_v23, %v7977_v24  ;;  %v3691_v63 = vpop.f32.mrf.mxu0 }
 0x4f2   :  { %v4819_v38 = vrot.slane %v4818_v13, 2  ;;  %v4831_v16 = vmax.f32 %v4829_v7, %v4830_v41  ;;  %v4138_v36 = vmax.f32 %v3690_v47, 0.0  ;;  %v3692_v22 = vadd.f32 %v3691_v63, %v7874_v33  ;;  %v3286_v62 = vpop.f32.mrf.mxu1 }
 0x4f3   :  { %v4685_v59 = vmax.f32 %v4684_v11, %v4048_v29  ;;  %v4049_v14 = vmax.f32 %v3285_v19, 0.0  ;;  %v3287_v61 = vadd.f32 %v3286_v62, %v7972_v6  ;;  %v3695_v2 = vpop.f32.mrf.mxu0 }
 0x4f4   :  { %v4820_v25 = vmax.f32 %v4818_v13, %v4819_v38  ;;  %v4832_v12 = vrot.slane %v4831_v16, 2  ;;  %v4914_v56 = vmax.f32 %v4130_v5, %v4138_v36  ;;  %v4139_v27 = vmax.f32 %v3692_v22, 0.0  ;;  %v3288_v46 = vpop.f32.mrf.mxu1 }
 0x4f5   :  { %v4698_v17 = vmax.f32 %v4697_v15, %v4049_v14  ;;  %v4056_v21 = vmax.f32 %v3287_v61, 0.0  ;;  %v3696_v57 = vadd.f32 %v3695_v2, %v7870_v0  ;;  %v3289_v54 = vadd.f32 %v3288_v46, %v7977_v24  ;;  %v3697_v43 = vpop.f32.mrf.mxu0 }
 0x4f6   :  { %v4821_v8 = vrot.slane %v4820_v25, 1  ;;  %v4833_v9 = vmax.f32 %v4831_v16, %v4832_v12  ;;  %v4927_v39 = vmax.f32 %v4131_v53, %v4139_v27  ;;  %v3698_v34 = vadd.f32 %v3697_v43, %v7874_v33  ;;  %v3292_v49 = vpop.f32.mrf.mxu1 }
 0x4f7   :  { %v4686_v48 = vmax.f32 %v4685_v59, %v4056_v21  ;;  %v4146_v44 = vmax.f32 %v3696_v57, 0.0  ;;  %v4057_v42 = vmax.f32 %v3289_v54, 0.0  ;;  %v3293_v37 = vadd.f32 %v3292_v49, %v7972_v6  ;;  %v3699_v51 = vpop.f32.mrf.mxu0 }
 0x4f8   :  { %v4822_v32 = vmax.f32 %v4820_v25, %v4821_v8  ;;  %v4834_v31 = vrot.slane %v4833_v9, 1  ;;  %v4147_v18 = vmax.f32 %v3698_v34, 0.0  ;;  %v3700_v52 = vadd.f32 %v3699_v51, %v7870_v0  ;;  %v3294_v60 = vpop.f32.mrf.mxu1 }
 0x4f9   :  { %v4687_v20 = vrot.slane %v4686_v48, 4  ;;  %v4915_v28 = vmax.f32 %v4914_v56, %v4146_v44  ;;  %v4699_v55 = vmax.f32 %v4698_v17, %v4057_v42  ;;  %v4064_v58 = vmax.f32 %v3293_v37, 0.0  ;;  %v3701_v40 = vpop.f32.mrf.mxu0 }
 0x4fa   :  { %v8233_v7 = vsel %vm5222_vm4, %v4822_v32, %v8185_v35  ;;  %v4835_v3 = vmax.f32 %v4833_v9, %v4834_v31  ;;  %v4928_v11 = vmax.f32 %v4927_v39, %v4147_v18  ;;  %v4154_v30 = vmax.f32 %v3700_v52, 0.0  ;;  %v3296_v26 = vpop.f32.mrf.mxu1 }
 0x4fb   :  { %v4688_v50 = vmax.f32 %v4686_v48, %v4687_v20  ;;  %v4700_v10 = vrot.slane %v4699_v55, 4  ;;  %v3295_v13 = vadd.f32 %v3294_v60, %v7977_v24  ;;  %v3702_v41 = vadd.f32 %v3701_v40, %v7874_v33  ;;  %v3705_v47 = vpop.f32.mrf.mxu0 }
 0x4fc   :  { %v8239_v23 = vsel %vm5222_vm4, %v4835_v3, %v8191_v4  ;;  %v4916_v5 = vmax.f32 %v4915_v28, %v4154_v30  ;;  %v3297_v15 = vadd.f32 %v3296_v26, %v7972_v6  ;;  %v3706_v35 = vadd.f32 %v3705_v47, %v7870_v0  ;;  %v3298_v29 = vpop.f32.mrf.mxu1 }
 0x4fd   :  { %v4689_v19 = vrot.slane %v4688_v50, 2  ;;  %v4701_v63 = vmax.f32 %v4699_v55, %v4700_v10  ;;  %v4065_v38 = vmax.f32 %v3295_v13, 0.0  ;;  %v4155_v16 = vmax.f32 %v3702_v41, 0.0  ;;  %v3707_v36 = vpop.f32.mrf.mxu0 }
 0x4fe   :  { %v4072_v22 = vmax.f32 %v3297_v15, 0.0  ;;  %v4162_v62 = vmax.f32 %v3706_v35, 0.0  ;;  %v3299_v53 = vadd.f32 %v3298_v29, %v7977_v24  ;;  %v3708_v59 = vadd.f32 %v3707_v36, %v7874_v33  ;;  %v3302_v14 = vpop.f32.mrf.mxu1 }
 0x4ff   :  { %v4690_v4 = vmax.f32 %v4688_v50, %v4689_v19  ;;  %v4702_v61 = vrot.slane %v4701_v63, 2  ;;  %v4929_v2 = vmax.f32 %v4928_v11, %v4155_v16  ;;  %v3303_v25 = vadd.f32 %v3302_v14, %v7972_v6  ;;  %v3709_v12 = vpop.f32.mrf.mxu0 }
 0x500   :  { %v4784_v56 = vmax.f32 %v4064_v58, %v4072_v22  ;;  %v4917_v27 = vmax.f32 %v4916_v5, %v4162_v62  ;;  %v4073_v46 = vmax.f32 %v3299_v53, 0.0  ;;  %v4163_v17 = vmax.f32 %v3708_v59, 0.0  ;;  %v3304_v21 = vpop.f32.mrf.mxu1 }
 0x501   :  { %v4691_v57 = vrot.slane %v4690_v4, 1  ;;  %v4703_v54 = vmax.f32 %v4701_v63, %v4702_v61  ;;  %v4080_v43 = vmax.f32 %v3303_v25, 0.0  ;;  %v3710_v8 = vadd.f32 %v3709_v12, %v7870_v0  ;;  %v3711_v9 = vpop.f32.mrf.mxu0 }
 0x502   :  { %v4797_v39 = vmax.f32 %v4065_v38, %v4073_v46  ;;  %v4930_v34 = vmax.f32 %v4929_v2, %v4163_v17  ;;  %v3305_v49 = vadd.f32 %v3304_v21, %v7977_v24  ;;  %v3712_v48 = vadd.f32 %v3711_v9, %v7874_v33  ;;  %v3306_v44 = vpop.f32.mrf.mxu1 }
 0x503   :  { %v4692_v42 = vmax.f32 %v4690_v4, %v4691_v57  ;;  %v4704_v37 = vrot.slane %v4703_v54, 1  ;;  %v4785_v51 = vmax.f32 %v4784_v56, %v4080_v43  ;;  %v4170_v32 = vmax.f32 %v3710_v8, 0.0  ;;  %v3715_v31 = vpop.f32.mrf.mxu0 }
 0x504   :  { %v4081_v18 = vmax.f32 %v3305_v49, 0.0  ;;  %v4171_v52 = vmax.f32 %v3712_v48, 0.0  ;;  %v3307_v60 = vadd.f32 %v3306_v44, %v7972_v6  ;;  %v3716_v20 = vadd.f32 %v3715_v31, %v7870_v0  ;;  %v3308_v28 = vpop.f32.mrf.mxu1 }
 0x505   :  { %v8253_v55 = vsel %vm5220_vm3, %v4692_v42, %v8205_v45  ;;  %v4705_v58 = vmax.f32 %v4703_v54, %v4704_v37  ;;  %v4918_v40 = vmax.f32 %v4917_v27, %v4170_v32  ;;  %v3309_v3 = vadd.f32 %v3308_v28, %v7977_v24  ;;  %v3717_v11 = vpop.f32.mrf.mxu0 }
 0x506   :  { %v4798_v30 = vmax.f32 %v4797_v39, %v4081_v18  ;;  %v4931_v26 = vmax.f32 %v4930_v34, %v4171_v52  ;;  %v4088_v50 = vmax.f32 %v3307_v60, 0.0  ;;  %v4178_v10 = vmax.f32 %v3716_v20, 0.0  ;;  %v3312_v13 = vpop.f32.mrf.mxu1 }
 0x507   :  { %v8258_v41 = vsel %vm5220_vm3, %v4705_v58, %v8210_v1  ;;  %v4089_v47 = vmax.f32 %v3309_v3, 0.0  ;;  %v3718_v5 = vadd.f32 %v3717_v11, %v7874_v33  ;;  %v3313_v45 = vadd.f32 %v3312_v13, %v7972_v6  ;;  %v3719_v15 = vpop.f32.mrf.mxu0 }
 0x508   :  { %v4786_v35 = vmax.f32 %v4785_v51, %v4088_v50  ;;  %v4919_v29 = vmax.f32 %v4918_v40, %v4178_v10  ;;  %v3720_v19 = vadd.f32 %v3719_v15, %v7870_v0  ;;  %v3314_v63 = vpop.f32.mrf.mxu1 }
 0x509   :  { %v4799_v38 = vmax.f32 %v4798_v30, %v4089_v47  ;;  %v4179_v16 = vmax.f32 %v3718_v5, 0.0  ;;  %v4096_v36 = vmax.f32 %v3313_v45, 0.0  ;;  %v3315_v22 = vadd.f32 %v3314_v63, %v7977_v24  ;;  %v3721_v62 = vpop.f32.mrf.mxu0 }
 0x50a   :  { %v4186_v53 = vmax.f32 %v3720_v19, 0.0  ;;  %v3722_v1 = vadd.f32 %v3721_v62, %v7874_v33  ;;  %v3316_v59 = vpop.f32.mrf.mxu1 }
 0x50b   :  { %v4932_v14 = vmax.f32 %v4931_v26, %v4179_v16  ;;  %v4787_v4 = vmax.f32 %v4786_v35, %v4096_v36  ;;  %v4097_v61 = vmax.f32 %v3315_v22, 0.0  ;;  %v3317_v2 = vadd.f32 %v3316_v59, %v7972_v6  ;;  %v8266_v25 = vpop.f32.mrf.mxu0 }
 0x50c   :  { %v4920_v12 = vmax.f32 %v4919_v29, %v4186_v53  ;;  %v4187_v56 = vmax.f32 %v3722_v1, 0.0  ;;  %v3318_v27 = vpop.f32.mrf.mxu1 }
 0x50d   :  { %v4800_v46 = vmax.f32 %v4799_v38, %v4097_v61  ;;  %v4104_v17 = vmax.f32 %v3317_v2, 0.0  ;;  %v3319_v21 = vadd.f32 %v3318_v27, %v7977_v24  ;;  %v8269_v57 = vpop.f32.mrf.mxu0 }
 0x50e   :  { %v4921_v54 = vrot.slane %v4920_v12, 4  ;;  %v4933_v43 = vmax.f32 %v4932_v14, %v4187_v56  ;;  %v3322_v8 = vpop.f32.mrf.mxu1 }
 0x50f   :  { %v4788_v9 = vmax.f32 %v4787_v4, %v4104_v17  ;;  %v4105_v39 = vmax.f32 %v3319_v21, 0.0  ;;  %v3323_v34 = vadd.f32 %v3322_v8, %v7972_v6  ;;  %v8272_v49 = vpop.f32.mrf.mxu0 }
 0x510   :  { %v4922_v48 = vmax.f32 %v4920_v12, %v4921_v54  ;;  %v4934_v44 = vrot.slane %v4933_v43, 4  ;;  %v3324_v42 = vpop.f32.mrf.mxu1 }
 0x511   :  { %v4801_v37 = vmax.f32 %v4800_v46, %v4105_v39  ;;  %v4112_v51 = vmax.f32 %v3323_v34, 0.0  ;;  %v3325_v32 = vadd.f32 %v3324_v42, %v7977_v24  ;;  %v8275_v31 = vpop.f32.mrf.mxu0 }
 0x512   :  { %v4923_v18 = vrot.slane %v4922_v48, 2  ;;  %v4935_v52 = vmax.f32 %v4933_v43, %v4934_v44  ;;  %v3326_v60 = vpop.f32.mrf.mxu1 }
 0x513   :  { %v4789_v20 = vmax.f32 %v4788_v9, %v4112_v51  ;;  %v4113_v28 = vmax.f32 %v3325_v32, 0.0  ;;  %v3327_v58 = vadd.f32 %v3326_v60, %v7972_v6  ;;  %v8278_v40 = vpop.f32.mrf.mxu0 }
 0x514   :  { %v4924_v3 = vmax.f32 %v4922_v48, %v4923_v18  ;;  %v4936_v11 = vrot.slane %v4935_v52, 2  ;;  %v3328_v30 = vpop.f32.mrf.mxu1 }
 0x515   :  { %v4802_v26 = vmax.f32 %v4801_v37, %v4113_v28  ;;  %v4120_v50 = vmax.f32 %v3327_v58, 0.0  ;;  %v3329_v10 = vadd.f32 %v3328_v30, %v7977_v24  ;;  %v8281_v13 = vpop.f32.mrf.mxu0 }
 0x516   :  { %v4925_v47 = vrot.slane %v4924_v3, 1  ;;  %v4937_v5 = vmax.f32 %v4935_v52, %v4936_v11  ;;  %v3332_v45 = vpop.f32.mrf.mxu1 }
 0x517   :  { %v4790_v15 = vmax.f32 %v4789_v20, %v4120_v50  ;;  %v4121_v35 = vmax.f32 %v3329_v10, 0.0  ;;  %v8283_v29 = vpop.f32.mrf.mxu0  ;;  %v3333_v1 = vadd.f32 %v3332_v45, %v7972_v6 }
 0x518   :  { %v4926_v19 = vmax.f32 %v4924_v3, %v4925_v47  ;;  %v4938_v63 = vrot.slane %v4937_v5, 1  ;;  %v3334_v38 = vpop.f32.mrf.mxu1 }
 0x519   :  { %v4791_v16 = vrot.slane %v4790_v15, 4  ;;  %v4803_v36 = vmax.f32 %v4802_v26, %v4121_v35  ;;  %v8285_v22 = vpop.f32.mrf.mxu0  ;;  %v3335_v12 = vadd.f32 %v3334_v38, %v7977_v24  ;;  %v4128_v21 = vmax.f32 %v3333_v1, 0.0 }
 0x51a   :  { %v8289_v62 = vsel %vm5224_vm5, %v4926_v19, %v8233_v7  ;;  %v4939_v53 = vmax.f32 %v4937_v5, %v4938_v63  ;;  %v3336_v59 = vpop.f32.mrf.mxu1  ;;  %v3730_v35 = vadd.f32 %v8272_v49, %v7870_v0  ;;  %v3732_v19 = vadd.f32 %v8275_v31, %v7874_v33 }
 0x51b   :  { %v4792_v14 = vmax.f32 %v4790_v15, %v4791_v16  ;;  %v4804_v4 = vrot.slane %v4803_v36, 4  ;;  %v8292_v61 = vpop.f32.mrf.mxu0  ;;  %v3337_v56 = vadd.f32 %v3336_v59, %v7972_v6  ;;  %v4129_v48 = vmax.f32 %v3335_v12, 0.0 }
 0x51c   :  { %v8296_v2 = vsel %vm5224_vm5, %v4939_v53, %v8239_v23  ;;  %v3338_v27 = vpop.f32.mrf.mxu1  ;;  %v3726_v59 = vadd.f32 %v8266_v25, %v7870_v0  ;;  %v3728_v49 = vadd.f32 %v8269_v57, %v7874_v33  ;;  %v3736_v31 = vadd.f32 %v8278_v40, %v7870_v0 }
 0x51d   :  { %v4793_v46 = vrot.slane %v4792_v14, 2  ;;  %v4805_v7 = vmax.f32 %v4803_v36, %v4804_v4  ;;  %v8300_v17 = vpop.f32.mrf.mxu0  ;;  %v4136_v54 = vmax.f32 %v3337_v56, 0.0  ;;  %v3339_v43 = vadd.f32 %v3338_v27, %v7977_v24 }
 0x51e   :  { %v3342_v8 = vpop.f32.mrf.mxu1  ;;  %v3738_v12 = vadd.f32 %v8281_v13, %v7874_v33  ;;  %v3740_v25 = vadd.f32 %v8283_v29, %v7870_v0  ;;  %v4210_v13 = vmax.f32 %v3736_v31, 0.0 }
 0x51f   :  { %v4794_v9 = vmax.f32 %v4792_v14, %v4793_v46  ;;  %v4806_v39 = vrot.slane %v4805_v7, 2  ;;  %v3343_v34 = vadd.f32 %v3342_v8, %v7972_v6  ;;  %v8304_v23 = vpop.f32.mrf.mxu0  ;;  %v4888_v44 = vmax.f32 %v4128_v21, %v4136_v54 }
 0x520   :  { %v4137_v42 = vmax.f32 %v3339_v43, 0.0  ;;  %v3344_v37 = vpop.f32.mrf.mxu1  ;;  %v4203_v21 = vmax.f32 %v3732_v19, 0.0 }
 0x521   :  { %v4795_v51 = vrot.slane %v4794_v9, 1  ;;  %v4807_v32 = vmax.f32 %v4805_v7, %v4806_v39  ;;  %v4144_v18 = vmax.f32 %v3343_v34, 0.0  ;;  %v8306_v52 = vpop.f32.mrf.mxu0  ;;  %v3345_v20 = vadd.f32 %v3344_v37, %v7977_v24 }
 0x522   :  { %v4901_v60 = vmax.f32 %v4129_v48, %v4137_v42  ;;  %v3346_v28 = vpop.f32.mrf.mxu1  ;;  %v4202_v7 = vmax.f32 %v3730_v35, 0.0  ;;  %v4195_v39 = vmax.f32 %v3728_v49, 0.0  ;;  %v3742_v34 = vadd.f32 %v8285_v22, %v7874_v33 }
 0x523   :  { %v4796_v58 = vmax.f32 %v4794_v9, %v4795_v51  ;;  %v4808_v3 = vrot.slane %v4807_v32, 1  ;;  %v4889_v11 = vmax.f32 %v4888_v44, %v4144_v18  ;;  %v8309_v30 = vpop.f32.mrf.mxu0  ;;  %v4145_v26 = vmax.f32 %v3345_v20, 0.0 }
 0x524   :  { %v3347_v50 = vadd.f32 %v3346_v28, %v7972_v6  ;;  %v3348_v10 = vpop.f32.mrf.mxu1  ;;  %v4194_v9 = vmax.f32 %v3726_v59, 0.0  ;;  %v4211_v44 = vmax.f32 %v3738_v12, 0.0  ;;  %v5031_v18 = vmax.f32 %v4195_v39, %v4203_v21 }
 0x525   :  { %v8314_v47 = vsel %vm5222_vm4, %v4796_v58, %v8253_v55  ;;  %v4809_v5 = vmax.f32 %v4807_v32, %v4808_v3  ;;  %v3349_v45 = vadd.f32 %v3348_v10, %v7977_v24  ;;  %v3757_v15 = vpop.f32.mrf.mxu0  ;;  %v4902_v63 = vmax.f32 %v4901_v60, %v4145_v26 }
 0x526   :  { %v4152_v38 = vmax.f32 %v3347_v50, 0.0  ;;  %v3352_v16 = vpop.f32.mrf.mxu1  ;;  %v5018_v29 = vmax.f32 %v4194_v9, %v4202_v7  ;;  %v3746_v60 = vadd.f32 %v8292_v61, %v7870_v0  ;;  %v3748_v20 = vadd.f32 %v8300_v17, %v7874_v33 }
 0x527   :  { %v8323_v36 = vsel %vm5222_vm4, %v4809_v5, %v8258_v41  ;;  %v4153_v53 = vmax.f32 %v3349_v45, 0.0  ;;  %v3353_v55 = vadd.f32 %v3352_v16, %v7972_v6  ;;  %v3759_v1 = vpop.f32.mrf.mxu0  ;;  %v4218_v58 = vmax.f32 %v3740_v25, 0.0 }
 0x528   :  { %v4890_v14 = vmax.f32 %v4889_v11, %v4152_v38  ;;  %v3354_v4 = vpop.f32.mrf.mxu1  ;;  %v5019_v50 = vmax.f32 %v5018_v29, %v4210_v13  ;;  %v4219_v10 = vmax.f32 %v3742_v34, 0.0  ;;  %v3750_v5 = vadd.f32 %v8304_v23, %v7870_v0 }
 0x529   :  { %v4903_v41 = vmax.f32 %v4902_v63, %v4153_v53  ;;  %v4160_v56 = vmax.f32 %v3353_v55, 0.0  ;;  %v3355_v27 = vadd.f32 %v3354_v4, %v7977_v24  ;;  %v3761_v46 = vpop.f32.mrf.mxu0  ;;  %v3752_v45 = vadd.f32 %v8306_v52, %v7874_v33 }
 0x52a   :  { %v3356_v54 = vpop.f32.mrf.mxu1  ;;  %v5032_v61 = vmax.f32 %v5031_v18, %v4211_v44  ;;  %v4226_v16 = vmax.f32 %v3746_v60, 0.0  ;;  %v4227_v53 = vmax.f32 %v3748_v20, 0.0  ;;  %v3756_v55 = vadd.f32 %v8309_v30, %v7870_v0 }
 0x52b   :  { %v4891_v57 = vmax.f32 %v4890_v14, %v4160_v56  ;;  %v4161_v43 = vmax.f32 %v3355_v27, 0.0  ;;  %v3357_v40 = vadd.f32 %v3356_v54, %v7972_v6  ;;  %v8338_v8 = vpop.f32.mrf.mxu0  ;;  %v3758_v59 = vadd.f32 %v3757_v15, %v7874_v33 }
 0x52c   :  { %v3358_v48 = vpop.f32.mrf.mxu1  ;;  %v5020_v31 = vmax.f32 %v5019_v50, %v4218_v58  ;;  %v5033_v12 = vmax.f32 %v5032_v61, %v4219_v10  ;;  %v4235_v56 = vmax.f32 %v3752_v45, 0.0  ;;  %v3760_v27 = vadd.f32 %v3759_v1, %v7870_v0 }
 0x52d   :  { %v4904_v42 = vmax.f32 %v4903_v41, %v4161_v43  ;;  %v4168_v37 = vmax.f32 %v3357_v40, 0.0  ;;  %v3359_v51 = vadd.f32 %v3358_v48, %v7977_v24  ;;  %v8343_v32 = vpop.f32.mrf.mxu0  ;;  %v4234_v41 = vmax.f32 %v3750_v5, 0.0 }
 0x52e   :  { %v3362_v28 = vpop.f32.mrf.mxu1  ;;  %v3762_v21 = vadd.f32 %v3761_v46, %v7874_v33  ;;  %v5034_v43 = vmax.f32 %v5033_v12, %v4227_v53  ;;  %v4242_v40 = vmax.f32 %v3756_v55, 0.0  ;;  %v4243_v9 = vmax.f32 %v3758_v59, 0.0 }
 0x52f   :  { %v4892_v3 = vmax.f32 %v4891_v57, %v4168_v37  ;;  %v4169_v22 = vmax.f32 %v3359_v51, 0.0  ;;  %v3363_v11 = vadd.f32 %v3362_v28, %v7972_v6  ;;  %v3769_v26 = vpop.f32.mrf.mxu0  ;;  %v5021_v57 = vmax.f32 %v5020_v31, %v4226_v16 }
 0x530   :  { %v3364_v35 = vpop.f32.mrf.mxu1  ;;  %v4250_v1 = vmax.f32 %v3760_v27, 0.0  ;;  %v3770_v37 = vadd.f32 %v3769_v26, %v7870_v0  ;;  %v4251_v51 = vmax.f32 %v3762_v21, 0.0  ;;  %v3768_v26 = vadd.f32 %v8343_v32, %v7874_v33 }
 0x531   :  { %v4905_v19 = vmax.f32 %v4904_v42, %v4169_v22  ;;  %v4176_v63 = vmax.f32 %v3363_v11, 0.0  ;;  %v3365_v17 = vadd.f32 %v3364_v35, %v7977_v24  ;;  %v3771_v38 = vpop.f32.mrf.mxu0  ;;  %v5022_v44 = vmax.f32 %v5021_v57, %v4234_v41 }
 0x532   :  { %v3366_v49 = vpop.f32.mrf.mxu1  ;;  %v5035_v42 = vmax.f32 %v5034_v43, %v4235_v56  ;;  %v3772_v29 = vadd.f32 %v3771_v38, %v7874_v33  ;;  %v4266_v61 = vmax.f32 %v3770_v37, 0.0 }
 0x533   :  { %v4893_v23 = vmax.f32 %v4892_v3, %v4176_v63  ;;  %v4177_v14 = vmax.f32 %v3365_v17, 0.0  ;;  %v3367_v52 = vadd.f32 %v3366_v49, %v7972_v6  ;;  %v3775_v4 = vpop.f32.mrf.mxu0  ;;  %v5023_v28 = vmax.f32 %v5022_v44, %v4242_v40 }
 0x534   :  { %v3368_v7 = vpop.f32.mrf.mxu1  ;;  %v5036_v58 = vmax.f32 %v5035_v42, %v4243_v9  ;;  %v3766_v3 = vadd.f32 %v8338_v8, %v7870_v0  ;;  %v3776_v22 = vadd.f32 %v3775_v4, %v7870_v0  ;;  %v4267_v8 = vmax.f32 %v3772_v29, 0.0 }
 0x535   :  { %v4906_v54 = vmax.f32 %v4905_v19, %v4177_v14  ;;  %v4184_v25 = vmax.f32 %v3367_v52, 0.0  ;;  %v3369_v30 = vadd.f32 %v3368_v7, %v7977_v24  ;;  %v3777_v15 = vpop.f32.mrf.mxu0  ;;  %v5024_v35 = vmax.f32 %v5023_v28, %v4250_v1 }
 0x536   :  { %v8362_v39 = vpop.f32.mrf.mxu1  ;;  %v3778_v5 = vadd.f32 %v3777_v15, %v7874_v33  ;;  %v5037_v17 = vmax.f32 %v5036_v58, %v4251_v51  ;;  %v4258_v55 = vmax.f32 %v3766_v3, 0.0  ;;  %v4274_v59 = vmax.f32 %v3776_v22, 0.0 }
 0x537   :  { %v4894_v13 = vmax.f32 %v4893_v23, %v4184_v25  ;;  %v4185_v34 = vmax.f32 %v3369_v30, 0.0  ;;  %v3779_v48 = vpop.f32.mrf.mxu0  ;;  %v4259_v23 = vmax.f32 %v3768_v26, 0.0  ;;  %v5025_v41 = vrot.slane %v5024_v35, 4 }
 0x538   :  { %v8365_v46 = vpop.f32.mrf.mxu1  ;;  %v3780_v19 = vadd.f32 %v3779_v48, %v7870_v0  ;;  %v4275_v4 = vmax.f32 %v3778_v5, 0.0  ;;  %v5122_v56 = vmax.f32 %v4258_v55, %v4266_v61  ;;  %v5038_v48 = vrot.slane %v5037_v17, 4 }
 0x539   :  { %v4895_v18 = vrot.slane %v4894_v13, 4  ;;  %v4907_v60 = vmax.f32 %v4906_v54, %v4185_v34  ;;  %v3781_v20 = vpop.f32.mrf.mxu0  ;;  %v5135_v54 = vmax.f32 %v4259_v23, %v4267_v8  ;;  %v5026_v28 = vmax.f32 %v5024_v35, %v5025_v41 }
 0x53a   :  { %v8371_v11 = vpop.f32.mrf.mxu1  ;;  %v3782_v32 = vadd.f32 %v3781_v20, %v7874_v33  ;;  %v4282_v27 = vmax.f32 %v3780_v19, 0.0  ;;  %v5123_v43 = vmax.f32 %v5122_v56, %v4274_v59  ;;  %v5039_v61 = vmax.f32 %v5037_v17, %v5038_v48 }
 0x53b   :  { %v4896_v50 = vmax.f32 %v4894_v13, %v4895_v18  ;;  %v4908_v10 = vrot.slane %v4907_v60, 4  ;;  %v3785_v45 = vpop.f32.mrf.mxu0  ;;  %v5136_v1 = vmax.f32 %v5135_v54, %v4275_v4  ;;  %v5027_v55 = vrot.slane %v5026_v28, 2 }
 0x53c   :  { %v8377_v63 = vpop.f32.mrf.mxu1  ;;  %v3786_v49 = vadd.f32 %v3785_v45, %v7870_v0  ;;  %v4283_v40 = vmax.f32 %v3782_v32, 0.0  ;;  %v5124_v51 = vmax.f32 %v5123_v43, %v4282_v27  ;;  %v5040_v4 = vrot.slane %v5039_v61, 2 }
 0x53d   :  { %v4897_v38 = vrot.slane %v4896_v50, 2  ;;  %v4909_v16 = vmax.f32 %v4907_v60, %v4908_v10  ;;  %v3787_v53 = vpop.f32.mrf.mxu0  ;;  %v5028_v27 = vmax.f32 %v5026_v28, %v5027_v55 }
 0x53e   :  { %v8381_v31 = vpop.f32.mrf.mxu1  ;;  %v3788_v7 = vadd.f32 %v3787_v53, %v7874_v33  ;;  %v4290_v9 = vmax.f32 %v3786_v49, 0.0  ;;  %v5137_v26 = vmax.f32 %v5136_v1, %v4283_v40 }
 0x53f   :  { %v4898_v14 = vmax.f32 %v4896_v50, %v4897_v38  ;;  %v4910_v52 = vrot.slane %v4909_v16, 2  ;;  %v3789_v12 = vpop.f32.mrf.mxu0  ;;  %v5029_v43 = vrot.slane %v5028_v27, 1 }
 0x540   :  { %v8384_v21 = vpop.f32.mrf.mxu1  ;;  %v3790_v15 = vadd.f32 %v3789_v12, %v7870_v0  ;;  %v4291_v29 = vmax.f32 %v3788_v7, 0.0  ;;  %v5125_v50 = vmax.f32 %v5124_v51, %v4290_v9  ;;  %v3373_v51 = vadd.f32 %v8362_v39, %v7972_v6 }
 0x541   :  { %v4899_v25 = vrot.slane %v4898_v14, 1  ;;  %v4911_v30 = vmax.f32 %v4909_v16, %v4910_v52  ;;  %v3791_v57 = vpop.f32.mrf.mxu0 }
 0x542   :  { %v3792_v13 = vadd.f32 %v3791_v57, %v7874_v33  ;;  %v8388_v34 = vpop.f32.mrf.mxu1  ;;  %v4298_v18 = vmax.f32 %v3790_v15, 0.0  ;;  %v5138_v35 = vmax.f32 %v5137_v26, %v4291_v29  ;;  %v3379_v29 = vadd.f32 %v8377_v63, %v7977_v24 }
 0x543   :  { %v4900_v44 = vmax.f32 %v4898_v14, %v4899_v25  ;;  %v4912_v42 = vrot.slane %v4911_v30, 1  ;;  %v3795_v37 = vpop.f32.mrf.mxu0  ;;  %v3385_v26 = vadd.f32 %v8384_v21, %v7977_v24  ;;  %v3387_v39 = vadd.f32 %v8388_v34, %v7972_v6 }
 0x544   :  { %v3796_v60 = vadd.f32 %v3795_v37, %v7870_v0  ;;  %v8391_v20 = vpop.f32.mrf.mxu1  ;;  %v4299_v10 = vmax.f32 %v3792_v13, 0.0  ;;  %v5126_v16 = vmax.f32 %v5125_v50, %v4298_v18  ;;  %v5030_v37 = vmax.f32 %v5028_v27, %v5029_v43 }
 0x545   :  { %v8395_v58 = vsel %vm5224_vm5, %v4900_v44, %v8314_v47  ;;  %v4913_v3 = vmax.f32 %v4911_v30, %v4912_v42  ;;  %v3797_v22 = vpop.f32.mrf.mxu0  ;;  %v3383_v18 = vadd.f32 %v8381_v31, %v7972_v6 }
 0x546   :  { %v4306_v5 = vmax.f32 %v3796_v60, 0.0  ;;  %v3392_v45 = vpop.f32.mrf.mxu1  ;;  %v3798_v8 = vadd.f32 %v3797_v22, %v7874_v33  ;;  %v5139_v49 = vmax.f32 %v5138_v35, %v4299_v10  ;;  %v5270_v31 = vsel %vm5226_vm6, %v5030_v37, %v8289_v62 }
 0x547   :  { %v8399_v19 = vsel %vm5224_vm5, %v4913_v3, %v8323_v36  ;;  %v3799_v38 = vpop.f32.mrf.mxu0  ;;  %v4208_v35 = vmax.f32 %v3383_v18, 0.0 }
 0x548   :  { %v3800_v47 = vadd.f32 %v3799_v38, %v7870_v0  ;;  %v3394_v53 = vpop.f32.mrf.mxu1  ;;  %v4307_v59 = vmax.f32 %v3798_v8, 0.0  ;;  %v5127_v23 = vmax.f32 %v5126_v16, %v4306_v5  ;;  %v5041_v0 = vmax.f32 %v5039_v61, %v5040_v4 }
 0x549   :  { %v3801_v32 = vpop.f32.mrf.mxu0  ;;  %v4192_v61 = vmax.f32 %v3373_v51, 0.0  ;;  %v4201_v8 = vmax.f32 %v3379_v29, 0.0  ;;  %v3389_v38 = vadd.f32 %v8391_v20, %v7977_v24  ;;  %v3395_v62 = vadd.f32 %v3394_v53, %v7977_v24 }
 0x54a   :  { %v4314_v14 = vmax.f32 %v3800_v47, 0.0  ;;  %v3802_v17 = vadd.f32 %v3801_v32, %v7874_v33  ;;  %v3396_v52 = vpop.f32.mrf.mxu1  ;;  %v5140_v36 = vmax.f32 %v5139_v49, %v4307_v59  ;;  %v5042_v48 = vrot.slane %v5041_v0, 1 }
 0x54b   :  { %v3377_v33 = vadd.f32 %v8371_v11, %v7972_v6  ;;  %v3375_v11 = vadd.f32 %v8365_v46, %v7977_v24  ;;  %v3393_v46 = vadd.f32 %v3392_v45, %v7972_v6  ;;  %v4209_v59 = vmax.f32 %v3385_v26, 0.0 }
 0x54c   :  { %v5128_v12 = vmax.f32 %v5127_v23, %v4314_v14  ;;  %v4315_v41 = vmax.f32 %v3802_v17, 0.0  ;;  %v3398_v56 = vpop.f32.mrf.mxu1  ;;  %v5043_v22 = vmax.f32 %v5041_v0, %v5042_v48  ;;  %v4216_v20 = vmax.f32 %v3387_v39, 0.0 }
 0x54d   :  { %v4200_v50 = vmax.f32 %v3377_v33, 0.0  ;;  %v4193_v55 = vmax.f32 %v3375_v11, 0.0  ;;  %v3397_v45 = vadd.f32 %v3396_v52, %v7972_v6  ;;  %v4217_v17 = vmax.f32 %v3389_v38, 0.0 }
 0x54e   :  { %v5129_v7 = vrot.slane %v5128_v12, 4  ;;  %v5141_v54 = vmax.f32 %v5140_v36, %v4315_v41  ;;  %v3402_v25 = vpop.f32.mrf.mxu1  ;;  %v5277_v34 = vsel %vm5226_vm6, %v5043_v22, %v8296_v2  ;;  %v3399_v2 = vadd.f32 %v3398_v56, %v7977_v24 }
 0x54f   :  { %v4992_v32 = vmax.f32 %v4192_v61, %v4200_v50  ;;  %v5005_v14 = vmax.f32 %v4193_v55, %v4201_v8  ;;  %v4224_v36 = vmax.f32 %v3393_v46, 0.0  ;;  %v4225_v27 = vmax.f32 %v3395_v62, 0.0 }
 0x550   :  { %v5130_v30 = vmax.f32 %v5128_v12, %v5129_v7  ;;  %v5142_v15 = vrot.slane %v5141_v54, 4  ;;  %v3404_v57 = vpop.f32.mrf.mxu1  ;;  %v3403_v12 = vadd.f32 %v3402_v25, %v7972_v6  ;;  %v4233_v43 = vmax.f32 %v3399_v2, 0.0 }
 0x551   :  { %v4993_v4 = vmax.f32 %v4992_v32, %v4208_v35  ;;  %v5006_v41 = vmax.f32 %v5005_v14, %v4209_v59  ;;  %v3405_v52 = vadd.f32 %v3404_v57, %v7977_v24 }
 0x552   :  { %v5131_v40 = vrot.slane %v5130_v30, 2  ;;  %v5143_v9 = vmax.f32 %v5141_v54, %v5142_v15  ;;  %v3406_v13 = vpop.f32.mrf.mxu1  ;;  %v4232_v54 = vmax.f32 %v3397_v45, 0.0 }
 0x553   :  { %v4994_v7 = vmax.f32 %v4993_v4, %v4216_v20  ;;  %v3407_v0 = vadd.f32 %v3406_v13, %v7972_v6  ;;  %v5007_v15 = vmax.f32 %v5006_v41, %v4217_v17 }
 0x554   :  { %v5132_v44 = vmax.f32 %v5130_v30, %v5131_v40  ;;  %v5144_v42 = vrot.slane %v5143_v9, 2  ;;  %v3408_v1 = vpop.f32.mrf.mxu1 }
 0x555   :  { %v4995_v40 = vmax.f32 %v4994_v7, %v4224_v36  ;;  %v3409_v56 = vadd.f32 %v3408_v1, %v7977_v24  ;;  %v5008_v33 = vmax.f32 %v5007_v15, %v4225_v27  ;;  %v4248_v37 = vmax.f32 %v3407_v0, 0.0 }
 0x556   :  { %v5133_v60 = vrot.slane %v5132_v44, 1  ;;  %v5145_v28 = vmax.f32 %v5143_v9, %v5144_v42  ;;  %v3412_v3 = vpop.f32.mrf.mxu1  ;;  %v4240_v9 = vmax.f32 %v3403_v12, 0.0  ;;  %v4241_v42 = vmax.f32 %v3405_v52, 0.0 }
 0x557   :  { %v5009_v57 = vmax.f32 %v5008_v33, %v4233_v43  ;;  %v3413_v13 = vadd.f32 %v3412_v3, %v7972_v6 }
 0x558   :  { %v5134_v10 = vmax.f32 %v5132_v44, %v5133_v60  ;;  %v5146_v5 = vrot.slane %v5145_v28, 1  ;;  %v3414_v63 = vpop.f32.mrf.mxu1  ;;  %v4996_v44 = vmax.f32 %v4995_v40, %v4232_v54 }
 0x559   :  { %v3415_v22 = vadd.f32 %v3414_v63, %v7977_v24  ;;  %v5010_v39 = vmax.f32 %v5009_v57, %v4241_v42  ;;  %v4256_v8 = vmax.f32 %v3413_v13, 0.0 }
 0x55a   :  { %v5271_v21 = vsel %vm5228_vm7, %v5134_v10, %v5270_v31  ;;  %v5147_v16 = vmax.f32 %v5145_v28, %v5146_v5  ;;  %v3416_v47 = vpop.f32.mrf.mxu1  ;;  %v4997_v60 = vmax.f32 %v4996_v44, %v4240_v9  ;;  %v4249_v28 = vmax.f32 %v3409_v56, 0.0 }
 0x55b   :  { %5293 = vst [vmem:[%s8475_s7 + $0x30] sm:$0xff] %v5271_v21  ;;  %v3417_v25 = vadd.f32 %v3416_v47, %v7972_v6  ;;  %v4257_v46 = vmax.f32 %v3415_v22, 0.0 }
 0x55c   :  { %v5278_v49 = vsel %vm5228_vm7, %v5147_v16, %v5277_v34  ;;  %v3418_v23 = vpop.f32.mrf.mxu1  ;;  %v4998_v10 = vmax.f32 %v4997_v60, %v4248_v37  ;;  %v5011_v35 = vmax.f32 %v5010_v39, %v4249_v28 }
 0x55d   :  { %5294 = vst [vmem:[%s8475_s7 + $0x38] sm:$0xff] %v5278_v49  ;;  %v3419_v51 = vadd.f32 %v3418_v23, %v7977_v24  ;;  %v4264_v26 = vmax.f32 %v3417_v25, 0.0 }
 0x55e   :  { %v3422_v53 = vpop.f32.mrf.mxu1  ;;  %v4999_v59 = vrot.slane %v4998_v10, 4  ;;  %v5012_v14 = vrot.slane %v5011_v35, 4 }
 0x55f   :  { %v3423_v18 = vadd.f32 %v3422_v53, %v7972_v6  ;;  %v4265_v5 = vmax.f32 %v3419_v51, 0.0  ;;  %v5096_v16 = vmax.f32 %v4256_v8, %v4264_v26 }
 0x560   :  { %v3424_v30 = vpop.f32.mrf.mxu1  ;;  %v5000_v41 = vmax.f32 %v4998_v10, %v4999_v59  ;;  %v5013_v15 = vmax.f32 %v5011_v35, %v5012_v14 }
 0x561   :  { %v3425_v1 = vadd.f32 %v3424_v30, %v7977_v24  ;;  %v4272_v3 = vmax.f32 %v3423_v18, 0.0  ;;  %v5109_v62 = vmax.f32 %v4257_v46, %v4265_v5 }
 0x562   :  { %v3426_v48 = vpop.f32.mrf.mxu1  ;;  %v5001_v33 = vrot.slane %v5000_v41, 2 }
 0x563   :  { %v3427_v50 = vadd.f32 %v3426_v48, %v7972_v6  ;;  %v4273_v21 = vmax.f32 %v3425_v1, 0.0  ;;  %v5097_v49 = vmax.f32 %v5096_v16, %v4272_v3 }
 0x564   :  { %v3428_v29 = vpop.f32.mrf.mxu1  ;;  %v5002_v60 = vmax.f32 %v5000_v41, %v5001_v33 }
 0x565   :  { %v3429_v31 = vadd.f32 %v3428_v29, %v7977_v24  ;;  %v4280_v47 = vmax.f32 %v3427_v50, 0.0  ;;  %v5110_v17 = vmax.f32 %v5109_v62, %v4273_v21  ;;  %v5014_v29 = vrot.slane %v5013_v15, 2 }
 0x566   :  { %v3432_v11 = vpop.f32.mrf.mxu1  ;;  %v5003_v50 = vrot.slane %v5002_v60, 1 }
 0x567   :  { %v3433_v38 = vadd.f32 %v3432_v11, %v7972_v6  ;;  %v4281_v32 = vmax.f32 %v3429_v31, 0.0  ;;  %v5098_v4 = vmax.f32 %v5097_v49, %v4280_v47  ;;  %v5015_v1 = vmax.f32 %v5013_v15, %v5014_v29 }
 0x568   :  { %v3434_v61 = vpop.f32.mrf.mxu1 }
 0x569   :  { %v3435_v34 = vadd.f32 %v3434_v61, %v7977_v24  ;;  %v4288_v45 = vmax.f32 %v3433_v38, 0.0  ;;  %v5111_v27 = vmax.f32 %v5110_v17, %v4281_v32  ;;  %v5016_v10 = vrot.slane %v5015_v1, 1 }
 0x56a   :  { %v3436_v63 = vpop.f32.mrf.mxu1  ;;  %v5004_v61 = vmax.f32 %v5002_v60, %v5003_v50 }
 0x56b   :  { %v3437_v55 = vadd.f32 %v3436_v63, %v7972_v6  ;;  %v4289_v36 = vmax.f32 %v3435_v34, 0.0  ;;  %v5099_v54 = vmax.f32 %v5098_v4, %v4288_v45 }
 0x56c   :  { %v3438_v20 = vpop.f32.mrf.mxu1  ;;  %v5256_v46 = vsel %vm5226_vm6, %v5004_v61, %v8395_v58 }
 0x56d   :  { %v3439_v23 = vadd.f32 %v3438_v20, %v7977_v24  ;;  %v4296_v12 = vmax.f32 %v3437_v55, 0.0  ;;  %v5112_v40 = vmax.f32 %v5111_v27, %v4289_v36 }
 0x56e   :  { %v3442_v2 = vpop.f32.mrf.mxu1 }
 0x56f   :  { %v3443_v53 = vadd.f32 %v3442_v2, %v7972_v6  ;;  %v4297_v52 = vmax.f32 %v3439_v23, 0.0  ;;  %v5100_v9 = vmax.f32 %v5099_v54, %v4296_v12 }
 0x570   :  { %v3444_v7 = vpop.f32.mrf.mxu1 }
 0x571   :  { %v4304_v0 = vmax.f32 %v3443_v53, 0.0  ;;  %v3445_v30 = vadd.f32 %v3444_v7, %v7977_v24  ;;  %v5113_v44 = vmax.f32 %v5112_v40, %v4297_v52 }
 0x572   :  { %v3446_v43 = vpop.f32.mrf.mxu1 }
 0x573   :  { %v4305_v56 = vmax.f32 %v3445_v30, 0.0  ;;  %v3447_v48 = vadd.f32 %v3446_v43, %v7972_v6  ;;  %v5101_v42 = vmax.f32 %v5100_v9, %v4304_v0 }
 0x574   :  { %v3448_v25 = vpop.f32.mrf.mxu1 }
 0x575   :  { %v4312_v37 = vmax.f32 %v3447_v48, 0.0  ;;  %v3449_v51 = vadd.f32 %v3448_v25, %v7977_v24  ;;  %v5114_v57 = vmax.f32 %v5113_v44, %v4305_v56  ;;  %v5017_v24 = vmax.f32 %v5015_v1, %v5016_v10 }
 0x577   :  { %v5102_v13 = vmax.f32 %v5101_v42, %v4312_v37  ;;  %v4313_v18 = vmax.f32 %v3449_v51, 0.0  ;;  %v5263_v16 = vsel %vm5226_vm6, %v5017_v24, %v8399_v19 }
 0x579   :  { %v5103_v28 = vrot.slane %v5102_v13, 4  ;;  %v5115_v22 = vmax.f32 %v5114_v57, %v4313_v18 }
 0x57b   :  { %v5104_v11 = vmax.f32 %v5102_v13, %v5103_v28  ;;  %v5116_v26 = vrot.slane %v5115_v22, 4 }
 0x57d   :  { %v5105_v39 = vrot.slane %v5104_v11, 2  ;;  %v5117_v6 = vmax.f32 %v5115_v22, %v5116_v26 }
 0x57f   :  { %v5106_v5 = vmax.f32 %v5104_v11, %v5105_v39  ;;  %v5118_v31 = vrot.slane %v5117_v6, 2 }
 0x581   :  { %v5107_v8 = vrot.slane %v5106_v5, 1  ;;  %v5119_v3 = vmax.f32 %v5117_v6, %v5118_v31 }
 0x583   :  { %v5108_v38 = vmax.f32 %v5106_v5, %v5107_v8  ;;  %v5120_v35 = vrot.slane %v5119_v3, 1 }
 0x585   :  { %v5257_v21 = vsel %vm5228_vm7, %v5108_v38, %v5256_v46  ;;  %v5121_v63 = vmax.f32 %v5119_v3, %v5120_v35 }
 0x586   :  { %5291 = vst [vmem:[%s8475_s7 + $0x20] sm:$0xff] %v5257_v21 }
 0x587   :  { %v5264_v47 = vsel %vm5228_vm7, %v5121_v63, %v5263_v16 }
 0x588   :  { %5292 = vst [vmem:[%s8475_s7 + $0x28] sm:$0xff] %v5264_v47 }

</bundles_post_ra>
